<compile_context>
chip_gen: v7x
topology: tpu7x:2x2x1
jax: 0.10.0
libtpu: 0.0.40
codegen_flags: <defaults>
</compile_context>

<pallas_src>
import math
import functools

import jax
import jax.numpy as jnp
from jax.experimental import pallas as pl
from jax.experimental.pallas import tpu as pltpu

CFG_VGG16 = [64, 64, 'M', 128, 128, 'M', 256, 256, 256, 'M',
             512, 512, 512, 'M', 512, 512, 512, 'M']
BN_EPS = 1e-5


# ----------------------------------------------------------------------------
# Pallas kernels
# ----------------------------------------------------------------------------
def _conv_bn_relu_kernel(x_ref, w_ref, s_ref, b_ref, o_ref, *, H, W, Cin, pool, kconcat):
    """Fused 3x3 same-padding conv + BatchNorm(scale/shift) + ReLU (+ optional fused 2x2
    maxpool) for one image; output is written in the NEXT layer's zero-padded layout.

    x_ref : (1, (H+3)*(W+2), Cin)   bf16  zero-padded input, rows flattened at padded width
    w_ref : (3, 3*Cin, Cout)        bf16  weights, di-major, (dj, cin) folded into K
    s_ref : (1, Cout)               f32   fused BN scale
    b_ref : (1, Cout)               f32   fused BN bias
    o_ref : (1, H2+3, W2+2, Cout)   bf16  zero-padded layout of the next layer,
                                          (H2, W2) = (H, W) or (H//2, W//2) with fused pool
    """
    wp = W + 2
    rows = H * wp                       # outputs at padded width (2 junk cols per image row)
    Cout = o_ref.shape[-1]

    acc = jnp.zeros((rows, Cout), jnp.float32)
    if kconcat:
        # Fold the three dj taps into K: one MXU matmul per di with K = 3*Cin.
        for di in range(3):
            slab = jnp.concatenate(
                [x_ref[0, pl.ds(di * wp + dj, rows), :] for dj in range(3)], axis=-1)
            acc = acc + jnp.dot(slab, w_ref[di], preferred_element_type=jnp.float32)
    else:
        # Cin >= 256 already fills the MXU depth: 9 matmuls with K = Cin.
        for di in range(3):
            for dj in range(3):
                slab = x_ref[0, pl.ds(di * wp + dj, rows), :]
                acc = acc + jnp.dot(slab, w_ref[di, pl.ds(dj * Cin, Cin), :],
                                    preferred_element_type=jnp.float32)

    y = jnp.maximum(acc * s_ref[...] + b_ref[...], 0.0)      # BN + ReLU on the f32 accumulator
    y = y.reshape(H, wp, Cout)[:, :W, :]                     # drop the 2 junk columns

    if pool:                                                 # fused 2x2 / stride-2 maxpool
        H2, W2 = H // 2, W // 2
        y = jnp.max(y.reshape(H2, 2, W, Cout), axis=1)       # vertical pairs
        y = jnp.max(y.reshape(H2, W2, 2, Cout), axis=2)      # horizontal pairs
    else:
        H2, W2 = H, W

    # Emit the next layer's padded layout: zero borders, data at [1:H2+1, 1:W2+1].
    o_ref[0] = jnp.zeros(o_ref.shape[1:], o_ref.dtype)
    o_ref[0, 1:H2 + 1, 1:W2 + 1, :] = y.astype(o_ref.dtype)


def _classifier_kernel(x_ref, w1_ref, b1_ref, w2_ref, b2_ref, w3_ref, b3_ref, o_ref):
    """Linear(512,512)+ReLU -> Linear(512,512)+ReLU -> Linear(512,10), one fused tiny call."""
    h = jnp.maximum(jnp.dot(x_ref[...], w1_ref[...],
                            preferred_element_type=jnp.float32) + b1_ref[...], 0.0)
    h = jnp.maximum(jnp.dot(h.astype(jnp.bfloat16), w2_ref[...],
                            preferred_element_type=jnp.float32) + b2_ref[...], 0.0)
    o_ref[...] = jnp.dot(h.astype(jnp.bfloat16), w3_ref[...],
                         preferred_element_type=jnp.float32) + b3_ref[...]


# ----------------------------------------------------------------------------
# Wrappers around pallas_call
# ----------------------------------------------------------------------------
def conv3x3_bn_relu(xp, w, scale, bias, *, H, W, pool):
    """xp: (N, H+3, W+2, Cin) bf16 zero-padded-layout input.
    Returns (N, H2+3, W2+2, Cout) bf16 in the next layer's zero-padded layout."""
    N, _, _, Cin = xp.shape
    Cout = w.shape[-1]
    wp = W + 2
    pr = (H + 3) * wp
    H2, W2 = (H // 2, W // 2) if pool else (H, W)
    x3 = xp.reshape(N, pr, Cin)                               # free reshape, no HBM pass

    kernel = functools.partial(_conv_bn_relu_kernel, H=H, W=W, Cin=Cin,
                               pool=pool, kconcat=Cin <= 128)
    return pl.pallas_call(
        kernel,
        out_shape=jax.ShapeDtypeStruct((N, H2 + 3, W2 + 2, Cout), jnp.bfloat16),
        grid_spec=pltpu.PrefetchScalarGridSpec(
            num_scalar_prefetch=0,
            grid=(N,),
            in_specs=[
                pl.BlockSpec((1, pr, Cin), lambda n: (n, 0, 0)),
                pl.BlockSpec((3, 3 * Cin, Cout), lambda n: (0, 0, 0)),   # constant -> VMEM resident
                pl.BlockSpec((1, Cout), lambda n: (0, 0)),
                pl.BlockSpec((1, Cout), lambda n: (0, 0)),
            ],
            out_specs=pl.BlockSpec((1, H2 + 3, W2 + 2, Cout), lambda n: (n, 0, 0, 0)),
        ),
        compiler_params=pltpu.CompilerParams(
            dimension_semantics=("parallel",),   # batch-parallel -> v7x megacore shards images
            vmem_limit_bytes=32 << 20,           # actual peak ~12 MB; well under v7x's 64 MiB
        ),
    )(x3, w, scale, bias)


def classifier(x, params_cls):
    """x: (N, 512) bf16 -> (N, 10) f32; three Linears fused in one small pallas_call."""
    (w1, b1), (w2, b2), (w3, b3) = params_cls
    n = x.shape[0]
    mp = max(8, ((n + 7) // 8) * 8)
    xp = jnp.pad(x, ((0, mp - n), (0, 0)))
    out = pl.pallas_call(
        _classifier_kernel,
        out_shape=jax.ShapeDtypeStruct((mp, 10), jnp.float32),
    )(xp, w1, b1, w2, b2, w3, b3)
    return out[:n]


# ----------------------------------------------------------------------------
# Parameter init (matches the PyTorch module's init) and full forward
# ----------------------------------------------------------------------------
def init_params(key):
    features = []
    in_c = 3
    i = 0
    while i < len(CFG_VGG16):
        v = CFG_VGG16[i]
        pool_after = (i + 1 < len(CFG_VGG16)) and CFG_VGG16[i + 1] == 'M'
        key, kw = jax.random.split(key)
        # Conv2d init of the reference module: weight ~ N(0, sqrt(2/(k*k*out))), bias = 0.
        std = math.sqrt(2.0 / (3 * 3 * v))
        w = std * jax.random.normal(kw, (3, 3, in_c, v), dtype=jnp.float32)
        w = w.reshape(3, 3 * in_c, v).astype(jnp.bfloat16)    # di-major, (dj,cin) folded into K
        # Eval-mode BatchNorm with fresh running stats (mean 0, var 1, gamma 1, beta 0) and
        # zero conv bias -> fused scale = 1/sqrt(1+eps), fused bias = 0.
        # TODO(synk): with trained weights recompute scale = gamma*rsqrt(var+eps),
        #             bias = beta - mean*scale (+ conv bias); training-mode BN not implemented.
        bn_scale = jnp.full((1, v), 1.0 / math.sqrt(1.0 + BN_EPS), dtype=jnp.float32)
        bn_bias = jnp.zeros((1, v), dtype=jnp.float32)
        features.append((w, bn_scale, bn_bias, pool_after))
        in_c = v
        i += 2 if pool_after else 1

    def linear_init(k, fan_in, fan_out):
        bound = 1.0 / math.sqrt(fan_in)
        kw, kb = jax.random.split(k)
        w = jax.random.uniform(kw, (fan_in, fan_out), minval=-bound, maxval=bound,
                               dtype=jnp.float32).astype(jnp.bfloat16)
        b = jax.random.uniform(kb, (1, fan_out), minval=-bound, maxval=bound,
                               dtype=jnp.float32)
        return w, b

    cls = []
    for fan_in, fan_out in [(512, 512), (512, 512), (512, 10)]:
        key, k = jax.random.split(key)
        cls.append(linear_init(k, fan_in, fan_out))
    return {'features': features, 'classifier': cls}


def vgg16_forward(x_nchw, params):
    x = jnp.transpose(x_nchw, (0, 2, 3, 1)).astype(jnp.bfloat16)   # NCHW -> NHWC, bf16
    N, H, W, _ = x.shape
    # One-time zero-pad into the first conv's padded layout; every conv kernel thereafter
    # emits its output already in the next layer's padded layout (no slice / re-pad passes).
    xp = jnp.pad(x, ((0, 0), (1, 2), (1, 1), (0, 0)))
    for w, scale, bias, pool_after in params['features']:
        xp = conv3x3_bn_relu(xp, w, scale, bias, H=H, W=W, pool=pool_after)
        if pool_after:
            H, W = H // 2, W // 2
    assert H == 1 and W == 1, (H, W)
    feats = xp[:, 1, 1, :]                                    # (N, 512): the single valid pixel
    # TODO(synk): nn.Dropout is identity in eval mode; training-mode dropout not implemented.
    return classifier(feats, params['classifier'])


if __name__ == "__main__":
    key = jax.random.PRNGKey(0)
    kp, kx = jax.random.split(key)
    params = init_params(kp)
    # VGG16's flatten-to-512 requires 32x32 spatial input (CIFAR-like), batch=2.
    x = jax.random.normal(kx, (2, 3, 32, 32), dtype=jnp.float32)
    out = vgg16_forward(x, params)
    out = jax.block_until_ready(out)
    assert out.shape == (2, 10), out.shape
    print("KERNEL_OK")
</pallas_src>

<mosaic_0001>
module attributes {stable_mosaic.version = 11 : i64} {
  func.func @_conv_bn_relu_kernel(%arg0: i32, %arg1: memref<1x1190x3xbf16, #tpu.memory_space<vmem>>, %arg2: memref<3x9x64xbf16, #tpu.memory_space<vmem>>, %arg3: memref<1x64xf32, #tpu.memory_space<vmem>>, %arg4: memref<1x64xf32, #tpu.memory_space<vmem>>, %arg5: memref<1x35x34x64xbf16, #tpu.memory_space<vmem>>) attributes {dimension_semantics = [#tpu.dimension_semantics<parallel>], iteration_bounds = array<i64: 2>, scalar_prefetch = 0 : i64, scratch_operands = 0 : i64, tpu.core_type = #tpu.core_type<tc>, window_params = [{transform_indices = @transform_0, window_bounds = array<i64: 1, 1190, 3>}, {pipeline_mode = #tpu.pipeline_mode<synchronous>, transform_indices = @transform_1, window_bounds = array<i64: 3, 9, 64>}, {pipeline_mode = #tpu.pipeline_mode<synchronous>, transform_indices = @transform_2, window_bounds = array<i64: 1, 64>}, {pipeline_mode = #tpu.pipeline_mode<synchronous>, transform_indices = @transform_3, window_bounds = array<i64: 1, 64>}, {transform_indices = @transform_4, window_bounds = array<i64: 1, 35, 34, 64>}]} {
    %cst = arith.constant 0.000000e+00 : f32
    %0 = vector.broadcast %cst : f32 to vector<1088x64xf32>
    %c0 = arith.constant 0 : index
    %c0_0 = arith.constant 0 : index
    %c0_1 = arith.constant 0 : index
    %1 = vector.load %arg1[%c0, %c0_0, %c0_1] : memref<1x1190x3xbf16, #tpu.memory_space<vmem>>, vector<1x1088x3xbf16>
    %2 = vector.shape_cast %1 : vector<1x1088x3xbf16> to vector<1088x3xbf16>
    %c0_2 = arith.constant 0 : index
    %c1 = arith.constant 1 : index
    %c0_3 = arith.constant 0 : index
    %3 = vector.load %arg1[%c0_2, %c1, %c0_3] : memref<1x1190x3xbf16, #tpu.memory_space<vmem>>, vector<1x1088x3xbf16>
    %4 = vector.shape_cast %3 : vector<1x1088x3xbf16> to vector<1088x3xbf16>
    %c0_4 = arith.constant 0 : index
    %c2 = arith.constant 2 : index
    %c0_5 = arith.constant 0 : index
    %5 = vector.load %arg1[%c0_4, %c2, %c0_5] : memref<1x1190x3xbf16, #tpu.memory_space<vmem>>, vector<1x1088x3xbf16>
    %6 = vector.shape_cast %5 : vector<1x1088x3xbf16> to vector<1088x3xbf16>
    %7 = tpu.concatenate %2, %4, %6 in 1 : vector<1088x3xbf16>, vector<1088x3xbf16>, vector<1088x3xbf16> -> vector<1088x9xbf16>
    %c0_6 = arith.constant 0 : index
    %c0_7 = arith.constant 0 : index
    %c0_8 = arith.constant 0 : index
    %8 = vector.load %arg2[%c0_6, %c0_7, %c0_8] : memref<3x9x64xbf16, #tpu.memory_space<vmem>>, vector<1x9x64xbf16>
    %9 = vector.shape_cast %8 : vector<1x9x64xbf16> to vector<9x64xbf16>
    %cst_9 = arith.constant dense<0.000000e+00> : vector<1088x64xf32>
    %10 = tpu.matmul %7, %9, %cst_9 {dimension_numbers = #tpu.dot_dimension_numbers<[1], [0], [0], [1], [0, 0, 1, 1], [], []>} : vector<1088x9xbf16>, vector<9x64xbf16>, vector<1088x64xf32> -> vector<1088x64xf32>
    %11 = arith.addf %0, %10 : vector<1088x64xf32>
    %c0_10 = arith.constant 0 : index
    %c34 = arith.constant 34 : index
    %c0_11 = arith.constant 0 : index
    %12 = vector.load %arg1[%c0_10, %c34, %c0_11] : memref<1x1190x3xbf16, #tpu.memory_space<vmem>>, vector<1x1088x3xbf16>
    %13 = vector.shape_cast %12 : vector<1x1088x3xbf16> to vector<1088x3xbf16>
    %c0_12 = arith.constant 0 : index
    %c35 = arith.constant 35 : index
    %c0_13 = arith.constant 0 : index
    %14 = vector.load %arg1[%c0_12, %c35, %c0_13] : memref<1x1190x3xbf16, #tpu.memory_space<vmem>>, vector<1x1088x3xbf16>
    %15 = vector.shape_cast %14 : vector<1x1088x3xbf16> to vector<1088x3xbf16>
    %c0_14 = arith.constant 0 : index
    %c36 = arith.constant 36 : index
    %c0_15 = arith.constant 0 : index
    %16 = vector.load %arg1[%c0_14, %c36, %c0_15] : memref<1x1190x3xbf16, #tpu.memory_space<vmem>>, vector<1x1088x3xbf16>
    %17 = vector.shape_cast %16 : vector<1x1088x3xbf16> to vector<1088x3xbf16>
    %18 = tpu.concatenate %13, %15, %17 in 1 : vector<1088x3xbf16>, vector<1088x3xbf16>, vector<1088x3xbf16> -> vector<1088x9xbf16>
    %c1_16 = arith.constant 1 : index
    %c0_17 = arith.constant 0 : index
    %c0_18 = arith.constant 0 : index
    %19 = vector.load %arg2[%c1_16, %c0_17, %c0_18] : memref<3x9x64xbf16, #tpu.memory_space<vmem>>, vector<1x9x64xbf16>
    %20 = vector.shape_cast %19 : vector<1x9x64xbf16> to vector<9x64xbf16>
    %cst_19 = arith.constant dense<0.000000e+00> : vector<1088x64xf32>
    %21 = tpu.matmul %18, %20, %cst_19 {dimension_numbers = #tpu.dot_dimension_numbers<[1], [0], [0], [1], [0, 0, 1, 1], [], []>} : vector<1088x9xbf16>, vector<9x64xbf16>, vector<1088x64xf32> -> vector<1088x64xf32>
    %22 = arith.addf %11, %21 : vector<1088x64xf32>
    %c0_20 = arith.constant 0 : index
    %c68 = arith.constant 68 : index
    %c0_21 = arith.constant 0 : index
    %23 = vector.load %arg1[%c0_20, %c68, %c0_21] : memref<1x1190x3xbf16, #tpu.memory_space<vmem>>, vector<1x1088x3xbf16>
    %24 = vector.shape_cast %23 : vector<1x1088x3xbf16> to vector<1088x3xbf16>
    %c0_22 = arith.constant 0 : index
    %c69 = arith.constant 69 : index
    %c0_23 = arith.constant 0 : index
    %25 = vector.load %arg1[%c0_22, %c69, %c0_23] : memref<1x1190x3xbf16, #tpu.memory_space<vmem>>, vector<1x1088x3xbf16>
    %26 = vector.shape_cast %25 : vector<1x1088x3xbf16> to vector<1088x3xbf16>
    %c0_24 = arith.constant 0 : index
    %c70 = arith.constant 70 : index
    %c0_25 = arith.constant 0 : index
    %27 = vector.load %arg1[%c0_24, %c70, %c0_25] : memref<1x1190x3xbf16, #tpu.memory_space<vmem>>, vector<1x1088x3xbf16>
    %28 = vector.shape_cast %27 : vector<1x1088x3xbf16> to vector<1088x3xbf16>
    %29 = tpu.concatenate %24, %26, %28 in 1 : vector<1088x3xbf16>, vector<1088x3xbf16>, vector<1088x3xbf16> -> vector<1088x9xbf16>
    %c2_26 = arith.constant 2 : index
    %c0_27 = arith.constant 0 : index
    %c0_28 = arith.constant 0 : index
    %30 = vector.load %arg2[%c2_26, %c0_27, %c0_28] : memref<3x9x64xbf16, #tpu.memory_space<vmem>>, vector<1x9x64xbf16>
    %31 = vector.shape_cast %30 : vector<1x9x64xbf16> to vector<9x64xbf16>
    %cst_29 = arith.constant dense<0.000000e+00> : vector<1088x64xf32>
    %32 = tpu.matmul %29, %31, %cst_29 {dimension_numbers = #tpu.dot_dimension_numbers<[1], [0], [0], [1], [0, 0, 1, 1], [], []>} : vector<1088x9xbf16>, vector<9x64xbf16>, vector<1088x64xf32> -> vector<1088x64xf32>
    %33 = arith.addf %22, %32 : vector<1088x64xf32>
    %c0_30 = arith.constant 0 : index
    %c0_31 = arith.constant 0 : index
    %34 = vector.load %arg3[%c0_30, %c0_31] : memref<1x64xf32, #tpu.memory_space<vmem>>, vector<1x64xf32>
    %35 = vector.broadcast %34 : vector<1x64xf32> to vector<1088x64xf32>
    %36 = arith.mulf %33, %35 : vector<1088x64xf32>
    %c0_32 = arith.constant 0 : index
    %c0_33 = arith.constant 0 : index
    %37 = vector.load %arg4[%c0_32, %c0_33] : memref<1x64xf32, #tpu.memory_space<vmem>>, vector<1x64xf32>
    %38 = vector.broadcast %37 : vector<1x64xf32> to vector<1088x64xf32>
    %39 = arith.addf %36, %38 : vector<1088x64xf32>
    %cst_34 = arith.constant 0.000000e+00 : f32
    %40 = vector.broadcast %cst_34 : f32 to vector<1088x64xf32>
    %41 = arith.maximumf %39, %40 : vector<1088x64xf32>
    %42 = vector.shape_cast %41 : vector<1088x64xf32> to vector<32x34x64xf32>
    %43 = vector.extract_strided_slice %42 {offsets = [0, 0, 0], sizes = [32, 32, 64], strides = [1, 1, 1]} : vector<32x34x64xf32> to vector<32x32x64xf32>
    %cst_35 = arith.constant 0.000000e+00 : bf16
    %44 = vector.broadcast %cst_35 : bf16 to vector<35x34x64xbf16>
    %c0_36 = arith.constant 0 : index
    %c0_37 = arith.constant 0 : index
    %c0_38 = arith.constant 0 : index
    %c0_39 = arith.constant 0 : index
    %45 = vector.load %arg5[%c0_36, %c0_37, %c0_38, %c0_39] : memref<1x35x34x64xbf16, #tpu.memory_space<vmem>>, vector<1x35x34x64xbf16>
    %46 = vector.shape_cast %45 : vector<1x35x34x64xbf16> to vector<35x34x64xbf16>
    %47 = vector.shape_cast %44 : vector<35x34x64xbf16> to vector<1x35x34x64xbf16>
    tpu.vector_store %arg5[%c0_36, %c0_37, %c0_38, %c0_39], %47 {strides = array<i32>} : memref<1x35x34x64xbf16, #tpu.memory_space<vmem>>, vector<1x35x34x64xbf16>,
    %48 = arith.truncf %43 : vector<32x32x64xf32> to vector<32x32x64xbf16>
    %c0_40 = arith.constant 0 : index
    %c1_41 = arith.constant 1 : index
    %c1_42 = arith.constant 1 : index
    %c0_43 = arith.constant 0 : index
    %49 = vector.load %arg5[%c0_40, %c1_41, %c1_42, %c0_43] : memref<1x35x34x64xbf16, #tpu.memory_space<vmem>>, vector<1x32x32x64xbf16>
    %50 = vector.shape_cast %49 : vector<1x32x32x64xbf16> to vector<32x32x64xbf16>
    %51 = vector.shape_cast %48 : vector<32x32x64xbf16> to vector<1x32x32x64xbf16>
    tpu.vector_store %arg5[%c0_40, %c1_41, %c1_42, %c0_43], %51 {strides = array<i32>} : memref<1x35x34x64xbf16, #tpu.memory_space<vmem>>, vector<1x32x32x64xbf16>,
    return
  }
  func.func @transform_0(%arg0: i32) -> (i32, i32, i32) {
    %c0_i32 = arith.constant 0 : i32
    %c0_i32_0 = arith.constant 0 : i32
    %c0_i32_1 = arith.constant 0 : i32
    return %arg0, %c0_i32, %c0_i32_0 : i32, i32, i32
  }
  func.func @transform_1(%arg0: i32) -> (i32, i32, i32) {
    %c0_i32 = arith.constant 0 : i32
    %c0_i32_0 = arith.constant 0 : i32
    %c0_i32_1 = arith.constant 0 : i32
    %c0_i32_2 = arith.constant 0 : i32
    return %c0_i32, %c0_i32_0, %c0_i32_1 : i32, i32, i32
  }
  func.func @transform_2(%arg0: i32) -> (i32, i32) {
    %c0_i32 = arith.constant 0 : i32
    %c0_i32_0 = arith.constant 0 : i32
    %c0_i32_1 = arith.constant 0 : i32
    return %c0_i32, %c0_i32_0 : i32, i32
  }
  func.func @transform_3(%arg0: i32) -> (i32, i32) {
    %c0_i32 = arith.constant 0 : i32
    %c0_i32_0 = arith.constant 0 : i32
    %c0_i32_1 = arith.constant 0 : i32
    return %c0_i32, %c0_i32_0 : i32, i32
  }
  func.func @transform_4(%arg0: i32) -> (i32, i32, i32, i32) {
    %c0_i32 = arith.constant 0 : i32
    %c0_i32_0 = arith.constant 0 : i32
    %c0_i32_1 = arith.constant 0 : i32
    %c0_i32_2 = arith.constant 0 : i32
    return %arg0, %c0_i32, %c0_i32_0, %c0_i32_1 : i32, i32, i32, i32
  }
}

</mosaic_0001>

<bundles_post_ra>
// kernel: tpu_custom_call.1
= control target key start
LH: loop header
LB: loop body
LE: loop exit
PB: predicated region body
PF: predicated region fallthrough
CT: control target
= control target key end

     0   :  { %s16063_s15 = smov 0   ;;  %s22693_s0 = inlined_call_operand.vmem [shape: bf16[2,1190,3], index: 0, kind: input, shape index: {}]   ;;  %s22694_s1 = inlined_call_operand.vmem [shape: bf16[3,9,64], index: 1, kind: input, shape index: {}]   ;;  %s22695_s2 = inlined_call_operand.vmem [shape: f32[1,64], index: 2, kind: input, shape index: {}]   ;;  %s22696_s3 = inlined_call_operand.vmem [shape: f32[1,64], index: 3, kind: input, shape index: {}]   ;;  %s22697_s4 = inlined_call_operand.vmem [shape: bf16[2,35,34,64], index: 4, kind: output, shape index: {}]  }
   0x1 LB: > { %s13968_s16 = sadd.s32 4294967295, %s16031_s15   ;;  %p13972_p0 = scmp.ge.s32.totalorder %s16031_s15, 1  ;;  %s16031_s15 = sphi %s16063_s15, %s14_s15  }
   0x2   : > { %p162_p1 = scmp.lt.s32.totalorder %s16031_s15, 3 }
   0x4   : > { %p163_p2 = pnand %p13972_p0, %p162_p1 }
   0x6   : > { %166 = sbr.rel (%p163_p2) target bundleno = 1374 (0x55e), region = 36 }
   0xd   : > { %p188_p3 = scmp.lt.s32.totalorder %s13968_s16, 1  ;;  %vm1368_vm0 = vcmask 1046528   ;;  %vm680_vm1 = vsmask.f32 7424  ;;  %s16033_s21 = smov 6   ;;  %vm2448_vm2 = vcmask 1043456  }
   0xe   : > { %s16034_s22 = smov 3   ;;  %vm2449_vm3 = vcmask 1044480   ;;  %vm1642_vm4 = vcmask 23552   ;;  %vm1779_vm5 = vcmask 48128   ;;  %vm2243_vm6 = vcmask 72704  }
   0xf   : > { %s23110_s16 = smov (!%p188_p3, %s13968_s16), 1  ;;  %vm5554_vm7 = vcmask 1045504   ;;  %vm9471_vm8 = vcmask 519168   ;;  %vm9476_vm9 = vcmask 516096   ;;  %vm13621_vm10 = vsmask.f32 7938 }
  0x10   : > { %s15712_s17 = smul.u32 596, %s23110_s16  ;;  %vm12336_vm11 = vsmask.f32 256  ;;  %vm12337_vm12 = vsmask.f32 4368  ;;  %vm19446_vm13 = vmand %vm9471_vm8, %vm13621_vm10 }
  0x11   : > { %s15713_s29 = smul.u32 700, %s23110_s16  ;;  %vm19456_vm14 = vmor %vm12336_vm11, %vm12337_vm12 }
  0x12   : > { %s16077_s20 = scalar_lea.vmem %s22693_s0, %s15712_s17  ;;  %vm19463_vm15 = vmand %vm9476_vm9, %vm12336_vm11 }
  0x13   : > { %v15727_v0 = vld [vmem:[%s16077_s20 + $0x18] sm:$0xff]   ;;  %v15728_v1 = vld [vmem:[%s16077_s20 + $0x20] sm:$0xff]   ;;  %v204_v2 = vld [vmem:[%s16077_s20 + $0x14] sm:$0xf]  ;;  %s17800_s6 = scalar_lea.vmem %s22697_s4, %s15713_s29 }
  0x14   : > { %v1918_v3 = vld [vmem:[%s16077_s20 + $0x10] sm:$0xe]  ;;  %v16084_v5 = vrot.slane %v15727_v0, 1  ;;  %v1376_v6 = vrot.slane %v15728_v1, 1  ;;  %v16090_v10 = vld [vmem:[%s16077_s20 + $0x28] sm:$0xff]   ;;  %v705_v12 = vshll.u32 %v15727_v0, 16 }
  0x15   : > { %v1925_v4 = vld [vmem:[%s16077_s20 + $0x10] sm:$0xc]  ;;  %v200_v11 = vld [vmem:[%s16077_s20 + $0x4] sm:$0xf]  ;;  %v15733_v15 = vld [vmem:[%s16077_s20 + $0x8] sm:$0xff]   ;;  %v16097_v16 = vcombine.low %v1918_v3, %v204_v2  ;;  %v1378_v17 = vrot.slane %v16090_v10, 1 }
  0x16   : > { %v14050_v7 = vcombine.low %v1925_v4, %v204_v2  ;;  %v203_v8 = vld [vmem:[%s16077_s20 + $0x10] sm:$0xf]  ;;  %v1377_v13 = vsel %vm1368_vm0, %v16084_v5, %v1376_v6  ;;  %v336_v18 = vld [vmem:[%s16077_s20] sm:$0xe]  ;;  %v1370_v23 = vrot.slane %v15733_v15, 1  ;;  %v16111_v26 = vrot.slane %v705_v12, 1 }
  0x17   : > { %v16087_v9 = vcombine.low %v203_v8, %v204_v2  ;;  %1512 = vrot.lane.b32.xlu1 %v1377_v13, %s16033_s21  ;;  %v199_v19 = vld [vmem:[%s16077_s20] sm:$0xf]  ;;  %v14044_v22 = vcombine.low %v336_v18, %v200_v11  ;;  %v1379_v25 = vsel %vm1368_vm0, %v1376_v6, %v1378_v17  ;;  %v709_v27 = vshrl.u32 %v15727_v0, 16  ;;  %v15736_v33 = vld [vmem:[%s16077_s20 + $0x30] sm:$0xff]   ;;  %v16124_v42 = vld [vmem:[%s16077_s20 + $0x38] sm:$0xff]  }
  0x18   : > { %v1990_v14 = vrot.slane %v14050_v7, 1  ;;  %v16105_v24 = vcombine.low %v199_v19, %v200_v11  ;;  %v713_v28 = vshll.u32 %v15728_v1, 16  ;;  %v717_v31 = vshrl.u32 %v15728_v1, 16  ;;  %v15738_v62 = vld [vmem:[%s16077_s20 + $0x40] sm:$0xff]   ;;  %v16146_v7 = vld [vmem:[%s16077_s20 + $0x48] sm:$0xff]  }
  0x19   : > { %v1372_v20 = vrot.slane %v16087_v9, 1  ;;  %v1369_v29 = vrot.slane %v14044_v22, 1  ;;  %v721_v32 = vshll.u32 %v16090_v10, 16  ;;  %v711_v34 = vor.u32 %v709_v27, %v16111_v26  ;;  %v16163_v27 = vld [vmem:[%s16077_s20 + $0x58] sm:$0xff]  }
  0x1a   : > { %v1991_v21 = vsel %vm1368_vm0, %v1990_v14, %v16084_v5  ;;  %v715_v35 = vrot.slane %v713_v28, 1  ;;  %v1946_v36 = vshrl.u32 %v16097_v16, 16  ;;  %v1948_v37 = vshll.u32 %v16097_v16, 16 }
  0x1b   : > { %1998 = vrot.lane.b32.xlu0 %v1991_v21, %s16033_s21  ;;  %v1373_v30 = vsel %vm1368_vm0, %v1370_v23, %v1372_v20  ;;  %1514 = vrot.lane.b32.xlu1 %v1379_v25, %s16033_s21  ;;  %v1371_v38 = vsel %vm1368_vm0, %v1369_v29, %v1370_v23  ;;  %v723_v39 = vrot.slane %v721_v32, 1  ;;  %v689_v40 = vshll.u32 %v15733_v15, 16 }
  0x1c   : > { %v693_v41 = vshrl.u32 %v15733_v15, 16  ;;  %v716_v43 = vsel %vm680_vm1, %v711_v34, %v715_v35  ;;  %v719_v44 = vor.u32 %v717_v31, %v715_v35  ;;  %v1950_v45 = vrot.slane %v1948_v37, 1  ;;  %v15740_v15 = vld [vmem:[%s16077_s20 + $0x50] sm:$0xff]   ;;  %v15742_v35 = vld [vmem:[%s16077_s20 + $0x60] sm:$0xff]  }
  0x1d   : > { %v697_v46 = vshll.u32 %v16087_v9, 16  ;;  %v691_v47 = vrot.slane %v689_v40, 1  ;;  %v682_v48 = vshrl.u32 %v16105_v24, 16  ;;  %v684_v49 = vshll.u32 %v16105_v24, 16 }
  0x1e   : > { %v729_v50 = vshll.u32 %v15736_v33, 16  ;;  %v724_v51 = vsel %vm680_vm1, %v719_v44, %v723_v39  ;;  %v1951_v52 = vor.u32 %v1950_v45, %v1946_v36  ;;  %v733_v54 = vshrl.u32 %v15736_v33, 16 }
  0x1f   : > { %1506 = vrot.lane.b32.xlu0 %v1371_v38, %s16033_s21  ;;  %1508 = vrot.lane.b32.xlu1 %v1373_v30, %s16033_s21  ;;  %v699_v53 = vrot.slane %v697_v46, 1  ;;  %v695_v55 = vor.u32 %v693_v41, %v691_v47  ;;  %v686_v56 = vrot.slane %v684_v49, 1  ;;  %v737_v58 = vshll.u32 %v16124_v42, 16  ;;  %v16183_v41 = vld [vmem:[%s16077_s20 + $0x68] sm:$0xff]  }
  0x20   : > { %v731_v57 = vrot.slane %v729_v50, 1  ;;  %v1952_v59 = vsel %vm680_vm1, %v1951_v52, %v16111_v26  ;;  %v725_v61 = vshrl.u32 %v16090_v10, 16  ;;  %v1380_v4 = vrot.slane %v15736_v33, 1 }
  0x21   : > { %v687_v60 = vor.u32 %v686_v56, %v682_v48  ;;  %v700_v63 = vsel %vm680_vm1, %v695_v55, %v699_v53  ;;  %v739_v1 = vrot.slane %v737_v58, 1  ;;  %v1382_v6 = vrot.slane %v16124_v42, 1 }
  0x22   : > { %v735_v0 = vor.u32 %v733_v54, %v731_v57  ;;  %v727_v3 = vor.u32 %v725_v61, %v723_v39  ;;  %v745_v8 = vshll.u32 %v15738_v62, 16  ;;  %v701_v13 = vshrl.u32 %v16087_v9, 16  ;;  %v16197_v54 = vld [vmem:[%s16077_s20 + $0x78] sm:$0xff]  }
  0x23   : > { %1235 = vrot.lane.b32.xlu0 %v716_v43, %s16034_s22  ;;  %1237 = vrot.lane.b32.xlu1 %v724_v51, %s16034_s22  ;;  %v692_v2 = vsel %vm680_vm1, %v687_v60, %v691_v47  ;;  %v749_v14 = vshrl.u32 %v15738_v62, 16  ;;  %v1383_v18 = vsel %vm1368_vm0, %v1380_v4, %v1382_v6  ;;  %v753_v21 = vshll.u32 %v16146_v7, 16  ;;  %v15744_v51 = vld [vmem:[%s16077_s20 + $0x70] sm:$0xff]  }
  0x24   : > { %v740_v11 = vsel %vm680_vm1, %v735_v0, %v739_v1  ;;  %v732_v12 = vsel %vm680_vm1, %v727_v3, %v731_v57  ;;  %v747_v19 = vrot.slane %v745_v8, 1  ;;  %v1381_v22 = vsel %vm1368_vm0, %v1378_v17, %v1380_v4  ;;  %v16207_v3 = vld [vmem:[%s16077_s20 + $0x80] sm:$0xff]  }
  0x25   : > { %v703_v23 = vor.u32 %v701_v13, %v699_v53  ;;  %v741_v25 = vshrl.u32 %v16124_v42, 16  ;;  %v1375_v28 = vsel %vm1368_vm0, %v1372_v20, %v16084_v5  ;;  %v755_v30 = vrot.slane %v753_v21, 1 }
  0x26   : > { %v751_v29 = vor.u32 %v749_v14, %v747_v19  ;;  %v761_v31 = vshll.u32 %v15740_v15, 16  ;;  %v1384_v32 = vrot.slane %v15738_v62, 1  ;;  %v1386_v33 = vrot.slane %v16146_v7, 1 }
  0x27   : > { %1977 = vrot.lane.b32.xlu0 %v1952_v59, %s16034_s22  ;;  %1231 = vrot.lane.b32.xlu1 %v700_v63, %s16034_s22  ;;  %v708_v10 = vsel %vm680_vm1, %v703_v23, %v16111_v26  ;;  %v743_v17 = vor.u32 %v741_v25, %v739_v1  ;;  %v765_v34 = vshrl.u32 %v15740_v15, 16  ;;  %v769_v20 = vshll.u32 %v16163_v27, 16 }
  0x28   : > { %v756_v36 = vsel %vm680_vm1, %v751_v29, %v755_v30  ;;  %v763_v5 = vrot.slane %v761_v31, 1  ;;  %v757_v26 = vshrl.u32 %v16146_v7, 16  ;;  %v1387_v38 = vsel %vm1368_vm0, %v1384_v32, %v1386_v33 }
  0x29   : > { %v748_v37 = vsel %vm680_vm1, %v743_v17, %v747_v19  ;;  %v771_v40 = vrot.slane %v769_v20, 1  ;;  %v777_v42 = vshll.u32 %v15742_v35, 16  ;;  %v1385_v43 = vsel %vm1368_vm0, %v1382_v6, %v1384_v32 }
  0x2a   : > { %v767_v39 = vor.u32 %v765_v34, %v763_v5  ;;  %v759_v44 = vor.u32 %v757_v26, %v755_v30  ;;  %v1388_v45 = vrot.slane %v15740_v15, 1  ;;  %v1390_v46 = vrot.slane %v16163_v27, 1  ;;  %v15765_v34 = vld [vmem:[%s22694_s1] sm:$0x1f]  }
  0x2b   : > { %1229 = vrot.lane.b32.xlu0 %v692_v2, %s16034_s22  ;;  %1241 = vrot.lane.b32.xlu1 %v740_v11, %s16034_s22  ;;  %v779_v48 = vrot.slane %v777_v42, 1  ;;  %v781_v49 = vshrl.u32 %v15742_v35, 16  ;;  %v785_v50 = vshll.u32 %v16183_v41, 16  ;;  %v773_v53 = vshrl.u32 %v16163_v27, 16 }
  0x2c   : > { %v772_v47 = vsel %vm680_vm1, %v767_v39, %v771_v40  ;;  %v764_v52 = vsel %vm680_vm1, %v759_v44, %v763_v5  ;;  %v1391_v55 = vsel %vm1368_vm0, %v1388_v45, %v1390_v46  ;;  %v793_v58 = vshll.u32 %v15744_v51, 16 }
  0x2d   : > { %v783_v56 = vor.u32 %v781_v49, %v779_v48  ;;  %v787_v57 = vrot.slane %v785_v50, 1  ;;  %v1389_v59 = vsel %vm1368_vm0, %v1386_v33, %v1388_v45  ;;  %v775_v60 = vor.u32 %v773_v53, %v771_v40 }
  0x2e   : > { %v1392_v61 = vrot.slane %v15742_v35, 1  ;;  %v1394_v62 = vrot.slane %v16183_v41, 1  ;;  %v795_v0 = vrot.slane %v793_v58, 1  ;;  %v797_v1 = vshrl.u32 %v15744_v51, 16 }
  0x2f   : > { %1239 = vrot.lane.b32.xlu0 %v732_v12, %s16034_s22  ;;  %1518 = vrot.lane.b32.xlu1 %v1383_v18, %s16033_s21  ;;  %v788_v63 = vsel %vm680_vm1, %v783_v56, %v787_v57  ;;  %v801_v2 = vshll.u32 %v16197_v54, 16  ;;  %v780_v4 = vsel %vm680_vm1, %v775_v60, %v779_v48  ;;  %v789_v6 = vshrl.u32 %v16183_v41, 16  ;;  %v16215_v12 = vld [vmem:[%s16077_s20 + $0x88] sm:$0xff]   ;;  %v16221_v18 = vld [vmem:[%s16077_s20 + $0x90] sm:$0xff]  }
  0x30   : > { %v1395_v7 = vsel %vm1368_vm0, %v1392_v61, %v1394_v62  ;;  %v799_v8 = vor.u32 %v797_v1, %v795_v0  ;;  %v809_v13 = vshll.u32 %v16207_v3, 16  ;;  %v1393_v14 = vsel %vm1368_vm0, %v1390_v46, %v1392_v61  ;;  %v16266_v48 = vld [vmem:[%s16077_s20 + $0xa8] sm:$0xff]   ;;  %v15752_v56 = vld [vmem:[%s16077_s20 + $0xb0] sm:$0xff]  }
  0x31   : > { %v803_v11 = vrot.slane %v801_v2, 1  ;;  %v791_v15 = vor.u32 %v789_v6, %v787_v57  ;;  %v1396_v19 = vrot.slane %v15744_v51, 1  ;;  %v1398_v21 = vrot.slane %v16197_v54, 1 }
  0x32   : > { %v811_v23 = vrot.slane %v809_v13, 1  ;;  %v813_v25 = vshrl.u32 %v16207_v3, 16  ;;  %v817_v27 = vshll.u32 %v16215_v12, 16  ;;  %v805_v30 = vshrl.u32 %v16197_v54, 16 }
  0x33   : > { %1516 = vrot.lane.b32.xlu0 %v1381_v22, %s16033_s21  ;;  %1510 = vrot.lane.b32.xlu1 %v1375_v28, %s16033_s21  ;;  %v804_v22 = vsel %vm680_vm1, %v799_v8, %v803_v11  ;;  %v16230_v28 = vld [vmem:[%s16077_s20 + $0x98] sm:$0xff]   ;;  %v796_v29 = vsel %vm680_vm1, %v791_v15, %v795_v0  ;;  %v825_v31 = vshll.u32 %v16221_v18, 16  ;;  %v1399_v17 = vsel %vm1368_vm0, %v1396_v19, %v1398_v21 }
  0x34   : > { %v815_v32 = vor.u32 %v813_v25, %v811_v23  ;;  %v819_v33 = vrot.slane %v817_v27, 1  ;;  %v1397_v35 = vsel %vm1368_vm0, %v1394_v62, %v1396_v19  ;;  %v1400_v5 = vrot.slane %v16207_v3, 1  ;;  %v16286_v0 = vld [vmem:[%s16077_s20 + $0xb8] sm:$0xff]   ;;  %v16303_v27 = vld [vmem:[%s16077_s20 + $0xc8] sm:$0xff]  }
  0x35   : > { %v1402_v20 = vrot.slane %v16215_v12, 1  ;;  %v16035_v26 = vmov 65535   ;;  %v827_v39 = vrot.slane %v825_v31, 1  ;;  %v829_v40 = vshrl.u32 %v16221_v18, 16 }
  0x36   : > { %v833_v41 = vshll.u32 %v16230_v28, 16  ;;  %v1401_v53 = vsel %vm1368_vm0, %v1398_v21, %v1400_v5  ;;  %v1406_v57 = vrot.slane %v16230_v28, 1  ;;  %v849_v61 = vshll.u32 %v16266_v48, 16 }
  0x37   : > { %1233 = vrot.lane.b32.xlu0 %v708_v10, %s16034_s22  ;;  %1245 = vrot.lane.b32.xlu1 %v756_v36, %s16034_s22  ;;  %v15764_v10 = vld [vmem:[%s22694_s1 + $0x8] sm:$0x1f]   ;;  %v807_v36 = vor.u32 %v805_v30, %v803_v11  ;;  %v1403_v49 = vsel %vm1368_vm0, %v1400_v5, %v1402_v20  ;;  %v831_v50 = vor.u32 %v829_v40, %v827_v39  ;;  %v1410_v11 = vrot.slane %v16266_v48, 1 }
  0x38   : > { %v835_v51 = vrot.slane %v833_v41, 1  ;;  %v851_v3 = vrot.slane %v849_v61, 1  ;;  %v865_v15 = vshll.u32 %v16286_v0, 16  ;;  %v853_v21 = vshrl.u32 %v16266_v48, 16  ;;  %v16338_v61 = vld [vmem:[%s16077_s20 + $0xf0] sm:$0xff]  }
  0x39   : > { %v812_v46 = vsel %vm680_vm1, %v807_v36, %v811_v23  ;;  %v1412_v31 = vrot.slane %v15752_v56, 1  ;;  %v869_v5 = vshrl.u32 %v16286_v0, 16 }
  0x3a   : > { %v867_v25 = vrot.slane %v865_v15, 1  ;;  %v855_v30 = vor.u32 %v853_v21, %v851_v3  ;;  %v16356_v15 = vld [vmem:[%s16077_s20 + $0x100] sm:$0xff]  }
  0x3b   : > { %1243 = vrot.lane.b32.xlu0 %v748_v37, %s16034_s22  ;;  %1522 = vrot.lane.b32.xlu1 %v1387_v38, %s16033_s21  ;;  %v16248_v37 = vld [vmem:[%s16077_s20 + $0xa0] sm:$0xff]   ;;  %v2450_v38 = vsel %vm2448_vm2, 4294967295, %v16035_v26  ;;  %v1413_v40 = vsel %vm1368_vm0, %v1410_v11, %v1412_v31 }
  0x3c   : > { %v16253_v42 = vsel %vm2449_vm3, %v2450_v38, 0  ;;  %v845_v58 = vshrl.u32 %v16248_v37, 16  ;;  %v1408_v8 = vrot.slane %v16248_v37, 1  ;;  %v871_v41 = vor.u32 %v869_v5, %v867_v25 }
  0x3d   : > { %v2453_v44 = vand.u32 %v15764_v10, %v16253_v42  ;;  %v16258_v45 = vand.u32 %v15765_v34, %v16253_v42  ;;  %v1414_v10 = vrot.slane %v16286_v0, 1  ;;  %v881_v34 = vshll.u32 %v16303_v27, 16 }
  0x3f   : > { %1520 = vrot.lane.b32.xlu0 %v1385_v43, %s16033_s21  ;;  %1249 = vrot.lane.b32.xlu1 %v772_v47, %s16034_s22  ;;  %v820_v43 = vsel %vm680_vm1, %v815_v32, %v819_v33  ;;  %v821_v47 = vshrl.u32 %v16215_v12, 16  ;;  %v883_v38 = vrot.slane %v881_v34, 1 }
  0x40   : > { %15024 = vmatprep.subr.bf16.mxu1 %v2453_v44  ;;  %15162 = vmatprep.subr.bf16.mxu0 %v16258_v45 }
  0x41   : > { %15025 = vmatpush3.bf16.msra.mxu1 %v2453_v44  ;;  %15163 = vmatpush3.bf16.msra.mxu0 %v16258_v45  ;;  %v823_v54 = vor.u32 %v821_v47, %v819_v33  ;;  %v1418_v44 = vrot.slane %v16303_v27, 1  ;;  %v15758_v47 = vld [vmem:[%s16077_s20 + $0xe0] sm:$0xff]  }
  0x42   : > { %15438 = vmatprep.subr.bf16.mxu1 %v16258_v45 }
  0x43   : > { %1247 = vrot.lane.b32.xlu0 %v764_v52, %s16034_s22  ;;  %1526 = vrot.lane.b32.xlu1 %v1391_v55, %s16033_s21  ;;  %v841_v52 = vshll.u32 %v16248_v37, 16  ;;  %v1404_v55 = vrot.slane %v16221_v18, 1  ;;  %v828_v62 = vsel %vm680_vm1, %v823_v54, %v827_v39  ;;  %v15754_v18 = vld [vmem:[%s16077_s20 + $0xc0] sm:$0xff]   ;;  %v1415_v37 = vsel %vm1368_vm0, %v1412_v31, %v1414_v10 }
  0x44   : > { %v877_v33 = vshrl.u32 %v15754_v18, 16 }
  0x45   : > { %v843_v60 = vrot.slane %v841_v52, 1  ;;  %v1407_v1 = vsel %vm1368_vm0, %v1404_v55, %v1406_v57  ;;  %v1405_v6 = vsel %vm1368_vm0, %v1402_v20, %v1404_v55  ;;  %v16317_v20 = vld [vmem:[%s16077_s20 + $0xd8] sm:$0xff]   ;;  %v885_v52 = vshrl.u32 %v16303_v27, 16  ;;  %v16365_v27 = vld [vmem:[%s16077_s20 + $0x108] sm:$0xff]  }
  0x47   : > { %1524 = vrot.lane.b32.xlu0 %v1389_v59, %s16033_s21  ;;  %1253 = vrot.lane.b32.xlu1 %v788_v63, %s16034_s22  ;;  %v836_v59 = vsel %vm680_vm1, %v831_v50, %v835_v51  ;;  %v837_v63 = vshrl.u32 %v16230_v28, 16  ;;  %v847_v2 = vor.u32 %v845_v58, %v843_v60  ;;  %v873_v28 = vshll.u32 %v15754_v18, 16 }
  0x48   : > { %v897_v50 = vshll.u32 %v16317_v20, 16 }
  0x49   : > { %v852_v12 = vsel %vm680_vm1, %v847_v2, %v851_v3  ;;  %v875_v32 = vrot.slane %v873_v28, 1 }
  0x4b   : > { %1251 = vrot.lane.b32.xlu0 %v780_v4, %s16034_s22  ;;  %1530 = vrot.lane.b32.xlu1 %v1395_v7, %s16033_s21  ;;  %v857_v4 = vshll.u32 %v15752_v56, 16  ;;  %v839_v7 = vor.u32 %v837_v63, %v835_v51  ;;  %v879_v26 = vor.u32 %v877_v33, %v875_v32  ;;  %v876_v51 = vsel %vm680_vm1, %v871_v41, %v875_v32  ;;  %v16374_v33 = vld [vmem:[%s16077_s20 + $0x110] sm:$0xff]  }
  0x4c   : > { %v909_v63 = vshrl.u32 %v15758_v47, 16  ;;  %v1428_v32 = vrot.slane %v16338_v61, 1 }
  0x4d   : > { %v859_v13 = vrot.slane %v857_v4, 1  ;;  %v844_v19 = vsel %vm680_vm1, %v839_v7, %v843_v60  ;;  %v884_v48 = vsel %vm680_vm1, %v879_v26, %v883_v38  ;;  %v901_v4 = vshrl.u32 %v16317_v20, 16 }
  0x4e   : > { %v945_v26 = vshll.u32 %v16365_v27, 16 }
  0x4f   : > { %1528 = vrot.lane.b32.xlu0 %v1393_v14, %s16033_s21  ;;  %1257 = vrot.lane.b32.xlu1 %v804_v22, %s16034_s22  ;;  %v861_v14 = vshrl.u32 %v15752_v56, 16  ;;  %v1411_v22 = vsel %vm1368_vm0, %v1408_v8, %v1410_v11  ;;  %v860_v36 = vsel %vm680_vm1, %v855_v30, %v859_v13  ;;  %v899_v56 = vrot.slane %v897_v50, 1  ;;  %v16350_v11 = vld [vmem:[%s16077_s20 + $0xf8] sm:$0xff]  }
  0x50   : > { %v937_v30 = vshll.u32 %v16356_v15, 16  ;;  %v933_v41 = vshrl.u32 %v16350_v11, 16  ;;  %v16394_v50 = vld [vmem:[%s16077_s20 + $0x118] sm:$0xff]  }
  0x51   : > { %v863_v23 = vor.u32 %v861_v14, %v859_v13  ;;  %v903_v14 = vor.u32 %v901_v4, %v899_v56  ;;  %v949_v4 = vshrl.u32 %v16365_v27, 16 }
  0x53   : > { %1255 = vrot.lane.b32.xlu0 %v796_v29, %s16034_s22  ;;  %1534 = vrot.lane.b32.xlu1 %v1399_v17, %s16033_s21  ;;  %v1409_v29 = vsel %vm1368_vm0, %v1406_v57, %v1408_v8  ;;  %v868_v17 = vsel %vm680_vm1, %v863_v23, %v867_v25  ;;  %v905_v57 = vshll.u32 %v15758_v47, 16  ;;  %v925_v23 = vshrl.u32 %v16338_v61, 16 }
  0x54   : > { %v929_v25 = vshll.u32 %v16350_v11, 16 }
  0x57   : > { %1532 = vrot.lane.b32.xlu0 %v1397_v35, %s16033_s21  ;;  %1261 = vrot.lane.b32.xlu1 %v820_v43, %s16034_s22  ;;  %v15756_v35 = vld [vmem:[%s16077_s20 + $0xd0] sm:$0xff]   ;;  %v1416_v43 = vrot.slane %v15754_v18, 1  ;;  %v1424_v18 = vrot.slane %v15758_v47, 1 }
  0x58   : > { %v889_v39 = vshll.u32 %v15756_v35, 16  ;;  %v1420_v60 = vrot.slane %v15756_v35, 1 }
  0x59   : > { %v1419_v54 = vsel %vm1368_vm0, %v1416_v43, %v1418_v44  ;;  %v1417_v58 = vsel %vm1368_vm0, %v1414_v10, %v1416_v43 }
  0x5a   : > { %v1421_v13 = vsel %vm1368_vm0, %v1418_v44, %v1420_v60  ;;  %v953_v44 = vshll.u32 %v16374_v33, 16 }
  0x5b   : > { %1259 = vrot.lane.b32.xlu0 %v812_v46, %s16034_s22  ;;  %1538 = vrot.lane.b32.xlu1 %v1403_v49, %s16033_s21  ;;  %v893_v46 = vshrl.u32 %v15756_v35, 16  ;;  %v891_v49 = vrot.slane %v889_v39, 1  ;;  %v1430_v35 = vrot.slane %v16350_v11, 1 }
  0x5d   : > { %v895_v55 = vor.u32 %v893_v46, %v891_v49  ;;  %v1431_v47 = vsel %vm1368_vm0, %v1428_v32, %v1430_v35 }
  0x5f   : > { %1536 = vrot.lane.b32.xlu0 %v1401_v53, %s16033_s21  ;;  %1265 = vrot.lane.b32.xlu1 %v836_v59, %s16034_s22  ;;  %v16332_v53 = vld [vmem:[%s16077_s20 + $0xe8] sm:$0xff]   ;;  %v887_v59 = vor.u32 %v885_v52, %v883_v38  ;;  %v900_v0 = vsel %vm680_vm1, %v895_v55, %v899_v56  ;;  %v1434_v56 = vrot.slane %v16365_v27, 1 }
  0x60   : > { %v913_v2 = vshll.u32 %v16332_v53, 16 }
  0x61   : > { %v892_v3 = vsel %vm680_vm1, %v887_v59, %v891_v49  ;;  %v947_v49 = vrot.slane %v945_v26, 1  ;;  %v15877_v59 = vld [vmem:[%s16077_s20 + $0x18] sm:$0xff]  }
  0x62   : > { %v915_v8 = vrot.slane %v913_v2, 1  ;;  %v15878_v2 = vld [vmem:[%s16077_s20 + $0x20] sm:$0xff]  }
  0x63   : > { %1263 = vrot.lane.b32.xlu0 %v828_v62, %s16034_s22  ;;  %1542 = vrot.lane.b32.xlu1 %v1407_v1, %s16033_s21  ;;  %v1422_v62 = vrot.slane %v16317_v20, 1  ;;  %v907_v1 = vrot.slane %v905_v57, 1  ;;  %v955_v57 = vrot.slane %v953_v44, 1  ;;  %v965_v44 = vshrl.u32 %v16394_v50, 16 }
  0x65   : > { %v911_v7 = vor.u32 %v909_v63, %v907_v1  ;;  %v908_v28 = vsel %vm680_vm1, %v903_v14, %v907_v1  ;;  %v1425_v5 = vsel %vm1368_vm0, %v1422_v62, %v1424_v18  ;;  %v961_v63 = vshll.u32 %v16394_v50, 16 }
  0x67   : > { %1540 = vrot.lane.b32.xlu0 %v1405_v6, %s16033_s21  ;;  %1269 = vrot.lane.b32.xlu1 %v852_v12, %s16034_s22  ;;  %v1423_v6 = vsel %vm1368_vm0, %v1420_v60, %v1422_v62  ;;  %v921_v12 = vshll.u32 %v16338_v61, 16  ;;  %v916_v21 = vsel %vm680_vm1, %v911_v7, %v915_v8  ;;  %v957_v62 = vshrl.u32 %v16374_v33, 16  ;;  %v16418_v7 = vld [vmem:[%s16077_s20 + $0x128] sm:$0xff]  }
  0x6b   : > { %1267 = vrot.lane.b32.xlu0 %v844_v19, %s16034_s22  ;;  %1546 = vrot.lane.b32.xlu1 %v1411_v22, %s16033_s21  ;;  %v1426_v19 = vrot.slane %v16332_v53, 1  ;;  %v923_v22 = vrot.slane %v921_v12, 1 }
  0x6d   : > { %v1427_v31 = vsel %vm1368_vm0, %v1424_v18, %v1426_v19  ;;  %v927_v10 = vor.u32 %v925_v23, %v923_v22  ;;  %v1429_v55 = vsel %vm1368_vm0, %v1426_v19, %v1428_v32  ;;  %v3753_v18 = vld [vmem:[%s16077_s20 + $0x20] sm:$0xc]  ;;  %v16433_v19 = vld [vmem:[%s16077_s20 + $0x24] sm:$0xf]  ;;  %v963_v23 = vrot.slane %v961_v63, 1 }
  0x6e   : > { %v1442_v63 = vrot.slane %v16418_v7, 1 }
  0x6f   : > { %1544 = vrot.lane.b32.xlu0 %v1409_v29, %s16033_s21  ;;  %1273 = vrot.lane.b32.xlu1 %v868_v17, %s16034_s22  ;;  %v917_v29 = vshrl.u32 %v16332_v53, 16  ;;  %v931_v17 = vrot.slane %v929_v25, 1  ;;  %v1432_v53 = vrot.slane %v16356_v15, 1  ;;  %v1438_v25 = vrot.slane %v16394_v50, 1 }
  0x71   : > { %v919_v20 = vor.u32 %v917_v29, %v915_v8  ;;  %v932_v39 = vsel %vm680_vm1, %v927_v10, %v931_v17  ;;  %v935_v52 = vor.u32 %v933_v41, %v931_v17  ;;  %v16443_v10 = vld [vmem:[%s16077_s20 + $0x28] sm:$0xff]  }
  0x73   : > { %1271 = vrot.lane.b32.xlu0 %v860_v36, %s16034_s22  ;;  %1550 = vrot.lane.b32.xlu1 %v1415_v37, %s16033_s21  ;;  %v941_v36 = vshrl.u32 %v16356_v15, 16  ;;  %v939_v37 = vrot.slane %v937_v30, 1  ;;  %v924_v43 = vsel %vm680_vm1, %v919_v20, %v923_v22  ;;  %v1435_v15 = vsel %vm1368_vm0, %v1432_v53, %v1434_v56 }
  0x74   : > { %v959_v22 = vor.u32 %v957_v62, %v955_v57 }
  0x75   : > { %v940_v1 = vsel %vm680_vm1, %v935_v52, %v939_v37  ;;  %v16479_v52 = vld [vmem:[%s16077_s20 + $0x130] sm:$0xff]  }
  0x76   : > { %v964_v11 = vsel %vm680_vm1, %v959_v22, %v963_v23 }
  0x77   : > { %1548 = vrot.lane.b32.xlu0 %v1413_v40, %s16033_s21  ;;  %1277 = vrot.lane.b32.xlu1 %v884_v48, %s16034_s22  ;;  %v943_v48 = vor.u32 %v941_v36, %v939_v37  ;;  %v977_v37 = vshll.u32 %v16418_v7, 16 }
  0x79   : > { %v948_v61 = vsel %vm680_vm1, %v943_v48, %v947_v49 }
  0x7b   : > { %1275 = vrot.lane.b32.xlu0 %v876_v51, %s16034_s22  ;;  %1554 = vrot.lane.b32.xlu1 %v1419_v54, %s16033_s21  ;;  %v16401_v54 = vld [vmem:[%s16077_s20 + $0x120] sm:$0xff]  }
  0x7c   : > { %v969_v8 = vshll.u32 %v16401_v54, 16  ;;  %v1440_v62 = vrot.slane %v16401_v54, 1 }
  0x7e   : > { %v971_v20 = vrot.slane %v969_v8, 1 }
  0x7f   : > { %1552 = vrot.lane.b32.xlu0 %v1417_v58, %s16033_s21  ;;  %1281 = vrot.lane.b32.xlu1 %v900_v0, %s16034_s22 }
  0x83   : > { %1279 = vrot.lane.b32.xlu0 %v892_v3, %s16034_s22  ;;  %1558 = vrot.lane.b32.xlu1 %v1423_v6, %s16033_s21  ;;  %v1436_v6 = vrot.slane %v16374_v33, 1  ;;  %v951_v33 = vor.u32 %v949_v4, %v947_v49  ;;  %v4246_v49 = vshll.u32 %v16443_v10, 16 }
  0x87   : > { %1556 = vrot.lane.b32.xlu0 %v1421_v13, %s16033_s21  ;;  %1285 = vrot.lane.b32.xlu1 %v916_v21, %s16034_s22 }
  0x89   : > { %v1513_v34 = vpop.permute.xlu1 %1512 }
  0x8b   : > { %1283 = vrot.lane.b32.xlu0 %v908_v28, %s16034_s22  ;;  %1562 = vrot.lane.b32.xlu1 %v1427_v31, %s16033_s21  ;;  %v973_v31 = vshrl.u32 %v16401_v54, 16  ;;  %v16508_v54 = vld [vmem:[%s16077_s20 + $0x38] sm:$0xff]  }
  0x8d   : > { %v1999_v38 = vpop.permute.xlu0 %1998  ;;  %v1515_v40 = vpop.permute.xlu1 %1514 }
  0x8f   : > { %1560 = vrot.lane.b32.xlu0 %v1425_v5, %s16033_s21  ;;  %1289 = vrot.lane.b32.xlu1 %v932_v39, %s16034_s22 }
  0x91   : > { %v16387_v46 = vpop.permute.xlu0 %1506  ;;  %v16397_v51 = vpop.permute.xlu1 %1508 }
  0x93   : > { %1287 = vrot.lane.b32.xlu0 %v924_v43, %s16034_s22  ;;  %1566 = vrot.lane.b32.xlu1 %v1431_v47, %s16033_s21  ;;  %v956_v43 = vsel %vm680_vm1, %v951_v33, %v955_v57  ;;  %v15880_v47 = vld [vmem:[%s16077_s20 + $0x30] sm:$0xff]   ;;  %v1443_v33 = vsel %vm1368_vm0, %v1440_v62, %v1442_v63 }
  0x95   : > { %v1236_v58 = vpop.permute.xlu0 %1235  ;;  %v1238_v0 = vpop.permute.xlu1 %1237 }
  0x96   : > { %v1650_v60 = vsel %vm1642_vm4, %v15877_v59, %v1236_v58  ;;  %v1652_v3 = vsel %vm1642_vm4, %v15878_v2, %v1238_v0  ;;  %v16486_v58 = vld [vmem:[%s16077_s20 + $0x138] sm:$0xff]   ;;  %v16489_v59 = vld [vmem:[%s16077_s20 + $0x30] sm:$0xff]  }
  0x97   : > { %1564 = vrot.lane.b32.xlu0 %v1429_v55, %s16033_s21  ;;  %v16422_v12 = vsel %vm1779_vm5, %v1650_v60, %v1513_v34  ;;  %v16425_v13 = vsel %vm1779_vm5, %v1652_v3, %v1515_v40  ;;  %1293 = vrot.lane.b32.xlu1 %v948_v61, %s16034_s22  ;;  %v15879_v34 = vld [vmem:[%s16077_s20 + $0x8] sm:$0xff]   ;;  %v979_v55 = vrot.slane %v977_v37, 1  ;;  %v1437_v61 = vsel %vm1368_vm0, %v1434_v56, %v1436_v6 }
  0x98   : > { %v2104_v28 = vrot.slane %v16425_v13, 1  ;;  %v2102_v32 = vrot.slane %v16422_v12, 1  ;;  %v15881_v3 = vld [vmem:[%s16077_s20 + $0x28] sm:$0xff]   ;;  %v4248_v56 = vrot.slane %v4246_v49, 1 }
  0x99   : > { %v1978_v14 = vpop.permute.xlu0 %1977  ;;  %v1232_v30 = vpop.permute.xlu1 %1231 }
  0x9a   : > { %v2009_v21 = vsel %vm1642_vm4, %v16097_v16, %v1978_v14  ;;  %v1433_v16 = vsel %vm1368_vm0, %v1430_v35, %v1432_v53  ;;  %v1646_v36 = vsel %vm1642_vm4, %v15879_v34, %v1232_v30  ;;  %v16458_v35 = vcombine.low %v3753_v18, %v16433_v19 }
  0x9b   : > { %v2020_v29 = vsel %vm1779_vm5, %v2009_v21, %v1999_v38  ;;  %1291 = vrot.lane.b32.xlu0 %v940_v1, %s16034_s22  ;;  %1570 = vrot.lane.b32.xlu1 %v1435_v15, %s16033_s21  ;;  %v2105_v39 = vsel %vm1368_vm0, %v2102_v32, %v2104_v28  ;;  %v1783_v41 = vsel %vm1779_vm5, %v1646_v36, %v16397_v51  ;;  %v985_v18 = vshll.u32 %v16479_v52, 16 }
  0x9c   : > { %v2101_v17 = vrot.slane %v2020_v29, 1  ;;  %v1439_v51 = vsel %vm1368_vm0, %v1436_v6, %v1438_v25  ;;  %v975_v53 = vor.u32 %v973_v31, %v971_v20  ;;  %v4241_v57 = vshll.u32 %v16458_v35, 16 }
  0x9d   : > { %v1230_v5 = vpop.permute.xlu0 %1229  ;;  %v967_v1 = vor.u32 %v965_v44, %v963_v23  ;;  %v4239_v2 = vshrl.u32 %v16458_v35, 16  ;;  %v989_v23 = vshrl.u32 %v16479_v52, 16  ;;  %v993_v30 = vshll.u32 %v16486_v58, 16 }
  0x9e   : > { %v1644_v26 = vsel %vm1642_vm4, %v16105_v24, %v1230_v5  ;;  %v2103_v38 = vsel %vm1368_vm0, %v2101_v17, %v2102_v32  ;;  %v1242_v24 = vpop.permute.xlu1 %1241  ;;  %v980_v14 = vsel %vm680_vm1, %v975_v53, %v979_v55  ;;  %v4243_v15 = vrot.slane %v4241_v57, 1 }
  0x9f   : > { %15026 = vmatprep.mubr.msk.bf16.mxu1 %vm2243_vm6, %v2103_v38  ;;  %1568 = vrot.lane.b32.xlu0 %v1433_v16, %s16033_s21  ;;  %v1781_v40 = vsel %vm1779_vm5, %v1644_v26, %v16387_v46  ;;  %v1656_v48 = vsel %vm1642_vm4, %v15880_v47, %v1242_v24  ;;  %v972_v29 = vsel %vm680_vm1, %v967_v1, %v971_v20  ;;  %v4254_v31 = vshll.u32 %v16489_v59, 16  ;;  %v15882_v24 = vld [vmem:[%s16077_s20 + $0x40] sm:$0xff]  }
  0xa0   : > { %15027 = vmatmul.mubr.msk.bf16.vlgmr.msra.gmra.mrb[0].mxu1 %vm2243_vm6, %v2105_v39  ;;  %15164 = vmatprep.mubr.msk.bf16.mxu0 %vm2243_vm6, %v1781_v40  ;;  %v4244_v36 = vor.u32 %v4243_v15, %v4239_v2  ;;  %v987_v5 = vrot.slane %v985_v18, 1  ;;  %v4258_v26 = vshrl.u32 %v16489_v59, 16  ;;  %v4262_v38 = vshll.u32 %v16508_v54, 16 }
  0xa1   : > { %15165 = vmatmul.mubr.msk.bf16.vlgmr.msra.gmra.mrb[0].mxu0 %vm2243_vm6, %v1783_v41  ;;  %v1240_v46 = vpop.permute.xlu0 %1239  ;;  %1297 = vrot.lane.b32.xlu1 %v964_v11, %s16034_s22  ;;  %v16544_v39 = vrot.slane %v993_v30, 1  ;;  %v4256_v40 = vrot.slane %v4254_v31, 1  ;;  %v4935_v30 = vrot.slane %v16508_v54, 1 }
  0xa2   : > { %15439 = vmatpush3.bf16.msra.mxu1 %v16258_v45  ;;  %v1519_v60 = vpop.permute.xlu1 %1518  ;;  %v981_v45 = vshrl.u32 %v16418_v7, 16  ;;  %v1654_v4 = vsel %vm1642_vm4, %v15881_v3, %v1240_v46  ;;  %v4249_v50 = vsel %vm680_vm1, %v4244_v36, %v4248_v56  ;;  %v1444_v3 = vrot.slane %v16479_v52, 1 }
  0xa3   : > { %1295 = vrot.lane.b32.xlu0 %v956_v43, %s16034_s22  ;;  %v16499_v0 = vsel %vm1779_vm5, %v1656_v48, %v1519_v60  ;;  %v4931_v52 = vrot.slane %v16443_v10, 1 }
  0xa4   : > { %v2108_v8 = vrot.slane %v16499_v0, 1  ;;  %v983_v11 = vor.u32 %v981_v45, %v979_v55  ;;  %v15805_v55 = vld [vmem:[%s22694_s1 + $0x10] sm:$0x1f]  }
  0xa5   : > { %v1517_v27 = vpop.permute.xlu0 %1516  ;;  %1574 = vrot.lane.b32.xlu1 %v1439_v51, %s16033_s21 }
  0xa6   : > { %v16511_v6 = vsel %vm1779_vm5, %v1654_v4, %v1517_v27  ;;  %v1511_v22 = vpop.permute.xlu1 %1510  ;;  %v988_v48 = vsel %vm680_vm1, %v983_v11, %v987_v5  ;;  %v16575_v27 = vld [vmem:[%s16077_s20 + $0x40] sm:$0xff]  }
  0xa7   : > { %v2106_v21 = vrot.slane %v16511_v6, 1  ;;  %1572 = vrot.lane.b32.xlu0 %v1437_v61, %s16033_s21  ;;  %v4260_v61 = vor.u32 %v4258_v26, %v4256_v40  ;;  %v15886_v26 = vld [vmem:[%s16077_s20 + $0x60] sm:$0xff]  }
  0xa9   : > { %v1234_v17 = vpop.permute.xlu0 %1233  ;;  %v2107_v32 = vsel %vm1368_vm0, %v2104_v28, %v2106_v21  ;;  %1301 = vrot.lane.b32.xlu1 %v980_v14, %s16034_s22  ;;  %v2109_v16 = vsel %vm1368_vm0, %v2106_v21, %v2108_v8  ;;  %v4250_v28 = vshrl.u32 %v16443_v10, 16  ;;  %v15884_v14 = vld [vmem:[%s16077_s20 + $0x50] sm:$0xff]   ;;  %v15885_v10 = vld [vmem:[%s16077_s20 + $0x48] sm:$0xff]  }
  0xaa   : > { %v1648_v34 = vsel %vm1642_vm4, %v16087_v9, %v1234_v17  ;;  %15030 = vmatprep.mubr.msk.bf16.mxu1 %vm2243_vm6, %v2107_v32  ;;  %v1246_v37 = vpop.permute.xlu1 %1245  ;;  %v1441_v9 = vsel %vm1368_vm0, %v1438_v25, %v1440_v62  ;;  %v991_v25 = vor.u32 %v989_v23, %v987_v5  ;;  %v4264_v62 = vrot.slane %v4262_v38, 1 }
  0xab   : > { %1299 = vrot.lane.b32.xlu0 %v972_v29, %s16034_s22  ;;  %15031 = vmatmul.mubr.msk.bf16.gmra.mrb[4].mxu1 %vm2243_vm6, %v2109_v16  ;;  %v1785_v20 = vsel %vm1779_vm5, %v1648_v34, %v1511_v22  ;;  %v1660_v41 = vsel %vm1642_vm4, %v15882_v24, %v1246_v37  ;;  %v4252_v46 = vor.u32 %v4250_v28, %v4248_v56  ;;  %v16596_v22 = vld [vmem:[%s16077_s20 + $0x140] sm:$0xff]   ;;  %v1446_v32 = vrot.slane %v16486_v58, 1  ;;  %v16619_v37 = vld [vmem:[%s16077_s20 + $0x148] sm:$0xff]  }
  0xac   : > { %15168 = vmatprep.mubr.msk.bf16.mxu0 %vm2243_vm6, %v1785_v20  ;;  %v996_v60 = vsel %vm680_vm1, %v991_v25, %v16544_v39  ;;  %v5902_v56 = vand.u32 %v15805_v55, %v16253_v42  ;;  %v4265_v42 = vsel %vm680_vm1, %v4260_v61, %v4264_v62  ;;  %v4266_v16 = vshrl.u32 %v16508_v54, 16 }
  0xad   : > { %15169 = vmatmul.mubr.msk.bf16.gmra.mrb[4].mxu0 %vm2243_vm6, %v16422_v12  ;;  %v1244_v43 = vpop.permute.xlu0 %1243  ;;  %1578 = vrot.lane.b32.xlu1 %v1443_v33, %s16033_s21  ;;  %v15883_v12 = vld [vmem:[%s16077_s20 + $0x38] sm:$0xff]   ;;  %v4257_v45 = vsel %vm680_vm1, %v4252_v46, %v4256_v40  ;;  %v4270_v33 = vshll.u32 %v16575_v27, 16  ;;  %v997_v5 = vshrl.u32 %v16486_v58, 16  ;;  %v1001_v20 = vshll.u32 %v16596_v22, 16 }
  0xae   : > { %15172 = vmatprep.mubr.msk.bf16.mxu0 %vm2243_vm6, %v16425_v13  ;;  %v1523_v44 = vpop.permute.xlu1 %1522  ;;  %v1658_v49 = vsel %vm1642_vm4, %v15883_v12, %v1244_v43  ;;  %v3891_v13 = vld [vmem:[%s16077_s20 + $0x20] sm:$0x8]  ;;  %15300 = vmatprep.subr.bf16.mxu0 %v5902_v56  ;;  %v4268_v24 = vor.u32 %v4266_v16, %v4264_v62  ;;  %v1009_v46 = vshll.u32 %v16619_v37, 16  ;;  %v16643_v12 = vld [vmem:[%s16077_s20 + $0x48] sm:$0xff]   ;;  %v4274_v62 = vshrl.u32 %v16575_v27, 16 }
  0xaf   : > { %1576 = vrot.lane.b32.xlu0 %v1441_v9, %s16033_s21  ;;  %v16556_v47 = vsel %vm1779_vm5, %v1660_v41, %v1523_v44  ;;  %v14261_v4 = vcombine.low %v3891_v13, %v16433_v19  ;;  %15301 = vmatpush3.bf16.msra.mxu0 %v5902_v56  ;;  %v4272_v41 = vrot.slane %v4270_v33, 1  ;;  %v999_v25 = vor.u32 %v997_v5, %v16544_v39 }
  0xb0   : > { %v2112_v51 = vrot.slane %v16556_v47, 1  ;;  %v1013_v5 = vshrl.u32 %v16619_v37, 16 }
  0xb1   : > { %v1521_v53 = vpop.permute.xlu0 %1520  ;;  %4789 = vrot.lane.b32.xlu1 %v4249_v50, %s16034_s22  ;;  %v4930_v29 = vrot.slane %v14261_v4, 1  ;;  %v1447_v50 = vsel %vm1368_vm0, %v1444_v3, %v1446_v32  ;;  %v4273_v55 = vsel %vm680_vm1, %v4268_v24, %v4272_v41  ;;  %v15888_v4 = vld [vmem:[%s16077_s20 + $0x70] sm:$0xff]  }
  0xb2   : > { %v1795_v57 = vsel %vm1779_vm5, %v1658_v49, %v1521_v53  ;;  %v1250_v2 = vpop.permute.xlu1 %1249  ;;  %v15887_v49 = vld [vmem:[%s16077_s20 + $0x58] sm:$0xff]  }
  0xb3   : > { %v2110_v1 = vrot.slane %v1795_v57, 1  ;;  %1303 = vrot.lane.b32.xlu0 %v988_v48, %s16034_s22  ;;  %v1664_v15 = vsel %vm1642_vm4, %v15884_v14, %v1250_v2  ;;  %v4932_v28 = vsel %vm1368_vm0, %v4930_v29, %v4931_v52  ;;  %v1003_v48 = vrot.slane %v1001_v20, 1  ;;  %v16679_v29 = vld [vmem:[%s16077_s20 + $0x150] sm:$0xff]   ;;  %v15890_v20 = vld [vmem:[%s16077_s20 + $0x80] sm:$0xff]  }
  0xb5   : > { %15173 = vmatmul.mubr.msk.bf16.gmra.mrb[8].mxu0 %vm2243_vm6, %v16511_v6  ;;  %v1248_v18 = vpop.permute.xlu0 %1247  ;;  %v2111_v21 = vsel %vm1368_vm0, %v2108_v8, %v2110_v1  ;;  %1305 = vrot.lane.b32.xlu1 %v996_v60, %s16034_s22  ;;  %v2113_v19 = vsel %vm1368_vm0, %v2110_v1, %v2112_v51  ;;  %v4933_v6 = vrot.slane %v16489_v59, 1  ;;  %v1004_v1 = vsel %vm680_vm1, %v999_v25, %v1003_v48 }
  0xb6   : > { %15034 = vmatprep.mubr.msk.bf16.mxu1 %vm2243_vm6, %v2111_v21  ;;  %15176 = vmatprep.mubr.msk.bf16.mxu0 %vm2243_vm6, %v16499_v0  ;;  %v1527_v8 = vpop.permute.xlu1 %1526  ;;  %v1445_v0 = vsel %vm1368_vm0, %v1442_v63, %v1444_v3  ;;  %v1662_v59 = vsel %vm1642_vm4, %v15885_v10, %v1248_v18  ;;  %v4278_v3 = vshll.u32 %v16643_v12, 16  ;;  %v4937_v21 = vrot.slane %v16575_v27, 1 }
  0xb7   : > { %4791 = vrot.lane.b32.xlu0 %v4257_v45, %s16034_s22  ;;  %15035 = vmatmul.mubr.msk.bf16.gmra.mrb[8].mxu1 %vm2243_vm6, %v2113_v19  ;;  %v16599_v23 = vsel %vm1779_vm5, %v1664_v15, %v1527_v8  ;;  %v4934_v63 = vsel %vm1368_vm0, %v4931_v52, %v4933_v6  ;;  %v4936_v58 = vsel %vm1368_vm0, %v4933_v6, %v4935_v30  ;;  %v1011_v45 = vrot.slane %v1009_v46, 1  ;;  %v15891_v46 = vld [vmem:[%s16077_s20 + $0x78] sm:$0xff]  }
  0xb8   : > { %v2116_v31 = vrot.slane %v16599_v23, 1  ;;  %v4276_v8 = vor.u32 %v4274_v62, %v4272_v41 }
  0xb9   : > { %v1525_v17 = vpop.permute.xlu0 %1524  ;;  %4793 = vrot.lane.b32.xlu1 %v4265_v42, %s16034_s22  ;;  %v16670_v42 = vld [vmem:[%s16077_s20 + $0x50] sm:$0xff]  }
  0xba   : > { %v1799_v7 = vsel %vm1779_vm5, %v1662_v59, %v1525_v17  ;;  %v1254_v36 = vpop.permute.xlu1 %1253  ;;  %v4938_v17 = vsel %vm1368_vm0, %v4935_v30, %v4937_v21  ;;  %v4286_v16 = vshll.u32 %v16670_v42, 16  ;;  %v1017_v30 = vshll.u32 %v16679_v29, 16 }
  0xbb   : > { %v2114_v34 = vrot.slane %v1799_v7, 1  ;;  %1580 = vrot.lane.b32.xlu0 %v1445_v0, %s16033_s21  ;;  %v1668_v38 = vsel %vm1642_vm4, %v15886_v26, %v1254_v36  ;;  %v4280_v0 = vrot.slane %v4278_v3, 1  ;;  %v1450_v36 = vrot.slane %v16619_v37, 1 }
  0xbc   : > { %v1019_v25 = vrot.slane %v1017_v30, 1  ;;  %v15894_v30 = vld [vmem:[%s16077_s20 + $0xa0] sm:$0xff]  }
  0xbd   : > { %15177 = vmatmul.mubr.msk.bf16.gmra.mrb[12].mxu0 %vm2243_vm6, %v1795_v57  ;;  %v1252_v9 = vpop.permute.xlu0 %1251  ;;  %v2115_v11 = vsel %vm1368_vm0, %v2112_v51, %v2114_v34  ;;  %5069 = vrot.lane.b32.xlu1 %v4934_v63, %s16033_s21  ;;  %v2117_v40 = vsel %vm1368_vm0, %v2114_v34, %v2116_v31  ;;  %v1448_v57 = vrot.slane %v16596_v22, 1  ;;  %v4282_v63 = vshrl.u32 %v16643_v12, 16 }
  0xbe   : > { %15038 = vmatprep.mubr.msk.bf16.mxu1 %vm2243_vm6, %v2115_v11  ;;  %15180 = vmatprep.mubr.msk.bf16.mxu0 %vm2243_vm6, %v16556_v47  ;;  %v1531_v43 = vpop.permute.xlu1 %1530  ;;  %v1005_v47 = vshrl.u32 %v16596_v22, 16  ;;  %v1666_v51 = vsel %vm1642_vm4, %v15887_v49, %v1252_v9  ;;  %v4281_v54 = vsel %vm680_vm1, %v4276_v8, %v4280_v0 }
  0xbf   : > { %5067 = vrot.lane.b32.xlu0 %v4932_v28, %s16033_s21  ;;  %15039 = vmatmul.mubr.msk.bf16.gmra.mrb[12].mxu1 %vm2243_vm6, %v2117_v40  ;;  %v16638_v44 = vsel %vm1779_vm5, %v1668_v38, %v1531_v43  ;;  %v1449_v19 = vsel %vm1368_vm0, %v1446_v32, %v1448_v57  ;;  %v16698_v28 = vld [vmem:[%s16077_s20 + $0x158] sm:$0xff]   ;;  %v4284_v40 = vor.u32 %v4282_v63, %v4280_v0  ;;  %v16759_v0 = vld [vmem:[%s16077_s20 + $0x160] sm:$0xff]  }
  0xc0   : > { %v2120_v53 = vrot.slane %v16638_v44, 1  ;;  %v1007_v2 = vor.u32 %v1005_v47, %v1003_v48  ;;  %v1451_v41 = vsel %vm1368_vm0, %v1448_v57, %v1450_v36  ;;  %v1015_v43 = vor.u32 %v1013_v5, %v1011_v45  ;;  %v16723_v47 = vld [vmem:[%s16077_s20 + $0x58] sm:$0xff]  }
  0xc1   : > { %v1529_v13 = vpop.permute.xlu0 %1528  ;;  %5071 = vrot.lane.b32.xlu1 %v4936_v58, %s16033_s21  ;;  %v4288_v58 = vrot.slane %v4286_v16, 1  ;;  %v1025_v48 = vshll.u32 %v16698_v28, 16  ;;  %v4298_v63 = vshrl.u32 %v16723_v47, 16  ;;  %v1029_v5 = vshrl.u32 %v16698_v28, 16 }
  0xc2   : > { %v1803_v39 = vsel %vm1779_vm5, %v1666_v51, %v1529_v13  ;;  %v1258_v61 = vpop.permute.xlu1 %1257  ;;  %v1012_v27 = vsel %vm680_vm1, %v1007_v2, %v1011_v45  ;;  %v4294_v2 = vshll.u32 %v16723_v47, 16  ;;  %v15892_v45 = vld [vmem:[%s16077_s20 + $0x90] sm:$0xff]  }
  0xc3   : > { %v2118_v60 = vrot.slane %v1803_v39, 1  ;;  %1582 = vrot.lane.b32.xlu0 %v1447_v50, %s16033_s21  ;;  %v1672_v56 = vsel %vm1642_vm4, %v15888_v4, %v1258_v61  ;;  %v4289_v13 = vsel %vm680_vm1, %v4284_v40, %v4288_v58  ;;  %v1020_v61 = vsel %vm680_vm1, %v1015_v43, %v1019_v25 }
  0xc4   : > { %v4296_v8 = vrot.slane %v4294_v2, 1 }
  0xc5   : > { %15181 = vmatmul.mubr.msk.bf16.gmra.mrb[16].mxu0 %vm2243_vm6, %v1799_v7  ;;  %v1256_v14 = vpop.permute.xlu0 %1255  ;;  %v2119_v15 = vsel %vm1368_vm0, %v2116_v31, %v2118_v60  ;;  %4795 = vrot.lane.b32.xlu1 %v4273_v55, %s16034_s22  ;;  %v2121_v18 = vsel %vm1368_vm0, %v2118_v60, %v2120_v53  ;;  %v4939_v7 = vrot.slane %v16643_v12, 1  ;;  %v4290_v60 = vshrl.u32 %v16670_v42, 16 }
  0xc6   : > { %15042 = vmatprep.mubr.msk.bf16.mxu1 %vm2243_vm6, %v2119_v15  ;;  %15184 = vmatprep.mubr.msk.bf16.mxu0 %vm2243_vm6, %v16599_v23  ;;  %v1535_v52 = vpop.permute.xlu1 %1534  ;;  %v15889_v23 = vld [vmem:[%s16077_s20 + $0x68] sm:$0xff]   ;;  %v4941_v15 = vrot.slane %v16670_v42, 1 }
  0xc7   : > { %1307 = vrot.lane.b32.xlu0 %v1004_v1, %s16034_s22  ;;  %15043 = vmatmul.mubr.msk.bf16.gmra.mrb[16].mxu1 %vm2243_vm6, %v2121_v18  ;;  %v16675_v6 = vsel %vm1779_vm5, %v1672_v56, %v1535_v52  ;;  %v1670_v10 = vsel %vm1642_vm4, %v15889_v23, %v1256_v14  ;;  %v4940_v37 = vsel %vm1368_vm0, %v4937_v21, %v4939_v7  ;;  %v1027_v1 = vrot.slane %v1025_v48, 1  ;;  %v16750_v21 = vld [vmem:[%s16077_s20 + $0x60] sm:$0xff]   ;;  %v15895_v48 = vld [vmem:[%s16077_s20 + $0x98] sm:$0xff]  }
  0xc8   : > { %v2124_v59 = vrot.slane %v16675_v6, 1  ;;  %v4302_v16 = vshll.u32 %v16750_v21, 16 }
  0xc9   : > { %v1533_v31 = vpop.permute.xlu0 %1532  ;;  %1584 = vrot.lane.b32.xlu1 %v1449_v19, %s16033_s21 }
  0xca   : > { %v1807_v32 = vsel %vm1779_vm5, %v1670_v10, %v1533_v31  ;;  %v1262_v34 = vpop.permute.xlu1 %1261  ;;  %v4942_v31 = vsel %vm1368_vm0, %v4939_v7, %v4941_v15  ;;  %v1033_v7 = vshll.u32 %v16759_v0, 16 }
  0xcb   : > { %v2122_v33 = vrot.slane %v1807_v32, 1  ;;  %1309 = vrot.lane.b32.xlu0 %v1012_v27, %s16034_s22  ;;  %v1676_v26 = vsel %vm1642_vm4, %v15890_v20, %v1262_v34  ;;  %v4292_v27 = vor.u32 %v4290_v60, %v4288_v58 }
  0xcc   : > { %v1035_v43 = vrot.slane %v1033_v7, 1  ;;  %v15898_v7 = vld [vmem:[%s16077_s20 + $0xc0] sm:$0xff]  }
  0xcd   : > { %15185 = vmatmul.mubr.msk.bf16.gmra.mrb[20].mxu0 %vm2243_vm6, %v1803_v39  ;;  %v1260_v38 = vpop.permute.xlu0 %1259  ;;  %v2123_v9 = vsel %vm1368_vm0, %v2120_v53, %v2122_v33  ;;  %5073 = vrot.lane.b32.xlu1 %v4938_v17, %s16033_s21  ;;  %v2125_v11 = vsel %vm1368_vm0, %v2122_v33, %v2124_v59  ;;  %v1452_v39 = vrot.slane %v16679_v29, 1  ;;  %v4297_v12 = vsel %vm680_vm1, %v4292_v27, %v4296_v8 }
  0xce   : > { %15046 = vmatprep.mubr.msk.bf16.mxu1 %vm2243_vm6, %v2123_v9  ;;  %15188 = vmatprep.mubr.msk.bf16.mxu0 %vm2243_vm6, %v16638_v44  ;;  %v1539_v24 = vpop.permute.xlu1 %1538  ;;  %v1021_v44 = vshrl.u32 %v16679_v29, 16  ;;  %v1674_v49 = vsel %vm1642_vm4, %v15891_v46, %v1260_v38 }
  0xcf   : > { %4797 = vrot.lane.b32.xlu0 %v4281_v54, %s16034_s22  ;;  %15047 = vmatmul.mubr.msk.bf16.gmra.mrb[20].mxu1 %vm2243_vm6, %v2125_v11  ;;  %v16718_v50 = vsel %vm1779_vm5, %v1676_v26, %v1539_v24  ;;  %v1453_v18 = vsel %vm1368_vm0, %v1450_v36, %v1452_v39  ;;  %v1454_v36 = vrot.slane %v16698_v28, 1  ;;  %v16778_v54 = vld [vmem:[%s16077_s20 + $0x168] sm:$0xff]   ;;  %v4300_v11 = vor.u32 %v4298_v63, %v4296_v8  ;;  %v16839_v8 = vld [vmem:[%s16077_s20 + $0x170] sm:$0xff]  }
  0xd0   : > { %v2128_v51 = vrot.slane %v16718_v50, 1  ;;  %v1023_v62 = vor.u32 %v1021_v44, %v1019_v25  ;;  %v1031_v24 = vor.u32 %v1029_v5, %v1027_v1  ;;  %v1041_v25 = vshll.u32 %v16778_v54, 16  ;;  %v16803_v44 = vld [vmem:[%s16077_s20 + $0x68] sm:$0xff]  }
  0xd1   : > { %v1537_v22 = vpop.permute.xlu0 %1536  ;;  %5075 = vrot.lane.b32.xlu1 %v4940_v37, %s16033_s21  ;;  %v4304_v37 = vrot.slane %v4302_v16, 1  ;;  %v1455_v58 = vsel %vm1368_vm0, %v1452_v39, %v1454_v36  ;;  %v4314_v63 = vshrl.u32 %v16803_v44, 16  ;;  %v1045_v5 = vshrl.u32 %v16778_v54, 16 }
  0xd2   : > { %v1811_v53 = vsel %vm1779_vm5, %v1674_v49, %v1537_v22  ;;  %v1266_v57 = vpop.permute.xlu1 %1265  ;;  %v1028_v42 = vsel %vm680_vm1, %v1023_v62, %v1027_v1  ;;  %v4310_v62 = vshll.u32 %v16803_v44, 16  ;;  %v15896_v1 = vld [vmem:[%s16077_s20 + $0xb0] sm:$0xff]  }
  0xd3   : > { %v2126_v55 = vrot.slane %v1811_v53, 1  ;;  %1586 = vrot.lane.b32.xlu0 %v1451_v41, %s16033_s21  ;;  %v1680_v3 = vsel %vm1642_vm4, %v15892_v45, %v1266_v57  ;;  %v4305_v22 = vsel %vm680_vm1, %v4300_v11, %v4304_v37  ;;  %v1036_v57 = vsel %vm680_vm1, %v1031_v24, %v1035_v43 }
  0xd4   : > { %v4312_v27 = vrot.slane %v4310_v62, 1 }
  0xd5   : > { %15189 = vmatmul.mubr.msk.bf16.gmra.mrb[24].mxu0 %vm2243_vm6, %v1807_v32  ;;  %v1264_v4 = vpop.permute.xlu0 %1263  ;;  %v2127_v56 = vsel %vm1368_vm0, %v2124_v59, %v2126_v55  ;;  %4799 = vrot.lane.b32.xlu1 %v4289_v13, %s16034_s22  ;;  %v2129_v14 = vsel %vm1368_vm0, %v2126_v55, %v2128_v51  ;;  %v4943_v32 = vrot.slane %v16723_v47, 1  ;;  %v4306_v55 = vshrl.u32 %v16750_v21, 16 }
  0xd6   : > { %15050 = vmatprep.mubr.msk.bf16.mxu1 %vm2243_vm6, %v2127_v56  ;;  %15192 = vmatprep.mubr.msk.bf16.mxu0 %vm2243_vm6, %v16675_v6  ;;  %v1543_v19 = vpop.permute.xlu1 %1542  ;;  %v15893_v6 = vld [vmem:[%s16077_s20 + $0x88] sm:$0xff]   ;;  %v4945_v56 = vrot.slane %v16750_v21, 1 }
  0xd7   : > { %1311 = vrot.lane.b32.xlu0 %v1020_v61, %s16034_s22  ;;  %15051 = vmatmul.mubr.msk.bf16.gmra.mrb[24].mxu1 %vm2243_vm6, %v2129_v14  ;;  %v16755_v52 = vsel %vm1779_vm5, %v1680_v3, %v1543_v19  ;;  %v1678_v23 = vsel %vm1642_vm4, %v15893_v6, %v1264_v4  ;;  %v4944_v28 = vsel %vm1368_vm0, %v4941_v15, %v4943_v32  ;;  %v1043_v61 = vrot.slane %v1041_v25, 1  ;;  %v16830_v15 = vld [vmem:[%s16077_s20 + $0x70] sm:$0xff]   ;;  %v15899_v25 = vld [vmem:[%s16077_s20 + $0xb8] sm:$0xff]  }
  0xd8   : > { %v2132_v10 = vrot.slane %v16755_v52, 1  ;;  %v4318_v16 = vshll.u32 %v16830_v15, 16 }
  0xd9   : > { %v1541_v59 = vpop.permute.xlu0 %1540  ;;  %1588 = vrot.lane.b32.xlu1 %v1453_v18, %s16033_s21 }
  0xda   : > { %v1815_v17 = vsel %vm1779_vm5, %v1678_v23, %v1541_v59  ;;  %v1270_v34 = vpop.permute.xlu1 %1269  ;;  %v4946_v59 = vsel %vm1368_vm0, %v4943_v32, %v4945_v56  ;;  %v1049_v32 = vshll.u32 %v16839_v8, 16 }
  0xdb   : > { %v2130_v33 = vrot.slane %v1815_v17, 1  ;;  %1313 = vrot.lane.b32.xlu0 %v1028_v42, %s16034_s22  ;;  %v1684_v20 = vsel %vm1642_vm4, %v15894_v30, %v1270_v34  ;;  %v4308_v42 = vor.u32 %v4306_v55, %v4304_v37 }
  0xdc   : > { %v1051_v24 = vrot.slane %v1049_v32, 1  ;;  %v15902_v32 = vld [vmem:[%s16077_s20 + $0xe0] sm:$0xff]  }
  0xdd   : > { %15193 = vmatmul.mubr.msk.bf16.gmra.mrb[28].mxu0 %vm2243_vm6, %v1811_v53  ;;  %v1268_v26 = vpop.permute.xlu0 %1267  ;;  %v2131_v38 = vsel %vm1368_vm0, %v2128_v51, %v2130_v33  ;;  %5077 = vrot.lane.b32.xlu1 %v4942_v31, %s16033_s21  ;;  %v2133_v9 = vsel %vm1368_vm0, %v2130_v33, %v2132_v10  ;;  %v1456_v53 = vrot.slane %v16759_v0, 1  ;;  %v4313_v47 = vsel %vm680_vm1, %v4308_v42, %v4312_v27 }
  0xde   : > { %15054 = vmatprep.mubr.msk.bf16.mxu1 %vm2243_vm6, %v2131_v38  ;;  %15196 = vmatprep.mubr.msk.bf16.mxu0 %vm2243_vm6, %v16718_v50  ;;  %v1547_v40 = vpop.permute.xlu1 %1546  ;;  %v1037_v50 = vshrl.u32 %v16759_v0, 16  ;;  %v1682_v46 = vsel %vm1642_vm4, %v15895_v48, %v1268_v26 }
  0xdf   : > { %4801 = vrot.lane.b32.xlu0 %v4297_v12, %s16034_s22  ;;  %15055 = vmatmul.mubr.msk.bf16.gmra.mrb[28].mxu1 %vm2243_vm6, %v2133_v9  ;;  %v16798_v41 = vsel %vm1779_vm5, %v1684_v20, %v1547_v40  ;;  %v1457_v14 = vsel %vm1368_vm0, %v1454_v36, %v1456_v53  ;;  %v1458_v36 = vrot.slane %v16778_v54, 1  ;;  %v16858_v12 = vld [vmem:[%s16077_s20 + $0x178] sm:$0xff]   ;;  %v4316_v9 = vor.u32 %v4314_v63, %v4312_v27  ;;  %v15901_v27 = vld [vmem:[%s16077_s20 + $0xc8] sm:$0xff]  }
  0xe0   : > { %v2136_v49 = vrot.slane %v16798_v41, 1  ;;  %v1039_v60 = vor.u32 %v1037_v50, %v1035_v43  ;;  %v1047_v40 = vor.u32 %v1045_v5, %v1043_v61  ;;  %v1057_v43 = vshll.u32 %v16858_v12, 16  ;;  %v16883_v50 = vld [vmem:[%s16077_s20 + $0x78] sm:$0xff]  }
  0xe1   : > { %v1545_v29 = vpop.permute.xlu0 %1544  ;;  %5079 = vrot.lane.b32.xlu1 %v4944_v28, %s16033_s21  ;;  %v4320_v28 = vrot.slane %v4318_v16, 1  ;;  %v1459_v37 = vsel %vm1368_vm0, %v1456_v53, %v1458_v36  ;;  %v4330_v63 = vshrl.u32 %v16883_v50, 16 }
  0xe2   : > { %v1819_v51 = vsel %vm1779_vm5, %v1682_v46, %v1545_v29  ;;  %v1274_v39 = vpop.permute.xlu1 %1273  ;;  %v1044_v21 = vsel %vm680_vm1, %v1039_v60, %v1043_v61  ;;  %v4326_v60 = vshll.u32 %v16883_v50, 16  ;;  %v15900_v61 = vld [vmem:[%s16077_s20 + $0xd0] sm:$0xff]  }
  0xe3   : > { %v2134_v13 = vrot.slane %v1819_v51, 1  ;;  %1590 = vrot.lane.b32.xlu0 %v1455_v58, %s16033_s21  ;;  %v1688_v2 = vsel %vm1642_vm4, %v15896_v1, %v1274_v39  ;;  %v4321_v29 = vsel %vm680_vm1, %v4316_v9, %v4320_v28  ;;  %v1052_v39 = vsel %vm680_vm1, %v1047_v40, %v1051_v24 }
  0xe5   : > { %15197 = vmatmul.mubr.msk.bf16.gmra.mrb[32].mxu0 %vm2243_vm6, %v1815_v17  ;;  %v1272_v45 = vpop.permute.xlu0 %1271  ;;  %v2135_v3 = vsel %vm1368_vm0, %v2132_v10, %v2134_v13  ;;  %4803 = vrot.lane.b32.xlu1 %v4305_v22, %s16034_s22  ;;  %v2137_v4 = vsel %vm1368_vm0, %v2134_v13, %v2136_v49  ;;  %v4947_v17 = vrot.slane %v16803_v44, 1  ;;  %v4322_v13 = vshrl.u32 %v16830_v15, 16 }
  0xe6   : > { %15058 = vmatprep.mubr.msk.bf16.mxu1 %vm2243_vm6, %v2135_v3  ;;  %15200 = vmatprep.mubr.msk.bf16.mxu0 %vm2243_vm6, %v16755_v52  ;;  %v1551_v18 = vpop.permute.xlu1 %1550  ;;  %v15897_v52 = vld [vmem:[%s16077_s20 + $0xa8] sm:$0xff]   ;;  %v4949_v3 = vrot.slane %v16830_v15, 1 }
  0xe7   : > { %1315 = vrot.lane.b32.xlu0 %v1036_v57, %s16034_s22  ;;  %15059 = vmatmul.mubr.msk.bf16.gmra.mrb[32].mxu1 %vm2243_vm6, %v2137_v4  ;;  %v16835_v19 = vsel %vm1779_vm5, %v1688_v2, %v1551_v18  ;;  %v1686_v6 = vsel %vm1642_vm4, %v15897_v52, %v1272_v45  ;;  %v4948_v54 = vsel %vm1368_vm0, %v4945_v56, %v4947_v17  ;;  %v1059_v57 = vrot.slane %v1057_v43, 1  ;;  %v16910_v56 = vld [vmem:[%s16077_s20 + $0x80] sm:$0xff]   ;;  %v15903_v43 = vld [vmem:[%s16077_s20 + $0xd8] sm:$0xff]  }
  0xe8   : > { %v2140_v23 = vrot.slane %v16835_v19, 1  ;;  %v16915_v18 = vld [vmem:[%s16077_s20 + $0x180] sm:$0xff]   ;;  %v4324_v42 = vor.u32 %v4322_v13, %v4320_v28  ;;  %v4334_v16 = vshll.u32 %v16910_v56, 16 }
  0xe9   : > { %v1549_v10 = vpop.permute.xlu0 %1548  ;;  %1592 = vrot.lane.b32.xlu1 %v1457_v14, %s16033_s21  ;;  %v1065_v5 = vshll.u32 %v16915_v18, 16 }
  0xea   : > { %v1823_v31 = vsel %vm1779_vm5, %v1686_v6, %v1549_v10  ;;  %v1278_v34 = vpop.permute.xlu1 %1277  ;;  %v4950_v10 = vsel %vm1368_vm0, %v4947_v17, %v4949_v3  ;;  %v1462_v17 = vrot.slane %v16858_v12, 1 }
  0xeb   : > { %v2138_v33 = vrot.slane %v1823_v31, 1  ;;  %1317 = vrot.lane.b32.xlu0 %v1044_v21, %s16034_s22  ;;  %v1692_v30 = vsel %vm1642_vm4, %v15898_v7, %v1278_v34 }
  0xed   : > { %15201 = vmatmul.mubr.msk.bf16.gmra.mrb[36].mxu0 %vm2243_vm6, %v1819_v51  ;;  %v1276_v20 = vpop.permute.xlu0 %1275  ;;  %v2139_v26 = vsel %vm1368_vm0, %v2136_v49, %v2138_v33  ;;  %5081 = vrot.lane.b32.xlu1 %v4946_v59, %s16033_s21  ;;  %v2141_v38 = vsel %vm1368_vm0, %v2138_v33, %v2140_v23  ;;  %v1460_v51 = vrot.slane %v16839_v8, 1 }
  0xee   : > { %15062 = vmatprep.mubr.msk.bf16.mxu1 %vm2243_vm6, %v2139_v26  ;;  %15204 = vmatprep.mubr.msk.bf16.mxu0 %vm2243_vm6, %v16798_v41  ;;  %v1555_v11 = vpop.permute.xlu1 %1554  ;;  %v1053_v41 = vshrl.u32 %v16839_v8, 16  ;;  %v1690_v48 = vsel %vm1642_vm4, %v15899_v25, %v1276_v20 }
  0xef   : > { %4805 = vrot.lane.b32.xlu0 %v4313_v47, %s16034_s22  ;;  %15063 = vmatmul.mubr.msk.bf16.gmra.mrb[36].mxu1 %vm2243_vm6, %v2141_v38  ;;  %v16878_v58 = vsel %vm1779_vm5, %v1692_v30, %v1555_v11  ;;  %v1461_v4 = vsel %vm1368_vm0, %v1458_v36, %v1460_v51  ;;  %v1061_v36 = vshrl.u32 %v16858_v12, 16  ;;  %v16938_v47 = vld [vmem:[%s16077_s20 + $0x188] sm:$0xff]   ;;  %v1067_v11 = vrot.slane %v1065_v5, 1 }
  0xf0   : > { %v2144_v46 = vrot.slane %v16878_v58, 1  ;;  %v1055_v55 = vor.u32 %v1053_v41, %v1051_v24  ;;  %v1463_v40 = vsel %vm1368_vm0, %v1460_v51, %v1462_v17  ;;  %v1073_v24 = vshll.u32 %v16938_v47, 16  ;;  %v16963_v41 = vld [vmem:[%s16077_s20 + $0x88] sm:$0xff]  }
  0xf1   : > { %v1553_v0 = vpop.permute.xlu0 %1552  ;;  %5083 = vrot.lane.b32.xlu1 %v4948_v54, %s16033_s21  ;;  %v4336_v54 = vrot.slane %v4334_v16, 1  ;;  %v1063_v28 = vor.u32 %v1061_v36, %v1059_v57  ;;  %v1077_v36 = vshrl.u32 %v16938_v47, 16 }
  0xf2   : > { %v1827_v49 = vsel %vm1779_vm5, %v1690_v48, %v1553_v0  ;;  %v1282_v53 = vpop.permute.xlu1 %1281  ;;  %v1060_v21 = vsel %vm680_vm1, %v1055_v55, %v1059_v57  ;;  %v1075_v13 = vrot.slane %v1073_v24, 1  ;;  %v4342_v55 = vshll.u32 %v16963_v41, 16  ;;  %v15904_v57 = vld [vmem:[%s16077_s20 + $0xf0] sm:$0xff]   ;;  %v15907_v24 = vld [vmem:[%s16077_s20 + $0xf8] sm:$0xff]  }
  0xf3   : > { %v2142_v22 = vrot.slane %v1827_v49, 1  ;;  %1594 = vrot.lane.b32.xlu0 %v1459_v37, %s16033_s21  ;;  %v1696_v62 = vsel %vm1642_vm4, %v15900_v61, %v1282_v53 }
  0xf5   : > { %15205 = vmatmul.mubr.msk.bf16.gmra.mrb[40].mxu0 %vm2243_vm6, %v1823_v31  ;;  %v1280_v1 = vpop.permute.xlu0 %1279  ;;  %v2143_v2 = vsel %vm1368_vm0, %v2140_v23, %v2142_v22  ;;  %4807 = vrot.lane.b32.xlu1 %v4321_v29, %s16034_s22  ;;  %v2145_v45 = vsel %vm1368_vm0, %v2142_v22, %v2144_v46  ;;  %v4951_v31 = vrot.slane %v16883_v50, 1  ;;  %v1068_v22 = vsel %vm680_vm1, %v1063_v28, %v1067_v11 }
  0xf6   : > { %15066 = vmatprep.mubr.msk.bf16.mxu1 %vm2243_vm6, %v2143_v2  ;;  %15208 = vmatprep.mubr.msk.bf16.mxu0 %vm2243_vm6, %v16835_v19  ;;  %v1559_v14 = vpop.permute.xlu1 %1558  ;;  %v4328_v19 = vrot.slane %v4326_v60, 1  ;;  %v1694_v52 = vsel %vm1642_vm4, %v15901_v27, %v1280_v1  ;;  %v4953_v2 = vrot.slane %v16910_v56, 1 }
  0xf7   : > { %1319 = vrot.lane.b32.xlu0 %v1052_v39, %s16034_s22  ;;  %15067 = vmatmul.mubr.msk.bf16.gmra.mrb[40].mxu1 %vm2243_vm6, %v2145_v45  ;;  %v16918_v15 = vsel %vm1779_vm5, %v1696_v62, %v1559_v14  ;;  %v4952_v12 = vsel %vm1368_vm0, %v4949_v3, %v4951_v31  ;;  %v4338_v39 = vshrl.u32 %v16910_v56, 16  ;;  %v16990_v3 = vld [vmem:[%s16077_s20 + $0x90] sm:$0xff]  }
  0xf8   : > { %v2148_v6 = vrot.slane %v16918_v15, 1  ;;  %v4329_v44 = vsel %vm680_vm1, %v4324_v42, %v4328_v19  ;;  %v4332_v38 = vor.u32 %v4330_v63, %v4328_v19  ;;  %v16995_v14 = vld [vmem:[%s16077_s20 + $0x190] sm:$0xff]   ;;  %v15905_v19 = vld [vmem:[%s16077_s20 + $0xe8] sm:$0xff]   ;;  %v4346_v63 = vshrl.u32 %v16963_v41, 16 }
  0xf9   : > { %v1557_v23 = vpop.permute.xlu0 %1556  ;;  %1596 = vrot.lane.b32.xlu1 %v1461_v4, %s16033_s21  ;;  %v4340_v42 = vor.u32 %v4338_v39, %v4336_v54  ;;  %v4350_v16 = vshll.u32 %v16990_v3, 16  ;;  %v1081_v5 = vshll.u32 %v16995_v14, 16  ;;  %v15908_v39 = vld [vmem:[%s16077_s20 + $0x110] sm:$0xff]  }
  0xfa   : > { %v1831_v59 = vsel %vm1779_vm5, %v1694_v52, %v1557_v23  ;;  %v1286_v34 = vpop.permute.xlu1 %1285  ;;  %v4337_v8 = vsel %vm680_vm1, %v4332_v38, %v4336_v54  ;;  %v4954_v23 = vsel %vm1368_vm0, %v4951_v31, %v4953_v2  ;;  %v1466_v31 = vrot.slane %v16938_v47, 1 }
  0xfb   : > { %v2146_v33 = vrot.slane %v1831_v59, 1  ;;  %1321 = vrot.lane.b32.xlu0 %v1060_v21, %s16034_s22  ;;  %v1700_v7 = vsel %vm1642_vm4, %v15902_v32, %v1286_v34  ;;  %v1079_v54 = vor.u32 %v1077_v36, %v1075_v13 }
  0xfd   : > { %15209 = vmatmul.mubr.msk.bf16.gmra.mrb[44].mxu0 %vm2243_vm6, %v1827_v49  ;;  %v1284_v30 = vpop.permute.xlu0 %1283  ;;  %v2147_v20 = vsel %vm1368_vm0, %v2144_v46, %v2146_v33  ;;  %5085 = vrot.lane.b32.xlu1 %v4950_v10, %s16033_s21  ;;  %v2149_v26 = vsel %vm1368_vm0, %v2146_v33, %v2148_v6  ;;  %v1464_v49 = vrot.slane %v16915_v18, 1 }
  0xfe   : > { %15070 = vmatprep.mubr.msk.bf16.mxu1 %vm2243_vm6, %v2147_v20  ;;  %15212 = vmatprep.mubr.msk.bf16.mxu0 %vm2243_vm6, %v16878_v58  ;;  %v1563_v9 = vpop.permute.xlu1 %1562  ;;  %v1069_v58 = vshrl.u32 %v16915_v18, 16  ;;  %v1698_v25 = vsel %vm1642_vm4, %v15903_v43, %v1284_v30 }
  0xff   : > { %4809 = vrot.lane.b32.xlu0 %v4329_v44, %s16034_s22  ;;  %15071 = vmatmul.mubr.msk.bf16.gmra.mrb[44].mxu1 %vm2243_vm6, %v2149_v26  ;;  %v16955_v37 = vsel %vm1779_vm5, %v1700_v7, %v1563_v9  ;;  %v1465_v45 = vsel %vm1368_vm0, %v1462_v17, %v1464_v49  ;;  %v17018_v44 = vld [vmem:[%s16077_s20 + $0x198] sm:$0xff]   ;;  %v15906_v17 = vld [vmem:[%s16077_s20 + $0x100] sm:$0xff]   ;;  %v1083_v9 = vrot.slane %v1081_v5, 1 }
 0x100   : > { %v2152_v48 = vrot.slane %v16955_v37, 1  ;;  %v1071_v53 = vor.u32 %v1069_v58, %v1067_v11  ;;  %v1467_v11 = vsel %vm1368_vm0, %v1464_v49, %v1466_v31  ;;  %v17043_v58 = vld [vmem:[%s16077_s20 + $0x98] sm:$0xff]   ;;  %v1093_v36 = vshrl.u32 %v17018_v44, 16 }
 0x101   : > { %v1561_v46 = vpop.permute.xlu0 %1560  ;;  %5087 = vrot.lane.b32.xlu1 %v4952_v12, %s16033_s21  ;;  %v4352_v12 = vrot.slane %v4350_v16, 1 }
 0x102   : > { %v1835_v0 = vsel %vm1779_vm5, %v1698_v25, %v1561_v46  ;;  %v1290_v51 = vpop.permute.xlu1 %1289  ;;  %v1076_v21 = vsel %vm680_vm1, %v1071_v53, %v1075_v13  ;;  %v4354_v53 = vshrl.u32 %v16990_v3, 16  ;;  %v4358_v13 = vshll.u32 %v17043_v58, 16 }
 0x103   : > { %v2150_v29 = vrot.slane %v1835_v0, 1  ;;  %1598 = vrot.lane.b32.xlu0 %v1463_v40, %s16033_s21  ;;  %v1704_v60 = vsel %vm1642_vm4, %v15904_v57, %v1290_v51  ;;  %v1089_v40 = vshll.u32 %v17018_v44, 16 }
 0x105   : > { %15213 = vmatmul.mubr.msk.bf16.gmra.mrb[48].mxu0 %vm2243_vm6, %v1831_v59  ;;  %v1288_v61 = vpop.permute.xlu0 %1287  ;;  %v2151_v62 = vsel %vm1368_vm0, %v2148_v6, %v2150_v29  ;;  %4811 = vrot.lane.b32.xlu1 %v4337_v8, %s16034_s22  ;;  %v2153_v1 = vsel %vm1368_vm0, %v2150_v29, %v2152_v48  ;;  %v4955_v59 = vrot.slane %v16963_v41, 1  ;;  %v1084_v29 = vsel %vm680_vm1, %v1079_v54, %v1083_v9 }
 0x106   : > { %15074 = vmatprep.mubr.msk.bf16.mxu1 %vm2243_vm6, %v2151_v62  ;;  %15216 = vmatprep.mubr.msk.bf16.mxu0 %vm2243_vm6, %v16918_v15  ;;  %v1567_v4 = vpop.permute.xlu1 %1566  ;;  %v4344_v15 = vrot.slane %v4342_v55, 1  ;;  %v1702_v27 = vsel %vm1642_vm4, %v15905_v19, %v1288_v61  ;;  %v4957_v62 = vrot.slane %v16990_v3, 1 }
 0x107   : > { %1323 = vrot.lane.b32.xlu0 %v1068_v22, %s16034_s22  ;;  %15075 = vmatmul.mubr.msk.bf16.gmra.mrb[48].mxu1 %vm2243_vm6, %v2153_v1  ;;  %v16998_v56 = vsel %vm1779_vm5, %v1704_v60, %v1567_v4  ;;  %v4956_v47 = vsel %vm1368_vm0, %v4953_v2, %v4955_v59  ;;  %v1091_v22 = vrot.slane %v1089_v40, 1  ;;  %v17070_v2 = vld [vmem:[%s16077_s20 + $0xa0] sm:$0xff]   ;;  %v15911_v40 = vld [vmem:[%s16077_s20 + $0x118] sm:$0xff]  }
 0x108   : > { %v2156_v52 = vrot.slane %v16998_v56, 1  ;;  %v4345_v50 = vsel %vm680_vm1, %v4340_v42, %v4344_v15  ;;  %v4348_v26 = vor.u32 %v4346_v63, %v4344_v15  ;;  %v17075_v4 = vld [vmem:[%s16077_s20 + $0x1a0] sm:$0xff]   ;;  %v4356_v42 = vor.u32 %v4354_v53, %v4352_v12  ;;  %v15909_v15 = vld [vmem:[%s16077_s20 + $0x108] sm:$0xff]  }
 0x109   : > { %v1565_v6 = vpop.permute.xlu0 %1564  ;;  %1600 = vrot.lane.b32.xlu1 %v1465_v45, %s16033_s21  ;;  %v4362_v63 = vshrl.u32 %v17043_v58, 16  ;;  %v4366_v16 = vshll.u32 %v17070_v2, 16  ;;  %v1097_v5 = vshll.u32 %v17075_v4, 16 }
 0x10a   : > { %v1839_v10 = vsel %vm1779_vm5, %v1702_v27, %v1565_v6  ;;  %v1294_v34 = vpop.permute.xlu1 %1293  ;;  %v4353_v18 = vsel %vm680_vm1, %v4348_v26, %v4352_v12  ;;  %v4958_v6 = vsel %vm1368_vm0, %v4955_v59, %v4957_v62  ;;  %v1470_v59 = vrot.slane %v17018_v44, 1 }
 0x10b   : > { %v2154_v33 = vrot.slane %v1839_v10, 1  ;;  %1325 = vrot.lane.b32.xlu0 %v1076_v21, %s16034_s22  ;;  %v1708_v32 = vsel %vm1642_vm4, %v15906_v17, %v1294_v34  ;;  %v1095_v12 = vor.u32 %v1093_v36, %v1091_v22 }
 0x10d   : > { %15217 = vmatmul.mubr.msk.bf16.gmra.mrb[52].mxu0 %vm2243_vm6, %v1835_v0  ;;  %v1292_v7 = vpop.permute.xlu0 %1291  ;;  %v2155_v30 = vsel %vm1368_vm0, %v2152_v48, %v2154_v33  ;;  %5089 = vrot.lane.b32.xlu1 %v4954_v23, %s16033_s21  ;;  %v2157_v20 = vsel %vm1368_vm0, %v2154_v33, %v2156_v52  ;;  %v1468_v0 = vrot.slane %v16995_v14, 1 }
 0x10e   : > { %15078 = vmatprep.mubr.msk.bf16.mxu1 %vm2243_vm6, %v2155_v30  ;;  %15220 = vmatprep.mubr.msk.bf16.mxu0 %vm2243_vm6, %v16955_v37  ;;  %v1571_v38 = vpop.permute.xlu1 %1570  ;;  %v1085_v37 = vshrl.u32 %v16995_v14, 16  ;;  %v1706_v43 = vsel %vm1642_vm4, %v15907_v24, %v1292_v7 }
 0x10f   : > { %4813 = vrot.lane.b32.xlu0 %v4345_v50, %s16034_s22  ;;  %15079 = vmatmul.mubr.msk.bf16.gmra.mrb[52].mxu1 %vm2243_vm6, %v2157_v20  ;;  %v17035_v28 = vsel %vm1779_vm5, %v1708_v32, %v1571_v38  ;;  %v1469_v1 = vsel %vm1368_vm0, %v1466_v31, %v1468_v0  ;;  %v17098_v50 = vld [vmem:[%s16077_s20 + $0x1a8] sm:$0xff]   ;;  %v15910_v31 = vld [vmem:[%s16077_s20 + $0x120] sm:$0xff]   ;;  %v1099_v38 = vrot.slane %v1097_v5, 1 }
 0x110   : > { %v2160_v25 = vrot.slane %v17035_v28, 1  ;;  %v1087_v51 = vor.u32 %v1085_v37, %v1083_v9  ;;  %v1471_v9 = vsel %vm1368_vm0, %v1468_v0, %v1470_v59  ;;  %v17123_v37 = vld [vmem:[%s16077_s20 + $0xa8] sm:$0xff]  }
 0x111   : > { %v1569_v48 = vpop.permute.xlu0 %1568  ;;  %5091 = vrot.lane.b32.xlu1 %v4956_v47, %s16033_s21  ;;  %v4368_v47 = vrot.slane %v4366_v16, 1 }
 0x112   : > { %v1843_v46 = vsel %vm1779_vm5, %v1706_v43, %v1569_v48  ;;  %v1092_v21 = vsel %vm680_vm1, %v1087_v51, %v1091_v22  ;;  %v4370_v51 = vshrl.u32 %v17070_v2, 16  ;;  %v4374_v22 = vshll.u32 %v17123_v37, 16 }
 0x113   : > { %v2158_v8 = vrot.slane %v1843_v46, 1  ;;  %1602 = vrot.lane.b32.xlu0 %v1467_v11, %s16033_s21  ;;  %v1298_v49 = vpop.permute.xlu1 %1297  ;;  %v1105_v11 = vshll.u32 %v17098_v50, 16 }
 0x114   : > { %v1712_v55 = vsel %vm1642_vm4, %v15908_v39, %v1298_v49 }
 0x115   : > { %15221 = vmatmul.mubr.msk.bf16.gmra.mrb[56].mxu0 %vm2243_vm6, %v1839_v10  ;;  %v1296_v57 = vpop.permute.xlu0 %1295  ;;  %v2159_v60 = vsel %vm1368_vm0, %v2156_v52, %v2158_v8  ;;  %4815 = vrot.lane.b32.xlu1 %v4353_v18, %s16034_s22  ;;  %v2161_v61 = vsel %vm1368_vm0, %v2158_v8, %v2160_v25  ;;  %v4959_v10 = vrot.slane %v17043_v58, 1  ;;  %v1100_v8 = vsel %vm680_vm1, %v1095_v12, %v1099_v38  ;;  %v15912_v58 = vld [vmem:[%s16077_s20 + $0x128] sm:$0xff]  }
 0x116   : > { %15082 = vmatprep.mubr.msk.bf16.mxu1 %vm2243_vm6, %v2159_v60  ;;  %15224 = vmatprep.mubr.msk.bf16.mxu0 %vm2243_vm6, %v16998_v56  ;;  %v4360_v56 = vrot.slane %v4358_v13, 1  ;;  %v1710_v19 = vsel %vm1642_vm4, %v15909_v15, %v1296_v57  ;;  %v4961_v57 = vrot.slane %v17070_v2, 1  ;;  %v17149_v60 = vld [vmem:[%s16077_s20 + $0xb0] sm:$0xff]   ;;  %v4963_v2 = vrot.slane %v17123_v37, 1 }
 0x117   : > { %1327 = vrot.lane.b32.xlu0 %v1084_v29, %s16034_s22  ;;  %15083 = vmatmul.mubr.msk.bf16.gmra.mrb[56].mxu1 %vm2243_vm6, %v2161_v61  ;;  %v1575_v45 = vpop.permute.xlu1 %1574  ;;  %v4960_v44 = vsel %vm1368_vm0, %v4957_v62, %v4959_v10  ;;  %v1107_v29 = vrot.slane %v1105_v11, 1  ;;  %v17154_v62 = vld [vmem:[%s16077_s20 + $0x1b0] sm:$0xff]   ;;  %v4382_v15 = vshll.u32 %v17149_v60, 16 }
 0x118   : > { %v17078_v3 = vsel %vm1779_vm5, %v1712_v55, %v1575_v45  ;;  %v4361_v41 = vsel %vm680_vm1, %v4356_v42, %v4360_v56  ;;  %v4364_v20 = vor.u32 %v4362_v63, %v4360_v56  ;;  %v4372_v45 = vor.u32 %v4370_v51, %v4368_v47  ;;  %v17170_v63 = vld [vmem:[%s16077_s20 + $0x1b8] sm:$0xff]  }
 0x119   : > { %22739 = vst [vmem:[#allocation2_spill] sm:$0xff] %v17078_v3  ;;  %v2164_v27 = vrot.slane %v17078_v3, 1  ;;  %v1573_v52 = vpop.permute.xlu0 %1572  ;;  %1604 = vrot.lane.b32.xlu1 %v1469_v1, %s16033_s21  ;;  %v4962_v42 = vsel %vm1368_vm0, %v4959_v10, %v4961_v57  ;;  %v4378_v56 = vshrl.u32 %v17123_v37, 16  ;;  %v4384_v5 = vrot.slane %v4382_v15, 1 }
 0x11a   : > { %v1847_v23 = vsel %vm1779_vm5, %v1710_v19, %v1573_v52  ;;  %v4369_v14 = vsel %vm680_vm1, %v4364_v20, %v4368_v47  ;;  %v1109_v19 = vshrl.u32 %v17098_v50, 16  ;;  %v1113_v52 = vshll.u32 %v17154_v62, 16  ;;  %v17190_v47 = vld [vmem:[%s16077_s20 + $0xb8] sm:$0xff]  }
 0x11b   : > { %v2162_v33 = vrot.slane %v1847_v23, 1  ;;  %1329 = vrot.lane.b32.xlu0 %v1092_v21, %s16034_s22  ;;  %v1302_v34 = vpop.permute.xlu1 %1301  ;;  %v1121_v20 = vshll.u32 %v17170_v63, 16 }
 0x11c   : > { %v1716_v17 = vsel %vm1642_vm4, %v15910_v31, %v1302_v34 }
 0x11d   : > { %15225 = vmatmul.mubr.msk.bf16.gmra.mrb[60].mxu0 %vm2243_vm6, %v1843_v46  ;;  %v1300_v32 = vpop.permute.xlu0 %1299  ;;  %v2163_v7 = vsel %vm1368_vm0, %v2160_v25, %v2162_v33  ;;  %5093 = vrot.lane.b32.xlu1 %v4958_v6, %s16033_s21  ;;  %v2165_v30 = vsel %vm1368_vm0, %v2162_v33, %v2164_v27  ;;  %v1472_v46 = vrot.slane %v17075_v4, 1  ;;  %v4964_v33 = vsel %vm1368_vm0, %v4961_v57, %v4963_v2 }
 0x11e   : > { %15086 = vmatprep.mubr.msk.bf16.mxu1 %vm2243_vm6, %v2163_v7  ;;  %15228 = vmatprep.mubr.msk.bf16.mxu0 %vm2243_vm6, %v17035_v28  ;;  %v1101_v28 = vshrl.u32 %v17075_v4, 16  ;;  %v1714_v24 = vsel %vm1642_vm4, %v15911_v40, %v1300_v32  ;;  %v4376_v4 = vrot.slane %v4374_v22, 1  ;;  %v1115_v32 = vrot.slane %v1113_v52, 1 }
 0x11f   : > { %4817 = vrot.lane.b32.xlu0 %v4361_v41, %s16034_s22  ;;  %15087 = vmatmul.mubr.msk.bf16.gmra.mrb[60].mxu1 %vm2243_vm6, %v2165_v30  ;;  %v1579_v26 = vpop.permute.xlu1 %1578  ;;  %v1473_v55 = vsel %vm1368_vm0, %v1470_v59, %v1472_v46  ;;  %v1111_v41 = vor.u32 %v1109_v19, %v1107_v29  ;;  %v15913_v59 = vld [vmem:[%s16077_s20 + $0x28] sm:$0xff]   ;;  %v1117_v7 = vshrl.u32 %v17154_v62, 16  ;;  %v1476_v40 = vrot.slane %v17154_v62, 1 }
 0x120   : > { %v17115_v54 = vsel %vm1779_vm5, %v1716_v17, %v1579_v26  ;;  %v1103_v49 = vor.u32 %v1101_v28, %v1099_v38  ;;  %v4377_v6 = vsel %vm680_vm1, %v4372_v45, %v4376_v4  ;;  %v4380_v36 = vor.u32 %v4378_v56, %v4376_v4  ;;  %v17233_v4 = vld [vmem:[%s16077_s20 + $0x1c0] sm:$0xff]  }
 0x121   : > { %22740 = vst [vmem:[#allocation3_spill] sm:$0xff] %v17115_v54  ;;  %v2168_v43 = vrot.slane %v17115_v54, 1  ;;  %v1577_v25 = vpop.permute.xlu0 %1576  ;;  %5095 = vrot.lane.b32.xlu1 %v4960_v44, %s16033_s21  ;;  %v4967_v52 = vrot.slane %v17190_v47, 1  ;;  %v1129_v37 = vshll.u32 %v17233_v4, 16  ;;  %v18830_v54 = vld [vmem:[%s16077_s20 + $0x1c8] sm:$0xff]  }
 0x122   : > { %v17130_v48 = vsel %vm1779_vm5, %v1714_v24, %v1577_v25  ;;  %v1108_v1 = vsel %vm680_vm1, %v1103_v49, %v1107_v29  ;;  %v4385_v11 = vsel %vm680_vm1, %v4380_v36, %v4384_v5  ;;  %v15914_v24 = vld [vmem:[%s16077_s20 + $0x30] sm:$0xff]   ;;  %v4390_v49 = vshll.u32 %v17190_v47, 16 }
 0x123   : > { %22741 = vst [vmem:[#allocation4_spill] sm:$0xff] %v17130_v48  ;;  %v2166_v18 = vrot.slane %v17130_v48, 1  ;;  %1606 = vrot.lane.b32.xlu0 %v1471_v9, %s16033_s21  ;;  %v4790_v0 = vpop.permute.xlu1 %4789  ;;  %v15915_v29 = vld [vmem:[%s16077_s20 + $0x130] sm:$0xff]   ;;  %v4666_v48 = vshrl.u32 %v18830_v54, 16 }
 0x124   : > { %v5206_v26 = vsel %vm1642_vm4, %v16458_v35, %v4790_v0  ;;  %v1123_v0 = vrot.slane %v1121_v20, 1  ;;  %v4392_v56 = vrot.slane %v4390_v49, 1 }
 0x125   : > { %15229 = vmatmul.mubr.msk.bf16.gmra.mrb[64].mxu0 %vm2243_vm6, %v1847_v23  ;;  %v1304_v53 = vpop.permute.xlu0 %1303  ;;  %v2167_v13 = vsel %vm1368_vm0, %v2164_v27, %v2166_v18  ;;  %4819 = vrot.lane.b32.xlu1 %v4369_v14, %s16034_s22  ;;  %v2169_v39 = vsel %vm1368_vm0, %v2166_v18, %v2168_v43  ;;  %v1474_v23 = vrot.slane %v17098_v50, 1 }
 0x126   : > { %15090 = vmatprep.mubr.msk.bf16.mxu1 %vm2243_vm6, %v2167_v13  ;;  %v1718_v10 = vsel %vm1642_vm4, %v15912_v58, %v1304_v53  ;;  %v1125_v58 = vshrl.u32 %v17170_v63, 16 }
 0x127   : > { %1331 = vrot.lane.b32.xlu0 %v1100_v8, %s16034_s22  ;;  %15091 = vmatmul.mubr.msk.bf16.gmra.mrb[64].mxu1 %vm2243_vm6, %v2169_v39  ;;  %v1306_v61 = vpop.permute.xlu1 %1305  ;;  %v1475_v44 = vsel %vm1368_vm0, %v1472_v46, %v1474_v23  ;;  %v1119_v46 = vor.u32 %v1117_v7, %v1115_v32  ;;  %v4386_v8 = vshrl.u32 %v17149_v60, 16  ;;  %v4965_v39 = vrot.slane %v17149_v60, 1 }
 0x128   : > { %v1720_v51 = vsel %vm1642_vm4, %v15915_v29, %v1306_v61  ;;  %v1477_v57 = vsel %vm1368_vm0, %v1474_v23, %v1476_v40  ;;  %v1127_v7 = vor.u32 %v1125_v58, %v1123_v0 }
 0x129   : > { %v4792_v21 = vpop.permute.xlu0 %4791  ;;  %1608 = vrot.lane.b32.xlu1 %v1473_v55, %s16033_s21 }
 0x12a   : > { %v5208_v50 = vsel %vm1642_vm4, %v15913_v59, %v4792_v21  ;;  %v1124_v21 = vsel %vm680_vm1, %v1119_v46, %v1123_v0 }
 0x12b   : > { %1333 = vrot.lane.b32.xlu0 %v1108_v1, %s16034_s22  ;;  %v4794_v27 = vpop.permute.xlu1 %4793  ;;  %v17225_v1 = vld [vmem:[%s16077_s20 + $0xc0] sm:$0xff]  }
 0x12c   : > { %v5210_v35 = vsel %vm1642_vm4, %v15914_v24, %v4794_v27  ;;  %v4966_v27 = vsel %vm1368_vm0, %v4963_v2, %v4965_v39  ;;  %v4398_v23 = vshll.u32 %v17225_v1, 16 }
 0x12d   : > { %v1581_v16 = vpop.permute.xlu0 %1580  ;;  %5097 = vrot.lane.b32.xlu1 %v4962_v42, %s16033_s21  ;;  %v4388_v42 = vor.u32 %v4386_v8, %v4384_v5  ;;  %v1478_v5 = vrot.slane %v17170_v63, 1 }
 0x12e   : > { %v17179_v34 = vsel %vm1779_vm5, %v1718_v10, %v1581_v16  ;;  %v15916_v10 = vld [vmem:[%s16077_s20 + $0x138] sm:$0xff]  }
 0x12f   : > { %22742 = vst [vmem:[#allocation5_spill] sm:$0xff] %v17179_v34  ;;  %v2170_v31 = vrot.slane %v17179_v34, 1  ;;  %4821 = vrot.lane.b32.xlu0 %v4377_v6, %s16034_s22  ;;  %v5070_v17 = vpop.permute.xlu1 %5069  ;;  %v4394_v6 = vshrl.u32 %v17190_v47, 16  ;;  %v4393_v36 = vsel %vm680_vm1, %v4388_v42, %v4392_v56 }
 0x130   : > { %v5347_v30 = vsel %vm1779_vm5, %v5208_v50, %v5070_v17 }
 0x131   : > { %v5556_v12 = vrot.slane %v5347_v30, 2  ;;  %v5068_v38 = vpop.permute.xlu0 %5067  ;;  %v2171_v9 = vsel %vm1368_vm0, %v2168_v43, %v2170_v31  ;;  %5099 = vrot.lane.b32.xlu1 %v4964_v33, %s16033_s21  ;;  %v1116_v43 = vsel %vm680_vm1, %v1111_v41, %v1115_v32  ;;  %v17257_v41 = vld [vmem:[%s16077_s20 + $0x1c8] sm:$0xff]   ;;  %v4396_v17 = vor.u32 %v4394_v6, %v4392_v56  ;;  %v15917_v30 = vld [vmem:[%s16077_s20 + $0x38] sm:$0xff]  }
 0x132   : > { %v5345_v28 = vsel %vm1779_vm5, %v5206_v26, %v5068_v38  ;;  %15094 = vmatprep.mubr.msk.bf16.mxu1 %vm2243_vm6, %v2171_v9  ;;  %v4400_v32 = vrot.slane %v4398_v23, 1  ;;  %v1131_v26 = vrot.slane %v1129_v37, 1  ;;  %v1479_v9 = vsel %vm1368_vm0, %v1476_v40, %v1478_v5 }
 0x133   : > { %v5555_v25 = vrot.slane %v5345_v28, 2  ;;  %1610 = vrot.lane.b32.xlu0 %v1475_v44, %s16033_s21  ;;  %v5072_v14 = vpop.permute.xlu1 %5071  ;;  %v1137_v28 = vshll.u32 %v17257_v41, 16  ;;  %v1141_v37 = vshrl.u32 %v17257_v41, 16 }
 0x134   : > { %v17207_v18 = vsel %vm1779_vm5, %v5210_v35, %v5072_v14  ;;  %v1480_v14 = vrot.slane %v17233_v4, 1  ;;  %v1132_v0 = vsel %vm680_vm1, %v1127_v7, %v1131_v26 }
 0x135   : > { %v5558_v22 = vrot.slane %v17207_v18, 2  ;;  %v1583_v53 = vpop.permute.xlu0 %1582  ;;  %v5557_v13 = vsel %vm5554_vm7, %v5555_v25, %v5556_v12  ;;  %4823 = vrot.lane.b32.xlu1 %v4385_v11, %s16034_s22  ;;  %v17276_v11 = vld [vmem:[%s16077_s20 + $0xc8] sm:$0xff]   ;;  %v4401_v25 = vsel %vm680_vm1, %v4396_v17, %v4400_v32  ;;  %v1139_v29 = vrot.slane %v1137_v28, 1  ;;  %v17338_v17 = vld [vmem:[%s16077_s20 + $0x1d8] sm:$0xff]  }
 0x136   : > { %v17218_v55 = vsel %vm1779_vm5, %v1720_v51, %v1583_v53  ;;  %15302 = vmatprep.mubr.msk.bf16.mxu0 %vm2243_vm6, %v5557_v13  ;;  %v4402_v51 = vshrl.u32 %v17225_v1, 16  ;;  %v4406_v53 = vshll.u32 %v17276_v11, 16  ;;  %v15919_v13 = vld [vmem:[%s16077_s20 + $0x140] sm:$0xff]  }
 0x137   : > { %22743 = vst [vmem:[#allocation6_spill] sm:$0xff] %v17218_v55  ;;  %v5559_v61 = vsel %vm5554_vm7, %v5556_v12, %v5558_v22  ;;  %v2172_v45 = vrot.slane %v17218_v55, 1  ;;  %1335 = vrot.lane.b32.xlu0 %v1116_v43, %s16034_s22  ;;  %v4796_v60 = vpop.permute.xlu1 %4795  ;;  %v1133_v12 = vshrl.u32 %v17233_v4, 16  ;;  %v15918_v43 = vld [vmem:[%s16077_s20 + $0x40] sm:$0xff]  }
 0x138   : > { %15303 = vmatmul.mubr.msk.bf16.vlgmr.msra.gmra.mrb[0].mxu0 %vm2243_vm6, %v5559_v61  ;;  %v5212_v44 = vsel %vm1642_vm4, %v15917_v30, %v4796_v60  ;;  %v17306_v60 = vld [vmem:[%s16077_s20 + $0xd0] sm:$0xff]  }
 0x139   : > { %v1308_v15 = vpop.permute.xlu0 %1307  ;;  %v2173_v19 = vsel %vm1368_vm0, %v2170_v31, %v2172_v45  ;;  %1612 = vrot.lane.b32.xlu1 %v1477_v57, %s16033_s21  ;;  %v4968_v31 = vsel %vm1368_vm0, %v4965_v39, %v4967_v52  ;;  %v1135_v8 = vor.u32 %v1133_v12, %v1131_v26  ;;  %v4969_v57 = vrot.slane %v17225_v1, 1  ;;  %v17314_v1 = vld [vmem:[%s16077_s20 + $0x1d0] sm:$0xff]   ;;  %v15921_v26 = vld [vmem:[%s16077_s20 + $0x48] sm:$0xff]  }
 0x13a   : > { %15095 = vmatmul.mubr.msk.bf16.gmra.mrb[68].mxu1 %vm2243_vm6, %v2173_v19  ;;  %v1722_v16 = vsel %vm1642_vm4, %v15916_v10, %v1308_v15  ;;  %v4404_v19 = vor.u32 %v4402_v51, %v4400_v32  ;;  %v4971_v10 = vrot.slane %v17276_v11, 1  ;;  %v1145_v47 = vshll.u32 %v17314_v1, 16 }
 0x13b   : > { %1337 = vrot.lane.b32.xlu0 %v1124_v21, %s16034_s22  ;;  %v1585_v33 = vpop.permute.xlu1 %1584  ;;  %v1140_v15 = vsel %vm680_vm1, %v1135_v8, %v1139_v29  ;;  %v4970_v58 = vsel %vm1368_vm0, %v4967_v52, %v4969_v57  ;;  %v1149_v28 = vshrl.u32 %v17314_v1, 16  ;;  %v15922_v8 = vld [vmem:[%s16077_s20 + $0x50] sm:$0xff]  }
 0x13c   : > { %v17252_v2 = vsel %vm1779_vm5, %v1722_v16, %v1585_v33  ;;  %v4410_v16 = vshrl.u32 %v17276_v11, 16  ;;  %v4414_v33 = vshll.u32 %v17306_v60, 16  ;;  %v4972_v30 = vsel %vm1368_vm0, %v4969_v57, %v4971_v10 }
 0x13d   : > { %22744 = vst [vmem:[#allocation7_spill] sm:$0xff] %v17252_v2  ;;  %v2174_v59 = vrot.slane %v17252_v2, 1  ;;  %v1310_v50 = vpop.permute.xlu0 %1309  ;;  %5101 = vrot.lane.b32.xlu1 %v4966_v27, %s16033_s21  ;;  %v4408_v27 = vrot.slane %v4406_v53, 1  ;;  %v18772_v2 = vld [vmem:[%s16077_s20 + $0x1c0] sm:$0xff]  }
 0x13e   : > { %v1724_v18 = vsel %vm1642_vm4, %v15919_v13, %v1310_v50 }
 0x13f   : > { %4825 = vrot.lane.b32.xlu0 %v4393_v36, %s16034_s22  ;;  %v5074_v63 = vpop.permute.xlu1 %5073  ;;  %v2175_v20 = vsel %vm1368_vm0, %v2172_v45, %v2174_v59  ;;  %v1481_v45 = vsel %vm1368_vm0, %v1478_v5, %v1480_v14  ;;  %v15920_v36 = vld [vmem:[%s16077_s20 + $0x148] sm:$0xff]   ;;  %v4409_v50 = vsel %vm680_vm1, %v4404_v19, %v4408_v27  ;;  %v17387_v19 = vld [vmem:[%s16077_s20 + $0xe0] sm:$0xff]  }
 0x140   : > { %v5351_v38 = vsel %vm1779_vm5, %v5212_v44, %v5074_v63  ;;  %15098 = vmatprep.mubr.msk.bf16.mxu1 %vm2243_vm6, %v2175_v20  ;;  %v4412_v44 = vor.u32 %v4410_v16, %v4408_v27  ;;  %v4416_v63 = vrot.slane %v4414_v33, 1  ;;  %v1143_v20 = vor.u32 %v1141_v37, %v1139_v29 }
 0x141   : > { %v5560_v24 = vrot.slane %v5351_v38, 2  ;;  %v4798_v35 = vpop.permute.xlu0 %4797  ;;  %5103 = vrot.lane.b32.xlu1 %v4968_v31, %s16033_s21  ;;  %v1482_v31 = vrot.slane %v17257_v41, 1 }
 0x142   : > { %v5214_v46 = vsel %vm1642_vm4, %v15918_v43, %v4798_v35  ;;  %v17357_v43 = vld [vmem:[%s16077_s20 + $0xd8] sm:$0xff]  }
 0x143   : > { %1614 = vrot.lane.b32.xlu0 %v1479_v9, %s16033_s21  ;;  %v5076_v62 = vpop.permute.xlu1 %5075  ;;  %v5561_v40 = vsel %vm5554_vm7, %v5558_v22, %v5560_v24  ;;  %v1147_v9 = vrot.slane %v1145_v47, 1  ;;  %v1483_v35 = vsel %vm1368_vm0, %v1480_v14, %v1482_v31  ;;  %v4422_v57 = vshll.u32 %v17357_v43, 16 }
 0x144   : > { %v17289_v49 = vsel %vm1779_vm5, %v5214_v46, %v5076_v62  ;;  %15306 = vmatprep.mubr.msk.bf16.mxu0 %vm2243_vm6, %v5561_v40  ;;  %v4417_v40 = vsel %vm680_vm1, %v4412_v44, %v4416_v63  ;;  %v4426_v47 = vshrl.u32 %v17357_v43, 16 }
 0x145   : > { %v5562_v22 = vrot.slane %v17289_v49, 2  ;;  %v1587_v39 = vpop.permute.xlu0 %1586  ;;  %4827 = vrot.lane.b32.xlu1 %v4401_v25, %s16034_s22  ;;  %v1153_v25 = vshll.u32 %v17338_v17, 16  ;;  %v1148_v51 = vsel %vm680_vm1, %v1143_v20, %v1147_v9  ;;  %v1151_v53 = vor.u32 %v1149_v28, %v1147_v9  ;;  %v17419_v20 = vld [vmem:[%s16077_s20 + $0x1e8] sm:$0xff]  }
 0x146   : > { %v17300_v61 = vsel %vm1779_vm5, %v1724_v18, %v1587_v39  ;;  %v4418_v39 = vshrl.u32 %v17306_v60, 16  ;;  %v4424_v33 = vrot.slane %v4422_v57, 1 }
 0x147   : > { %22745 = vst [vmem:[#allocation8_spill] sm:$0xff] %v17300_v61  ;;  %v2176_v21 = vrot.slane %v17300_v61, 1  ;;  %1339 = vrot.lane.b32.xlu0 %v1132_v0, %s16034_s22  ;;  %v4800_v42 = vpop.permute.xlu1 %4799  ;;  %v5563_v56 = vsel %vm5554_vm7, %v5560_v24, %v5562_v22  ;;  %v1484_v0 = vrot.slane %v17314_v1, 1  ;;  %v1155_v18 = vrot.slane %v1153_v25, 1  ;;  %v18685_v61 = vld [vmem:[%s16077_s20 + $0x198] sm:$0xff]  }
 0x148   : > { %15307 = vmatmul.mubr.msk.bf16.gmra.mrb[4].mxu0 %vm2243_vm6, %v5563_v56  ;;  %v5216_v12 = vsel %vm1642_vm4, %v15921_v26, %v4800_v42  ;;  %v4973_v42 = vrot.slane %v17306_v60, 1  ;;  %v17395_v60 = vld [vmem:[%s16077_s20 + $0x1e0] sm:$0xff]   ;;  %v4420_v16 = vor.u32 %v4418_v39, %v4416_v63  ;;  %v1486_v63 = vrot.slane %v17338_v17, 1 }
 0x149   : > { %v1312_v6 = vpop.permute.xlu0 %1311  ;;  %v2177_v23 = vsel %vm1368_vm0, %v2174_v59, %v2176_v21  ;;  %1616 = vrot.lane.b32.xlu1 %v1481_v45, %s16033_s21  ;;  %v15923_v45 = vld [vmem:[%s16077_s20 + $0x150] sm:$0xff]   ;;  %v1161_v11 = vshll.u32 %v17395_v60, 16  ;;  %v15926_v39 = vld [vmem:[%s16077_s20 + $0x60] sm:$0xff]  }
 0x14a   : > { %15099 = vmatmul.mubr.msk.bf16.gmra.mrb[72].mxu1 %vm2243_vm6, %v2177_v23  ;;  %v1726_v5 = vsel %vm1642_vm4, %v15920_v36, %v1312_v6  ;;  %v4425_v44 = vsel %vm680_vm1, %v4420_v16, %v4424_v33 }
 0x14b   : > { %1341 = vrot.lane.b32.xlu0 %v1140_v15, %s16034_s22  ;;  %v1589_v59 = vpop.permute.xlu1 %1588  ;;  %v1485_v15 = vsel %vm1368_vm0, %v1482_v31, %v1484_v0  ;;  %v1157_v31 = vshrl.u32 %v17338_v17, 16 }
 0x14c   : > { %v17333_v52 = vsel %vm1779_vm5, %v1726_v5, %v1589_v59  ;;  %v4974_v5 = vsel %vm1368_vm0, %v4971_v10, %v4973_v42  ;;  %v4975_v59 = vrot.slane %v17357_v43, 1 }
 0x14d   : > { %22746 = vst [vmem:[#allocation9_spill] sm:$0xff] %v17333_v52  ;;  %v2178_v32 = vrot.slane %v17333_v52, 1  ;;  %v1314_v7 = vpop.permute.xlu0 %1313  ;;  %5105 = vrot.lane.b32.xlu1 %v4970_v58, %s16033_s21  ;;  %v1156_v58 = vsel %vm680_vm1, %v1151_v53, %v1155_v18  ;;  %v1159_v28 = vor.u32 %v1157_v31, %v1155_v18  ;;  %v1488_v18 = vrot.slane %v17395_v60, 1 }
 0x14e   : > { %v1728_v49 = vsel %vm1642_vm4, %v15923_v45, %v1314_v7  ;;  %v15924_v7 = vld [vmem:[%s16077_s20 + $0x158] sm:$0xff]  }
 0x14f   : > { %4829 = vrot.lane.b32.xlu0 %v4409_v50, %s16034_s22  ;;  %v5078_v41 = vpop.permute.xlu1 %5077  ;;  %v2179_v38 = vsel %vm1368_vm0, %v2176_v21, %v2178_v32  ;;  %v4430_v50 = vshll.u32 %v17387_v19, 16 }
 0x150   : > { %v5355_v24 = vsel %vm1779_vm5, %v5216_v12, %v5078_v41  ;;  %15102 = vmatprep.mubr.msk.bf16.mxu1 %vm2243_vm6, %v2179_v38  ;;  %v4976_v41 = vsel %vm1368_vm0, %v4973_v42, %v4975_v59  ;;  %v4428_v38 = vor.u32 %v4426_v47, %v4424_v33  ;;  %v1489_v33 = vsel %vm1368_vm0, %v1486_v63, %v1488_v18 }
 0x151   : > { %v5564_v46 = vrot.slane %v5355_v24, 2  ;;  %v4802_v62 = vpop.permute.xlu0 %4801  ;;  %5107 = vrot.lane.b32.xlu1 %v4972_v30, %s16033_s21  ;;  %v4432_v9 = vrot.slane %v4430_v50, 1  ;;  %v15925_v24 = vld [vmem:[%s16077_s20 + $0x58] sm:$0xff]  }
 0x152   : > { %v5218_v29 = vsel %vm1642_vm4, %v15922_v8, %v4802_v62  ;;  %v1165_v62 = vshrl.u32 %v17395_v60, 16  ;;  %v1487_v8 = vsel %vm1368_vm0, %v1484_v0, %v1486_v63 }
 0x153   : > { %1618 = vrot.lane.b32.xlu0 %v1483_v35, %s16033_s21  ;;  %v5080_v4 = vpop.permute.xlu1 %5079  ;;  %v5565_v14 = vsel %vm5554_vm7, %v5562_v22, %v5564_v46  ;;  %v4433_v53 = vsel %vm680_vm1, %v4428_v38, %v4432_v9  ;;  %v15928_v38 = vld [vmem:[%s16077_s20 + $0x168] sm:$0xff]  }
 0x154   : > { %v17370_v13 = vsel %vm1779_vm5, %v5218_v29, %v5080_v4  ;;  %15310 = vmatprep.mubr.msk.bf16.mxu0 %vm2243_vm6, %v5565_v14  ;;  %v1169_v29 = vshll.u32 %v17419_v20, 16  ;;  %v17438_v4 = vld [vmem:[%s16077_s20 + $0xe8] sm:$0xff]  }
 0x155   : > { %v5566_v22 = vrot.slane %v17370_v13, 2  ;;  %v1591_v21 = vpop.permute.xlu0 %1590  ;;  %4831 = vrot.lane.b32.xlu1 %v4417_v40, %s16034_s22  ;;  %v4442_v63 = vshrl.u32 %v17438_v4, 16 }
 0x156   : > { %v17381_v56 = vsel %vm1779_vm5, %v1728_v49, %v1591_v21  ;;  %v1171_v42 = vrot.slane %v1169_v29, 1  ;;  %v15929_v29 = vld [vmem:[%s16077_s20 + $0x68] sm:$0xff]  }
 0x157   : > { %22747 = vst [vmem:[#allocation10_spill] sm:$0xff] %v17381_v56  ;;  %v2180_v27 = vrot.slane %v17381_v56, 1  ;;  %1343 = vrot.lane.b32.xlu0 %v1148_v51, %s16034_s22  ;;  %v4804_v6 = vpop.permute.xlu1 %4803  ;;  %v5567_v23 = vsel %vm5554_vm7, %v5564_v46, %v5566_v22  ;;  %v1163_v46 = vrot.slane %v1161_v11, 1 }
 0x158   : > { %15311 = vmatmul.mubr.msk.bf16.gmra.mrb[8].mxu0 %vm2243_vm6, %v5567_v23  ;;  %v5220_v35 = vsel %vm1642_vm4, %v15925_v24, %v4804_v6  ;;  %v15927_v6 = vld [vmem:[%s16077_s20 + $0x160] sm:$0xff]   ;;  %v1490_v24 = vrot.slane %v17419_v20, 1 }
 0x159   : > { %v1316_v37 = vpop.permute.xlu0 %1315  ;;  %v2181_v36 = vsel %vm1368_vm0, %v2178_v32, %v2180_v27  ;;  %1620 = vrot.lane.b32.xlu1 %v1485_v15, %s16033_s21  ;;  %v1164_v45 = vsel %vm680_vm1, %v1159_v28, %v1163_v46  ;;  %v1167_v49 = vor.u32 %v1165_v62, %v1163_v46  ;;  %v4434_v15 = vshrl.u32 %v17387_v19, 16 }
 0x15a   : > { %15103 = vmatmul.mubr.msk.bf16.gmra.mrb[76].mxu1 %vm2243_vm6, %v2181_v36  ;;  %v1730_v32 = vsel %vm1642_vm4, %v15924_v7, %v1316_v37  ;;  %v17468_v37 = vld [vmem:[%s16077_s20 + $0xf0] sm:$0xff]  }
 0x15b   : > { %1345 = vrot.lane.b32.xlu0 %v1156_v58, %s16034_s22  ;;  %v1593_v30 = vpop.permute.xlu1 %1592  ;;  %v4977_v58 = vrot.slane %v17387_v19, 1  ;;  %v17476_v19 = vld [vmem:[%s16077_s20 + $0x1f0] sm:$0xff]   ;;  %v1172_v50 = vsel %vm680_vm1, %v1167_v49, %v1171_v42  ;;  %v4436_v31 = vor.u32 %v4434_v15, %v4432_v9 }
 0x15c   : > { %v17414_v10 = vsel %vm1779_vm5, %v1730_v32, %v1593_v30  ;;  %v1177_v43 = vshll.u32 %v17476_v19, 16 }
 0x15d   : > { %22748 = vst [vmem:[#allocation11_spill] sm:$0xff] %v17414_v10  ;;  %v2182_v26 = vrot.slane %v17414_v10, 1  ;;  %v1318_v12 = vpop.permute.xlu0 %1317  ;;  %5109 = vrot.lane.b32.xlu1 %v4974_v5, %s16033_s21  ;;  %v4978_v11 = vsel %vm1368_vm0, %v4975_v59, %v4977_v58 }
 0x15e   : > { %v1732_v13 = vsel %vm1642_vm4, %v15927_v6, %v1318_v12  ;;  %v4446_v12 = vshll.u32 %v17468_v37, 16  ;;  %v15930_v6 = vld [vmem:[%s16077_s20 + $0x70] sm:$0xff]  }
 0x15f   : > { %4833 = vrot.lane.b32.xlu0 %v4425_v44, %s16034_s22  ;;  %v5082_v17 = vpop.permute.xlu1 %5081  ;;  %v2183_v25 = vsel %vm1368_vm0, %v2180_v27, %v2182_v26  ;;  %v4438_v27 = vshll.u32 %v17438_v4, 16  ;;  %v4979_v44 = vrot.slane %v17438_v4, 1 }
 0x160   : > { %v5359_v40 = vsel %vm1779_vm5, %v5220_v35, %v5082_v17  ;;  %15106 = vmatprep.mubr.msk.bf16.mxu1 %vm2243_vm6, %v2183_v25  ;;  %v17500_v35 = vld [vmem:[%s16077_s20 + $0x1f8] sm:$0xff]  }
 0x161   : > { %v5568_v14 = vrot.slane %v5359_v40, 2  ;;  %v4806_v51 = vpop.permute.xlu0 %4805  ;;  %5111 = vrot.lane.b32.xlu1 %v4976_v41, %s16033_s21  ;;  %v4440_v7 = vrot.slane %v4438_v27, 1  ;;  %v1173_v41 = vshrl.u32 %v17419_v20, 16  ;;  %v4980_v46 = vsel %vm1368_vm0, %v4977_v58, %v4979_v44 }
 0x162   : > { %v5222_v57 = vsel %vm1642_vm4, %v15926_v39, %v4806_v51  ;;  %v4448_v40 = vrot.slane %v4446_v12, 1  ;;  %v1181_v39 = vshrl.u32 %v17476_v19, 16  ;;  %v1492_v27 = vrot.slane %v17476_v19, 1 }
 0x163   : > { %1622 = vrot.lane.b32.xlu0 %v1487_v8, %s16033_s21  ;;  %v5084_v1 = vpop.permute.xlu1 %5083  ;;  %v5569_v0 = vsel %vm5554_vm7, %v5566_v22, %v5568_v14  ;;  %v4441_v28 = vsel %vm680_vm1, %v4436_v31, %v4440_v7  ;;  %v4444_v62 = vor.u32 %v4442_v63, %v4440_v7  ;;  %v1175_v8 = vor.u32 %v1173_v41, %v1171_v42 }
 0x164   : > { %v17451_v21 = vsel %vm1779_vm5, %v5222_v57, %v5084_v1  ;;  %15314 = vmatprep.mubr.msk.bf16.mxu0 %vm2243_vm6, %v5569_v0  ;;  %v1491_v1 = vsel %vm1368_vm0, %v1488_v18, %v1490_v24  ;;  %v1185_v0 = vshll.u32 %v17500_v35, 16  ;;  %v1493_v41 = vsel %vm1368_vm0, %v1490_v24, %v1492_v27 }
 0x165   : > { %v5570_v22 = vrot.slane %v17451_v21, 2  ;;  %v1595_v23 = vpop.permute.xlu0 %1594  ;;  %4835 = vrot.lane.b32.xlu1 %v4433_v53, %s16034_s22  ;;  %v1179_v53 = vrot.slane %v1177_v43, 1  ;;  %v4449_v15 = vsel %vm680_vm1, %v4444_v62, %v4448_v40  ;;  %v15931_v21 = vld [vmem:[%s16077_s20 + $0x170] sm:$0xff]   ;;  %v17565_v43 = vld [vmem:[%s16077_s20 + $0x200] sm:$0xff]  }
 0x166   : > { %v17462_v16 = vsel %vm1779_vm5, %v1732_v13, %v1595_v23  ;;  %v1193_v4 = vshll.u32 %v17565_v43, 16 }
 0x167   : > { %22749 = vst [vmem:[#allocation12_spill] sm:$0xff] %v17462_v16  ;;  %v2184_v36 = vrot.slane %v17462_v16, 1  ;;  %1347 = vrot.lane.b32.xlu0 %v1164_v45, %s16034_s22  ;;  %v4808_v5 = vpop.permute.xlu1 %4807  ;;  %v5571_v47 = vsel %vm5554_vm7, %v5568_v14, %v5570_v22  ;;  %v17519_v45 = vld [vmem:[%s16077_s20 + $0xf8] sm:$0xff]   ;;  %v1180_v58 = vsel %vm680_vm1, %v1175_v8, %v1179_v53  ;;  %v18592_v16 = vld [vmem:[%s16077_s20 + $0x168] sm:$0xff]  }
 0x168   : > { %15315 = vmatmul.mubr.msk.bf16.gmra.mrb[12].mxu0 %vm2243_vm6, %v5571_v47  ;;  %v5224_v14 = vsel %vm1642_vm4, %v15929_v29, %v4808_v5  ;;  %v1187_v47 = vrot.slane %v1185_v0, 1  ;;  %v4454_v31 = vshll.u32 %v17519_v45, 16  ;;  %v4983_v29 = vrot.slane %v17519_v45, 1 }
 0x169   : > { %v1320_v32 = vpop.permute.xlu0 %1319  ;;  %v2185_v30 = vsel %vm1368_vm0, %v2182_v26, %v2184_v36  ;;  %1624 = vrot.lane.b32.xlu1 %v1489_v33, %s16033_s21  ;;  %v1183_v33 = vor.u32 %v1181_v39, %v1179_v53  ;;  %v5011_v52 = vrot.slane %v18592_v16, 1 }
 0x16a   : > { %15107 = vmatmul.mubr.msk.bf16.gmra.mrb[80].mxu1 %vm2243_vm6, %v2185_v30  ;;  %v1734_v26 = vsel %vm1642_vm4, %v15928_v38, %v1320_v32  ;;  %v17557_v38 = vld [vmem:[%s16077_s20 + $0x100] sm:$0xff]   ;;  %v4456_v24 = vrot.slane %v4454_v31, 1  ;;  %v1195_v31 = vrot.slane %v1193_v4, 1 }
 0x16b   : > { %1349 = vrot.lane.b32.xlu0 %v1172_v50, %s16034_s22  ;;  %v1597_v9 = vpop.permute.xlu1 %1596  ;;  %v4450_v50 = vshrl.u32 %v17468_v37, 16  ;;  %v4985_v4 = vrot.slane %v17557_v38, 1 }
 0x16c   : > { %v17495_v59 = vsel %vm1779_vm5, %v1734_v26, %v1597_v9 }
 0x16d   : > { %22750 = vst [vmem:[#allocation13_spill] sm:$0xff] %v17495_v59  ;;  %v2186_v17 = vrot.slane %v17495_v59, 1  ;;  %v1322_v25 = vpop.permute.xlu0 %1321  ;;  %5113 = vrot.lane.b32.xlu1 %v4978_v11, %s16033_s21  ;;  %v4981_v11 = vrot.slane %v17468_v37, 1 }
 0x16f   : > { %4837 = vrot.lane.b32.xlu0 %v4441_v28, %s16034_s22  ;;  %v5086_v20 = vpop.permute.xlu1 %5085  ;;  %v2187_v51 = vsel %vm1368_vm0, %v2184_v36, %v2186_v17  ;;  %v1188_v28 = vsel %vm680_vm1, %v1183_v33, %v1187_v47  ;;  %v4982_v8 = vsel %vm1368_vm0, %v4979_v44, %v4981_v11 }
 0x170   : > { %v5363_v57 = vsel %vm1779_vm5, %v5224_v14, %v5086_v20  ;;  %15110 = vmatprep.mubr.msk.bf16.mxu1 %vm2243_vm6, %v2187_v51  ;;  %v4458_v14 = vshrl.u32 %v17519_v45, 16  ;;  %v4462_v20 = vshll.u32 %v17557_v38, 16  ;;  %v15932_v51 = vld [vmem:[%s16077_s20 + $0x178] sm:$0xff]  }
 0x171   : > { %v5572_v49 = vrot.slane %v5363_v57, 2  ;;  %v4810_v42 = vpop.permute.xlu0 %4809  ;;  %5115 = vrot.lane.b32.xlu1 %v4980_v46, %s16033_s21  ;;  %v1494_v57 = vrot.slane %v17500_v35, 1 }
 0x172   : > { %v5226_v13 = vsel %vm1642_vm4, %v15930_v6, %v4810_v42  ;;  %v4460_v6 = vor.u32 %v4458_v14, %v4456_v24 }
 0x173   : > { %v17526_v23 = vpop.f32.mrb[0].mxu1  ;;  %1626 = vrot.lane.b32.xlu0 %v1491_v1, %s16033_s21  ;;  %v5088_v60 = vpop.permute.xlu1 %5087  ;;  %v5573_v18 = vsel %vm5554_vm7, %v5570_v22, %v5572_v49  ;;  %v1736_v22 = vsel %vm1642_vm4, %v15931_v21, %v1322_v25  ;;  %v4452_v25 = vor.u32 %v4450_v50, %v4448_v40  ;;  %v1189_v40 = vshrl.u32 %v17500_v35, 16  ;;  %v17589_v1 = vld [vmem:[%s16077_s20 + $0x208] sm:$0xff]  }
 0x174   : > { %v17533_v36 = vpop.f32.mrb[1].mxu1  ;;  %v17536_v5 = vsel %vm1779_vm5, %v5226_v13, %v5088_v60  ;;  %15318 = vmatprep.mubr.msk.bf16.mxu0 %vm2243_vm6, %v5573_v18  ;;  %v4464_v13 = vrot.slane %v4462_v20, 1  ;;  %v15933_v18 = vld [vmem:[%s16077_s20 + $0x78] sm:$0xff]   ;;  %v1197_v21 = vshrl.u32 %v17565_v43, 16 }
 0x175   : > { %v5574_v7 = vrot.slane %v17536_v5, 2  ;;  %v17544_v32 = vpop.f32.mrb[2].mxu1  ;;  %v1599_v30 = vpop.permute.xlu0 %1598  ;;  %4839 = vrot.lane.b32.xlu1 %v4449_v15, %s16034_s22  ;;  %v4457_v39 = vsel %vm680_vm1, %v4452_v25, %v4456_v24  ;;  %v4984_v15 = vsel %vm1368_vm0, %v4981_v11, %v4983_v29  ;;  %v1191_v60 = vor.u32 %v1189_v40, %v1187_v47  ;;  %v15934_v24 = vld [vmem:[%s16077_s20 + $0x80] sm:$0xff]  }
 0x176   : > { %v17549_v63 = vsel %vm1779_vm5, %v1736_v22, %v1599_v30  ;;  %v17551_v12 = vpop.f32.mrb[3].mxu1  ;;  %v1495_v47 = vsel %vm1368_vm0, %v1492_v27, %v1494_v57  ;;  %v1201_v11 = vshll.u32 %v17589_v1, 16  ;;  %v1496_v25 = vrot.slane %v17565_v43, 1 }
 0x177   : > { %22751 = vst [vmem:[#allocation14_spill] sm:$0xff] %v17549_v63  ;;  %v2188_v26 = vrot.slane %v17549_v63, 1  ;;  %1351 = vrot.lane.b32.xlu0 %v1180_v58, %s16034_s22  ;;  %v4812_v9 = vpop.permute.xlu1 %4811  ;;  %v5575_v37 = vsel %vm5554_vm7, %v5572_v49, %v5574_v7  ;;  %v4466_v40 = vshrl.u32 %v17557_v38, 16  ;;  %v17654_v38 = vld [vmem:[%s16077_s20 + $0x210] sm:$0xff]   ;;  %v15949_v63 = vld [vmem:[%s16077_s20 + $0xb8] sm:$0xff]  }
 0x178   : > { %15319 = vmatmul.mubr.msk.bf16.gmra.mrb[16].mxu0 %vm2243_vm6, %v5575_v37  ;;  %v5228_v35 = vsel %vm1642_vm4, %v15933_v18, %v4812_v9  ;;  %v1203_v20 = vrot.slane %v1201_v11, 1 }
 0x179   : > { %v1324_v46 = vpop.permute.xlu0 %1323  ;;  %v2189_v62 = vsel %vm1368_vm0, %v2186_v17, %v2188_v26  ;;  %1628 = vrot.lane.b32.xlu1 %v1493_v41, %s16033_s21  ;;  %v17614_v41 = vld [vmem:[%s16077_s20 + $0x108] sm:$0xff]  }
 0x17a   : > { %15111 = vmatmul.mubr.msk.bf16.gmra.mrb[84].mxu1 %vm2243_vm6, %v2189_v62  ;;  %v1738_v17 = vsel %vm1642_vm4, %v15932_v51, %v1324_v46  ;;  %v1196_v62 = vsel %vm680_vm1, %v1191_v60, %v1195_v31  ;;  %v4470_v51 = vshll.u32 %v17614_v41, 16  ;;  %v4474_v11 = vshrl.u32 %v17614_v41, 16 }
 0x17b   : > { %1353 = vrot.lane.b32.xlu0 %v1188_v28, %s16034_s22  ;;  %v1601_v53 = vpop.permute.xlu1 %1600  ;;  %v4465_v28 = vsel %vm680_vm1, %v4460_v6, %v4464_v13  ;;  %v17646_v6 = vld [vmem:[%s16077_s20 + $0x110] sm:$0xff]  }
 0x17c   : > { %v17584_v44 = vsel %vm1779_vm5, %v1738_v17, %v1601_v53  ;;  %v15935_v17 = vld [vmem:[%s16077_s20 + $0x180] sm:$0xff]  }
 0x17d   : > { %22752 = vst [vmem:[#allocation15_spill] sm:$0xff] %v17584_v44  ;;  %v2190_v0 = vrot.slane %v17584_v44, 1  ;;  %v1326_v49 = vpop.permute.xlu0 %1325  ;;  %5117 = vrot.lane.b32.xlu1 %v4982_v8, %s16033_s21  ;;  %v1199_v8 = vor.u32 %v1197_v21, %v1195_v31  ;;  %v4986_v21 = vsel %vm1368_vm0, %v4983_v29, %v4985_v4  ;;  %v1209_v29 = vshll.u32 %v17654_v38, 16 }
 0x17e   : > { %v17593_v42 = vpop.f32.mrb[4].mxu1  ;;  %v1740_v5 = vsel %vm1642_vm4, %v15935_v17, %v1326_v49 }
 0x17f   : > { %v17600_v58 = vpop.f32.mrb[5].mxu1  ;;  %4841 = vrot.lane.b32.xlu0 %v4457_v39, %s16034_s22  ;;  %v5090_v33 = vpop.permute.xlu1 %5089  ;;  %v2191_v50 = vsel %vm1368_vm0, %v2188_v26, %v2190_v0 }
 0x180   : > { %v17605_v22 = vpop.f32.mrb[6].mxu1  ;;  %v5367_v30 = vsel %vm1779_vm5, %v5228_v35, %v5090_v33  ;;  %15114 = vmatprep.mubr.msk.bf16.mxu1 %vm2243_vm6, %v2191_v50  ;;  %v1204_v35 = vsel %vm680_vm1, %v1199_v8, %v1203_v20  ;;  %v4468_v33 = vor.u32 %v4466_v40, %v4464_v13  ;;  %v4478_v13 = vshll.u32 %v17646_v6, 16 }
 0x181   : > { %v5576_v9 = vrot.slane %v5367_v30, 2  ;;  %v17616_v37 = vpop.f32.mrb[7].mxu1  ;;  %v4814_v26 = vpop.permute.xlu0 %4813  ;;  %5119 = vrot.lane.b32.xlu1 %v4984_v15, %s16033_s21  ;;  %v1497_v15 = vsel %vm1368_vm0, %v1494_v57, %v1496_v25  ;;  %v4472_v57 = vrot.slane %v4470_v51, 1 }
 0x182   : > { %22753 = vst [vmem:[#allocation16_spill] sm:$0xff] %v17616_v37  ;;  %v5230_v19 = vsel %vm1642_vm4, %v15934_v24, %v4814_v26 }
 0x183   : > { %1630 = vrot.lane.b32.xlu0 %v1495_v47, %s16033_s21  ;;  %v5092_v27 = vpop.permute.xlu1 %5091  ;;  %v5577_v46 = vsel %vm5554_vm7, %v5574_v7, %v5576_v9  ;;  %v4987_v47 = vrot.slane %v17614_v41, 1 }
 0x184   : > { %v17629_v14 = vsel %vm1779_vm5, %v5230_v19, %v5092_v27  ;;  %15322 = vmatprep.mubr.msk.bf16.mxu0 %vm2243_vm6, %v5577_v46  ;;  %v4473_v27 = vsel %vm680_vm1, %v4468_v33, %v4472_v57  ;;  %v1498_v46 = vrot.slane %v17589_v1, 1 }
 0x185   : > { %v5578_v7 = vrot.slane %v17629_v14, 2  ;;  %v1603_v53 = vpop.permute.xlu0 %1602  ;;  %4843 = vrot.lane.b32.xlu1 %v4465_v28, %s16034_s22  ;;  %v4988_v17 = vsel %vm1368_vm0, %v4985_v4, %v4987_v47 }
 0x186   : > { %v17640_v39 = vsel %vm1779_vm5, %v1740_v5, %v1603_v53  ;;  %v4476_v5 = vor.u32 %v4474_v11, %v4472_v57  ;;  %v4480_v53 = vrot.slane %v4478_v13, 1 }
 0x187   : > { %22754 = vst [vmem:[#allocation17_spill] sm:$0xff] %v17640_v39  ;;  %v2192_v60 = vrot.slane %v17640_v39, 1  ;;  %1355 = vrot.lane.b32.xlu0 %v1196_v62, %s16034_s22  ;;  %v4816_v49 = vpop.permute.xlu1 %4815  ;;  %v5579_v18 = vsel %vm5554_vm7, %v5576_v9, %v5578_v7  ;;  %v1205_v9 = vshrl.u32 %v17589_v1, 16  ;;  %v17684_v62 = vld [vmem:[%s16077_s20 + $0x218] sm:$0xff]  }
 0x188   : > { %15323 = vmatmul.mubr.msk.bf16.gmra.mrb[20].mxu0 %vm2243_vm6, %v5579_v18  ;;  %v15937_v18 = vld [vmem:[%s16077_s20 + $0x88] sm:$0xff]   ;;  %v1217_v4 = vshll.u32 %v17684_v62, 16  ;;  %v4481_v13 = vsel %vm680_vm1, %v4476_v5, %v4480_v53  ;;  %v17773_v41 = vrot.slane %v17684_v62, 1 }
 0x189   : > { %v1328_v50 = vpop.permute.xlu0 %1327  ;;  %v2193_v31 = vsel %vm1368_vm0, %v2190_v0, %v2192_v60  ;;  %1632 = vrot.lane.b32.xlu1 %v1497_v15, %s16033_s21  ;;  %v15936_v0 = vld [vmem:[%s16077_s20 + $0x188] sm:$0xff]   ;;  %v1207_v15 = vor.u32 %v1205_v9, %v1203_v20  ;;  %v5232_v1 = vsel %vm1642_vm4, %v15937_v18, %v4816_v49  ;;  %v1499_v20 = vsel %vm1368_vm0, %v1496_v25, %v1498_v46  ;;  %v17705_v49 = vld [vmem:[%s16077_s20 + $0x118] sm:$0xff]  }
 0x18a   : > { %v17663_v30 = vpop.f32.mrb[8].mxu1  ;;  %15115 = vmatmul.mubr.msk.bf16.gmra.mrb[88].mxu1 %vm2243_vm6, %v2193_v31  ;;  %v1742_v26 = vsel %vm1642_vm4, %v15936_v0, %v1328_v50  ;;  %v1211_v50 = vrot.slane %v1209_v29, 1  ;;  %v1213_v31 = vshrl.u32 %v17654_v38, 16  ;;  %v22699_v9 = vrot.slane %v17654_v38, 1  ;;  %v15938_v0 = vld [vmem:[%s16077_s20 + $0x90] sm:$0xff]  }
 0x18b   : > { %22755 = vst [vmem:[#allocation18_spill] sm:$0xff] %v17663_v30  ;;  %v17672_v28 = vpop.f32.mrb[9].mxu1  ;;  %1357 = vrot.lane.b32.xlu0 %v1204_v35, %s16034_s22  ;;  %v1605_v45 = vpop.permute.xlu1 %1604  ;;  %v1219_v18 = vrot.slane %v1217_v4, 1  ;;  %v17743_v4 = vld [vmem:[%s16077_s20 + $0x120] sm:$0xff]  }
 0x18c   : > { %22756 = vst [vmem:[#allocation19_spill] sm:$0xff] %v17672_v28  ;;  %v17676_v24 = vpop.f32.mrb[10].mxu1  ;;  %v17679_v19 = vsel %vm1779_vm5, %v1742_v26, %v1605_v45  ;;  %v1212_v29 = vsel %vm680_vm1, %v1207_v15, %v1211_v50 }
 0x18d   : > { %22757 = vst [vmem:[#allocation20_spill] sm:$0xff] %v17676_v24  ;;  %22758 = vst [vmem:[#allocation21_spill] sm:$0xff] %v17679_v19  ;;  %v2194_v8 = vrot.slane %v17679_v19, 1  ;;  %v17687_v40 = vpop.f32.mrb[11].mxu1  ;;  %v1330_v51 = vpop.permute.xlu0 %1329  ;;  %5121 = vrot.lane.b32.xlu1 %v4986_v21, %s16033_s21 }
 0x18e   : > { %22759 = vst [vmem:[#allocation22_spill] sm:$0xff] %v17687_v40 }
 0x18f   : > { %4845 = vrot.lane.b32.xlu0 %v4473_v27, %s16034_s22  ;;  %v5094_v35 = vpop.permute.xlu1 %5093  ;;  %v2195_v33 = vsel %vm1368_vm0, %v2192_v60, %v2194_v8  ;;  %v1215_v27 = vor.u32 %v1213_v31, %v1211_v50 }
 0x190   : > { %v5371_v21 = vsel %vm1779_vm5, %v5232_v1, %v5094_v35  ;;  %15118 = vmatprep.mubr.msk.bf16.mxu1 %vm2243_vm6, %v2195_v33  ;;  %v4482_v1 = vshrl.u32 %v17646_v6, 16  ;;  %v4486_v35 = vshll.u32 %v17705_v49, 16  ;;  %v15939_v33 = vld [vmem:[%s16077_s20 + $0x190] sm:$0xff]  }
 0x191   : > { %v5580_v57 = vrot.slane %v5371_v21, 2  ;;  %v4818_v11 = vpop.permute.xlu0 %4817  ;;  %5123 = vrot.lane.b32.xlu1 %v4988_v17, %s16033_s21  ;;  %v1744_v14 = vsel %vm1642_vm4, %v15939_v33, %v1330_v51  ;;  %v1501_v21 = vsel %vm1368_vm0, %v1498_v46, %v22699_v9 }
 0x192   : > { %v17708_v60 = vpop.f32.mrb[12].mxu1  ;;  %v5234_v43 = vsel %vm1642_vm4, %v15938_v0, %v4818_v11  ;;  %v1220_v0 = vsel %vm680_vm1, %v1215_v27, %v1219_v18  ;;  %v4484_v46 = vor.u32 %v4482_v1, %v4480_v53  ;;  %v22701_v27 = vrot.slane %v17705_v49, 1 }
 0x193   : > { %22760 = vst [vmem:[#allocation23_spill] sm:$0xff] %v17708_v60  ;;  %v17714_v26 = vpop.f32.mrb[13].mxu1  ;;  %1634 = vrot.lane.b32.xlu0 %v1499_v20, %s16033_s21  ;;  %v5096_v25 = vpop.permute.xlu1 %5095  ;;  %v5581_v45 = vsel %vm5554_vm7, %v5578_v7, %v5580_v57  ;;  %v4989_v20 = vrot.slane %v17646_v6, 1  ;;  %v17753_v6 = vld [vmem:[%s16077_s20 + $0x220] sm:$0xff]   ;;  %v4490_v53 = vshrl.u32 %v17705_v49, 16  ;;  %v4494_v1 = vshll.u32 %v17743_v4, 16 }
 0x194   : > { %22761 = vst [vmem:[#allocation24_spill] sm:$0xff] %v17714_v26  ;;  %v17721_v17 = vpop.f32.mrb[14].mxu1  ;;  %v17724_v5 = vsel %vm1779_vm5, %v5234_v43, %v5096_v25  ;;  %15326 = vmatprep.mubr.msk.bf16.mxu0 %vm2243_vm6, %v5581_v45  ;;  %v4488_v43 = vrot.slane %v4486_v35, 1  ;;  %v15940_v35 = vld [vmem:[%s16077_s20 + $0x198] sm:$0xff]  }
 0x195   : > { %22762 = vst [vmem:[#allocation25_spill] sm:$0xff] %v17721_v17  ;;  %v22698_v7 = vrot.slane %v17724_v5, 2  ;;  %v17732_v15 = vpop.f32.mrb[15].mxu1  ;;  %v1607_v50 = vpop.permute.xlu0 %1606  ;;  %4847 = vrot.lane.b32.xlu1 %v4481_v13, %s16034_s22 }
 0x196   : > { %22763 = vst [vmem:[#allocation26_spill] sm:$0xff] %v17732_v15  ;;  %v17736_v31 = vsel %vm1779_vm5, %v1744_v14, %v1607_v50  ;;  %v7179_v15 = vlaneseq }
 0x197   : > { %22764 = vst [vmem:[#allocation27_spill] sm:$0xff] %v17736_v31  ;;  %v2196_v51 = vrot.slane %v17736_v31, 1  ;;  %1359 = vrot.lane.b32.xlu0 %v1212_v29, %s16034_s22  ;;  %v4820_v11 = vpop.permute.xlu1 %4819  ;;  %v5583_v13 = vsel %vm5554_vm7, %v5580_v57, %v22698_v7  ;;  %v4990_v57 = vsel %vm1368_vm0, %v4987_v47, %v4989_v20  ;;  %v1221_v47 = vshrl.u32 %v17684_v62, 16 }
 0x198   : > { %15327 = vmatmul.mubr.msk.bf16.gmra.mrb[24].mxu0 %vm2243_vm6, %v5583_v13  ;;  %v4489_v13 = vsel %vm680_vm1, %v4484_v46, %v4488_v43  ;;  %v4992_v62 = vsel %vm1368_vm0, %v4989_v20, %v22701_v27  ;;  %v15941_v46 = vld [vmem:[%s16077_s20 + $0x98] sm:$0xff]   ;;  %v22771_v20 = vrot.slane %v17654_v38, 1  ;;  %v1958_v38 = vshrl.u32 %v17753_v6, 16 }
 0x199   : > { %v1332_v25 = vpop.permute.xlu0 %1331  ;;  %v2197_v45 = vsel %vm1368_vm0, %v2194_v8, %v2196_v51  ;;  %1636 = vrot.lane.b32.xlu1 %v1501_v21, %s16033_s21  ;;  %v5236_v9 = vsel %vm1642_vm4, %v15941_v46, %v4820_v11  ;;  %v7180_v60 = vshrl.u32 %v7179_v15, 7 }
 0x19a   : > { %v17757_v29 = vpop.f32.mrb[16].mxu1  ;;  %15119 = vmatmul.mubr.msk.bf16.gmra.mrb[92].mxu1 %vm2243_vm6, %v2197_v45  ;;  %v1746_v8 = vsel %vm1642_vm4, %v15940_v35, %v1332_v25  ;;  %v1954_v25 = vshll.u32 %v17753_v6, 16  ;;  %v17784_v45 = vld [vmem:[%s16077_s20 + $0x228] sm:$0xff]  }
 0x19b   : > { %22765 = vst [vmem:[#allocation28_spill] sm:$0xff] %v17757_v29  ;;  %v17769_v33 = vpop.f32.mrb[17].mxu1  ;;  %1361 = vrot.lane.b32.xlu0 %v1220_v0, %s16034_s22  ;;  %v1609_v14 = vpop.permute.xlu1 %1608 }
 0x19c   : > { %22766 = vst [vmem:[#allocation29_spill] sm:$0xff] %v17769_v33  ;;  %v17776_v50 = vpop.f32.mrb[18].mxu1  ;;  %v17779_v21 = vsel %vm1779_vm5, %v1746_v8, %v1609_v14  ;;  %v4492_v8 = vor.u32 %v4490_v53, %v4488_v43  ;;  %v17795_v14 = vrot.slane %v4494_v1, 1  ;;  %v17812_v43 = vsel %vm1368_vm0, %v22771_v20, %v17773_v41  ;;  %v17817_v1 = vld [vmem:[%s16077_s20 + $0x128] sm:$0xff]  }
 0x19d   : > { %22767 = vst [vmem:[#allocation30_spill] sm:$0xff] %v17776_v50  ;;  %22768 = vst [vmem:[#allocation31_spill] sm:$0xff] %v17779_v21  ;;  %v17787_v35 = vpop.f32.mrb[19].mxu1  ;;  %v17789_v7 = vpop.permute.xlu0 %1333  ;;  %5125 = vrot.lane.b32.xlu1 %v4990_v57, %s16033_s21  ;;  %v22770_v57 = vrot.slane %v17779_v21, 1  ;;  %v17814_v53 = vor.u32 %v1221_v47, %v1219_v18  ;;  %v1962_v18 = vshll.u32 %v17784_v45, 16  ;;  %v22774_v20 = vrot.slane %v17724_v5, 2 }
 0x19e   : > { %22769 = vst [vmem:[#allocation32_spill] sm:$0xff] %v17787_v35 }
 0x19f   : > { %4849 = vrot.lane.b32.xlu0 %v4489_v13, %s16034_s22  ;;  %v5098_v0 = vpop.permute.xlu1 %5097  ;;  %v2199_v31 = vsel %vm1368_vm0, %v2196_v51, %v22770_v57  ;;  %v17823_v51 = vrot.slane %v1954_v25, 1  ;;  %v4498_v25 = vshrl.u32 %v17743_v4, 16 }
 0x1a0   : > { %v17820_v11 = vsel %vm1779_vm5, %v5236_v9, %v5098_v0  ;;  %15122 = vmatprep.mubr.msk.bf16.mxu1 %vm2243_vm6, %v2199_v31  ;;  %v17835_v31 = vsel %vm680_vm1, %v4492_v8, %v17795_v14  ;;  %v16036_v0 = vmov 0  }
 0x1a1   : > { %v22702_v47 = vrot.slane %v17820_v11, 2  ;;  %v17828_v13 = vpop.permute.xlu0 %4821  ;;  %5127 = vrot.lane.b32.xlu1 %v4992_v62, %s16033_s21  ;;  %9478 = vst.msk [vmem:[%s17800_s6 + $0x14] sm:$0xf] %vm9471_vm8, %v16036_v0  ;;  %9472 = vst.msk [vmem:[%s17800_s6] sm:$0xf] %vm9471_vm8, %v16036_v0  ;;  %v15942_v62 = vld [vmem:[%s16077_s20 + $0xa0] sm:$0xff]  }
 0x1a2   : > { %v17831_v9 = vpop.f32.mrb[20].mxu1  ;;  %9473 = vst.msk [vmem:[%s17800_s6 + $0x4] sm:$0xf] %vm9471_vm8, %v16036_v0  ;;  %9474 = vst.msk [vmem:[%s17800_s6 + $0x8] sm:$0xf] %vm9471_vm8, %v16036_v0  ;;  %v5238_v8 = vsel %vm1642_vm4, %v15942_v62, %v17828_v13  ;;  %v4502_v13 = vshll.u32 %v17817_v1, 16  ;;  %v1957_v62 = vsel %vm680_vm1, %v17814_v53, %v17823_v51 }
 0x1a3   : > { %22772 = vst [vmem:[#allocation33_spill] sm:$0xff] %v17831_v9  ;;  %9475 = vst.msk [vmem:[%s17800_s6 + $0xc] sm:$0xf] %vm9471_vm8, %v16036_v0  ;;  %v18261_v46 = vpop.f32.mrb[21].mxu1  ;;  %1638 = vrot.lane.b32.xlu0 %v17812_v43, %s16033_s21  ;;  %v5100_v57 = vpop.permute.xlu1 %5099  ;;  %v5585_v27 = vsel %vm5554_vm7, %v22774_v20, %v22702_v47  ;;  %v1960_v20 = vor.u32 %v1958_v38, %v17823_v51  ;;  %v1964_v47 = vrot.slane %v1962_v18, 1  ;;  %v22778_v51 = vrot.slane %v17753_v6, 1 }
 0x1a4   : > { %9479 = vst.msk [vmem:[%s17800_s6 + $0x18] sm:$0xf] %vm9471_vm8, %v16036_v0  ;;  %9480 = vst.msk [vmem:[%s17800_s6 + $0x1c] sm:$0xf] %vm9471_vm8, %v16036_v0  ;;  %v18377_v5 = vpop.f32.mrb[22].mxu1  ;;  %v18380_v43 = vsel %vm1779_vm5, %v5238_v8, %v5100_v57  ;;  %15330 = vmatprep.mubr.msk.bf16.mxu0 %vm2243_vm6, %v5585_v27  ;;  %v4993_v18 = vrot.slane %v17743_v4, 1 }
 0x1a5   : > { %9481 = vst.msk [vmem:[%s17800_s6 + $0x20] sm:$0xf] %vm9471_vm8, %v16036_v0  ;;  %9483 = vst.msk [vmem:[%s17800_s6 + $0x28] sm:$0xf] %vm9471_vm8, %v16036_v0  ;;  %v18395_v57 = vpop.f32.mrb[23].mxu1  ;;  %v1611_v27 = vpop.permute.xlu0 %1610  ;;  %4851 = vrot.lane.b32.xlu1 %v17835_v31, %s16034_s22  ;;  %v1993_v38 = vsel %vm1368_vm0, %v17773_v41, %v22778_v51  ;;  %v22780_v31 = vrot.slane %v17820_v11, 2  ;;  %v1965_v4 = vsel %vm680_vm1, %v1960_v20, %v1964_v47 }
 0x1a6   : > { %9484 = vst.msk [vmem:[%s17800_s6 + $0x2c] sm:$0xf] %vm9471_vm8, %v16036_v0  ;;  %9485 = vst.msk [vmem:[%s17800_s6 + $0x30] sm:$0xf] %vm9471_vm8, %v16036_v0  ;;  %v4504_v44 = vrot.slane %v4502_v13, 1  ;;  %v4506_v20 = vshrl.u32 %v17817_v1, 16 }
 0x1a7   : > { %9486 = vst.msk [vmem:[%s17800_s6 + $0x34] sm:$0xf] %vm9471_vm8, %v16036_v0  ;;  %9488 = vst.msk [vmem:[%s17800_s6 + $0x3c] sm:$0xf] %vm9471_vm8, %v16036_v0  ;;  %1979 = vrot.lane.b32.xlu0 %v1957_v62, %s16034_s22  ;;  %v4824_v8 = vpop.permute.xlu1 %4823  ;;  %v22781_v62 = vrot.slane %v17779_v21, 1  ;;  %v1994_v13 = vrot.slane %v17784_v45, 1 }
 0x1a8   : > { %9489 = vst.msk [vmem:[%s17800_s6 + $0x40] sm:$0xf] %vm9471_vm8, %v16036_v0  ;;  %9490 = vst.msk [vmem:[%s17800_s6 + $0x44] sm:$0xf] %vm9471_vm8, %v16036_v0  ;;  %v18557_v9 = vld [vmem:[%s16077_s20 + $0x160] sm:$0xff]  }
 0x1a9   : > { %9491 = vst.msk [vmem:[%s17800_s6 + $0x48] sm:$0xf] %vm9471_vm8, %v16036_v0  ;;  %9493 = vst.msk [vmem:[%s17800_s6 + $0x50] sm:$0xf] %vm9471_vm8, %v16036_v0  ;;  %2000 = vrot.lane.b32.xlu1 %v1993_v38, %s16033_s21 }
 0x1aa   : > { %9494 = vst.msk [vmem:[%s17800_s6 + $0x54] sm:$0xf] %vm9471_vm8, %v16036_v0  ;;  %9495 = vst.msk [vmem:[%s17800_s6 + $0x58] sm:$0xf] %vm9471_vm8, %v16036_v0  ;;  %v18427_v11 = vpop.f32.mrb[24].mxu1 }
 0x1ab   : > { %9496 = vst.msk [vmem:[%s17800_s6 + $0x5c] sm:$0xf] %vm9471_vm8, %v16036_v0  ;;  %9498 = vst.msk [vmem:[%s17800_s6 + $0x64] sm:$0xf] %vm9471_vm8, %v16036_v0  ;;  %1981 = vrot.lane.b32.xlu0 %v1965_v4, %s16034_s22  ;;  %v1613_v38 = vpop.permute.xlu1 %1612 }
 0x1ac   : > { %9499 = vst.msk [vmem:[%s17800_s6 + $0x68] sm:$0xf] %vm9471_vm8, %v16036_v0  ;;  %9500 = vst.msk [vmem:[%s17800_s6 + $0x6c] sm:$0xf] %vm9471_vm8, %v16036_v0 }
 0x1ad   : > { %9501 = vst.msk [vmem:[%s17800_s6 + $0x70] sm:$0xf] %vm9471_vm8, %v16036_v0  ;;  %9503 = vst.msk [vmem:[%s17800_s6 + $0x78] sm:$0xf] %vm9471_vm8, %v16036_v0 }
 0x1ae   : > { %9504 = vst.msk [vmem:[%s17800_s6 + $0x7c] sm:$0xf] %vm9471_vm8, %v16036_v0  ;;  %9505 = vst.msk [vmem:[%s17800_s6 + $0x80] sm:$0xf] %vm9471_vm8, %v16036_v0 }
 0x1af   : > { %9506 = vst.msk [vmem:[%s17800_s6 + $0x84] sm:$0xf] %vm9471_vm8, %v16036_v0  ;;  %9508 = vst.msk [vmem:[%s17800_s6 + $0x8c] sm:$0xf] %vm9471_vm8, %v16036_v0 }
 0x1b0   : > { %9509 = vst.msk [vmem:[%s17800_s6 + $0x90] sm:$0xf] %vm9471_vm8, %v16036_v0  ;;  %9510 = vst.msk [vmem:[%s17800_s6 + $0x94] sm:$0xf] %vm9471_vm8, %v16036_v0 }
 0x1b1   : > { %9511 = vst.msk [vmem:[%s17800_s6 + $0x98] sm:$0xf] %vm9471_vm8, %v16036_v0  ;;  %9513 = vst.msk [vmem:[%s17800_s6 + $0xa0] sm:$0xf] %vm9471_vm8, %v16036_v0 }
 0x1b2   : > { %9514 = vst.msk [vmem:[%s17800_s6 + $0xa4] sm:$0xf] %vm9471_vm8, %v16036_v0  ;;  %9515 = vst.msk [vmem:[%s17800_s6 + $0xa8] sm:$0xf] %vm9471_vm8, %v16036_v0 }
 0x1b3   : > { %9516 = vst.msk [vmem:[%s17800_s6 + $0xac] sm:$0xf] %vm9471_vm8, %v16036_v0  ;;  %9518 = vst.msk [vmem:[%s17800_s6 + $0xb4] sm:$0xf] %vm9471_vm8, %v16036_v0 }
 0x1b4   : > { %9519 = vst.msk [vmem:[%s17800_s6 + $0xb8] sm:$0xf] %vm9471_vm8, %v16036_v0  ;;  %9520 = vst.msk [vmem:[%s17800_s6 + $0xbc] sm:$0xf] %vm9471_vm8, %v16036_v0 }
 0x1b5   : > { %9521 = vst.msk [vmem:[%s17800_s6 + $0xc0] sm:$0xf] %vm9471_vm8, %v16036_v0  ;;  %9523 = vst.msk [vmem:[%s17800_s6 + $0xc8] sm:$0xf] %vm9471_vm8, %v16036_v0 }
 0x1b6   : > { %9524 = vst.msk [vmem:[%s17800_s6 + $0xcc] sm:$0xf] %vm9471_vm8, %v16036_v0  ;;  %9525 = vst.msk [vmem:[%s17800_s6 + $0xd0] sm:$0xf] %vm9471_vm8, %v16036_v0 }
 0x1b7   : > { %9526 = vst.msk [vmem:[%s17800_s6 + $0xd4] sm:$0xf] %vm9471_vm8, %v16036_v0  ;;  %9528 = vst.msk [vmem:[%s17800_s6 + $0xdc] sm:$0xf] %vm9471_vm8, %v16036_v0 }
 0x1b8   : > { %9529 = vst.msk [vmem:[%s17800_s6 + $0xe0] sm:$0xf] %vm9471_vm8, %v16036_v0  ;;  %9530 = vst.msk [vmem:[%s17800_s6 + $0xe4] sm:$0xf] %vm9471_vm8, %v16036_v0 }
 0x1b9   : > { %9531 = vst.msk [vmem:[%s17800_s6 + $0xe8] sm:$0xf] %vm9471_vm8, %v16036_v0  ;;  %9533 = vst.msk [vmem:[%s17800_s6 + $0xf0] sm:$0xf] %vm9471_vm8, %v16036_v0 }
 0x1ba   : > { %9534 = vst.msk [vmem:[%s17800_s6 + $0xf4] sm:$0xf] %vm9471_vm8, %v16036_v0  ;;  %9535 = vst.msk [vmem:[%s17800_s6 + $0xf8] sm:$0xf] %vm9471_vm8, %v16036_v0 }
 0x1bb   : > { %9536 = vst.msk [vmem:[%s17800_s6 + $0xfc] sm:$0xf] %vm9471_vm8, %v16036_v0  ;;  %9538 = vst.msk [vmem:[%s17800_s6 + $0x104] sm:$0xf] %vm9471_vm8, %v16036_v0 }
 0x1bc   : > { %9539 = vst.msk [vmem:[%s17800_s6 + $0x108] sm:$0xf] %vm9471_vm8, %v16036_v0  ;;  %9540 = vst.msk [vmem:[%s17800_s6 + $0x10c] sm:$0xf] %vm9471_vm8, %v16036_v0 }
 0x1bd   : > { %9541 = vst.msk [vmem:[%s17800_s6 + $0x110] sm:$0xf] %vm9471_vm8, %v16036_v0  ;;  %9543 = vst.msk [vmem:[%s17800_s6 + $0x118] sm:$0xf] %vm9471_vm8, %v16036_v0 }
 0x1be   : > { %9544 = vst.msk [vmem:[%s17800_s6 + $0x11c] sm:$0xf] %vm9471_vm8, %v16036_v0  ;;  %9545 = vst.msk [vmem:[%s17800_s6 + $0x120] sm:$0xf] %vm9471_vm8, %v16036_v0 }
 0x1bf   : > { %9546 = vst.msk [vmem:[%s17800_s6 + $0x124] sm:$0xf] %vm9471_vm8, %v16036_v0  ;;  %9548 = vst.msk [vmem:[%s17800_s6 + $0x12c] sm:$0xf] %vm9471_vm8, %v16036_v0 }
 0x1c0   : > { %9549 = vst.msk [vmem:[%s17800_s6 + $0x130] sm:$0xf] %vm9471_vm8, %v16036_v0  ;;  %9550 = vst.msk [vmem:[%s17800_s6 + $0x134] sm:$0xf] %vm9471_vm8, %v16036_v0 }
 0x1c1   : > { %9551 = vst.msk [vmem:[%s17800_s6 + $0x138] sm:$0xf] %vm9471_vm8, %v16036_v0  ;;  %9553 = vst.msk [vmem:[%s17800_s6 + $0x140] sm:$0xf] %vm9471_vm8, %v16036_v0 }
 0x1c2   : > { %9554 = vst.msk [vmem:[%s17800_s6 + $0x144] sm:$0xf] %vm9471_vm8, %v16036_v0  ;;  %9555 = vst.msk [vmem:[%s17800_s6 + $0x148] sm:$0xf] %vm9471_vm8, %v16036_v0 }
 0x1c3   : > { %9556 = vst.msk [vmem:[%s17800_s6 + $0x14c] sm:$0xf] %vm9471_vm8, %v16036_v0  ;;  %9558 = vst.msk [vmem:[%s17800_s6 + $0x154] sm:$0xf] %vm9471_vm8, %v16036_v0 }
 0x1c4   : > { %9559 = vst.msk [vmem:[%s17800_s6 + $0x158] sm:$0xf] %vm9471_vm8, %v16036_v0  ;;  %9560 = vst.msk [vmem:[%s17800_s6 + $0x15c] sm:$0xf] %vm9471_vm8, %v16036_v0 }
 0x1c5   : > { %9561 = vst.msk [vmem:[%s17800_s6 + $0x160] sm:$0xf] %vm9471_vm8, %v16036_v0  ;;  %9563 = vst.msk [vmem:[%s17800_s6 + $0x168] sm:$0xf] %vm9471_vm8, %v16036_v0 }
 0x1c6   : > { %9564 = vst.msk [vmem:[%s17800_s6 + $0x16c] sm:$0xf] %vm9471_vm8, %v16036_v0  ;;  %9565 = vst.msk [vmem:[%s17800_s6 + $0x170] sm:$0xf] %vm9471_vm8, %v16036_v0 }
 0x1c7   : > { %9566 = vst.msk [vmem:[%s17800_s6 + $0x174] sm:$0xf] %vm9471_vm8, %v16036_v0  ;;  %9568 = vst.msk [vmem:[%s17800_s6 + $0x17c] sm:$0xf] %vm9471_vm8, %v16036_v0 }
 0x1c8   : > { %9569 = vst.msk [vmem:[%s17800_s6 + $0x180] sm:$0xf] %vm9471_vm8, %v16036_v0  ;;  %9570 = vst.msk [vmem:[%s17800_s6 + $0x184] sm:$0xf] %vm9471_vm8, %v16036_v0 }
 0x1c9   : > { %9571 = vst.msk [vmem:[%s17800_s6 + $0x188] sm:$0xf] %vm9471_vm8, %v16036_v0  ;;  %9573 = vst.msk [vmem:[%s17800_s6 + $0x190] sm:$0xf] %vm9471_vm8, %v16036_v0 }
 0x1ca   : > { %9574 = vst.msk [vmem:[%s17800_s6 + $0x194] sm:$0xf] %vm9471_vm8, %v16036_v0  ;;  %9575 = vst.msk [vmem:[%s17800_s6 + $0x198] sm:$0xf] %vm9471_vm8, %v16036_v0 }
 0x1cb   : > { %9576 = vst.msk [vmem:[%s17800_s6 + $0x19c] sm:$0xf] %vm9471_vm8, %v16036_v0  ;;  %9578 = vst.msk [vmem:[%s17800_s6 + $0x1a4] sm:$0xf] %vm9471_vm8, %v16036_v0 }
 0x1cc   : > { %9579 = vst.msk [vmem:[%s17800_s6 + $0x1a8] sm:$0xf] %vm9471_vm8, %v16036_v0  ;;  %9580 = vst.msk [vmem:[%s17800_s6 + $0x1ac] sm:$0xf] %vm9471_vm8, %v16036_v0 }
 0x1cd   : > { %9581 = vst.msk [vmem:[%s17800_s6 + $0x1b0] sm:$0xf] %vm9471_vm8, %v16036_v0  ;;  %9583 = vst.msk [vmem:[%s17800_s6 + $0x1b8] sm:$0xf] %vm9471_vm8, %v16036_v0 }
 0x1ce   : > { %9584 = vst.msk [vmem:[%s17800_s6 + $0x1bc] sm:$0xf] %vm9471_vm8, %v16036_v0  ;;  %9585 = vst.msk [vmem:[%s17800_s6 + $0x1c0] sm:$0xf] %vm9471_vm8, %v16036_v0 }
 0x1cf   : > { %9586 = vst.msk [vmem:[%s17800_s6 + $0x1c4] sm:$0xf] %vm9471_vm8, %v16036_v0  ;;  %9588 = vst.msk [vmem:[%s17800_s6 + $0x1cc] sm:$0xf] %vm9471_vm8, %v16036_v0 }
 0x1d0   : > { %9589 = vst.msk [vmem:[%s17800_s6 + $0x1d0] sm:$0xf] %vm9471_vm8, %v16036_v0  ;;  %9590 = vst.msk [vmem:[%s17800_s6 + $0x1d4] sm:$0xf] %vm9471_vm8, %v16036_v0 }
 0x1d1   : > { %9591 = vst.msk [vmem:[%s17800_s6 + $0x1d8] sm:$0xf] %vm9471_vm8, %v16036_v0  ;;  %9593 = vst.msk [vmem:[%s17800_s6 + $0x1e0] sm:$0xf] %vm9471_vm8, %v16036_v0 }
 0x1d2   : > { %9594 = vst.msk [vmem:[%s17800_s6 + $0x1e4] sm:$0xf] %vm9471_vm8, %v16036_v0  ;;  %9595 = vst.msk [vmem:[%s17800_s6 + $0x1e8] sm:$0xf] %vm9471_vm8, %v16036_v0 }
 0x1d3   : > { %9596 = vst.msk [vmem:[%s17800_s6 + $0x1ec] sm:$0xf] %vm9471_vm8, %v16036_v0  ;;  %9598 = vst.msk [vmem:[%s17800_s6 + $0x1f4] sm:$0xf] %vm9471_vm8, %v16036_v0 }
 0x1d4   : > { %9599 = vst.msk [vmem:[%s17800_s6 + $0x1f8] sm:$0xf] %vm9471_vm8, %v16036_v0  ;;  %9600 = vst.msk [vmem:[%s17800_s6 + $0x1fc] sm:$0xf] %vm9471_vm8, %v16036_v0 }
 0x1d5   : > { %9601 = vst.msk [vmem:[%s17800_s6 + $0x200] sm:$0xf] %vm9471_vm8, %v16036_v0  ;;  %9603 = vst.msk [vmem:[%s17800_s6 + $0x208] sm:$0xf] %vm9471_vm8, %v16036_v0 }
 0x1d6   : > { %9604 = vst.msk [vmem:[%s17800_s6 + $0x20c] sm:$0xf] %vm9471_vm8, %v16036_v0  ;;  %9605 = vst.msk [vmem:[%s17800_s6 + $0x210] sm:$0xf] %vm9471_vm8, %v16036_v0 }
 0x1d7   : > { %9606 = vst.msk [vmem:[%s17800_s6 + $0x214] sm:$0xf] %vm9471_vm8, %v16036_v0  ;;  %9608 = vst.msk [vmem:[%s17800_s6 + $0x21c] sm:$0xf] %vm9471_vm8, %v16036_v0 }
 0x1d8   : > { %9609 = vst.msk [vmem:[%s17800_s6 + $0x220] sm:$0xf] %vm9471_vm8, %v16036_v0  ;;  %9610 = vst.msk [vmem:[%s17800_s6 + $0x224] sm:$0xf] %vm9471_vm8, %v16036_v0 }
 0x1d9   : > { %9611 = vst.msk [vmem:[%s17800_s6 + $0x228] sm:$0xf] %vm9471_vm8, %v16036_v0  ;;  %9613 = vst.msk [vmem:[%s17800_s6 + $0x230] sm:$0xf] %vm9471_vm8, %v16036_v0 }
 0x1da   : > { %9614 = vst.msk [vmem:[%s17800_s6 + $0x234] sm:$0xf] %vm9471_vm8, %v16036_v0  ;;  %9615 = vst.msk [vmem:[%s17800_s6 + $0x238] sm:$0xf] %vm9471_vm8, %v16036_v0 }
 0x1db   : > { %9616 = vst.msk [vmem:[%s17800_s6 + $0x23c] sm:$0xf] %vm9471_vm8, %v16036_v0  ;;  %9618 = vst.msk [vmem:[%s17800_s6 + $0x244] sm:$0xf] %vm9471_vm8, %v16036_v0 }
 0x1dc   : > { %9619 = vst.msk [vmem:[%s17800_s6 + $0x248] sm:$0xf] %vm9471_vm8, %v16036_v0  ;;  %9620 = vst.msk [vmem:[%s17800_s6 + $0x24c] sm:$0xf] %vm9471_vm8, %v16036_v0 }
 0x1dd   : > { %9621 = vst.msk [vmem:[%s17800_s6 + $0x250] sm:$0xf] %vm9471_vm8, %v16036_v0  ;;  %9623 = vst.msk [vmem:[%s17800_s6 + $0x258] sm:$0xf] %vm9471_vm8, %v16036_v0 }
 0x1de   : > { %9624 = vst.msk [vmem:[%s17800_s6 + $0x25c] sm:$0xf] %vm9471_vm8, %v16036_v0  ;;  %9625 = vst.msk [vmem:[%s17800_s6 + $0x260] sm:$0xf] %vm9471_vm8, %v16036_v0 }
 0x1df   : > { %9626 = vst.msk [vmem:[%s17800_s6 + $0x264] sm:$0xf] %vm9471_vm8, %v16036_v0  ;;  %9628 = vst.msk [vmem:[%s17800_s6 + $0x26c] sm:$0xf] %vm9471_vm8, %v16036_v0 }
 0x1e0   : > { %9629 = vst.msk [vmem:[%s17800_s6 + $0x270] sm:$0xf] %vm9471_vm8, %v16036_v0  ;;  %9630 = vst.msk [vmem:[%s17800_s6 + $0x274] sm:$0xf] %vm9471_vm8, %v16036_v0 }
 0x1e1   : > { %9631 = vst.msk [vmem:[%s17800_s6 + $0x278] sm:$0xf] %vm9471_vm8, %v16036_v0  ;;  %9633 = vst.msk [vmem:[%s17800_s6 + $0x280] sm:$0xf] %vm9471_vm8, %v16036_v0 }
 0x1e2   : > { %9634 = vst.msk [vmem:[%s17800_s6 + $0x284] sm:$0xf] %vm9471_vm8, %v16036_v0  ;;  %9635 = vst.msk [vmem:[%s17800_s6 + $0x288] sm:$0xf] %vm9471_vm8, %v16036_v0 }
 0x1e3   : > { %9636 = vst.msk [vmem:[%s17800_s6 + $0x28c] sm:$0xf] %vm9471_vm8, %v16036_v0  ;;  %9638 = vst.msk [vmem:[%s17800_s6 + $0x294] sm:$0xf] %vm9471_vm8, %v16036_v0 }
 0x1e4   : > { %9639 = vst.msk [vmem:[%s17800_s6 + $0x298] sm:$0xf] %vm9471_vm8, %v16036_v0  ;;  %9640 = vst.msk [vmem:[%s17800_s6 + $0x29c] sm:$0xf] %vm9471_vm8, %v16036_v0 }
 0x1e5   : > { %9641 = vst.msk [vmem:[%s17800_s6 + $0x2a0] sm:$0xf] %vm9471_vm8, %v16036_v0  ;;  %9643 = vst.msk [vmem:[%s17800_s6 + $0x2a8] sm:$0xf] %vm9471_vm8, %v16036_v0 }
 0x1e6   : > { %9644 = vst.msk [vmem:[%s17800_s6 + $0x2ac] sm:$0xf] %vm9471_vm8, %v16036_v0  ;;  %9645 = vst.msk [vmem:[%s17800_s6 + $0x2b0] sm:$0xf] %vm9471_vm8, %v16036_v0 }
 0x1e7   : > { %9646 = vst.msk [vmem:[%s17800_s6 + $0x2b4] sm:$0xf] %vm9471_vm8, %v16036_v0  ;;  %22773 = vst [vmem:[#allocation34_spill] sm:$0xff] %v18261_v46  ;;  %v18421_v51 = vld [vmem:[%s16077_s20 + $0x230] ss:$0 sps:$4 sm:$0x33]  }
 0x1e8   : > { %9482 = vst.msk [vmem:[%s17800_s6 + $0x24] sm:$0x1] %vm9476_vm9, %v16036_v0  ;;  %9477 = vst.msk [vmem:[%s17800_s6 + $0x10] sm:$0x1] %vm9476_vm9, %v16036_v0  ;;  %v1970_v21 = vshll.u32 %v18421_v51, 16 }
 0x1e9   : > { %9487 = vst.msk [vmem:[%s17800_s6 + $0x38] sm:$0x1] %vm9476_vm9, %v16036_v0  ;;  %9492 = vst.msk [vmem:[%s17800_s6 + $0x4c] sm:$0x1] %vm9476_vm9, %v16036_v0 }
 0x1ea   : > { %9497 = vst.msk [vmem:[%s17800_s6 + $0x60] sm:$0x1] %vm9476_vm9, %v16036_v0  ;;  %9502 = vst.msk [vmem:[%s17800_s6 + $0x74] sm:$0x1] %vm9476_vm9, %v16036_v0 }
 0x1eb   : > { %9507 = vst.msk [vmem:[%s17800_s6 + $0x88] sm:$0x1] %vm9476_vm9, %v16036_v0  ;;  %9512 = vst.msk [vmem:[%s17800_s6 + $0x9c] sm:$0x1] %vm9476_vm9, %v16036_v0 }
 0x1ec   : > { %9517 = vst.msk [vmem:[%s17800_s6 + $0xb0] sm:$0x1] %vm9476_vm9, %v16036_v0  ;;  %9522 = vst.msk [vmem:[%s17800_s6 + $0xc4] sm:$0x1] %vm9476_vm9, %v16036_v0 }
 0x1ed   : > { %9527 = vst.msk [vmem:[%s17800_s6 + $0xd8] sm:$0x1] %vm9476_vm9, %v16036_v0  ;;  %9532 = vst.msk [vmem:[%s17800_s6 + $0xec] sm:$0x1] %vm9476_vm9, %v16036_v0 }
 0x1ee   : > { %9537 = vst.msk [vmem:[%s17800_s6 + $0x100] sm:$0x1] %vm9476_vm9, %v16036_v0  ;;  %9542 = vst.msk [vmem:[%s17800_s6 + $0x114] sm:$0x1] %vm9476_vm9, %v16036_v0 }
 0x1ef   : > { %9547 = vst.msk [vmem:[%s17800_s6 + $0x128] sm:$0x1] %vm9476_vm9, %v16036_v0  ;;  %9552 = vst.msk [vmem:[%s17800_s6 + $0x13c] sm:$0x1] %vm9476_vm9, %v16036_v0 }
 0x1f0   : > { %9557 = vst.msk [vmem:[%s17800_s6 + $0x150] sm:$0x1] %vm9476_vm9, %v16036_v0  ;;  %9562 = vst.msk [vmem:[%s17800_s6 + $0x164] sm:$0x1] %vm9476_vm9, %v16036_v0 }
 0x1f1   : > { %9567 = vst.msk [vmem:[%s17800_s6 + $0x178] sm:$0x1] %vm9476_vm9, %v16036_v0  ;;  %9572 = vst.msk [vmem:[%s17800_s6 + $0x18c] sm:$0x1] %vm9476_vm9, %v16036_v0 }
 0x1f2   : > { %9577 = vst.msk [vmem:[%s17800_s6 + $0x1a0] sm:$0x1] %vm9476_vm9, %v16036_v0  ;;  %9582 = vst.msk [vmem:[%s17800_s6 + $0x1b4] sm:$0x1] %vm9476_vm9, %v16036_v0 }
 0x1f3   : > { %9587 = vst.msk [vmem:[%s17800_s6 + $0x1c8] sm:$0x1] %vm9476_vm9, %v16036_v0  ;;  %9592 = vst.msk [vmem:[%s17800_s6 + $0x1dc] sm:$0x1] %vm9476_vm9, %v16036_v0 }
 0x1f4   : > { %9597 = vst.msk [vmem:[%s17800_s6 + $0x1f0] sm:$0x1] %vm9476_vm9, %v16036_v0  ;;  %9602 = vst.msk [vmem:[%s17800_s6 + $0x204] sm:$0x1] %vm9476_vm9, %v16036_v0 }
 0x1f5   : > { %9607 = vst.msk [vmem:[%s17800_s6 + $0x218] sm:$0x1] %vm9476_vm9, %v16036_v0  ;;  %9612 = vst.msk [vmem:[%s17800_s6 + $0x22c] sm:$0x1] %vm9476_vm9, %v16036_v0 }
 0x1f6   : > { %9617 = vst.msk [vmem:[%s17800_s6 + $0x240] sm:$0x1] %vm9476_vm9, %v16036_v0  ;;  %9622 = vst.msk [vmem:[%s17800_s6 + $0x254] sm:$0x1] %vm9476_vm9, %v16036_v0 }
 0x1f7   : > { %9627 = vst.msk [vmem:[%s17800_s6 + $0x268] sm:$0x1] %vm9476_vm9, %v16036_v0  ;;  %9632 = vst.msk [vmem:[%s17800_s6 + $0x27c] sm:$0x1] %vm9476_vm9, %v16036_v0 }
 0x1f8   : > { %9637 = vst.msk [vmem:[%s17800_s6 + $0x290] sm:$0x1] %vm9476_vm9, %v16036_v0  ;;  %9642 = vst.msk [vmem:[%s17800_s6 + $0x2a4] sm:$0x1] %vm9476_vm9, %v16036_v0 }
 0x1f9   : > { %9647 = vst.msk [vmem:[%s17800_s6 + $0x2b8] sm:$0x1] %vm9476_vm9, %v16036_v0  ;;  %22775 = vst [vmem:[#allocation35_spill] sm:$0xff] %v18377_v5  ;;  %v15943_v0 = vld [vmem:[%s16077_s20 + $0x1a0] sm:$0xff]  }
 0x1fa   : > { %v1748_v19 = vsel %vm1642_vm4, %v15943_v0, %v17789_v7  ;;  %22776 = vst [vmem:[#allocation36_spill] sm:$0xff] %v18395_v57  ;;  %v18408_v7 = vld [vmem:[%s16077_s20 + $0x130] sm:$0xff]   ;;  %v22779_v57 = vrot.slane %v18380_v43, 2  ;;  %22782 = vst [vmem:[#allocation38_spill] sm:$0xff] %v18427_v11  ;;  %v1966_v11 = vshrl.u32 %v17784_v45, 16  ;;  %v5102_v45 = vpop.permute.xlu1 %5101 }
 0x1fb   : > { %v18400_v39 = vsel %vm1779_vm5, %v1748_v19, %v1611_v27  ;;  %v4500_v27 = vor.u32 %v4498_v25, %v17795_v14  ;;  %v22783_v14 = vrot.slane %v17705_v49, 1 }
 0x1fc   : > { %22777 = vst [vmem:[#allocation37_spill] sm:$0xff] %v18400_v39  ;;  %v2200_v0 = vrot.slane %v18400_v39, 1  ;;  %v5587_v19 = vsel %vm5554_vm7, %v22780_v31, %v22779_v57  ;;  %v1336_v39 = vpop.permute.xlu0 %1335  ;;  %v4510_v57 = vshll.u32 %v18408_v7, 16  ;;  %v15944_v31 = vld [vmem:[%s16077_s20 + $0x1a8] sm:$0xff]  }
 0x1fd   : > { %15331 = vmatmul.mubr.msk.bf16.gmra.mrb[28].mxu0 %vm2243_vm6, %v5587_v19  ;;  %v4994_v25 = vsel %vm1368_vm0, %v22783_v14, %v4993_v18  ;;  %v1750_v19 = vsel %vm1642_vm4, %v15944_v31, %v1336_v39 }
 0x1fe   : > { %v2201_v5 = vsel %vm1368_vm0, %v22781_v62, %v2200_v0  ;;  %v18438_v62 = vpop.f32.mrb[25].mxu1  ;;  %v18445_v14 = vsel %vm1779_vm5, %v1750_v19, %v1613_v38  ;;  %5129 = vrot.lane.b32.xlu1 %v4994_v25, %s16033_s21  ;;  %v4508_v19 = vor.u32 %v4506_v20, %v4504_v44  ;;  %v4512_v38 = vrot.slane %v4510_v57, 1  ;;  %v18467_v57 = vld [vmem:[%s16077_s20 + $0x138] sm:$0xff]  }
 0x1ff   : > { %15123 = vmatmul.mubr.msk.bf16.gmra.mrb[96].mxu1 %vm2243_vm6, %v2201_v5  ;;  %22784 = vst [vmem:[#allocation39_spill] sm:$0xff] %v18438_v62  ;;  %v4505_v5 = vsel %vm680_vm1, %v4500_v27, %v4504_v44  ;;  %v18442_v49 = vpop.f32.mrb[26].mxu1  ;;  %22786 = vst [vmem:[#allocation41_spill] sm:$0xff] %v18445_v14  ;;  %v2202_v39 = vrot.slane %v18445_v14, 1  ;;  %v22788_v27 = vrot.slane %v17817_v1, 1  ;;  %v15945_v62 = vld [vmem:[%s16077_s20 + $0xa8] sm:$0xff]   ;;  %v1968_v44 = vor.u32 %v1966_v11, %v1964_v47 }
 0x200   : > { %22785 = vst [vmem:[#allocation40_spill] sm:$0xff] %v18442_v49  ;;  %v18451_v31 = vpop.f32.mrb[27].mxu1  ;;  %v1338_v4 = vpop.permute.xlu0 %1337  ;;  %v5240_v46 = vsel %vm1642_vm4, %v15945_v62, %v4824_v8  ;;  %4853 = vrot.lane.b32.xlu0 %v4505_v5, %s16034_s22  ;;  %v22789_v25 = vrot.slane %v17753_v6, 1  ;;  %v1972_v20 = vrot.slane %v1970_v21, 1  ;;  %v15946_v6 = vld [vmem:[%s16077_s20 + $0xb0] sm:$0xff]   ;;  %v22792_v11 = vrot.slane %v18380_v43, 2 }
 0x201   : > { %22787 = vst [vmem:[#allocation42_spill] sm:$0xff] %v18451_v31  ;;  %v4996_v49 = vsel %vm1368_vm0, %v4993_v18, %v22788_v27  ;;  %v2203_v14 = vsel %vm1368_vm0, %v2200_v0, %v2202_v39  ;;  %v5379_v31 = vsel %vm1779_vm5, %v5240_v46, %v5102_v45  ;;  %v18470_v5 = vpop.f32.mrb[28].mxu1  ;;  %v4513_v0 = vsel %vm680_vm1, %v4508_v19, %v4512_v38  ;;  %v5104_v21 = vpop.permute.xlu1 %5103 }
 0x202   : > { %15126 = vmatprep.mubr.msk.bf16.mxu1 %vm2243_vm6, %v2203_v14  ;;  %v1995_v18 = vsel %vm1368_vm0, %v22789_v25, %v1994_v13  ;;  %v5588_v8 = vrot.slane %v5379_v31, 2  ;;  %5131 = vrot.lane.b32.xlu1 %v4996_v49, %s16033_s21  ;;  %22790 = vst [vmem:[#allocation43_spill] sm:$0xff] %v18470_v5  ;;  %v18475_v14 = vld [vmem:[%s16077_s20 + $0x140] sm:$0xff]   ;;  %v18479_v47 = vpop.f32.mrb[29].mxu1  ;;  %v1974_v31 = vshrl.u32 %v18421_v51, 16  ;;  %v1973_v25 = vsel %vm680_vm1, %v1968_v44, %v1972_v20 }
 0x203   : > { %22791 = vst [vmem:[#allocation44_spill] sm:$0xff] %v18479_v47  ;;  %v18486_v19 = vpop.f32.mrb[30].mxu1  ;;  %v22796_v44 = vrot.slane %v18421_v51, 1  ;;  %v18509_v47 = vld [vmem:[%s16077_s20 + $0x148] sm:$0xff]  }
 0x204   : > { %v4826_v62 = vpop.permute.xlu0 %4825  ;;  %2002 = vrot.lane.b32.xlu0 %v1995_v18, %s16033_s21  ;;  %v5589_v49 = vsel %vm5554_vm7, %v22792_v11, %v5588_v8  ;;  %22793 = vst [vmem:[#allocation45_spill] sm:$0xff] %v18486_v19  ;;  %v4518_v18 = vshll.u32 %v18467_v57, 16  ;;  %v18498_v46 = vpop.f32.mrb[31].mxu1 }
 0x205   : > { %v5242_v27 = vsel %vm1642_vm4, %v15946_v6, %v4826_v62  ;;  %15334 = vmatprep.mubr.msk.bf16.mxu0 %vm2243_vm6, %v5589_v49  ;;  %v4514_v62 = vshrl.u32 %v18408_v7, 16  ;;  %v15947_v6 = vld [vmem:[%s16077_s20 + $0x1b0] sm:$0xff]   ;;  %22794 = vst [vmem:[#allocation46_spill] sm:$0xff] %v18498_v46  ;;  %v1997_v49 = vsel %vm1368_vm0, %v1994_v13, %v22796_v44  ;;  %v4828_v11 = vpop.permute.xlu1 %4827  ;;  %v1976_v46 = vor.u32 %v1974_v31, %v1972_v20  ;;  %v18527_v20 = vpop.f32.mrb[32].mxu1 }
 0x206   : > { %v18489_v45 = vsel %vm1779_vm5, %v5242_v27, %v5104_v21  ;;  %v1752_v43 = vsel %vm1642_vm4, %v15947_v6, %v1338_v4  ;;  %4855 = vrot.lane.b32.xlu1 %v4513_v0, %s16034_s22  ;;  %v4997_v27 = vrot.slane %v18408_v7, 1  ;;  %v4526_v4 = vshll.u32 %v18475_v14, 16  ;;  %v18519_v13 = vld [vmem:[%s16077_s20 + $0x150] sm:$0xff]   ;;  %22799 = vst [vmem:[#allocation48_spill] sm:$0xff] %v18527_v20 }
 0x207   : > { %v22797_v0 = vrot.slane %v18489_v45, 2  ;;  %v4530_v31 = vshrl.u32 %v18475_v14, 16  ;;  %v5244_v59 = vsel %vm1642_vm4, %v15949_v63, %v4828_v11  ;;  %v4538_v11 = vshrl.u32 %v18509_v47, 16 }
 0x208   : > { %v1615_v19 = vpop.permute.xlu0 %1614  ;;  %1983 = vrot.lane.b32.xlu0 %v1973_v25, %s16034_s22  ;;  %v22798_v25 = vrot.slane %v17817_v1, 1  ;;  %v18535_v1 = vpop.f32.mrb[33].mxu1 }
 0x209   : > { %v18503_v21 = vsel %vm1779_vm5, %v1752_v43, %v1615_v19  ;;  %v5591_v7 = vsel %vm5554_vm7, %v5588_v8, %v22797_v0  ;;  %v4516_v19 = vor.u32 %v4514_v62, %v4512_v38  ;;  %v4520_v43 = vrot.slane %v4518_v18, 1  ;;  %v15948_v18 = vld [vmem:[%s16077_s20 + $0x1b8] sm:$0xff]   ;;  %22800 = vst [vmem:[#allocation49_spill] sm:$0xff] %v18535_v1  ;;  %v1617_v0 = vpop.permute.xlu1 %1616 }
 0x20a   : > { %22795 = vst [vmem:[#allocation47_spill] sm:$0xff] %v18503_v21  ;;  %v2204_v6 = vrot.slane %v18503_v21, 1  ;;  %15335 = vmatmul.mubr.msk.bf16.gmra.mrb[32].mxu0 %vm2243_vm6, %v5591_v7  ;;  %2004 = vrot.lane.b32.xlu1 %v1997_v49, %s16033_s21  ;;  %v4998_v21 = vsel %vm1368_vm0, %v22798_v25, %v4997_v27  ;;  %v4528_v38 = vrot.slane %v4526_v4, 1  ;;  %v4534_v62 = vshll.u32 %v18509_v47, 16  ;;  %v18538_v7 = vpop.f32.mrb[34].mxu1  ;;  %v18545_v25 = vld [vmem:[%s16077_s20 + $0x158] sm:$0xff]  }
 0x20b   : > { %22801 = vst [vmem:[#allocation50_spill] sm:$0xff] %v18538_v7  ;;  %v4521_v4 = vsel %vm680_vm1, %v4516_v19, %v4520_v43  ;;  %v4542_v8 = vshll.u32 %v18519_v13, 16  ;;  %v5001_v19 = vrot.slane %v18475_v14, 1  ;;  %v4550_v63 = vshll.u32 %v18545_v25, 16 }
 0x20c   : > { %v1340_v44 = vpop.permute.xlu0 %1339  ;;  %v2205_v5 = vsel %vm1368_vm0, %v2202_v39, %v2204_v6  ;;  %v4522_v39 = vshrl.u32 %v18467_v57, 16  ;;  %1985 = vrot.lane.b32.xlu0 %v1976_v46, %s16034_s22  ;;  %v22804_v46 = vrot.slane %v18467_v57, 1  ;;  %v4532_v20 = vor.u32 %v4530_v31, %v4528_v38 }
 0x20d   : > { %15127 = vmatmul.mubr.msk.bf16.gmra.mrb[100].mxu1 %vm2243_vm6, %v2205_v5  ;;  %v1754_v49 = vsel %vm1642_vm4, %v15948_v18, %v1340_v44  ;;  %v18549_v18 = vpop.f32.mrb[35].mxu1  ;;  %v5106_v44 = vpop.permute.xlu1 %5105  ;;  %v4544_v31 = vrot.slane %v4542_v8, 1 }
 0x20e   : > { %v18541_v5 = vsel %vm1779_vm5, %v1754_v49, %v1617_v0  ;;  %22803 = vst [vmem:[#allocation52_spill] sm:$0xff] %v18549_v18  ;;  %5133 = vrot.lane.b32.xlu1 %v4998_v21, %s16033_s21  ;;  %v5000_v7 = vsel %vm1368_vm0, %v4997_v27, %v22804_v46  ;;  %v4536_v49 = vrot.slane %v4534_v62, 1  ;;  %v4524_v0 = vor.u32 %v4522_v39, %v4520_v43 }
 0x20f   : > { %22802 = vst [vmem:[#allocation51_spill] sm:$0xff] %v18541_v5  ;;  %v22805_v21 = vrot.slane %v18541_v5, 1  ;;  %v5003_v27 = vrot.slane %v18509_v47, 1  ;;  %v4546_v43 = vshrl.u32 %v18519_v13, 16  ;;  %v5383_v14 = vsel %vm1779_vm5, %v5244_v59, %v5106_v44  ;;  %v15950_v59 = vld [vmem:[%s16077_s20 + $0xc0] sm:$0xff]  }
 0x210   : > { %v1342_v1 = vpop.permute.xlu0 %1341  ;;  %4857 = vrot.lane.b32.xlu0 %v4521_v4, %s16034_s22  ;;  %v5592_v62 = vrot.slane %v5383_v14, 2  ;;  %v18572_v4 = vpop.f32.mrb[36].mxu1  ;;  %v4558_v46 = vshll.u32 %v18557_v9, 16  ;;  %v22808_v44 = vrot.slane %v18421_v51, 1  ;;  %v4529_v14 = vsel %vm680_vm1, %v4524_v0, %v4528_v38 }
 0x211   : > { %v2207_v18 = vsel %vm1368_vm0, %v2204_v6, %v22805_v21  ;;  %22806 = vst [vmem:[#allocation53_spill] sm:$0xff] %v18572_v4  ;;  %v4537_v6 = vsel %vm680_vm1, %v4532_v20, %v4536_v49  ;;  %v18577_v21 = vld [vmem:[%s16077_s20 + $0x170] sm:$0xff]   ;;  %v18581_v47 = vpop.f32.mrb[37].mxu1  ;;  %v5004_v4 = vsel %vm1368_vm0, %v5001_v19, %v5003_v27  ;;  %v4548_v51 = vor.u32 %v4546_v43, %v4544_v31 }
 0x212   : > { %15130 = vmatprep.mubr.msk.bf16.mxu1 %vm2243_vm6, %v2207_v18  ;;  %5135 = vrot.lane.b32.xlu1 %v5000_v7, %s16033_s21  ;;  %22807 = vst [vmem:[#allocation54_spill] sm:$0xff] %v18581_v47  ;;  %v5108_v7 = vpop.permute.xlu1 %5107  ;;  %v22809_v18 = vrot.slane %v18489_v45, 2  ;;  %v18594_v10 = vpop.f32.mrb[38].mxu1  ;;  %v18601_v47 = vld [vmem:[%s16077_s20 + $0x178] sm:$0xff]   ;;  %v18604_v45 = vld [vmem:[%s16077_s20 + $0x180] sm:$0xff]  }
 0x213   : > { %22810 = vst [vmem:[#allocation55_spill] sm:$0xff] %v18594_v10  ;;  %v18609_v35 = vpop.f32.mrb[39].mxu1  ;;  %v4590_v43 = vshll.u32 %v18604_v45, 16 }
 0x214   : > { %v4830_v39 = vpop.permute.xlu0 %4829  ;;  %2006 = vrot.lane.b32.xlu0 %v22808_v44, %s16033_s21  ;;  %v5593_v20 = vsel %vm5554_vm7, %v22809_v18, %v5592_v62  ;;  %v4540_v44 = vor.u32 %v4538_v11, %v4536_v49  ;;  %v15951_v18 = vld [vmem:[%s16077_s20 + $0x1c0] sm:$0xff]   ;;  %22811 = vst [vmem:[#allocation56_spill] sm:$0xff] %v18609_v35  ;;  %v4562_v11 = vshrl.u32 %v18557_v9, 16 }
 0x215   : > { %v5246_v8 = vsel %vm1642_vm4, %v15950_v59, %v4830_v39  ;;  %15338 = vmatprep.mubr.msk.bf16.mxu0 %vm2243_vm6, %v5593_v20  ;;  %v4552_v59 = vrot.slane %v4550_v63, 1  ;;  %v1756_v38 = vsel %vm1642_vm4, %v15951_v18, %v1342_v1  ;;  %v18617_v63 = vrot.slane %v4558_v46, 1 }
 0x216   : > { %v18597_v39 = vsel %vm1779_vm5, %v5246_v8, %v5108_v7  ;;  %4861 = vrot.lane.b32.xlu1 %v4537_v6, %s16034_s22  ;;  %v5005_v8 = vrot.slane %v18519_v13, 1  ;;  %v4574_v1 = vshll.u32 %v18577_v21, 16  ;;  %v4832_v20 = vpop.permute.xlu1 %4831  ;;  %v4566_v6 = vshll.u32 %v18592_v16, 16 }
 0x217   : > { %v22714_v0 = vrot.slane %v18597_v39, 2  ;;  %v22813_v46 = vrot.slane %v18467_v57, 1  ;;  %v22815_v57 = vrot.slane %v18545_v25, 1 }
 0x218   : > { %v1619_v10 = vpop.permute.xlu0 %1618  ;;  %4859 = vrot.lane.b32.xlu0 %v4529_v14, %s16034_s22  ;;  %v4582_v14 = vshll.u32 %v18601_v47, 16 }
 0x219   : > { %v18615_v49 = vsel %vm1779_vm5, %v1756_v38, %v1619_v10  ;;  %v5595_v13 = vsel %vm5554_vm7, %v5592_v62, %v22714_v0  ;;  %v4554_v10 = vshrl.u32 %v18545_v25, 16  ;;  %v5002_v18 = vsel %vm1368_vm0, %v22813_v46, %v5001_v19  ;;  %v18645_v46 = vld [vmem:[%s16077_s20 + $0x188] sm:$0xff]  }
 0x21a   : > { %22812 = vst [vmem:[#allocation57_spill] sm:$0xff] %v18615_v49  ;;  %v2208_v7 = vrot.slane %v18615_v49, 1  ;;  %15339 = vmatmul.mubr.msk.bf16.gmra.mrb[36].mxu0 %vm2243_vm6, %v5595_v13  ;;  %v4553_v38 = vsel %vm680_vm1, %v4548_v51, %v4552_v59  ;;  %v22814_v62 = vrot.slane %v18541_v5, 1  ;;  %5139 = vrot.lane.b32.xlu1 %v5004_v4, %s16033_s21  ;;  %v4545_v13 = vsel %vm680_vm1, %v4540_v44, %v4544_v31  ;;  %v18647_v49 = vpop.f32.mrb[40].mxu1  ;;  %v15952_v44 = vld [vmem:[%s16077_s20 + $0x1c8] sm:$0xff]  }
 0x21b   : > { %v5008_v19 = vsel %vm1368_vm0, %v5005_v8, %v22815_v57  ;;  %v5006_v51 = vsel %vm1368_vm0, %v5003_v27, %v5005_v8  ;;  %22816 = vst [vmem:[#allocation58_spill] sm:$0xff] %v18647_v49  ;;  %v4564_v5 = vor.u32 %v4562_v11, %v18617_v63  ;;  %v4578_v4 = vshrl.u32 %v18577_v21, 16  ;;  %v18655_v57 = vpop.f32.mrb[41].mxu1  ;;  %v1621_v27 = vpop.permute.xlu1 %1620 }
 0x21c   : > { %v1344_v35 = vpop.permute.xlu0 %1343  ;;  %v2209_v0 = vsel %vm1368_vm0, %v22814_v62, %v2208_v7  ;;  %v4576_v62 = vrot.slane %v4574_v1, 1  ;;  %v4570_v31 = vshrl.u32 %v18592_v16, 16  ;;  %22817 = vst [vmem:[#allocation59_spill] sm:$0xff] %v18655_v57  ;;  %5137 = vrot.lane.b32.xlu0 %v5002_v18, %s16033_s21  ;;  %v4568_v8 = vrot.slane %v4566_v6, 1  ;;  %v18662_v11 = vpop.f32.mrb[42].mxu1 }
 0x21d   : > { %15131 = vmatmul.mubr.msk.bf16.gmra.mrb[104].mxu1 %vm2243_vm6, %v2209_v0  ;;  %v1758_v56 = vsel %vm1642_vm4, %v15952_v44, %v1344_v35  ;;  %v4556_v50 = vor.u32 %v4554_v10, %v4552_v59  ;;  %v5009_v49 = vrot.slane %v18557_v9, 1  ;;  %v18660_v0 = vld [vmem:[%s16077_s20 + $0x190] sm:$0xff]   ;;  %22818 = vst [vmem:[#allocation60_spill] sm:$0xff] %v18662_v11  ;;  %v4584_v35 = vrot.slane %v4582_v14, 1  ;;  %v18669_v18 = vpop.f32.mrb[43].mxu1  ;;  %v15953_v14 = vld [vmem:[%s16077_s20 + $0xc8] sm:$0xff]  }
 0x21e   : > { %v18665_v1 = vsel %vm1779_vm5, %v1758_v56, %v1621_v27  ;;  %v4592_v44 = vrot.slane %v4590_v43, 1  ;;  %22820 = vst [vmem:[#allocation62_spill] sm:$0xff] %v18669_v18  ;;  %4865 = vrot.lane.b32.xlu1 %v4553_v38, %s16034_s22  ;;  %v4594_v9 = vshrl.u32 %v18604_v45, 16  ;;  %v4598_v6 = vshll.u32 %v18645_v46, 16 }
 0x21f   : > { %22819 = vst [vmem:[#allocation61_spill] sm:$0xff] %v18665_v1  ;;  %v4586_v10 = vshrl.u32 %v18601_v47, 16  ;;  %v4580_v56 = vor.u32 %v4578_v4, %v4576_v62  ;;  %v4572_v27 = vor.u32 %v4570_v31, %v4568_v8  ;;  %v5013_v16 = vrot.slane %v18577_v21, 1  ;;  %v5110_v18 = vpop.permute.xlu1 %5109 }
 0x220   : > { %v1346_v59 = vpop.permute.xlu0 %1345  ;;  %v22720_v43 = vrot.slane %v18601_v47, 1  ;;  %v5248_v57 = vsel %vm1642_vm4, %v15953_v14, %v4832_v20  ;;  %4863 = vrot.lane.b32.xlu0 %v4545_v13, %s16034_s22  ;;  %v22821_v38 = vrot.slane %v18665_v1, 1  ;;  %v4569_v33 = vsel %vm680_vm1, %v4564_v5, %v4568_v8  ;;  %v18699_v5 = vld [vmem:[%s16077_s20 + $0x1a0] sm:$0xff]  }
 0x221   : > { %v4606_v4 = vshll.u32 %v18660_v0, 16  ;;  %v5387_v21 = vsel %vm1779_vm5, %v5248_v57, %v5110_v18  ;;  %v4561_v20 = vsel %vm680_vm1, %v4556_v50, %v18617_v63  ;;  %v5012_v13 = vsel %vm1368_vm0, %v5009_v49, %v5011_v52 }
 0x222   : > { %v2211_v11 = vsel %vm1368_vm0, %v2208_v7, %v22821_v38  ;;  %v22822_v31 = vrot.slane %v18545_v25, 1  ;;  %v5596_v8 = vrot.slane %v5387_v21, 2  ;;  %5143 = vrot.lane.b32.xlu1 %v5008_v19, %s16033_s21  ;;  %v4596_v57 = vor.u32 %v4594_v9, %v4592_v44  ;;  %v18702_v38 = vpop.f32.mrb[44].mxu1  ;;  %v18717_v19 = vld [vmem:[%s16077_s20 + $0x1b0] sm:$0xff]  }
 0x223   : > { %15134 = vmatprep.mubr.msk.bf16.mxu1 %vm2243_vm6, %v2211_v11  ;;  %v4600_v11 = vrot.slane %v4598_v6, 1  ;;  %v4588_v18 = vor.u32 %v4586_v10, %v4584_v35  ;;  %22823 = vst [vmem:[#allocation63_spill] sm:$0xff] %v18702_v38  ;;  %v18705_v50 = vsel %vm680_vm1, %v4580_v56, %v4584_v35  ;;  %v18708_v63 = vsel %vm680_vm1, %v4572_v27, %v4576_v62  ;;  %v15954_v9 = vld [vmem:[%s16077_s20 + $0xd0] sm:$0xff]   ;;  %v18721_v10 = vpop.f32.mrb[45].mxu1  ;;  %v5112_v35 = vpop.permute.xlu1 %5111 }
 0x224   : > { %v18696_v7 = vsel %vm1368_vm0, %v22822_v31, %v5009_v49  ;;  %v4834_v14 = vpop.permute.xlu0 %4833  ;;  %v18713_v25 = vsel %vm1368_vm0, %v5013_v16, %v22720_v43  ;;  %v4610_v49 = vshrl.u32 %v18660_v0, 16  ;;  %22824 = vst [vmem:[#allocation64_spill] sm:$0xff] %v18721_v10  ;;  %5141 = vrot.lane.b32.xlu0 %v5006_v51, %s16033_s21  ;;  %v22825_v62 = vrot.slane %v18597_v39, 2  ;;  %v18728_v31 = vpop.f32.mrb[46].mxu1 }
 0x225   : > { %v5250_v6 = vsel %vm1642_vm4, %v15954_v9, %v4834_v14  ;;  %v4608_v27 = vrot.slane %v4606_v4, 1  ;;  %v4614_v21 = vshll.u32 %v18685_v61, 16  ;;  %22826 = vst [vmem:[#allocation65_spill] sm:$0xff] %v18728_v31  ;;  %v18735_v14 = vsel %vm1368_vm0, %v5011_v52, %v5013_v16  ;;  %v15955_v9 = vld [vmem:[%s16077_s20 + $0x1d0] sm:$0xff]   ;;  %v18742_v10 = vpop.f32.mrb[47].mxu1  ;;  %v18752_v16 = vld [vmem:[%s16077_s20 + $0x1a8] sm:$0xff]  }
 0x226   : > { %v5597_v56 = vsel %vm5554_vm7, %v22825_v62, %v5596_v8  ;;  %v18731_v43 = vsel %vm1779_vm5, %v5250_v6, %v5112_v35  ;;  %v4602_v51 = vshrl.u32 %v18645_v46, 16  ;;  %v4622_v39 = vshll.u32 %v18699_v5, 16  ;;  %22827 = vst [vmem:[#allocation66_spill] sm:$0xff] %v18742_v10  ;;  %4869 = vrot.lane.b32.xlu1 %v4569_v33, %s16034_s22 }
 0x227   : > { %15342 = vmatprep.mubr.msk.bf16.mxu0 %vm2243_vm6, %v5597_v56  ;;  %v1760_v4 = vsel %vm1642_vm4, %v15955_v9, %v1346_v59  ;;  %v22723_v62 = vrot.slane %v18731_v43, 2  ;;  %v18746_v6 = vsel %vm680_vm1, %v4596_v57, %v4600_v11  ;;  %v18749_v52 = vsel %vm680_vm1, %v4588_v18, %v4592_v44  ;;  %v18760_v9 = vld [vmem:[%s16077_s20 + $0x1b8] sm:$0xff]   ;;  %v4836_v44 = vpop.permute.xlu1 %4835 }
 0x228   : > { %v1623_v31 = vpop.permute.xlu0 %1622  ;;  %v5017_v59 = vrot.slane %v18604_v45, 1  ;;  %v4638_v33 = vshll.u32 %v18717_v19, 16  ;;  %4867 = vrot.lane.b32.xlu0 %v4561_v20, %s16034_s22  ;;  %v4604_v45 = vor.u32 %v4602_v51, %v4600_v11  ;;  %v5021_v56 = vrot.slane %v18660_v0, 1  ;;  %v18781_v0 = vpop.f32.mrb[48].mxu1 }
 0x229   : > { %v18755_v35 = vsel %vm1779_vm5, %v1760_v4, %v1623_v31  ;;  %v5599_v18 = vsel %vm5554_vm7, %v5596_v8, %v22723_v62  ;;  %v4612_v31 = vor.u32 %v4610_v49, %v4608_v27  ;;  %v4616_v4 = vrot.slane %v4614_v21, 1  ;;  %22830 = vst [vmem:[#allocation68_spill] sm:$0xff] %v18781_v0  ;;  %v18793_v10 = vpop.f32.mrb[49].mxu1 }
 0x22a   : > { %22828 = vst [vmem:[#allocation67_spill] sm:$0xff] %v18755_v35  ;;  %v2212_v57 = vrot.slane %v18755_v35, 1  ;;  %15343 = vmatmul.mubr.msk.bf16.gmra.mrb[40].mxu0 %vm2243_vm6, %v5599_v18  ;;  %v4624_v38 = vrot.slane %v4622_v39, 1  ;;  %v22829_v20 = vrot.slane %v18665_v1, 1  ;;  %5147 = vrot.lane.b32.xlu1 %v5012_v13, %s16033_s21  ;;  %v4626_v8 = vshrl.u32 %v18699_v5, 16  ;;  %22832 = vst [vmem:[#allocation69_spill] sm:$0xff] %v18793_v10 }
 0x22b   : > { %v4630_v49 = vshll.u32 %v18752_v16, 16  ;;  %v4618_v11 = vshrl.u32 %v18685_v61, 16  ;;  %v22831_v21 = vrot.slane %v18645_v46, 1  ;;  %v4640_v39 = vrot.slane %v4638_v33, 1  ;;  %v1625_v0 = vpop.permute.xlu1 %1624  ;;  %v18806_v55 = vpop.f32.mrb[50].mxu1 }
 0x22c   : > { %v1348_v35 = vpop.permute.xlu0 %1347  ;;  %v2213_v29 = vsel %vm1368_vm0, %v22829_v20, %v2212_v57  ;;  %v4642_v18 = vshrl.u32 %v18717_v19, 16  ;;  %v4646_v13 = vshll.u32 %v18760_v9, 16  ;;  %v15956_v20 = vld [vmem:[%s16077_s20 + $0x1d8] sm:$0xff]   ;;  %5145 = vrot.lane.b32.xlu0 %v18696_v7, %s16033_s21  ;;  %v18803_v33 = vsel %vm680_vm1, %v4612_v31, %v4616_v4  ;;  %22834 = vst [vmem:[#allocation70_spill] sm:$0xff] %v18806_v55 }
 0x22d   : > { %15135 = vmatmul.mubr.msk.bf16.gmra.mrb[108].mxu1 %vm2243_vm6, %v2213_v29  ;;  %v18787_v51 = vsel %vm1368_vm0, %v5017_v59, %v22831_v21  ;;  %v1762_v62 = vsel %vm1642_vm4, %v15956_v20, %v1348_v35  ;;  %v22833_v29 = vrot.slane %v18601_v47, 1  ;;  %v4634_v21 = vshrl.u32 %v18752_v16, 16  ;;  %v15957_v20 = vld [vmem:[%s16077_s20 + $0xd8] sm:$0xff]  }
 0x22e   : > { %v18809_v35 = vsel %vm1779_vm5, %v1762_v62, %v1625_v0  ;;  %v18812_v7 = vsel %vm680_vm1, %v4604_v45, %v4608_v27  ;;  %v22836_v47 = vrot.slane %v18685_v61, 1  ;;  %v4654_v31 = vshll.u32 %v18772_v2, 16  ;;  %4873 = vrot.lane.b32.xlu1 %v18705_v50, %s16034_s22 }
 0x22f   : > { %v18800_v1 = vsel %vm1368_vm0, %v22833_v29, %v5017_v59  ;;  %22835 = vst [vmem:[#allocation71_spill] sm:$0xff] %v18809_v35  ;;  %v18821_v29 = vpop.f32.mrb[51].mxu1  ;;  %v4628_v62 = vor.u32 %v4626_v8, %v4624_v38  ;;  %v4632_v0 = vrot.slane %v4630_v49, 1  ;;  %v4620_v27 = vor.u32 %v4618_v11, %v4616_v4  ;;  %v5114_v50 = vpop.permute.xlu1 %5113  ;;  %v18841_v11 = vld [vmem:[%s16077_s20 + $0x1d0] sm:$0xff]  }
 0x230   : > { %v18817_v59 = vsel %vm1368_vm0, %v5021_v56, %v22836_v47  ;;  %22837 = vst [vmem:[#allocation72_spill] sm:$0xff] %v18821_v29  ;;  %v1350_v55 = vpop.permute.xlu0 %1349  ;;  %v5025_v45 = vrot.slane %v18699_v5, 1  ;;  %v4644_v47 = vor.u32 %v4642_v18, %v4640_v39  ;;  %v18827_v34 = vrot.slane %v4646_v13, 1  ;;  %4871 = vrot.lane.b32.xlu0 %v18708_v63, %s16034_s22 }
 0x231   : > { %v5252_v29 = vsel %vm1642_vm4, %v15957_v20, %v4836_v44  ;;  %v22838_v8 = vrot.slane %v18809_v35, 1  ;;  %v4636_v5 = vor.u32 %v4634_v21, %v4632_v0  ;;  %v5029_v49 = vrot.slane %v18717_v19, 1 }
 0x232   : > { %v5391_v18 = vsel %vm1779_vm5, %v5252_v29, %v5114_v50  ;;  %v22728_v44 = vrot.slane %v18760_v9, 1  ;;  %v18846_v63 = vrot.slane %v4654_v31, 1  ;;  %v4658_v13 = vshrl.u32 %v18772_v2, 16  ;;  %5151 = vrot.lane.b32.xlu1 %v18713_v25, %s16033_s21  ;;  %v18863_v31 = vld [vmem:[%s16077_s20 + $0x1e0] sm:$0xff]   ;;  %v18865_v50 = vpop.f32.mrb[52].mxu1 }
 0x233   : > { %v2215_v4 = vsel %vm1368_vm0, %v2212_v57, %v22838_v8  ;;  %v5600_v20 = vrot.slane %v5391_v18, 2  ;;  %v22839_v19 = vrot.slane %v18645_v46, 1  ;;  %v18857_v21 = vsel %vm680_vm1, %v4628_v62, %v4632_v0  ;;  %22840 = vst [vmem:[#allocation73_spill] sm:$0xff] %v18865_v50  ;;  %v18883_v62 = vld [vmem:[%s16077_s20 + $0x1d8] sm:$0xff]   ;;  %v15958_v0 = vld [vmem:[%s16077_s20 + $0xe0] sm:$0xff]   ;;  %v18887_v18 = vpop.f32.mrb[53].mxu1 }
 0x234   : > { %15138 = vmatprep.mubr.msk.bf16.mxu1 %vm2243_vm6, %v2215_v4  ;;  %v4838_v10 = vpop.permute.xlu0 %4837  ;;  %v18860_v29 = vsel %vm680_vm1, %v4620_v27, %v4624_v38  ;;  %v22841_v8 = vrot.slane %v18752_v16, 1  ;;  %v22842_v46 = vrot.slane %v18685_v61, 1  ;;  %v4662_v38 = vshll.u32 %v18830_v54, 16  ;;  %22843 = vst [vmem:[#allocation74_spill] sm:$0xff] %v18887_v18  ;;  %5149 = vrot.lane.b32.xlu0 %v18735_v14, %s16033_s21  ;;  %v5116_v61 = vpop.permute.xlu1 %5115 }
 0x235   : > { %v18854_v57 = vsel %vm1368_vm0, %v22839_v19, %v5021_v56  ;;  %v18879_v56 = vsel %vm680_vm1, %v4644_v47, %v18827_v34  ;;  %v5254_v27 = vsel %vm1642_vm4, %v15958_v0, %v4838_v10  ;;  %v18895_v19 = vsel %vm680_vm1, %v4636_v5, %v4640_v39  ;;  %v15959_v39 = vld [vmem:[%s16077_s20 + $0x1e0] sm:$0xff]  }
 0x236   : > { %v18870_v4 = vsel %vm1368_vm0, %v5025_v45, %v22841_v8  ;;  %v18875_v25 = vsel %vm1368_vm0, %v22842_v46, %v5025_v45  ;;  %v22844_v45 = vrot.slane %v18731_v43, 2  ;;  %v4670_v8 = vshll.u32 %v18841_v11, 16  ;;  %v18898_v46 = vpop.f32.mrb[54].mxu1  ;;  %4877 = vrot.lane.b32.xlu1 %v18746_v6, %s16034_s22 }
 0x237   : > { %22845 = vst [vmem:[#allocation75_spill] sm:$0xff] %v18898_v46  ;;  %v18901_v10 = vsel %vm1779_vm5, %v5254_v27, %v5116_v61  ;;  %v18907_v14 = vsel %vm1368_vm0, %v5029_v49, %v22728_v44  ;;  %v4660_v43 = vor.u32 %v4658_v13, %v18846_v63  ;;  %v4650_v0 = vshrl.u32 %v18760_v9, 16  ;;  %v18914_v46 = vpop.f32.mrb[55].mxu1  ;;  %v18919_v61 = vld [vmem:[%s16077_s20 + $0x1e8] sm:$0xff]  }
 0x238   : > { %v5601_v47 = vsel %vm5554_vm7, %v22844_v45, %v5600_v20  ;;  %v1764_v5 = vsel %vm1642_vm4, %v15959_v39, %v1350_v55  ;;  %22846 = vst [vmem:[#allocation76_spill] sm:$0xff] %v18914_v46  ;;  %v1627_v27 = vpop.permute.xlu0 %1626  ;;  %v4664_v13 = vrot.slane %v4662_v38, 1  ;;  %v4674_v18 = vshrl.u32 %v18841_v11, 16  ;;  %4875 = vrot.lane.b32.xlu0 %v18749_v52, %s16034_s22  ;;  %v4840_v45 = vpop.permute.xlu1 %4839 }
 0x239   : > { %15346 = vmatprep.mubr.msk.bf16.mxu0 %vm2243_vm6, %v5601_v47  ;;  %v4686_v47 = vshll.u32 %v18863_v31, 16  ;;  %v18923_v44 = vsel %vm1779_vm5, %v1764_v5, %v1627_v27  ;;  %v4678_v55 = vshll.u32 %v18883_v62, 16  ;;  %v22848_v6 = vrot.slane %v18901_v10, 2 }
 0x23a   : > { %22847 = vst [vmem:[#allocation77_spill] sm:$0xff] %v18923_v44  ;;  %v2216_v39 = vrot.slane %v18923_v44, 1  ;;  %v4672_v50 = vrot.slane %v4670_v8, 1  ;;  %v22849_v38 = vrot.slane %v18752_v16, 1  ;;  %v4652_v27 = vor.u32 %v4650_v0, %v18827_v34  ;;  %5155 = vrot.lane.b32.xlu1 %v18787_v51, %s16033_s21  ;;  %v18950_v34 = vpop.f32.mrb[56].mxu1  ;;  %v18959_v51 = vld [vmem:[%s16077_s20 + $0x1f0] sm:$0xff]  }
 0x23b   : > { %v5603_v46 = vsel %vm5554_vm7, %v5600_v20, %v22848_v6  ;;  %v16037_v44 = vmov 1983009808   ;;  %v22850_v20 = vrot.slane %v18809_v35, 1  ;;  %v4690_v16 = vshrl.u32 %v18863_v31, 16  ;;  %22851 = vst [vmem:[#allocation78_spill] sm:$0xff] %v18950_v34  ;;  %v18963_v35 = vpop.f32.mrb[57].mxu1 }
 0x23c   : > { %15347 = vmatmul.mubr.msk.bf16.gmra.mrb[44].mxu0 %vm2243_vm6, %v5603_v46  ;;  %v18938_v5 = vsel %vm1368_vm0, %v22849_v38, %v5029_v49  ;;  %v7177_v52 = vunpack.c.l.s4 %v16037_v44  ;;  %v1352_v17 = vpop.permute.xlu0 %1351  ;;  %v18946_v46 = vrot.slane %v4686_v47, 1  ;;  %v4694_v49 = vshll.u32 %v18919_v61, 16  ;;  %v15960_v47 = vld [vmem:[%s16077_s20 + $0x1e8] sm:$0xff]   ;;  %22852 = vst [vmem:[#allocation79_spill] sm:$0xff] %v18963_v35  ;;  %5153 = vrot.lane.b32.xlu0 %v18800_v1, %s16033_s21 }
 0x23d   : > { %v2217_v8 = vsel %vm1368_vm0, %v22850_v20, %v2216_v39  ;;  %v18954_v44 = vsel %vm680_vm1, %v4660_v43, %v4664_v13  ;;  %v5033_v0 = vrot.slane %v18772_v2, 1  ;;  %v5035_v6 = vrot.slane %v18830_v54, 1  ;;  %v18968_v2 = vpop.f32.mrb[58].mxu1 }
 0x23e   : > { %15139 = vmatmul.mubr.msk.bf16.gmra.mrb[112].mxu1 %vm2243_vm6, %v2217_v8  ;;  %v4680_v38 = vrot.slane %v4678_v55, 1  ;;  %v1766_v20 = vsel %vm1642_vm4, %v15960_v47, %v1352_v17  ;;  %v1629_v8 = vpop.permute.xlu1 %1628  ;;  %v4676_v34 = vor.u32 %v4674_v18, %v4672_v50  ;;  %v4668_v43 = vor.u32 %v4666_v48, %v4664_v13  ;;  %22853 = vst [vmem:[#allocation80_spill] sm:$0xff] %v18968_v2  ;;  %v18975_v47 = vld [vmem:[%s16077_s20 + $0x200] sm:$0xff]   ;;  %v18978_v1 = vpop.f32.mrb[59].mxu1 }
 0x23f   : > { %v5037_v26 = vrot.slane %v18841_v11, 1  ;;  %v18971_v54 = vsel %vm1779_vm5, %v1766_v20, %v1629_v8  ;;  %v7178_v55 = vunpack.c.0.s8 %v7177_v52  ;;  %22855 = vst [vmem:[#allocation82_spill] sm:$0xff] %v18978_v1  ;;  %4881 = vrot.lane.b32.xlu1 %v18803_v33, %s16034_s22  ;;  %v4692_v48 = vor.u32 %v4690_v16, %v18946_v46  ;;  %v15961_v16 = vld [vmem:[%s16077_s20 + $0xe8] sm:$0xff]  }
 0x240   : > { %22854 = vst [vmem:[#allocation81_spill] sm:$0xff] %v18971_v54  ;;  %v22732_v35 = vrot.slane %v18971_v54, 1  ;;  %v1354_v18 = vpop.permute.xlu0 %1353  ;;  %v18983_v11 = vrot.slane %v4694_v49, 1  ;;  %v4682_v13 = vshrl.u32 %v18883_v62, 16  ;;  %v18988_v15 = vsel %vm680_vm1, %v4652_v27, %v18846_v63  ;;  %4879 = vrot.lane.b32.xlu0 %v18812_v7, %s16034_s22 }
 0x241   : > { %v18991_v52 = vsel %vm1368_vm0, %v5033_v0, %v5035_v6  ;;  %v22856_v20 = vrot.slane %v18760_v9, 1  ;;  %v4702_v33 = vshll.u32 %v18959_v51, 16  ;;  %v5256_v49 = vsel %vm1642_vm4, %v15961_v16, %v4840_v45 }
 0x242   : > { %v5118_v17 = vpop.permute.xlu1 %5117  ;;  %v2219_v63 = vsel %vm1368_vm0, %v2216_v39, %v22732_v35  ;;  %v19007_v27 = vsel %vm680_vm1, %v4676_v34, %v4680_v38  ;;  %v19010_v9 = vsel %vm680_vm1, %v4668_v43, %v4672_v50  ;;  %v22857_v7 = vrot.slane %v18883_v62, 1  ;;  %v19026_v34 = vld [vmem:[%s16077_s20 + $0x208] sm:$0xff]  }
 0x243   : > { %v18996_v8 = vsel %vm1368_vm0, %v22856_v20, %v5033_v0  ;;  %v19013_v0 = vld [vmem:[%s16077_s20 + $0x1f8] sm:$0xff]   ;;  %v5395_v20 = vsel %vm1779_vm5, %v5256_v49, %v5118_v17  ;;  %15142 = vmatprep.mubr.msk.bf16.mxu1 %vm2243_vm6, %v2219_v63  ;;  %v19023_v39 = vsel %vm1368_vm0, %v5035_v6, %v5037_v26  ;;  %v4718_v50 = vshll.u32 %v18975_v47, 16  ;;  %5159 = vrot.lane.b32.xlu1 %v18817_v59, %s16033_s21  ;;  %v15962_v59 = vld [vmem:[%s16077_s20 + $0xf0] sm:$0xff]  }
 0x244   : > { %v19020_v45 = vsel %vm1368_vm0, %v5037_v26, %v22857_v7  ;;  %v5604_v43 = vrot.slane %v5395_v20, 2  ;;  %v4842_v16 = vpop.permute.xlu0 %4841  ;;  %v19031_v17 = vsub.s32 %v7178_v55, %v7180_v60  ;;  %v19035_v49 = vsel %vm680_vm1, %v4692_v48, %v18983_v11  ;;  %v19038_v7 = vld [vmem:[%s16077_s20 + $0x210] sm:$0xff]   ;;  %v19040_v26 = vpop.f32.mrb[60].mxu1  ;;  %5157 = vrot.lane.b32.xlu0 %v18854_v57, %s16033_s21 }
 0x245   : > { %v4684_v63 = vor.u32 %v4682_v13, %v4680_v38  ;;  %22858 = vst [vmem:[#allocation83_spill] sm:$0xff] %v19040_v26  ;;  %v5041_v6 = vrot.slane %v18863_v31, 1  ;;  %v4704_v20 = vrot.slane %v4702_v33, 1  ;;  %v4706_v1 = vshrl.u32 %v18959_v51, 16  ;;  %v19047_v55 = vpop.f32.mrb[61].mxu1 }
 0x246   : > { %v5258_v60 = vsel %vm1642_vm4, %v15962_v59, %v4842_v16  ;;  %22859 = vst [vmem:[#allocation84_spill] sm:$0xff] %v19047_v55  ;;  %v5120_v38 = vpop.permute.xlu1 %5119  ;;  %v22860_v48 = vrot.slane %v18901_v10, 2  ;;  %v4710_v31 = vshll.u32 %v19013_v0, 16  ;;  %v4698_v33 = vshrl.u32 %v18919_v61, 16  ;;  %v19056_v35 = vpop.f32.mrb[62].mxu1  ;;  %v15963_v59 = vld [vmem:[%s16077_s20 + $0x1f0] sm:$0xff]  }
 0x247   : > { %22861 = vst [vmem:[#allocation85_spill] sm:$0xff] %v19056_v35  ;;  %v19059_v26 = vsel %vm1779_vm5, %v5258_v60, %v5120_v38  ;;  %v19062_v16 = vrot.slane %v4718_v50, 1  ;;  %v4722_v57 = vshrl.u32 %v18975_v47, 16  ;;  %v4726_v10 = vshll.u32 %v19026_v34, 16  ;;  %v19069_v2 = vpop.f32.mrb[63].mxu1  ;;  %4885 = vrot.lane.b32.xlu1 %v18857_v21, %s16034_s22  ;;  %v19078_v60 = vld [vmem:[%s16077_s20 + $0x218] sm:$0xff]  }
 0x248   : > { %v5605_v13 = vsel %vm5554_vm7, %v22860_v48, %v5604_v43  ;;  %v1768_v48 = vsel %vm1642_vm4, %v15963_v59, %v1354_v18  ;;  %22862 = vst [vmem:[#allocation86_spill] sm:$0xff] %v19069_v2  ;;  %v1631_v35 = vpop.permute.xlu0 %1630  ;;  %v19075_v50 = vsel %vm680_vm1, %v4684_v63, %v18946_v46  ;;  %v4734_v38 = vshll.u32 %v19038_v7, 16  ;;  %v19091_v21 = vld [vmem:[%s16077_s20 + $0x220] sm:$0xff]   ;;  %4883 = vrot.lane.b32.xlu0 %v18860_v29, %s16034_s22 }
 0x249   : > { %15350 = vmatprep.mubr.msk.bf16.mxu0 %vm2243_vm6, %v5605_v13  ;;  %v19082_v13 = vsel %vm1779_vm5, %v1768_v48, %v1631_v35  ;;  %v22864_v18 = vrot.slane %v18919_v61, 1  ;;  %v4708_v55 = vor.u32 %v4706_v1, %v4704_v20  ;;  %v4714_v2 = vshrl.u32 %v19013_v0, 16 }
 0x24a   : > { %22863 = vst [vmem:[#allocation87_spill] sm:$0xff] %v19082_v13  ;;  %v2220_v46 = vrot.slane %v19082_v13, 1  ;;  %v4844_v63 = vpop.permute.xlu1 %4843  ;;  %v22865_v35 = vrot.slane %v19059_v26, 2  ;;  %v4712_v3 = vrot.slane %v4710_v31, 1  ;;  %v5045_v1 = vrot.slane %v18959_v51, 1  ;;  %v19116_v31 = vpop.f32.mrb[64].mxu1 }
 0x24b   : > { %v19087_v59 = vsel %vm1368_vm0, %v5041_v6, %v22864_v18  ;;  %v4700_v18 = vor.u32 %v4698_v33, %v18983_v11  ;;  %v5047_v40 = vrot.slane %v19013_v0, 1  ;;  %v4724_v13 = vor.u32 %v4722_v57, %v19062_v16  ;;  %5163 = vrot.lane.b32.xlu1 %v18870_v4, %s16033_s21  ;;  %v19114_v0 = vld [vmem:[%s16077_s20 + $0x230] sm:$0xff]   ;;  %22867 = vst [vmem:[#allocation88_spill] sm:$0xff] %v19116_v31 }
 0x24c   : > { %v5607_v48 = vsel %vm5554_vm7, %v5604_v43, %v22865_v35  ;;  %v4728_v24 = vrot.slane %v4726_v10, 1  ;;  %v1356_v29 = vpop.permute.xlu0 %1355  ;;  %v22866_v28 = vrot.slane %v18971_v54, 1  ;;  %v19109_v43 = vrot.slane %v4734_v38, 1  ;;  %v15964_v10 = vld [vmem:[%s16077_s20 + $0x1f8] sm:$0xff]   ;;  %v19124_v35 = vpop.f32.mrb[65].mxu1  ;;  %5161 = vrot.lane.b32.xlu0 %v18875_v25, %s16033_s21 }
 0x24d   : > { %15351 = vmatmul.mubr.msk.bf16.gmra.mrb[48].mxu0 %vm2243_vm6, %v5607_v48  ;;  %v4738_v11 = vshrl.u32 %v19038_v7, 16  ;;  %v4742_v51 = vshll.u32 %v19078_v60, 16  ;;  %v4716_v33 = vor.u32 %v4714_v2, %v4712_v3  ;;  %v5049_v57 = vrot.slane %v18975_v47, 1  ;;  %22868 = vst [vmem:[#allocation89_spill] sm:$0xff] %v19124_v35 }
 0x24e   : > { %v2221_v30 = vsel %vm1368_vm0, %v22866_v28, %v2220_v46  ;;  %v4750_v4 = vshll.u32 %v19091_v21, 16  ;;  %v1770_v38 = vsel %vm1642_vm4, %v15964_v10, %v1356_v29  ;;  %v1633_v48 = vpop.permute.xlu1 %1632  ;;  %v22869_v31 = vrot.slane %v18883_v62, 1  ;;  %v19140_v28 = vld [vmem:[%s16077_s20 + $0x228] sm:$0xff]   ;;  %v19142_v29 = vpop.f32.mrb[66].mxu1 }
 0x24f   : > { %15143 = vmatmul.mubr.msk.bf16.gmra.mrb[116].mxu1 %vm2243_vm6, %v2221_v30  ;;  %v19134_v2 = vsel %vm680_vm1, %v4708_v55, %v4712_v3  ;;  %v19137_v47 = vsel %vm680_vm1, %v4700_v18, %v4704_v20  ;;  %22870 = vst [vmem:[#allocation90_spill] sm:$0xff] %v19142_v29  ;;  %v19145_v10 = vsel %vm1779_vm5, %v1770_v38, %v1633_v48  ;;  %v22871_v62 = vrot.slane %v18919_v61, 1  ;;  %v19157_v55 = vpop.f32.mrb[67].mxu1 }
 0x250   : > { %v19131_v30 = vsel %vm1368_vm0, %v22869_v31, %v5041_v6  ;;  %v19148_v25 = vsel %vm1368_vm0, %v5045_v1, %v5047_v40  ;;  %v4730_v6 = vshrl.u32 %v19026_v34, 16  ;;  %22872 = vst [vmem:[#allocation91_spill] sm:$0xff] %v19157_v55  ;;  %v1358_v18 = vpop.permute.xlu0 %1357  ;;  %4889 = vrot.lane.b32.xlu1 %v18879_v56, %s16034_s22  ;;  %v4740_v31 = vor.u32 %v4738_v11, %v19109_v43  ;;  %v19178_v56 = vld [vmem:[%s16077_s20 + $0x238] sm:$0xff]  }
 0x251   : > { %v19153_v3 = vsel %vm1368_vm0, %v22871_v62, %v5045_v1  ;;  %v4744_v38 = vrot.slane %v4742_v51, 1  ;;  %v4766_v48 = vshll.u32 %v19114_v0, 16  ;;  %v19164_v61 = vsel %vm680_vm1, %v4724_v13, %v4728_v24  ;;  %v15965_v11 = vld [vmem:[%s16077_s20 + $0xf8] sm:$0xff]   ;;  %4887 = vrot.lane.b32.xlu0 %v18895_v19, %s16034_s22 }
 0x252   : > { %v19168_v1 = vsel %vm680_vm1, %v4716_v33, %v19062_v16  ;;  %v22873_v62 = vrot.slane %v19026_v34, 1  ;;  %v19175_v55 = vrot.slane %v4750_v4, 1  ;;  %v5260_v51 = vsel %vm1642_vm4, %v15965_v11, %v4844_v63  ;;  %v5122_v13 = vpop.permute.xlu1 %5121 }
 0x253   : > { %v22875_v16 = vrot.slane %v19145_v10, 1  ;;  %v4754_v29 = vshrl.u32 %v19091_v21, 16  ;;  %v5399_v4 = vsel %vm1779_vm5, %v5260_v51, %v5122_v13  ;;  %v19192_v63 = vsel %vm1368_vm0, %v5047_v40, %v5049_v57  ;;  %v19202_v13 = vld [vmem:[%s16077_s20 + $0x240] ss:$0 sps:$4 sm:$0x77]  }
 0x254   : > { %v19173_v20 = vsel %vm1368_vm0, %v5049_v57, %v22873_v62  ;;  %v4758_v62 = vshll.u32 %v19140_v28, 16  ;;  %22876 = vst [vmem:[#allocation93_spill] sm:$0xff] %v19192_v63  ;;  %v4732_v11 = vor.u32 %v4730_v6, %v4728_v24  ;;  %v4746_v19 = vshrl.u32 %v19078_v60, 16  ;;  %v4846_v54 = vpop.permute.xlu0 %4845  ;;  %5167 = vrot.lane.b32.xlu1 %v18907_v14, %s16033_s21  ;;  %v15966_v6 = vld [vmem:[%s16077_s20 + $0x100] sm:$0xff]  }
 0x255   : > { %22874 = vst [vmem:[#allocation92_spill] sm:$0xff] %v19173_v20  ;;  %v2223_v33 = vsel %vm1368_vm0, %v2220_v46, %v22875_v16  ;;  %v5608_v35 = vrot.slane %v5399_v4, 2  ;;  %v19198_v46 = vsel %vm680_vm1, %v4740_v31, %v4744_v38  ;;  %v4768_v16 = vrot.slane %v4766_v48, 1  ;;  %5165 = vrot.lane.b32.xlu0 %v18938_v5, %s16033_s21  ;;  %v15967_v5 = vld [vmem:[%s16077_s20 + $0x200] sm:$0xff]  }
 0x256   : > { %15146 = vmatprep.mubr.msk.bf16.mxu1 %vm2243_vm6, %v2223_v33  ;;  %22877 = vst [vmem:[#allocation94_spill] sm:$0xff] %v19198_v46  ;;  %v4770_v51 = vshrl.u32 %v19114_v0, 16  ;;  %v5053_v33 = vrot.slane %v19038_v7, 1  ;;  %v5055_v24 = vrot.slane %v19078_v60, 1  ;;  %v4774_v40 = vshll.u32 %v19178_v56, 16  ;;  %v5124_v31 = vpop.permute.xlu1 %5123 }
 0x257   : > { %v4762_v57 = vshrl.u32 %v19140_v28, 16  ;;  %v5262_v14 = vsel %vm1642_vm4, %v15966_v6, %v4846_v54  ;;  %v22878_v48 = vrot.slane %v19059_v26, 2  ;;  %v4756_v7 = vor.u32 %v4754_v29, %v19175_v55 }
 0x258   : > { %v4760_v46 = vrot.slane %v4758_v62, 1  ;;  %v19217_v60 = vsel %vm1779_vm5, %v5262_v14, %v5124_v31  ;;  %v4748_v37 = vor.u32 %v4746_v19, %v4744_v38  ;;  %v5057_v54 = vrot.slane %v19091_v21, 1  ;;  %v1635_v20 = vpop.permute.xlu0 %1634  ;;  %4893 = vrot.lane.b32.xlu1 %v18954_v44, %s16034_s22  ;;  %v19229_v14 = vld [vmem:[%s16077_s20 + $0x220] ss:$0 sps:$4 sm:$0x11]  }
 0x259   : > { %v5609_v4 = vsel %vm5554_vm7, %v22878_v48, %v5608_v35  ;;  %v5059_v6 = vrot.slane %v19140_v28, 1  ;;  %v1772_v63 = vsel %vm1642_vm4, %v15967_v5, %v1358_v18  ;;  %v22736_v26 = vrot.slane %v19217_v60, 2  ;;  %4891 = vrot.lane.b32.xlu0 %v18988_v15, %s16034_s22  ;;  %v15968_v5 = vld [vmem:[%s16077_s20 + $0x208] sm:$0xff]  }
 0x25a   : > { %15354 = vmatprep.mubr.msk.bf16.mxu0 %vm2243_vm6, %v5609_v4  ;;  %v4772_v29 = vor.u32 %v4770_v51, %v4768_v16  ;;  %v4782_v62 = vshll.u32 %v19202_v13, 16  ;;  %v19232_v38 = vsel %vm1779_vm5, %v1772_v63, %v1635_v20  ;;  %v4776_v21 = vrot.slane %v4774_v40, 1  ;;  %v4848_v31 = vpop.permute.xlu1 %4847 }
 0x25b   : > { %v4764_v19 = vor.u32 %v4762_v57, %v4760_v46  ;;  %v4778_v28 = vshrl.u32 %v19178_v56, 16  ;;  %v2224_v18 = vrot.slane %v19232_v38, 1  ;;  %v5611_v44 = vsel %vm5554_vm7, %v5608_v35, %v22736_v26  ;;  %v15969_v26 = vld [vmem:[%s16077_s20 + $0x108] sm:$0xff]  }
 0x25c   : > { %v5061_v51 = vrot.slane %v19114_v0, 1  ;;  %v5063_v48 = vrot.slane %v19178_v56, 1  ;;  %15355 = vmatmul.mubr.msk.bf16.gmra.mrb[52].mxu0 %vm2243_vm6, %v5611_v44  ;;  %v19246_v20 = vsel %vm680_vm1, %v4732_v11, %v19109_v43  ;;  %v19249_v63 = vsel %vm1368_vm0, %v5053_v33, %v5055_v24  ;;  %v1360_v0 = vpop.permute.xlu0 %1359  ;;  %5171 = vrot.lane.b32.xlu1 %v18991_v52, %s16033_s21  ;;  %v15304_v44 = vpop.f32.mrb[0].mxu0 }
 0x25d   : > { %v22879_v15 = vrot.slane %v19026_v34, 1  ;;  %v19257_v35 = vsel %vm680_vm1, %v4756_v7, %v4760_v46  ;;  %v22880_v56 = vrot.slane %v19145_v10, 1  ;;  %v4784_v43 = vrot.slane %v4782_v62, 1  ;;  %5169 = vrot.lane.b32.xlu0 %v18996_v8, %s16033_s21 }
 0x25e   : > { %v4786_v11 = vshrl.u32 %v19202_v13, 16  ;;  %v1225_v4 = vshll.u32 %v19229_v14, 16  ;;  %v19269_v34 = vsel %vm680_vm1, %v4748_v37, %v19175_v55  ;;  %v19272_v46 = vsel %vm1368_vm0, %v5057_v54, %v5059_v6  ;;  %v1637_v62 = vpop.permute.xlu1 %1636  ;;  %v19284_v37 = vld [vmem:[%s22695_s2] ss:$0 sm:$0xff] }
 0x25f   : > { %v19254_v40 = vsel %vm1368_vm0, %v22879_v15, %v5053_v33  ;;  %v2225_v57 = vsel %vm1368_vm0, %v22880_v56, %v2224_v18  ;;  %v19275_v33 = vsel %vm1368_vm0, %v5055_v24, %v5057_v54  ;;  %v4780_v7 = vor.u32 %v4778_v28, %v4776_v21  ;;  %v5938_v15 = vpop.f32.mrb[1].mxu0 }
 0x260   : > { %15147 = vmatmul.mubr.msk.bf16.gmra.mrb[120].mxu1 %vm2243_vm6, %v2225_v57  ;;  %v1774_v52 = vsel %vm1642_vm4, %v15968_v5, %v1360_v0  ;;  %v19287_v55 = vsel %vm680_vm1, %v4772_v29, %v4776_v21  ;;  %v19290_v24 = vsel %vm680_vm1, %v4764_v19, %v4768_v16  ;;  %v19293_v54 = vsel %vm1368_vm0, %v5061_v51, %v5063_v48  ;;  %v19307_v16 = vld [vmem:[%s22696_s3] ss:$0 sm:$0xff]  ;;  %v1362_v21 = vpop.permute.xlu0 %1361 }
 0x261   : > { %v19296_v28 = vsel %vm1779_vm5, %v1774_v52, %v1637_v62  ;;  %v15440_v8 = vadd.f32 %v15304_v44, %v17526_v23  ;;  %v19300_v0 = vsel %vm1368_vm0, %v5059_v6, %v5061_v51  ;;  %v22737_v56 = vrot.slane %v19202_v13, 1  ;;  %4897 = vrot.lane.b32.xlu1 %v19007_v27, %s16034_s22  ;;  %v15305_v23 = vpop.f32.mrb[2].mxu0  ;;  %4895 = vrot.lane.b32.xlu0 %v19010_v9, %s16034_s22 }
 0x262   : > { %v2226_v29 = vrot.slane %v19296_v28, 1  ;;  %v15441_v19 = vadd.f32 %v5938_v15, %v17533_v36  ;;  %v19312_v57 = vor.u32 %v4786_v11, %v4784_v43  ;;  %v1227_v6 = vrot.slane %v1225_v4, 1  ;;  %v5941_v52 = vpop.f32.mrb[3].mxu0  ;;  %v5126_v11 = vpop.permute.xlu1 %5125 }
 0x263   : > { %v6626_v51 = vmul.f32 %v15440_v8, %v19284_v37  ;;  %v15442_v5 = vadd.f32 %v15305_v23, %v17544_v32  ;;  %v19317_v62 = vsel %vm680_vm1, %v4780_v7, %v4784_v43  ;;  %v1504_v44 = vrot.slane %v19229_v14, 1 }
 0x264   : > { %v5264_v36 = vsel %vm1642_vm4, %v15969_v26, %v4848_v31  ;;  %v6624_v15 = vmul.f32 %v15441_v19, %v19284_v37  ;;  %v15443_v27 = vadd.f32 %v5941_v52, %v17551_v12  ;;  %v2227_v32 = vsel %vm1368_vm0, %v2224_v18, %v2226_v29  ;;  %v4850_v31 = vpop.permute.xlu0 %4849  ;;  %v15970_v19 = vld [vmem:[%s16077_s20 + $0x210] sm:$0xff]  }
 0x265   : > { %v6769_v43 = vadd.f32 %v19307_v16, %v6626_v51  ;;  %v6627_v14 = vmul.f32 %v15442_v5, %v19284_v37  ;;  %v19332_v4 = vsel %vm1779_vm5, %v5264_v36, %v5126_v11  ;;  %15150 = vmatprep.mubr.msk.bf16.mxu1 %vm2243_vm6, %v2227_v32  ;;  %v19338_v9 = vsel %vm1368_vm0, %v5063_v48, %v22737_v56  ;;  %v15971_v36 = vld [vmem:[%s16077_s20 + $0x110] sm:$0xff]  }
 0x266   : > { %v6767_v12 = vadd.f32 %v19307_v16, %v6624_v15  ;;  %v6625_v26 = vmul.f32 %v15443_v27, %v19284_v37  ;;  %v22738_v18 = vrot.slane %v19332_v4, 2  ;;  %5175 = vrot.lane.b32.xlu1 %v19020_v45, %s16033_s21  ;;  %v19347_v7 = vsel %vm680_vm1, %v17814_v53, %v1227_v6  ;;  %5173 = vrot.lane.b32.xlu0 %v19023_v39, %s16033_s21  ;;  %v5128_v53 = vpop.permute.xlu1 %5127 }
 0x267   : > { %v6905_v8 = vmax.f32 %v6769_v43, 0.0  ;;  %v1776_v23 = vsel %vm1642_vm4, %v15970_v19, %v1362_v21  ;;  %v6770_v48 = vadd.f32 %v19307_v16, %v6627_v14  ;;  %v19354_v51 = vsel %vm1368_vm0, %v17773_v41, %v1504_v44 }
 0x268   : > { %v6903_v5 = vmax.f32 %v6767_v12, 0.0  ;;  %v6768_v52 = vadd.f32 %v19307_v16, %v6625_v26  ;;  %v5266_v45 = vsel %vm1642_vm4, %v15971_v36, %v4850_v31  ;;  %v22881_v21 = vrot.slane %v19217_v60, 2  ;;  %v1639_v14 = vpop.permute.xlu0 %1638 }
 0x269   : > { %v7209_v15 = vcombine.high %v6905_v8, %v6905_v8  ;;  %v7216_v41 = vrot.slane %v6905_v8, %v19031_v17  ;;  %v6906_v44 = vmax.f32 %v6770_v48, 0.0  ;;  %v19368_v27 = vsel %vm1779_vm5, %v5266_v45, %v5128_v53 }
 0x26a   : > { %v5613_v6 = vsel %vm5554_vm7, %v22881_v21, %v22738_v18  ;;  %v7175_v11 = vcombine.high %v6903_v5, %v6903_v5  ;;  %v7182_v32 = vrot.slane %v6903_v5, %v19031_v17  ;;  %v6904_v39 = vmax.f32 %v6768_v52, 0.0  ;;  %4901 = vrot.lane.b32.xlu1 %v19035_v49, %s16034_s22  ;;  %4899 = vrot.lane.b32.xlu0 %v19075_v50, %s16034_s22  ;;  %v4852_v5 = vpop.permute.xlu1 %4851 }
 0x26b   : > { %15358 = vmatprep.mubr.msk.bf16.mxu0 %vm2243_vm6, %v5613_v6  ;;  %v7223_v60 = vrot.slane %v7209_v15, %v19031_v17  ;;  %v7224_v12 = vcombine.high %v7216_v41, %v7216_v41  ;;  %v7226_v26 = vcombine.high %v6906_v44, %v6906_v44  ;;  %v7233_v31 = vrot.slane %v6906_v44, %v19031_v17 }
 0x26c   : > { %v7189_v8 = vrot.slane %v7175_v11, %v19031_v17  ;;  %v7190_v19 = vcombine.high %v7182_v32, %v7182_v32  ;;  %v7192_v48 = vcombine.high %v6904_v39, %v6904_v39  ;;  %v7199_v36 = vrot.slane %v6904_v39, %v19031_v17  ;;  %v1980_v56 = vpop.permute.xlu0 %1979 }
 0x26d   : > { %v7225_v52 = vcombine.high %v7223_v60, %v7223_v60  ;;  %v9682_v45 = vcombine.low %v7216_v41, %v7224_v12  ;;  %v7240_v49 = vrot.slane %v7226_v26, %v19031_v17  ;;  %v7241_v53 = vcombine.high %v7233_v31, %v7233_v31 }
 0x26e   : > { %v7191_v21 = vcombine.high %v7189_v8, %v7189_v8  ;;  %v9648_v6 = vcombine.low %v7182_v32, %v7190_v19  ;;  %v7206_v15 = vrot.slane %v7192_v48, %v19031_v17  ;;  %v7207_v44 = vcombine.high %v7199_v36, %v7199_v36  ;;  %5179 = vrot.lane.b32.xlu1 %v19087_v59, %s16033_s21  ;;  %v2001_v32 = vpop.permute.xlu1 %2000  ;;  %v15308_v19 = vpop.f32.mrb[4].mxu0 }
 0x26f   : > { %v9683_v11 = vcombine.low %v7223_v60, %v7225_v52  ;;  %v9690_v39 = vrot.slane %v9682_v45, %v19031_v17  ;;  %v7242_v50 = vcombine.high %v7240_v49, %v7240_v49  ;;  %v9699_v18 = vcombine.low %v7233_v31, %v7241_v53  ;;  %5177 = vrot.lane.b32.xlu0 %v19131_v30, %s16033_s21 }
 0x270   : > { %v9649_v43 = vcombine.low %v7189_v8, %v7191_v21  ;;  %v9656_v41 = vrot.slane %v9648_v6, %v19031_v17  ;;  %v7208_v12 = vcombine.high %v7206_v15, %v7206_v15  ;;  %v9665_v26 = vcombine.low %v7199_v36, %v7207_v44  ;;  %v5954_v8 = vpop.f32.mrb[5].mxu0  ;;  %v1982_v53 = vpop.permute.xlu0 %1981  ;;  %v15972_v6 = vld [vmem:[%s16077_s20 + $0x118] sm:$0xff]  }
 0x271   : > { %v9697_v59 = vrot.slane %v9683_v11, %v19031_v17  ;;  %v9700_v60 = vcombine.low %v7240_v49, %v7242_v50  ;;  %v9707_v48 = vrot.slane %v9699_v18, %v19031_v17  ;;  %v19392_v31 = vsel %vm1779_vm5, %v1776_v23, %v1639_v14  ;;  %v19399_v21 = vpop.f32.mrb[6].mxu0  ;;  %v15973_v14 = vld [vmem:[%s16077_s20 + $0x218] sm:$0xff]  }
 0x272   : > { %v9663_v52 = vrot.slane %v9649_v43, %v19031_v17  ;;  %v9666_v45 = vcombine.low %v7206_v15, %v7208_v12  ;;  %v9673_v36 = vrot.slane %v9665_v26, %v19031_v17  ;;  %v2228_v30 = vrot.slane %v19392_v31, 1  ;;  %4905 = vrot.lane.b32.xlu1 %v19134_v2, %s16034_s22  ;;  %v19408_v15 = vpop.f32.mrb[7].mxu0 }
 0x273   : > { %v9698_v49 = vcombine.low %v9690_v39, %v9697_v59  ;;  %v9714_v18 = vrot.slane %v9700_v60, %v19031_v17  ;;  %v19404_v23 = vsel %vm1642_vm4, %v15972_v6, %v4852_v5  ;;  %v2011_v43 = vsel %vm1642_vm4, %v15973_v14, %v1980_v56  ;;  %4903 = vrot.lane.b32.xlu0 %v19137_v47, %s16034_s22 }
 0x274   : > { %v9664_v44 = vcombine.low %v9656_v41, %v9663_v52  ;;  %v9680_v11 = vrot.slane %v9666_v45, %v19031_v17  ;;  %v2229_v2 = vsel %vm1368_vm0, %v2226_v29, %v2228_v30  ;;  %v22882_v39 = vrot.slane %v19368_v27, 2  ;;  %v19428_v29 = vpop.permute.xlu1 %5129  ;;  %v15974_v45 = vld [vmem:[%s16077_s20 + $0x220] sm:$0xff]  }
 0x275   : > { %v22883_v50 = vrot.slane %v19332_v4, 2  ;;  %v14691_v56 = vpack.c.bf16 %v9698_v49, %v9698_v49  ;;  %v9715_v41 = vcombine.low %v9707_v48, %v9714_v18  ;;  %15151 = vmatmul.mubr.msk.bf16.gmra.mrb[124].mxu1 %vm2243_vm6, %v2229_v2  ;;  %v19426_v12 = vsel %vm1779_vm5, %v2011_v43, %v2001_v32  ;;  %v19438_v32 = vpop.permute.xlu0 %4853 }
 0x276   : > { %v14689_v26 = vpack.c.bf16 %v9664_v44, %v9664_v44  ;;  %v9681_v4 = vcombine.low %v9673_v36, %v9680_v11  ;;  %v2230_v59 = vrot.slane %v19426_v12, 1  ;;  %v15444_v60 = vadd.f32 %v15308_v19, %v17593_v42  ;;  %5183 = vrot.lane.b32.xlu1 %v19148_v25, %s16033_s21 }
 0x277   : > { %v5615_v5 = vsel %vm5554_vm7, %v22883_v50, %v22882_v39  ;;  %v12357_v47 = vshrl.u32 %v14691_v56, 16  ;;  %v12360_v48 = vshll.u32 %v14691_v56, 16  ;;  %v14692_v52 = vpack.c.bf16 %v9715_v41, %v9715_v41  ;;  %5181 = vrot.lane.b32.xlu0 %v19153_v3, %s16033_s21 }
 0x278   : > { %15359 = vmatmul.mubr.msk.bf16.gmra.mrb[56].mxu0 %vm2243_vm6, %v5615_v5  ;;  %v19436_v49 = vsel %vm1642_vm4, %v15974_v45, %v1982_v53  ;;  %v12340_v18 = vshrl.u32 %v14689_v26, 16  ;;  %v12343_v6 = vshll.u32 %v14689_v26, 16  ;;  %v14690_v36 = vpack.c.bf16 %v9681_v4, %v9681_v4  ;;  %v14463_v5 = vld [vmem:[%s17800_s6 + $0x14] sm:$0xf]  ;;  %v5132_v41 = vpop.permute.xlu1 %5131 }
 0x279   : > { %v6630_v14 = vmul.f32 %v15444_v60, %v19284_v37  ;;  %v12359_v42 = vrot.slane %v12357_v47, 7  ;;  %v12366_v25 = vshrl.u32 %v14692_v52, 16  ;;  %v12369_v19 = vshll.u32 %v14692_v52, 16  ;;  %v14468_v60 = vld [vmem:[%s17800_s6 + $0x24] sm:$0x1] }
 0x27a   : > { %v15445_v43 = vadd.f32 %v5954_v8, %v17600_v58  ;;  %v12342_v44 = vrot.slane %v12340_v18, 7  ;;  %v12348_v11 = vshrl.u32 %v14690_v36, 16  ;;  %v12351_v2 = vshll.u32 %v14690_v36, 16  ;;  %4909 = vrot.lane.b32.xlu1 %v19164_v61, %s16034_s22  ;;  %v2003_v36 = vpop.permute.xlu0 %2002 }
 0x27b   : > { %v6773_v39 = vadd.f32 %v19307_v16, %v6630_v14  ;;  %v12362_v3 = vor.u32 %v12360_v48, %v12359_v42  ;;  %v12364_v50 = vrot.slane %v12359_v42, 4  ;;  %v12368_v8 = vrot.slane %v12366_v25, 7  ;;  %4907 = vrot.lane.b32.xlu0 %v19168_v1, %s16034_s22 }
 0x27c   : > { %v6628_v56 = vmul.f32 %v15445_v43, %v19284_v37  ;;  %v12345_v26 = vor.u32 %v12343_v6, %v12342_v44  ;;  %v12346_v4 = vrot.slane %v12342_v44, 4  ;;  %v12350_v47 = vrot.slane %v12348_v11, 7  ;;  %v22890_v44 = vld [vmem:[#allocation92_spill] sm:$0xff] }
 0x27d   : > { %v6909_v48 = vmax.f32 %v6773_v39, 0.0  ;;  %v12371_v52 = vor.u32 %v12369_v19, %v12368_v8  ;;  %v12373_v45 = vrot.slane %v12368_v8, 4  ;;  %v15446_v6 = vadd.f32 %v19399_v21, %v17605_v22  ;;  %v19496_v8 = vpop.f32.mrb[8].mxu0 }
 0x27e   : > { %v6771_v18 = vadd.f32 %v19307_v16, %v6628_v56  ;;  %v13624_v14 = vsel %vm19446_vm13, %v12345_v26, %v14463_v5  ;;  %v12353_v42 = vor.u32 %v12351_v2, %v12350_v47  ;;  %v12355_v25 = vrot.slane %v12350_v47, 4  ;;  %5187 = vrot.lane.b32.xlu1 %v22890_v44, %s16033_s21  ;;  %v22891_v5 = vld [vmem:[#allocation93_spill] sm:$0xff]  ;;  %v4856_v47 = vpop.permute.xlu1 %4855 }
 0x27f   : > { %v7277_v43 = vcombine.high %v6909_v48, %v6909_v48  ;;  %14464 = vst [vmem:[%s17800_s6 + $0x14] sm:$0xf] %v13624_v14  ;;  %v12372_v1 = vsel %vm19456_vm14, %v12364_v50, %v12371_v52  ;;  %v13632_v19 = vsel %vm19463_vm15, %v12373_v45, %v14468_v60  ;;  %v19483_v22 = vrot.slane %v6909_v48, %v19031_v17  ;;  %v19507_v48 = vpop.f32.mrb[9].mxu0 }
 0x280   : > { %v6907_v21 = vmax.f32 %v6771_v18, 0.0  ;;  %14467 = vst.msk [vmem:[%s17800_s6 + $0x20] sm:$0xf] %vm9471_vm8, %v12372_v1  ;;  %14469 = vst [vmem:[%s17800_s6 + $0x24] sm:$0x1] %v13632_v19  ;;  %v12354_v11 = vsel %vm19456_vm14, %v12346_v4, %v12353_v42  ;;  %v12363_v2 = vsel %vm19456_vm14, %v12355_v25, %v12362_v3  ;;  %v6631_v50 = vmul.f32 %v15446_v6, %v19284_v37  ;;  %v22892_v4 = vld [vmem:[#allocation16_spill] sm:$0xff]  ;;  %v1984_v19 = vpop.permute.xlu0 %1983 }
 0x281   : > { %v7291_v39 = vrot.slane %v7277_v43, %v19031_v17  ;;  %5185 = vrot.lane.b32.xlu0 %v22891_v5, %s16033_s21  ;;  %14465 = vst.msk [vmem:[%s17800_s6 + $0x18] sm:$0xf] %vm9471_vm8, %v12354_v11  ;;  %14466 = vst.msk [vmem:[%s17800_s6 + $0x1c] sm:$0xf] %vm9471_vm8, %v12363_v2  ;;  %v7292_v56 = vcombine.high %v19483_v22, %v19483_v22  ;;  %v15447_v60 = vadd.f32 %v19408_v15, %v22892_v4  ;;  %v15975_v6 = vld [vmem:[%s16077_s20 + $0x120] sm:$0xff]   ;;  %v19518_v25 = vpop.f32.mrb[10].mxu0 }
 0x282   : > { %v7243_v26 = vcombine.high %v6907_v21, %v6907_v21  ;;  %v7250_v3 = vrot.slane %v6907_v21, %v19031_v17  ;;  %v6774_v52 = vadd.f32 %v19307_v16, %v6631_v50  ;;  %v5407_v18 = vsel %vm1779_vm5, %v19404_v23, %v19428_v29  ;;  %v22893_v42 = vld [vmem:[#allocation94_spill] sm:$0xff]  ;;  %v19522_v21 = vpop.f32.mrb[11].mxu0 }
 0x283   : > { %v7293_v45 = vcombine.high %v7291_v39, %v7291_v39  ;;  %v5270_v14 = vsel %vm1642_vm4, %v15975_v6, %v19438_v32  ;;  %4913 = vrot.lane.b32.xlu1 %v22893_v42, %s16034_s22  ;;  %v9750_v15 = vcombine.low %v7292_v56, %v7291_v39  ;;  %v6629_v1 = vmul.f32 %v15447_v60, %v19284_v37  ;;  %v15867_v42 = vld [vmem:[%s16077_s20 + $0x230] ss:$0 sps:$4 sm:$0x11]  }
 0x284   : > { %v7257_v43 = vrot.slane %v7243_v26, %v19031_v17  ;;  %v7258_v44 = vcombine.high %v7250_v3, %v7250_v3  ;;  %v6910_v11 = vmax.f32 %v6774_v52, 0.0  ;;  %v5616_v23 = vrot.slane %v5407_v18, 2  ;;  %v2005_v18 = vpop.permute.xlu1 %2004 }
 0x285   : > { %v2231_v29 = vsel %vm1368_vm0, %v2228_v30, %v2230_v59  ;;  %v19530_v32 = vsel %vm1779_vm5, %v5270_v14, %v5132_v41  ;;  %4911 = vrot.lane.b32.xlu0 %v19246_v20, %s16034_s22  ;;  %v9758_v2 = vrot.slane %v9750_v15, %v19031_v17  ;;  %v6772_v50 = vadd.f32 %v19307_v16, %v6629_v1 }
 0x286   : > { %v9716_v39 = vcombine.low %v7258_v44, %v7257_v43  ;;  %v7259_v5 = vcombine.high %v7257_v43, %v7257_v43  ;;  %15154 = vmatprep.mubr.msk.bf16.mxu1 %vm2243_vm6, %v2231_v29  ;;  %v7294_v56 = vcombine.high %v6910_v11, %v6910_v11  ;;  %v7301_v26 = vrot.slane %v6910_v11, %v19031_v17  ;;  %v15977_v44 = vld [vmem:[%s16077_s20 + $0x228] sm:$0xff]   ;;  %v1986_v11 = vpop.permute.xlu0 %1985 }
 0x287   : > { %v5618_v30 = vrot.slane %v19530_v32, 2  ;;  %v19541_v41 = vsel %vm1779_vm5, %v19436_v49, %v2003_v36  ;;  %5191 = vrot.lane.b32.xlu1 %v19249_v63, %s16033_s21  ;;  %v6908_v3 = vmax.f32 %v6772_v50, 0.0  ;;  %v22894_v60 = vrot.slane %v19368_v27, 2  ;;  %v15976_v36 = vld [vmem:[%s16077_s20 + $0x128] sm:$0xff]  }
 0x288   : > { %v9724_v20 = vrot.slane %v9716_v39, %v19031_v17  ;;  %v2232_v4 = vrot.slane %v19541_v41, 1  ;;  %v19551_v6 = vrot.slane %v7294_v56, %v19031_v17  ;;  %v7309_v14 = vcombine.high %v7301_v26, %v7301_v26 }
 0x289   : > { %v5617_v52 = vsel %vm5554_vm7, %v22894_v60, %v5616_v23  ;;  %v9751_v49 = vcombine.low %v7293_v45, %v7301_v26  ;;  %v5272_v63 = vsel %vm1642_vm4, %v15976_v36, %v4856_v47  ;;  %v7260_v15 = vcombine.high %v6908_v3, %v6908_v3  ;;  %5189 = vrot.lane.b32.xlu0 %v19254_v40, %s16033_s21  ;;  %v22895_v26 = vld [vmem:[#allocation18_spill] sm:$0xff] }
 0x28a   : > { %15362 = vmatprep.mubr.msk.bf16.mxu0 %vm2243_vm6, %v5617_v52  ;;  %v7267_v43 = vrot.slane %v6908_v3, %v19031_v17  ;;  %v2015_v27 = vsel %vm1642_vm4, %v15977_v44, %v1984_v19  ;;  %v2233_v1 = vsel %vm1368_vm0, %v2230_v59, %v2232_v4  ;;  %v19569_v47 = vcombine.low %v7309_v14, %v19551_v6 }
 0x28b   : > { %v9765_v45 = vrot.slane %v9751_v49, %v19031_v17  ;;  %15155 = vmatmul.mubr.msk.bf16.gmra.mrb[128].mxu1 %vm2243_vm6, %v2233_v1  ;;  %v5619_v19 = vsel %vm5554_vm7, %v5616_v23, %v5618_v30  ;;  %v19576_v29 = vsel %vm1779_vm5, %v2015_v27, %v2005_v18  ;;  %v7274_v12 = vrot.slane %v7260_v15, %v19031_v17  ;;  %v22896_v18 = vld [vmem:[#allocation19_spill] sm:$0xff] }
 0x28c   : > { %v7275_v59 = vcombine.high %v7267_v43, %v7267_v43  ;;  %v9717_v39 = vcombine.low %v7259_v5, %v7267_v43  ;;  %15363 = vmatmul.mubr.msk.bf16.gmra.mrb[60].mxu0 %vm2243_vm6, %v5619_v19  ;;  %v2234_v40 = vrot.slane %v19576_v29, 1  ;;  %4917 = vrot.lane.b32.xlu1 %v19257_v35, %s16034_s22  ;;  %v9775_v56 = vrot.slane %v19569_v47, %v19031_v17  ;;  %v22898_v19 = vld [vmem:[#allocation22_spill] sm:$0xff] }
 0x28d   : > { %v9766_v50 = vcombine.low %v9758_v2, %v9765_v45  ;;  %v15448_v23 = vadd.f32 %v19496_v8, %v22895_v26  ;;  %v19588_v3 = vsel %vm1642_vm4, %v15867_v42, %v1986_v11  ;;  %v7276_v60 = vcombine.high %v7274_v12, %v7274_v12  ;;  %4915 = vrot.lane.b32.xlu0 %v19269_v34, %s16034_s22  ;;  %v22897_v8 = vld [vmem:[#allocation20_spill] sm:$0xff]  ;;  %v19607_v11 = vpop.permute.xlu0 %4857 }
 0x28e   : > { %v9731_v5 = vrot.slane %v9717_v39, %v19031_v17  ;;  %v9733_v52 = vcombine.low %v7275_v59, %v7274_v12  ;;  %v15449_v14 = vadd.f32 %v19507_v48, %v22896_v18  ;;  %v7310_v49 = vcombine.high %v19551_v6, %v19551_v6  ;;  %v5134_v48 = vpop.permute.xlu1 %5133 }
 0x28f   : > { %v14695_v35 = vpack.c.bf16 %v9766_v50, %v9766_v50  ;;  %v6634_v2 = vmul.f32 %v15448_v23, %v19284_v37  ;;  %v15450_v36 = vadd.f32 %v19518_v25, %v22897_v8  ;;  %v9734_v15 = vcombine.low %v7276_v60, %v19483_v22  ;;  %v19609_v25 = vpop.f32.mrb[12].mxu0 }
 0x290   : > { %v9732_v42 = vcombine.low %v9724_v20, %v9731_v5  ;;  %v9741_v43 = vrot.slane %v9733_v52, %v19031_v17  ;;  %v6632_v44 = vmul.f32 %v15449_v14, %v19284_v37  ;;  %5195 = vrot.lane.b32.xlu1 %v19272_v46, %s16033_s21  ;;  %v15451_v12 = vadd.f32 %v19522_v21, %v22898_v19  ;;  %v19617_v46 = vpop.f32.mrb[13].mxu0 }
 0x291   : > { %v12392_v34 = vshrl.u32 %v14695_v35, 16  ;;  %v12395_v27 = vshll.u32 %v14695_v35, 16  ;;  %v6777_v1 = vadd.f32 %v19307_v16, %v6634_v2  ;;  %v6635_v6 = vmul.f32 %v15450_v36, %v19284_v37  ;;  %5193 = vrot.lane.b32.xlu0 %v19275_v33, %s16033_s21  ;;  %v19625_v23 = vpop.f32.mrb[14].mxu0 }
 0x292   : > { %v9748_v22 = vrot.slane %v9734_v15, %v19031_v17  ;;  %v14693_v20 = vpack.c.bf16 %v9732_v42, %v9732_v42  ;;  %v6775_v45 = vadd.f32 %v19307_v16, %v6632_v44  ;;  %v19623_v26 = vsel %vm1779_vm5, %v5272_v63, %v5134_v48  ;;  %v19629_v33 = vpop.f32.mrb[15].mxu0  ;;  %v19635_v15 = vpop.permute.xlu1 %5135 }
 0x293   : > { %v19619_v59 = vrot.slane %v12392_v34, 7  ;;  %v6913_v39 = vmax.f32 %v6777_v1, 0.0  ;;  %v6778_v50 = vadd.f32 %v19307_v16, %v6635_v6  ;;  %v6633_v34 = vmul.f32 %v15451_v12, %v19284_v37 }
 0x294   : > { %v9749_v60 = vcombine.low %v9741_v43, %v9748_v22  ;;  %v12375_v5 = vshrl.u32 %v14693_v20, 16  ;;  %v12378_v52 = vshll.u32 %v14693_v20, 16  ;;  %v6911_v21 = vmax.f32 %v6775_v45, 0.0  ;;  %4921 = vrot.lane.b32.xlu1 %v19287_v55, %s16034_s22  ;;  %v14470_v55 = vld [vmem:[%s17800_s6 + $0x28] sm:$0xf] }
 0x295   : > { %v12397_v18 = vor.u32 %v12395_v27, %v19619_v59  ;;  %v12399_v14 = vrot.slane %v19619_v59, 4  ;;  %v7344_v35 = vcombine.high %v6913_v39, %v6913_v39  ;;  %v7351_v63 = vrot.slane %v6913_v39, %v19031_v17  ;;  %4919 = vrot.lane.b32.xlu0 %v19290_v24, %s16034_s22  ;;  %v2007_v27 = vpop.permute.xlu0 %2006 }
 0x296   : > { %v14694_v2 = vpack.c.bf16 %v9749_v60, %v9749_v60  ;;  %v12377_v8 = vrot.slane %v12375_v5, 7  ;;  %v7311_v36 = vcombine.high %v6911_v21, %v6911_v21  ;;  %v7318_v42 = vrot.slane %v6911_v21, %v19031_v17 }
 0x297   : > { %v7358_v43 = vrot.slane %v7344_v35, %v19031_v17  ;;  %v7359_v44 = vcombine.high %v7351_v63, %v7351_v63  ;;  %v6914_v48 = vmax.f32 %v6778_v50, 0.0 }
 0x298   : > { %v12380_v1 = vor.u32 %v12378_v52, %v12377_v8  ;;  %v12381_v6 = vrot.slane %v12377_v8, 4  ;;  %v12383_v22 = vshrl.u32 %v14694_v2, 16  ;;  %v12386_v20 = vshll.u32 %v14694_v2, 16  ;;  %5199 = vrot.lane.b32.xlu1 %v19293_v54, %s16033_s21 }
 0x299   : > { %v7360_v45 = vcombine.high %v7358_v43, %v7358_v43  ;;  %v19644_v19 = vcombine.low %v7351_v63, %v7359_v44  ;;  %v7325_v24 = vrot.slane %v7311_v36, %v19031_v17  ;;  %v9768_v39 = vcombine.low %v7310_v49, %v7318_v42  ;;  %5197 = vrot.lane.b32.xlu0 %v19300_v0, %s16033_s21  ;;  %v4862_v36 = vpop.permute.xlu1 %4861  ;;  %v4860_v44 = vpop.permute.xlu0 %4859 }
 0x29a   : > { %v12385_v60 = vrot.slane %v12383_v22, 7  ;;  %v13635_v50 = vsel %vm19446_vm13, %v12380_v1, %v14470_v55  ;;  %v7361_v12 = vcombine.high %v6914_v48, %v6914_v48  ;;  %v7368_v5 = vrot.slane %v6914_v48, %v19031_v17 }
 0x29b   : > { %14471 = vst [vmem:[%s17800_s6 + $0x28] sm:$0xf] %v13635_v50  ;;  %v9816_v54 = vrot.slane %v19644_v19, %v19031_v17  ;;  %v9818_v52 = vcombine.low %v7358_v43, %v7360_v45  ;;  %v7326_v21 = vcombine.high %v7325_v24, %v7325_v24  ;;  %v9782_v35 = vrot.slane %v9768_v39, %v19031_v17 }
 0x29c   : > { %v12388_v63 = vor.u32 %v12386_v20, %v12385_v60  ;;  %v12390_v49 = vrot.slane %v12385_v60, 4  ;;  %v7375_v2 = vrot.slane %v7361_v12, %v19031_v17  ;;  %v7376_v8 = vcombine.high %v7368_v5, %v7368_v5  ;;  %4925 = vrot.lane.b32.xlu1 %v19312_v57, %s16034_s22 }
 0x29d   : > { %v9826_v0 = vrot.slane %v9818_v52, %v19031_v17  ;;  %v9783_v42 = vcombine.low %v9775_v56, %v9782_v35  ;;  %v19663_v55 = vcombine.low %v7325_v24, %v7326_v21  ;;  %v6776_v43 = vadd.f32 %v19307_v16, %v6633_v34  ;;  %4923 = vrot.lane.b32.xlu0 %v19317_v62, %s16034_s22  ;;  %v5140_v52 = vpop.permute.xlu1 %5139 }
 0x29e   : > { %v12389_v48 = vsel %vm19456_vm14, %v12381_v6, %v12388_v63  ;;  %v12398_v1 = vsel %vm19456_vm14, %v12390_v49, %v12397_v18  ;;  %v7377_v22 = vcombine.high %v7375_v2, %v7375_v2  ;;  %v9819_v57 = vcombine.low %v7368_v5, %v7376_v8  ;;  %v15978_v18 = vld [vmem:[%s16077_s20 + $0x130] sm:$0xff]   ;;  %v19695_v5 = vpop.f32.mrb[16].mxu0  ;;  %v5138_v8 = vpop.permute.xlu0 %5137 }
 0x29f   : > { %14472 = vst.msk [vmem:[%s17800_s6 + $0x2c] sm:$0xf] %vm9471_vm8, %v12389_v48  ;;  %14473 = vst.msk [vmem:[%s17800_s6 + $0x30] sm:$0xf] %vm9471_vm8, %v12398_v1  ;;  %v9792_v47 = vrot.slane %v19663_v55, %v19031_v17  ;;  %v14696_v56 = vpack.c.bf16 %v9783_v42, %v9783_v42  ;;  %v6912_v34 = vmax.f32 %v6776_v43, 0.0  ;;  %v5620_v20 = vrot.slane %v19623_v26, 2 }
 0x2a0   : > { %v9833_v6 = vrot.slane %v9819_v57, %v19031_v17  ;;  %v19680_v45 = vcombine.low %v7375_v2, %v7377_v22  ;;  %v5274_v24 = vsel %vm1642_vm4, %v15978_v18, %v19607_v11  ;;  %v2235_v62 = vsel %vm1368_vm0, %v2232_v4, %v2234_v40  ;;  %v19707_v21 = vpop.f32.mrb[17].mxu0 }
 0x2a1   : > { %v22899_v39 = vrot.slane %v19202_v13, 1  ;;  %v12401_v60 = vshrl.u32 %v14696_v56, 16  ;;  %v12404_v26 = vshll.u32 %v14696_v56, 16  ;;  %v7327_v50 = vcombine.high %v6912_v34, %v6912_v34  ;;  %15158 = vmatprep.mubr.msk.bf16.mxu1 %vm2243_vm6, %v2235_v62  ;;  %5201 = vrot.lane.b32.xlu0 %v19338_v9, %s16033_s21  ;;  %v15979_v9 = vld [vmem:[%s16077_s20 + $0x140] sm:$0xff]  }
 0x2a2   : > { %v7334_v12 = vrot.slane %v6912_v34, %v19031_v17  ;;  %v9834_v11 = vcombine.low %v9826_v0, %v9833_v6  ;;  %v9843_v41 = vrot.slane %v19680_v45, %v19031_v17  ;;  %v19701_v4 = vsel %vm1779_vm5, %v5274_v24, %v19635_v15  ;;  %v19711_v0 = vpop.f32.mrb[18].mxu0  ;;  %v14475_v15 = vld [vmem:[%s17800_s6 + $0x38] sm:$0x1] }
 0x2a3   : > { %5203 = vrot.lane.b32.xlu1 %v22899_v39, %s16033_s21  ;;  %v2028_v13 = vsel %vm1779_vm5, %v19588_v3, %v2007_v27  ;;  %v12403_v35 = vrot.slane %v12401_v60, 7  ;;  %v7341_v63 = vrot.slane %v7327_v50, %v19031_v17  ;;  %v5622_v2 = vrot.slane %v19701_v4, 2  ;;  %v19721_v43 = vpop.f32.mrb[19].mxu0  ;;  %v15980_v34 = vld [vmem:[%s16077_s20 + $0x138] sm:$0xff]   ;;  %v4864_v50 = vpop.permute.xlu0 %4863 }
 0x2a4   : > { %v7342_v49 = vcombine.high %v7334_v12, %v7334_v12  ;;  %v14699_v42 = vpack.c.bf16 %v9834_v11, %v9834_v11  ;;  %v2236_v55 = vrot.slane %v2028_v13, 1  ;;  %v5621_v3 = vsel %vm5554_vm7, %v5618_v30, %v5620_v20 }
 0x2a5   : > { %v5278_v27 = vsel %vm1642_vm4, %v15979_v9, %v4862_v36  ;;  %v12406_v48 = vor.u32 %v12404_v26, %v12403_v35  ;;  %v12408_v1 = vrot.slane %v12403_v35, 4  ;;  %v7343_v22 = vcombine.high %v7341_v63, %v7341_v63  ;;  %15366 = vmatprep.mubr.msk.bf16.mxu0 %vm2243_vm6, %v5621_v3  ;;  %1363 = vrot.lane.b32.xlu0 %v19347_v7, %s16034_s22  ;;  %v4866_v26 = vpop.permute.xlu1 %4865  ;;  %v22902_v35 = vld [vmem:[#allocation24_spill] sm:$0xff] }
 0x2a6   : > { %v9785_v57 = vcombine.low %v7334_v12, %v7342_v49  ;;  %v12427_v56 = vshrl.u32 %v14699_v42, 16  ;;  %v12430_v32 = vshll.u32 %v14699_v42, 16  ;;  %v5276_v30 = vsel %vm1642_vm4, %v15980_v34, %v4860_v44  ;;  %v22903_v49 = vld [vmem:[#allocation25_spill] sm:$0xff]  ;;  %v22904_v42 = vld [vmem:[#allocation26_spill] sm:$0xff]  ;;  %v15981_v3 = vld [vmem:[%s16077_s20 + $0x150] sm:$0xff]  }
 0x2a7   : > { %1640 = vrot.lane.b32.xlu1 %v19354_v51, %s16033_s21  ;;  %v2237_v36 = vsel %vm1368_vm0, %v2234_v40, %v2236_v55  ;;  %v12407_v51 = vsel %vm19456_vm14, %v12399_v14, %v12406_v48  ;;  %v13641_v6 = vsel %vm19463_vm15, %v12408_v1, %v14475_v15  ;;  %v9801_v24 = vcombine.low %v7341_v63, %v7343_v22  ;;  %v22900_v40 = vld [vmem:[#allocation2_spill] sm:$0xff]  ;;  %v22901_v14 = vld [vmem:[#allocation23_spill] sm:$0xff] }
 0x2a8   : > { %v9799_v18 = vrot.slane %v9785_v57, %v19031_v17  ;;  %15159 = vmatmul.mubr.msk.bf16.gmra.mrb[132].mxu1 %vm2243_vm6, %v2237_v36  ;;  %14474 = vst.msk [vmem:[%s17800_s6 + $0x34] sm:$0xf] %vm9471_vm8, %v12407_v51  ;;  %14476 = vst [vmem:[%s17800_s6 + $0x38] sm:$0x1] %v13641_v6  ;;  %v19742_v29 = vrot.slane %v12427_v56, 7  ;;  %v5623_v7 = vsel %vm5554_vm7, %v5620_v20, %v5622_v2  ;;  %v22905_v36 = vld [vmem:[#allocation4_spill] sm:$0xff] }
 0x2a9   : > { %15232 = vmatprep.mubr.msk.bf16.mxu1 %vm2243_vm6, %v22900_v40  ;;  %v19750_v59 = vsel %vm1779_vm5, %v5278_v27, %v5140_v52  ;;  %v15452_v44 = vadd.f32 %v19609_v25, %v22901_v14  ;;  %v9809_v39 = vrot.slane %v9801_v24, %v19031_v17  ;;  %15367 = vmatmul.mubr.msk.bf16.gmra.mrb[64].mxu0 %vm2243_vm6, %v5623_v7  ;;  %v15982_v27 = vld [vmem:[%s16077_s20 + $0x148] sm:$0xff]   ;;  %v5144_v51 = vpop.permute.xlu1 %5143  ;;  %v14477_v6 = vld [vmem:[%s17800_s6 + $0x3c] sm:$0xf]  ;;  %v5142_v7 = vpop.permute.xlu0 %5141 }
 0x2aa   : > { %v9800_v62 = vcombine.low %v9792_v47, %v9799_v18  ;;  %v5626_v60 = vrot.slane %v19750_v59, 2  ;;  %v19758_v20 = vsel %vm1779_vm5, %v5276_v30, %v5138_v8  ;;  %v12432_v12 = vor.u32 %v12430_v32, %v19742_v29  ;;  %v22906_v24 = vld [vmem:[#allocation3_spill] sm:$0xff] }
 0x2ab   : > { %v12434_v11 = vrot.slane %v19742_v29, 4  ;;  %v6638_v25 = vmul.f32 %v15452_v44, %v19284_v37  ;;  %v5624_v47 = vrot.slane %v19758_v20, 2  ;;  %v9817_v13 = vcombine.low %v9809_v39, %v9816_v54  ;;  %v19802_v39 = vpop.f32.mrb[20].mxu0 }
 0x2ac   : > { %v14697_v52 = vpack.c.bf16 %v9800_v62, %v9800_v62  ;;  %v15453_v63 = vadd.f32 %v19617_v46, %v22902_v35  ;;  %v15454_v8 = vadd.f32 %v19625_v23, %v22903_v49  ;;  %v15455_v55 = vadd.f32 %v19629_v33, %v22904_v42 }
 0x2ad   : > { %v6781_v15 = vadd.f32 %v19307_v16, %v6638_v25  ;;  %v19776_v9 = vsel %vm1642_vm4, %v15981_v3, %v4866_v26  ;;  %v19780_v19 = vsel %vm1642_vm4, %v15982_v27, %v4864_v50  ;;  %v14698_v54 = vpack.c.bf16 %v9817_v13, %v9817_v13 }
 0x2ae   : > { %v12410_v48 = vshrl.u32 %v14697_v52, 16  ;;  %v12413_v46 = vshll.u32 %v14697_v52, 16  ;;  %v6636_v1 = vmul.f32 %v15453_v63, %v19284_v37  ;;  %v6639_v22 = vmul.f32 %v15454_v8, %v19284_v37  ;;  %v19807_v52 = vpop.f32.mrb[21].mxu0 }
 0x2af   : > { %v6917_v23 = vmax.f32 %v6781_v15, 0.0  ;;  %v6637_v57 = vmul.f32 %v15455_v55, %v19284_v37  ;;  %v5625_v33 = vsel %vm5554_vm7, %v5622_v2, %v5624_v47  ;;  %v12418_v32 = vshrl.u32 %v14698_v54, 16  ;;  %v19811_v8 = vpop.f32.mrb[22].mxu0 }
 0x2b0   : > { %v12412_v56 = vrot.slane %v12410_v48, 7  ;;  %v12421_v34 = vshll.u32 %v14698_v54, 16  ;;  %v6779_v30 = vadd.f32 %v19307_v16, %v6636_v1  ;;  %15233 = vmatmul.mubr.msk.bf16.vlgmr.msra.gmra.mrb[68].mxu1 %vm2243_vm6, %v22905_v36  ;;  %15370 = vmatprep.mubr.msk.bf16.mxu0 %vm2243_vm6, %v5625_v33  ;;  %v6782_v4 = vadd.f32 %v19307_v16, %v6639_v22  ;;  %v19817_v27 = vpop.f32.mrb[23].mxu0 }
 0x2b1   : > { %v7412_v18 = vcombine.high %v6917_v23, %v6917_v23  ;;  %v19796_v37 = vrot.slane %v6917_v23, %v19031_v17  ;;  %v6780_v2 = vadd.f32 %v19307_v16, %v6637_v57  ;;  %15236 = vmatprep.mubr.msk.bf16.mxu1 %vm2243_vm6, %v22906_v24  ;;  %v12420_v44 = vrot.slane %v12418_v32, 7  ;;  %v4870_v23 = vpop.permute.xlu1 %4869  ;;  %v4868_v32 = vpop.permute.xlu0 %4867 }
 0x2b2   : > { %v12415_v40 = vor.u32 %v12413_v46, %v12412_v56  ;;  %v12416_v14 = vrot.slane %v12412_v56, 4  ;;  %v6915_v62 = vmax.f32 %v6779_v30, 0.0  ;;  %v6918_v25 = vmax.f32 %v6782_v4, 0.0 }
 0x2b3   : > { %v7426_v26 = vrot.slane %v7412_v18, %v19031_v17  ;;  %v7427_v50 = vcombine.high %v19796_v37, %v19796_v37  ;;  %v6916_v13 = vmax.f32 %v6780_v2, 0.0  ;;  %v12423_v16 = vor.u32 %v12421_v34, %v12420_v44 }
 0x2b4   : > { %v12425_v35 = vrot.slane %v12420_v44, 4  ;;  %v13644_v63 = vsel %vm19446_vm13, %v12415_v40, %v14477_v6  ;;  %v7378_v49 = vcombine.high %v6915_v62, %v6915_v62  ;;  %v7385_v42 = vrot.slane %v6915_v62, %v19031_v17  ;;  %v22907_v6 = vld [vmem:[#allocation5_spill] sm:$0xff]  ;;  %v22908_v40 = vld [vmem:[#allocation6_spill] sm:$0xff] }
 0x2b5   : > { %14478 = vst [vmem:[%s17800_s6 + $0x3c] sm:$0xf] %v13644_v63  ;;  %v19814_v15 = vcombine.low %v7427_v50, %v7426_v26  ;;  %v7428_v55 = vcombine.high %v7426_v26, %v7426_v26  ;;  %v7429_v3 = vcombine.high %v6918_v25, %v6918_v25  ;;  %v12424_v54 = vsel %vm19456_vm14, %v12416_v14, %v12423_v16 }
 0x2b6   : > { %v12433_v48 = vsel %vm19456_vm14, %v12425_v35, %v12432_v12  ;;  %v7392_v46 = vrot.slane %v7378_v49, %v19031_v17  ;;  %v7436_v1 = vrot.slane %v6918_v25, %v19031_v17  ;;  %14479 = vst.msk [vmem:[%s17800_s6 + $0x40] sm:$0xf] %vm9471_vm8, %v12424_v54  ;;  %v7393_v57 = vcombine.high %v7385_v42, %v7385_v42  ;;  %v5148_v35 = vpop.permute.xlu1 %5147 }
 0x2b7   : > { %14480 = vst.msk [vmem:[%s17800_s6 + $0x44] sm:$0xf] %vm9471_vm8, %v12433_v48  ;;  %v9884_v22 = vrot.slane %v19814_v15, %v19031_v17  ;;  %v19832_v33 = vrot.slane %v7429_v3, %v19031_v17  ;;  %v7395_v56 = vcombine.high %v6916_v13, %v6916_v13  ;;  %v7402_v36 = vrot.slane %v6916_v13, %v19031_v17  ;;  %v15983_v15 = vld [vmem:[%s16077_s20 + $0x160] sm:$0xff]  }
 0x2b8   : > { %v7394_v34 = vcombine.high %v7392_v46, %v7392_v46  ;;  %v7444_v12 = vcombine.high %v7436_v1, %v7436_v1  ;;  %v9886_v30 = vcombine.low %v7428_v55, %v7436_v1  ;;  %15237 = vmatmul.mubr.msk.bf16.gmra.mrb[72].mxu1 %vm2243_vm6, %v22907_v6  ;;  %v9836_v18 = vcombine.low %v7385_v42, %v7393_v57  ;;  %v15984_v55 = vld [vmem:[%s16077_s20 + $0x158] sm:$0xff]   ;;  %v22909_v1 = vld [vmem:[#allocation28_spill] sm:$0xff] }
 0x2b9   : > { %v7409_v4 = vrot.slane %v7395_v56, %v19031_v17  ;;  %v5627_v2 = vsel %vm5554_vm7, %v5624_v47, %v5626_v60  ;;  %v19845_v24 = vsel %vm1779_vm5, %v19776_v9, %v5144_v51  ;;  %15240 = vmatprep.mubr.msk.bf16.mxu1 %vm2243_vm6, %v22908_v40  ;;  %v7410_v62 = vcombine.high %v7402_v36, %v7402_v36  ;;  %v22911_v6 = vld [vmem:[#allocation8_spill] sm:$0xff] }
 0x2ba   : > { %v9887_v14 = vcombine.low %v7444_v12, %v19832_v33  ;;  %v9894_v44 = vrot.slane %v9886_v30, %v19031_v17  ;;  %v9852_v26 = vcombine.low %v7394_v34, %v7402_v36  ;;  %15371 = vmatmul.mubr.msk.bf16.gmra.mrb[68].mxu0 %vm2243_vm6, %v5627_v2  ;;  %v9850_v20 = vrot.slane %v9836_v18, %v19031_v17  ;;  %v19889_v36 = vld [vmem:[%s22695_s2] ss:$0 sm:$0xff] }
 0x2bb   : > { %v7411_v47 = vcombine.high %v7409_v4, %v7409_v4  ;;  %v5630_v50 = vrot.slane %v19845_v24, 2  ;;  %v5419_v9 = vsel %vm1779_vm5, %v19780_v19, %v5142_v7  ;;  %v9853_v25 = vcombine.low %v7410_v62, %v7409_v4  ;;  %v5146_v19 = vpop.permute.xlu0 %5145 }
 0x2bc   : > { %v9901_v51 = vrot.slane %v9887_v14, %v19031_v17  ;;  %v9860_v13 = vrot.slane %v9852_v26, %v19031_v17  ;;  %v5628_v16 = vrot.slane %v5419_v9, 2  ;;  %v9851_v63 = vcombine.low %v9843_v41, %v9850_v20  ;;  %v4874_v14 = vpop.permute.xlu1 %4873  ;;  %v19901_v26 = vld [vmem:[%s22696_s3] ss:$0 sm:$0xff] }
 0x2bd   : > { %v9869_v49 = vcombine.low %v7411_v47, %v19796_v37  ;;  %v5286_v42 = vsel %vm1642_vm4, %v15983_v15, %v4870_v23  ;;  %v5284_v3 = vsel %vm1642_vm4, %v15984_v55, %v4868_v32  ;;  %v9867_v54 = vrot.slane %v9853_v25, %v19031_v17  ;;  %v22910_v32 = vld [vmem:[#allocation7_spill] sm:$0xff]  ;;  %v22912_v47 = vld [vmem:[#allocation29_spill] sm:$0xff] }
 0x2be   : > { %v9902_v7 = vcombine.low %v9894_v44, %v9901_v51  ;;  %v5629_v48 = vsel %vm5554_vm7, %v5626_v60, %v5628_v16  ;;  %v5631_v45 = vsel %vm5554_vm7, %v5628_v16, %v5630_v50  ;;  %v14700_v41 = vpack.c.bf16 %v9851_v63, %v9851_v63  ;;  %v14482_v25 = vld [vmem:[%s17800_s6 + $0x4c] sm:$0x1] }
 0x2bf   : > { %v9877_v37 = vrot.slane %v9869_v49, %v19031_v17  ;;  %15374 = vmatprep.mubr.msk.bf16.mxu0 %vm2243_vm6, %v5629_v48  ;;  %v19876_v46 = vsel %vm1779_vm5, %v5286_v42, %v5148_v35  ;;  %v15456_v23 = vadd.f32 %v19695_v5, %v22909_v1  ;;  %v9868_v56 = vcombine.low %v9860_v13, %v9867_v54  ;;  %v4872_v49 = vpop.permute.xlu0 %4871  ;;  %v14484_v1 = vld [vmem:[%s17800_s6 + $0x50] sm:$0xf] }
 0x2c0   : > { %v14703_v57 = vpack.c.bf16 %v9902_v7, %v9902_v7  ;;  %v5634_v59 = vrot.slane %v19876_v46, 2  ;;  %v19882_v60 = vsel %vm1779_vm5, %v5284_v3, %v5146_v19  ;;  %15241 = vmatmul.mubr.msk.bf16.gmra.mrb[76].mxu1 %vm2243_vm6, %v22910_v32  ;;  %v12436_v34 = vshrl.u32 %v14700_v41, 16  ;;  %v5152_v29 = vpop.permute.xlu1 %5151 }
 0x2c1   : > { %v12439_v12 = vshll.u32 %v14700_v41, 16  ;;  %v9885_v30 = vcombine.low %v9877_v37, %v9884_v22  ;;  %v6642_v5 = vmul.f32 %v19889_v36, %v15456_v23  ;;  %15244 = vmatprep.mubr.msk.bf16.mxu1 %vm2243_vm6, %v22911_v6  ;;  %v14701_v2 = vpack.c.bf16 %v9868_v56, %v9868_v56  ;;  %v19896_v22 = vpop.f32.mrb[24].mxu0  ;;  %v22914_v6 = vld [vmem:[#allocation30_spill] sm:$0xff] }
 0x2c2   : > { %v12462_v18 = vshrl.u32 %v14703_v57, 16  ;;  %v12465_v4 = vshll.u32 %v14703_v57, 16  ;;  %15375 = vmatmul.mubr.msk.bf16.gmra.mrb[72].mxu0 %vm2243_vm6, %v5631_v45  ;;  %v5632_v40 = vrot.slane %v19882_v60, 2  ;;  %v12438_v44 = vrot.slane %v12436_v34, 7  ;;  %v19906_v51 = vpop.f32.mrb[25].mxu0 }
 0x2c3   : > { %v14702_v62 = vpack.c.bf16 %v9885_v30, %v9885_v30  ;;  %v6785_v20 = vadd.f32 %v19901_v26, %v6642_v5  ;;  %v15457_v9 = vadd.f32 %v19707_v21, %v22912_v47  ;;  %v12445_v16 = vshrl.u32 %v14701_v2, 16  ;;  %v19913_v15 = vpop.f32.mrb[26].mxu0 }
 0x2c4   : > { %v19909_v13 = vrot.slane %v12462_v18, 7  ;;  %v12448_v35 = vshll.u32 %v14701_v2, 16  ;;  %v7445_v63 = vcombine.high %v19832_v33, %v19832_v33  ;;  %v12441_v42 = vor.u32 %v12439_v12, %v12438_v44  ;;  %v19915_v19 = vpop.f32.mrb[27].mxu0  ;;  %v22913_v12 = vld [vmem:[#allocation9_spill] sm:$0xff] }
 0x2c5   : > { %v12443_v55 = vrot.slane %v12438_v44, 4  ;;  %v12453_v3 = vshrl.u32 %v14702_v62, 16  ;;  %v12456_v21 = vshll.u32 %v14702_v62, 16  ;;  %v12447_v48 = vrot.slane %v12445_v16, 7 }
 0x2c6   : > { %v12467_v7 = vor.u32 %v12465_v4, %v19909_v13  ;;  %v12469_v54 = vrot.slane %v19909_v13, 4  ;;  %v6921_v45 = vmax.f32 %v6785_v20, 0.0  ;;  %v12442_v33 = vsel %vm19456_vm14, %v12434_v11, %v12441_v42  ;;  %v22915_v4 = vld [vmem:[#allocation10_spill] sm:$0xff]  ;;  %v22916_v20 = vld [vmem:[#allocation32_spill] sm:$0xff] }
 0x2c7   : > { %v13650_v41 = vsel %vm19463_vm15, %v12443_v55, %v14482_v25  ;;  %v12455_v37 = vrot.slane %v12453_v3, 7  ;;  %v6640_v23 = vmul.f32 %v19889_v36, %v15457_v9  ;;  %14481 = vst.msk [vmem:[%s17800_s6 + $0x48] sm:$0xf] %vm9471_vm8, %v12442_v33  ;;  %v12450_v57 = vor.u32 %v12448_v35, %v12447_v48  ;;  %v5150_v9 = vpop.permute.xlu0 %5149  ;;  %v15987_v3 = vld [vmem:[%s16077_s20 + $0x170] sm:$0xff]   ;;  %v15988_v33 = vld [vmem:[%s16077_s20 + $0x168] sm:$0xff]  }
 0x2c8   : > { %14483 = vst [vmem:[%s17800_s6 + $0x4c] sm:$0x1] %v13650_v41  ;;  %v12451_v56 = vrot.slane %v12447_v48, 4  ;;  %v7479_v32 = vcombine.high %v6921_v45, %v6921_v45  ;;  %v7486_v34 = vrot.slane %v6921_v45, %v19031_v17  ;;  %15245 = vmatmul.mubr.msk.bf16.gmra.mrb[80].mxu1 %vm2243_vm6, %v22913_v12  ;;  %v15458_v18 = vadd.f32 %v19711_v0, %v22914_v6 }
 0x2c9   : > { %v12458_v11 = vor.u32 %v12456_v21, %v12455_v37  ;;  %v12460_v30 = vrot.slane %v12455_v37, 4  ;;  %v6783_v5 = vadd.f32 %v19901_v26, %v6640_v23  ;;  %15248 = vmatprep.mubr.msk.bf16.mxu1 %vm2243_vm6, %v22915_v4  ;;  %v13653_v2 = vsel %vm19446_vm13, %v12450_v57, %v14484_v1 }
 0x2ca   : > { %v7493_v44 = vrot.slane %v7479_v32, %v19031_v17  ;;  %v7494_v62 = vcombine.high %v7486_v34, %v7486_v34  ;;  %v15459_v47 = vadd.f32 %v19721_v43, %v22916_v20  ;;  %14485 = vst [vmem:[%s17800_s6 + $0x50] sm:$0xf] %v13653_v2  ;;  %v6643_v35 = vmul.f32 %v19889_v36, %v15458_v18 }
 0x2cb   : > { %v12459_v25 = vsel %vm19456_vm14, %v12451_v56, %v12458_v11  ;;  %v12468_v0 = vsel %vm19456_vm14, %v12460_v30, %v12467_v7  ;;  %v6919_v16 = vmax.f32 %v6783_v5, 0.0  ;;  %v5290_v21 = vsel %vm1642_vm4, %v15987_v3, %v4874_v14  ;;  %v4878_v14 = vpop.permute.xlu1 %4877  ;;  %v22917_v5 = vld [vmem:[#allocation11_spill] sm:$0xff] }
 0x2cc   : > { %14486 = vst.msk [vmem:[%s17800_s6 + $0x54] sm:$0xf] %vm9471_vm8, %v12459_v25  ;;  %14487 = vst.msk [vmem:[%s17800_s6 + $0x58] sm:$0xf] %vm9471_vm8, %v12468_v0  ;;  %v7495_v42 = vcombine.high %v7493_v44, %v7493_v44  ;;  %v9937_v55 = vcombine.low %v7486_v34, %v7494_v62  ;;  %v6641_v43 = vmul.f32 %v19889_v36, %v15459_v47 }
 0x2cd   : > { %v7446_v48 = vcombine.high %v6919_v16, %v6919_v16  ;;  %v7453_v45 = vrot.slane %v6919_v16, %v19031_v17  ;;  %v6786_v7 = vadd.f32 %v19901_v26, %v6643_v35  ;;  %v5288_v41 = vsel %vm1642_vm4, %v15988_v33, %v4872_v49  ;;  %v15989_v33 = vld [vmem:[%s16077_s20 + $0x180] sm:$0xff]  }
 0x2ce   : > { %v9938_v37 = vcombine.low %v7493_v44, %v7495_v42  ;;  %v9945_v1 = vrot.slane %v9937_v55, %v19031_v17  ;;  %v6784_v23 = vadd.f32 %v19901_v26, %v6641_v43  ;;  %v5633_v57 = vsel %vm5554_vm7, %v5630_v50, %v5632_v40  ;;  %v4876_v50 = vpop.permute.xlu0 %4875 }
 0x2cf   : > { %v7460_v56 = vrot.slane %v7446_v48, %v19031_v17  ;;  %v7461_v32 = vcombine.high %v7453_v45, %v7453_v45  ;;  %v9903_v34 = vcombine.low %v7445_v63, %v7453_v45  ;;  %v6922_v12 = vmax.f32 %v6786_v7, 0.0  ;;  %15378 = vmatprep.mubr.msk.bf16.mxu0 %vm2243_vm6, %v5633_v57  ;;  %v5156_v3 = vpop.permute.xlu1 %5155 }
 0x2d0   : > { %v9952_v49 = vrot.slane %v9938_v37, %v19031_v17  ;;  %v6920_v11 = vmax.f32 %v6784_v23, 0.0  ;;  %v5635_v30 = vsel %vm5554_vm7, %v5632_v40, %v5634_v59  ;;  %v19976_v24 = vsel %vm1779_vm5, %v5290_v21, %v5152_v29  ;;  %15249 = vmatmul.mubr.msk.bf16.gmra.mrb[84].mxu1 %vm2243_vm6, %v22917_v5  ;;  %v22918_v29 = vld [vmem:[#allocation12_spill] sm:$0xff]  ;;  %v19987_v62 = vpop.f32.mrb[28].mxu0 }
 0x2d1   : > { %v9904_v63 = vcombine.low %v7461_v32, %v7460_v56  ;;  %v9911_v6 = vrot.slane %v9903_v34, %v19031_v17  ;;  %v7496_v18 = vcombine.high %v6922_v12, %v6922_v12  ;;  %v7503_v4 = vrot.slane %v6922_v12, %v19031_v17  ;;  %15379 = vmatmul.mubr.msk.bf16.gmra.mrb[76].mxu0 %vm2243_vm6, %v5635_v30  ;;  %v19992_v16 = vpop.f32.mrb[29].mxu0 }
 0x2d2   : > { %v9953_v2 = vcombine.low %v9945_v1, %v9952_v49  ;;  %v7462_v44 = vcombine.high %v6920_v11, %v6920_v11  ;;  %v7469_v60 = vrot.slane %v6920_v11, %v19031_v17  ;;  %v5638_v40 = vrot.slane %v19976_v24, 2  ;;  %15252 = vmatprep.mubr.msk.bf16.mxu1 %vm2243_vm6, %v22918_v29  ;;  %v19995_v21 = vpop.f32.mrb[30].mxu0  ;;  %v5154_v56 = vpop.permute.xlu0 %5153  ;;  %v15990_v49 = vld [vmem:[%s16077_s20 + $0x178] sm:$0xff]  }
 0x2d3   : > { %v9918_v20 = vrot.slane %v9904_v63, %v19031_v17  ;;  %v7510_v47 = vrot.slane %v7496_v18, %v19031_v17  ;;  %v7511_v25 = vcombine.high %v7503_v4, %v7503_v4  ;;  %v5427_v0 = vsel %vm1779_vm5, %v5288_v41, %v5150_v9  ;;  %v19999_v1 = vpop.f32.mrb[31].mxu0 }
 0x2d4   : > { %v14706_v35 = vpack.c.bf16 %v9953_v2, %v9953_v2  ;;  %v7476_v42 = vrot.slane %v7462_v44, %v19031_v17  ;;  %v7477_v55 = vcombine.high %v7469_v60, %v7469_v60  ;;  %v5636_v43 = vrot.slane %v5427_v0, 2  ;;  %v22920_v44 = vld [vmem:[#allocation14_spill] sm:$0xff] }
 0x2d5   : > { %v9919_v48 = vcombine.low %v9911_v6, %v9918_v20  ;;  %v7512_v45 = vcombine.high %v7510_v47, %v7510_v47  ;;  %v9954_v7 = vcombine.low %v7503_v4, %v7511_v25  ;;  %v5294_v37 = vsel %vm1642_vm4, %v15989_v33, %v4878_v14  ;;  %v22919_v6 = vld [vmem:[#allocation13_spill] sm:$0xff]  ;;  %v4882_v20 = vpop.permute.xlu1 %4881  ;;  %v22923_v33 = vld [vmem:[#allocation35_spill] sm:$0xff] }
 0x2d6   : > { %v12488_v9 = vshrl.u32 %v14706_v35, 16  ;;  %v12491_v41 = vshll.u32 %v14706_v35, 16  ;;  %v7478_v23 = vcombine.high %v7476_v42, %v7476_v42  ;;  %v9920_v57 = vcombine.low %v7469_v60, %v7477_v55  ;;  %v22921_v35 = vld [vmem:[#allocation33_spill] sm:$0xff]  ;;  %v14489_v55 = vld [vmem:[%s17800_s6 + $0x60] sm:$0x1] }
 0x2d7   : > { %v14704_v32 = vpack.c.bf16 %v9919_v48, %v9919_v48  ;;  %v9955_v34 = vcombine.low %v7510_v47, %v7512_v45  ;;  %v9962_v12 = vrot.slane %v9954_v7, %v19031_v17  ;;  %v5292_v11 = vsel %vm1642_vm4, %v15990_v49, %v4876_v50  ;;  %v22922_v45 = vld [vmem:[#allocation34_spill] sm:$0xff] }
 0x2d8   : > { %v20004_v30 = vrot.slane %v12488_v9, 7  ;;  %v9921_v5 = vcombine.low %v7476_v42, %v7478_v23  ;;  %v9928_v63 = vrot.slane %v9920_v57, %v19031_v17  ;;  %v5637_v14 = vsel %vm5554_vm7, %v5634_v59, %v5636_v43  ;;  %15253 = vmatmul.mubr.msk.bf16.gmra.mrb[88].mxu1 %vm2243_vm6, %v22919_v6 }
 0x2d9   : > { %v12471_v18 = vshrl.u32 %v14704_v32, 16  ;;  %v12474_v4 = vshll.u32 %v14704_v32, 16  ;;  %v9969_v2 = vrot.slane %v9955_v34, %v19031_v17  ;;  %15382 = vmatprep.mubr.msk.bf16.mxu0 %vm2243_vm6, %v5637_v14  ;;  %v5639_v50 = vsel %vm5554_vm7, %v5636_v43, %v5638_v40  ;;  %15256 = vmatprep.mubr.msk.bf16.mxu1 %vm2243_vm6, %v22920_v44  ;;  %v5160_v13 = vpop.permute.xlu1 %5159  ;;  %v22924_v14 = vld [vmem:[#allocation15_spill] sm:$0xff]  ;;  %v22926_v44 = vld [vmem:[#allocation17_spill] sm:$0xff] }
 0x2da   : > { %v20020_v46 = vor.u32 %v12491_v41, %v20004_v30  ;;  %v12495_v59 = vrot.slane %v20004_v30, 4  ;;  %v9935_v60 = vrot.slane %v9921_v5, %v19031_v17  ;;  %15383 = vmatmul.mubr.msk.bf16.gmra.mrb[80].mxu0 %vm2243_vm6, %v5639_v50  ;;  %v20026_v29 = vsel %vm1779_vm5, %v5294_v37, %v5156_v3  ;;  %v4880_v37 = vpop.permute.xlu0 %4879 }
 0x2db   : > { %v12473_v47 = vrot.slane %v12471_v18, 7  ;;  %v9970_v25 = vcombine.low %v9962_v12, %v9969_v2  ;;  %v5642_v0 = vrot.slane %v20026_v29, 2  ;;  %v15460_v42 = vadd.f32 %v19802_v39, %v22921_v35  ;;  %v22925_v18 = vld [vmem:[#allocation36_spill] sm:$0xff]  ;;  %v15992_v35 = vld [vmem:[%s16077_s20 + $0x188] sm:$0xff]  }
 0x2dc   : > { %v9936_v43 = vcombine.low %v9928_v63, %v9935_v60  ;;  %v20033_v48 = vsel %vm1779_vm5, %v5292_v11, %v5154_v56  ;;  %v15461_v7 = vadd.f32 %v19807_v52, %v22922_v45  ;;  %v15462_v3 = vadd.f32 %v19811_v8, %v22923_v33  ;;  %v15991_v2 = vld [vmem:[%s16077_s20 + $0x190] sm:$0xff]  }
 0x2dd   : > { %v12476_v9 = vor.u32 %v12474_v4, %v12473_v47  ;;  %v12478_v41 = vrot.slane %v12473_v47, 4  ;;  %v14707_v23 = vpack.c.bf16 %v9970_v25, %v9970_v25  ;;  %v6646_v57 = vmul.f32 %v19889_v36, %v15460_v42 }
 0x2de   : > { %v14705_v39 = vpack.c.bf16 %v9936_v43, %v9936_v43  ;;  %v5640_v32 = vrot.slane %v20033_v48, 2  ;;  %v6644_v56 = vmul.f32 %v19889_v36, %v15461_v7  ;;  %v6647_v34 = vmul.f32 %v19889_v36, %v15462_v3  ;;  %v20067_v43 = vpop.f32.mrb[32].mxu0  ;;  %v14491_v7 = vld [vmem:[%s17800_s6 + $0x64] sm:$0xf] }
 0x2df   : > { %v12477_v52 = vsel %vm19456_vm14, %v12469_v54, %v12476_v9  ;;  %v13659_v8 = vsel %vm19463_vm15, %v12478_v41, %v14489_v55  ;;  %v12497_v12 = vshrl.u32 %v14707_v23, 16  ;;  %v12500_v49 = vshll.u32 %v14707_v23, 16  ;;  %v5158_v55 = vpop.permute.xlu0 %5157  ;;  %v20073_v3 = vpop.f32.mrb[33].mxu0 }
 0x2e0   : > { %14488 = vst.msk [vmem:[%s17800_s6 + $0x5c] sm:$0xf] %vm9471_vm8, %v12477_v52  ;;  %14490 = vst [vmem:[%s17800_s6 + $0x60] sm:$0x1] %v13659_v8  ;;  %v12480_v11 = vshrl.u32 %v14705_v39, 16  ;;  %v12483_v30 = vshll.u32 %v14705_v39, 16  ;;  %v6789_v5 = vadd.f32 %v19901_v26, %v6646_v57  ;;  %v6787_v63 = vadd.f32 %v19901_v26, %v6644_v56  ;;  %15257 = vmatmul.mubr.msk.bf16.gmra.mrb[92].mxu1 %vm2243_vm6, %v22924_v14 }
 0x2e1   : > { %v20056_v54 = vrot.slane %v12497_v12, 7  ;;  %v6790_v6 = vadd.f32 %v19901_v26, %v6647_v34  ;;  %v15463_v4 = vadd.f32 %v19817_v27, %v22925_v18  ;;  %v5298_v50 = vsel %vm1642_vm4, %v15991_v2, %v4882_v20  ;;  %15260 = vmatprep.mubr.msk.bf16.mxu1 %vm2243_vm6, %v22926_v44  ;;  %v20078_v57 = vpop.f32.mrb[34].mxu0 }
 0x2e2   : > { %v12482_v60 = vrot.slane %v12480_v11, 7  ;;  %v6925_v47 = vmax.f32 %v6789_v5, 0.0  ;;  %v6923_v25 = vmax.f32 %v6787_v63, 0.0  ;;  %v5296_v42 = vsel %vm1642_vm4, %v15992_v35, %v4880_v37  ;;  %v20083_v8 = vpop.f32.mrb[35].mxu0 }
 0x2e3   : > { %v12502_v45 = vor.u32 %v12500_v49, %v20056_v54  ;;  %v12504_v27 = vrot.slane %v20056_v54, 4  ;;  %v6926_v33 = vmax.f32 %v6790_v6, 0.0  ;;  %v6645_v20 = vmul.f32 %v19889_v36, %v15463_v4  ;;  %v4884_v44 = vpop.permute.xlu0 %4883 }
 0x2e4   : > { %v12485_v9 = vor.u32 %v12483_v30, %v12482_v60  ;;  %v12486_v41 = vrot.slane %v12482_v60, 4  ;;  %v7547_v23 = vcombine.high %v6925_v47, %v6925_v47  ;;  %v20076_v37 = vrot.slane %v6925_v47, %v19031_v17  ;;  %v4886_v30 = vpop.permute.xlu1 %4885  ;;  %v22927_v60 = vld [vmem:[#allocation21_spill] sm:$0xff] }
 0x2e5   : > { %v12503_v39 = vsel %vm19456_vm14, %v12495_v59, %v12502_v45  ;;  %v7513_v56 = vcombine.high %v6923_v25, %v6923_v25  ;;  %v7520_v34 = vrot.slane %v6923_v25, %v19031_v17  ;;  %v7564_v52 = vcombine.high %v6926_v33, %v6926_v33 }
 0x2e6   : > { %14494 = vst.msk [vmem:[%s17800_s6 + $0x6c] sm:$0xf] %vm9471_vm8, %v12503_v39  ;;  %v12494_v12 = vsel %vm19456_vm14, %v12486_v41, %v20020_v46  ;;  %v13662_v49 = vsel %vm19446_vm13, %v12485_v9, %v14491_v7  ;;  %v7561_v11 = vrot.slane %v7547_v23, %v19031_v17  ;;  %v7562_v59 = vcombine.high %v20076_v37, %v20076_v37 }
 0x2e7   : > { %14492 = vst [vmem:[%s17800_s6 + $0x64] sm:$0xf] %v13662_v49  ;;  %14493 = vst.msk [vmem:[%s17800_s6 + $0x68] sm:$0xf] %vm9471_vm8, %v12494_v12  ;;  %v7527_v5 = vrot.slane %v7513_v56, %v19031_v17  ;;  %v7528_v63 = vcombine.high %v7520_v34, %v7520_v34  ;;  %v7571_v14 = vrot.slane %v6926_v33, %v19031_v17  ;;  %v15993_v49 = vld [vmem:[%s16077_s20 + $0x1a0] sm:$0xff]  }
 0x2e8   : > { %v20101_v6 = vrot.slane %v7564_v52, %v19031_v17  ;;  %v10005_v46 = vcombine.low %v7562_v59, %v7561_v11  ;;  %v7563_v18 = vcombine.high %v7561_v11, %v7561_v11  ;;  %v6788_v4 = vadd.f32 %v19901_v26, %v6645_v20  ;;  %15261 = vmatmul.mubr.msk.bf16.gmra.mrb[96].mxu1 %vm2243_vm6, %v22927_v60  ;;  %v22928_v20 = vld [vmem:[#allocation27_spill] sm:$0xff] }
 0x2e9   : > { %v5641_v2 = vsel %vm5554_vm7, %v5638_v40, %v5640_v32  ;;  %v7529_v47 = vcombine.high %v7527_v5, %v7527_v5  ;;  %v9971_v25 = vcombine.low %v7520_v34, %v7528_v63  ;;  %v7579_v35 = vcombine.high %v7571_v14, %v7571_v14  ;;  %15264 = vmatprep.mubr.msk.bf16.mxu1 %vm2243_vm6, %v22928_v20 }
 0x2ea   : > { %15386 = vmatprep.mubr.msk.bf16.mxu0 %vm2243_vm6, %v5641_v2  ;;  %v5643_v45 = vsel %vm5554_vm7, %v5640_v32, %v5642_v0  ;;  %v10013_v7 = vrot.slane %v10005_v46, %v19031_v17  ;;  %v10006_v24 = vcombine.low %v7563_v18, %v7571_v14  ;;  %v6924_v33 = vmax.f32 %v6788_v4, 0.0  ;;  %v15994_v14 = vld [vmem:[%s16077_s20 + $0x198] sm:$0xff]   ;;  %v5162_v18 = vpop.permute.xlu0 %5161 }
 0x2eb   : > { %15387 = vmatmul.mubr.msk.bf16.gmra.mrb[84].mxu0 %vm2243_vm6, %v5643_v45  ;;  %v20120_v40 = vsel %vm1779_vm5, %v5298_v50, %v5160_v13  ;;  %v9972_v9 = vcombine.low %v7527_v5, %v7529_v47  ;;  %v9979_v41 = vrot.slane %v9971_v25, %v19031_v17  ;;  %v20126_v48 = vcombine.low %v7579_v35, %v20101_v6  ;;  %v5164_v50 = vpop.permute.xlu1 %5163  ;;  %v22929_v25 = vld [vmem:[#allocation31_spill] sm:$0xff]  ;;  %v22930_v35 = vld [vmem:[#allocation38_spill] sm:$0xff] }
 0x2ec   : > { %v5646_v32 = vrot.slane %v20120_v40, 2  ;;  %v10020_v23 = vrot.slane %v10006_v24, %v19031_v17  ;;  %v7530_v39 = vcombine.high %v6924_v33, %v6924_v33  ;;  %v7537_v56 = vrot.slane %v6924_v33, %v19031_v17  ;;  %v22932_v33 = vld [vmem:[#allocation37_spill] sm:$0xff] }
 0x2ed   : > { %v5435_v13 = vsel %vm1779_vm5, %v5296_v42, %v5158_v55  ;;  %v9986_v34 = vrot.slane %v9972_v9, %v19031_v17  ;;  %v10030_v52 = vrot.slane %v20126_v48, %v19031_v17  ;;  %v5302_v11 = vsel %vm1642_vm4, %v15993_v49, %v4886_v30 }
 0x2ee   : > { %v5644_v12 = vrot.slane %v5435_v13, 2  ;;  %v10021_v59 = vcombine.low %v10013_v7, %v10020_v23  ;;  %v7544_v5 = vrot.slane %v7530_v39, %v19031_v17  ;;  %v7545_v63 = vcombine.high %v7537_v56, %v7537_v56  ;;  %v22931_v7 = vld [vmem:[#allocation39_spill] sm:$0xff]  ;;  %v20165_v39 = vpop.f32.mrb[36].mxu0 }
 0x2ef   : > { %v5300_v46 = vsel %vm1642_vm4, %v15994_v14, %v4884_v44  ;;  %v9987_v4 = vcombine.low %v9979_v41, %v9986_v34  ;;  %v20147_v2 = vsel %vm1779_vm5, %v5302_v11, %v5164_v50  ;;  %v15465_v24 = vadd.f32 %v19906_v51, %v22931_v7  ;;  %v4890_v50 = vpop.permute.xlu1 %4889  ;;  %v20169_v34 = vpop.f32.mrb[37].mxu0  ;;  %v22933_v14 = vld [vmem:[#allocation40_spill] sm:$0xff] }
 0x2f0   : > { %v5645_v42 = vsel %vm5554_vm7, %v5642_v0, %v5644_v12  ;;  %v5647_v55 = vsel %vm5554_vm7, %v5644_v12, %v5646_v32  ;;  %v14710_v30 = vpack.c.bf16 %v10021_v59, %v10021_v59  ;;  %v7546_v60 = vcombine.high %v7544_v5, %v7544_v5  ;;  %15265 = vmatmul.mubr.msk.bf16.gmra.mrb[100].mxu1 %vm2243_vm6, %v22929_v25  ;;  %v20177_v59 = vpop.f32.mrb[38].mxu0  ;;  %v20190_v25 = vpop.permute.xlu0 %4887 }
 0x2f1   : > { %v9988_v47 = vcombine.low %v7545_v63, %v7544_v5  ;;  %15390 = vmatprep.mubr.msk.bf16.mxu0 %vm2243_vm6, %v5645_v42  ;;  %v5650_v44 = vrot.slane %v20147_v2, 2  ;;  %v14708_v29 = vpack.c.bf16 %v9987_v4, %v9987_v4  ;;  %v15464_v0 = vadd.f32 %v19896_v22, %v22930_v35  ;;  %15268 = vmatprep.mubr.msk.bf16.mxu1 %vm2243_vm6, %v22932_v33  ;;  %v20184_v42 = vpop.f32.mrb[39].mxu0  ;;  %v15995_v33 = vld [vmem:[%s16077_s20 + $0x1b0] sm:$0xff]  }
 0x2f2   : > { %v20156_v45 = vsel %vm1779_vm5, %v5300_v46, %v5162_v18  ;;  %v12523_v20 = vshrl.u32 %v14710_v30, 16  ;;  %v12526_v9 = vshll.u32 %v14710_v30, 16  ;;  %v9989_v41 = vcombine.low %v7546_v60, %v20076_v37  ;;  %v22934_v18 = vld [vmem:[#allocation42_spill] sm:$0xff] }
 0x2f3   : > { %v9996_v23 = vrot.slane %v9988_v47, %v19031_v17  ;;  %15391 = vmatmul.mubr.msk.bf16.gmra.mrb[88].mxu0 %vm2243_vm6, %v5647_v55  ;;  %v12506_v22 = vshrl.u32 %v14708_v29, 16  ;;  %v12509_v56 = vshll.u32 %v14708_v29, 16  ;;  %v6650_v13 = vmul.f32 %v19889_v36, %v15464_v0  ;;  %v14496_v55 = vld [vmem:[%s17800_s6 + $0x74] sm:$0x1] }
 0x2f4   : > { %v5648_v51 = vrot.slane %v20156_v45, 2  ;;  %v20171_v12 = vrot.slane %v12523_v20, 7  ;;  %v10003_v37 = vrot.slane %v9989_v41, %v19031_v17  ;;  %v6648_v49 = vmul.f32 %v19889_v36, %v15465_v24 }
 0x2f5   : > { %v7580_v11 = vcombine.high %v20101_v6, %v20101_v6  ;;  %v12508_v5 = vrot.slane %v12506_v22, 7  ;;  %v6793_v63 = vadd.f32 %v19901_v26, %v6650_v13  ;;  %v15466_v46 = vadd.f32 %v19913_v15, %v22933_v14  ;;  %v20207_v13 = vpop.permute.xlu1 %5167 }
 0x2f6   : > { %v15467_v4 = vadd.f32 %v19915_v19, %v22934_v18  ;;  %v12528_v30 = vor.u32 %v12526_v9, %v20171_v12  ;;  %v12530_v60 = vrot.slane %v20171_v12, 4  ;;  %v10004_v6 = vcombine.low %v9996_v23, %v10003_v37  ;;  %v22935_v9 = vld [vmem:[#allocation41_spill] sm:$0xff]  ;;  %v22936_v37 = vld [vmem:[#allocation47_spill] sm:$0xff] }
 0x2f7   : > { %v6791_v47 = vadd.f32 %v19901_v26, %v6648_v49  ;;  %v12511_v29 = vor.u32 %v12509_v56, %v12508_v5  ;;  %v12513_v35 = vrot.slane %v12508_v5, 4  ;;  %v6929_v15 = vmax.f32 %v6793_v63, 0.0 }
 0x2f8   : > { %v6651_v0 = vmul.f32 %v19889_v36, %v15466_v46  ;;  %v14709_v19 = vpack.c.bf16 %v10004_v6, %v10004_v6  ;;  %v6649_v24 = vmul.f32 %v19889_v36, %v15467_v4  ;;  %v20196_v20 = vsel %vm1642_vm4, %v15995_v33, %v4890_v50  ;;  %15269 = vmatmul.mubr.msk.bf16.gmra.mrb[104].mxu1 %vm2243_vm6, %v22935_v9 }
 0x2f9   : > { %v6927_v7 = vmax.f32 %v6791_v47, 0.0  ;;  %v12512_v41 = vsel %vm19456_vm14, %v12504_v27, %v12511_v29  ;;  %v13668_v23 = vsel %vm19463_vm15, %v12513_v35, %v14496_v55  ;;  %v7614_v22 = vcombine.high %v6929_v15, %v6929_v15  ;;  %15272 = vmatprep.mubr.msk.bf16.mxu1 %vm2243_vm6, %v22936_v37  ;;  %v5166_v47 = vpop.permute.xlu0 %5165  ;;  %v14498_v29 = vld [vmem:[%s17800_s6 + $0x78] sm:$0xf]  ;;  %v4894_v37 = vpop.permute.xlu1 %4893 }
 0x2fa   : > { %v7621_v56 = vrot.slane %v6929_v15, %v19031_v17  ;;  %14495 = vst.msk [vmem:[%s17800_s6 + $0x70] sm:$0xf] %vm9471_vm8, %v12512_v41  ;;  %14497 = vst [vmem:[%s17800_s6 + $0x74] sm:$0x1] %v13668_v23  ;;  %v12515_v50 = vshrl.u32 %v14709_v19, 16  ;;  %v12518_v54 = vshll.u32 %v14709_v19, 16  ;;  %v6794_v14 = vadd.f32 %v19901_v26, %v6651_v0 }
 0x2fb   : > { %v7581_v49 = vcombine.high %v6927_v7, %v6927_v7  ;;  %v7588_v27 = vrot.slane %v6927_v7, %v19031_v17  ;;  %v7628_v5 = vrot.slane %v7614_v22, %v19031_v17  ;;  %v6792_v46 = vadd.f32 %v19901_v26, %v6649_v24 }
 0x2fc   : > { %v7629_v63 = vcombine.high %v7621_v56, %v7621_v56  ;;  %v12517_v18 = vrot.slane %v12515_v50, 7  ;;  %v6930_v19 = vmax.f32 %v6794_v14, 0.0  ;;  %v20272_v45 = vsel %vm1779_vm5, %v20196_v20, %v20207_v13  ;;  %v15997_v20 = vld [vmem:[%s16077_s20 + $0x1c0] sm:$0xff]  }
 0x2fd   : > { %v7595_v4 = vrot.slane %v7581_v49, %v19031_v17  ;;  %v7596_v55 = vcombine.high %v7588_v27, %v7588_v27  ;;  %v10023_v6 = vcombine.low %v7580_v11, %v7588_v27  ;;  %v7630_v35 = vcombine.high %v7628_v5, %v7628_v5  ;;  %v22937_v27 = vld [vmem:[#allocation51_spill] sm:$0xff] }
 0x2fe   : > { %v20220_v15 = vcombine.low %v7621_v56, %v7629_v63  ;;  %v6928_v7 = vmax.f32 %v6792_v46, 0.0  ;;  %v12520_v33 = vor.u32 %v12518_v54, %v12517_v18  ;;  %v12521_v9 = vrot.slane %v12517_v18, 4  ;;  %v22938_v46 = vld [vmem:[#allocation57_spill] sm:$0xff] }
 0x2ff   : > { %v10037_v0 = vrot.slane %v10023_v6, %v19031_v17  ;;  %v10039_v41 = vcombine.low %v7596_v55, %v7595_v4  ;;  %v10073_v23 = vcombine.low %v7628_v5, %v7630_v35  ;;  %v7631_v22 = vcombine.high %v6930_v19, %v6930_v19  ;;  %v15996_v55 = vld [vmem:[%s16077_s20 + $0x1a8] sm:$0xff]   ;;  %v20247_v35 = vpop.f32.mrb[40].mxu0 }
 0x300   : > { %v10071_v24 = vrot.slane %v20220_v15, %v19031_v17  ;;  %v7638_v11 = vrot.slane %v6930_v19, %v19031_v17  ;;  %v12529_v56 = vsel %vm19456_vm14, %v12521_v9, %v12528_v30  ;;  %v13671_v50 = vsel %vm19446_vm13, %v12520_v33, %v14498_v29  ;;  %15273 = vmatmul.mubr.msk.bf16.gmra.mrb[108].mxu1 %vm2243_vm6, %v22937_v27  ;;  %v4892_v29 = vpop.permute.xlu0 %4891  ;;  %v20259_v9 = vpop.f32.mrb[41].mxu0 }
 0x301   : > { %v10038_v54 = vcombine.low %v10030_v52, %v10037_v0  ;;  %v10047_v49 = vrot.slane %v10039_v41, %v19031_v17  ;;  %14499 = vst [vmem:[%s17800_s6 + $0x78] sm:$0xf] %v13671_v50  ;;  %14500 = vst.msk [vmem:[%s17800_s6 + $0x7c] sm:$0xf] %vm9471_vm8, %v12529_v56  ;;  %v10081_v5 = vrot.slane %v10073_v23, %v19031_v17  ;;  %15276 = vmatprep.mubr.msk.bf16.mxu1 %vm2243_vm6, %v22938_v46 }
 0x302   : > { %v7645_v63 = vrot.slane %v7631_v22, %v19031_v17  ;;  %v7646_v30 = vcombine.high %v7638_v11, %v7638_v11  ;;  %v7597_v14 = vcombine.high %v7595_v4, %v7595_v4  ;;  %v7598_v48 = vcombine.high %v6928_v7, %v6928_v7  ;;  %v20263_v22 = vpop.f32.mrb[42].mxu0 }
 0x303   : > { %v14711_v18 = vpack.c.bf16 %v10038_v54, %v10038_v54  ;;  %v7605_v52 = vrot.slane %v6928_v7, %v19031_v17  ;;  %v5304_v6 = vsel %vm1642_vm4, %v15996_v55, %v20190_v25  ;;  %v5649_v4 = vsel %vm5554_vm7, %v5646_v32, %v5648_v51  ;;  %v20275_v56 = vpop.f32.mrb[43].mxu0 }
 0x304   : > { %v7647_v19 = vcombine.high %v7645_v63, %v7645_v63  ;;  %v10074_v33 = vcombine.low %v7638_v11, %v7646_v30  ;;  %v5651_v7 = vsel %vm5554_vm7, %v5648_v51, %v5650_v44  ;;  %v7612_v41 = vrot.slane %v7598_v48, %v19031_v17  ;;  %15394 = vmatprep.mubr.msk.bf16.mxu0 %vm2243_vm6, %v5649_v4  ;;  %v5172_v11 = vpop.permute.xlu1 %5171  ;;  %v5170_v55 = vpop.permute.xlu0 %5169 }
 0x305   : > { %v12532_v25 = vshrl.u32 %v14711_v18, 16  ;;  %v12535_v0 = vshll.u32 %v14711_v18, 16  ;;  %v10040_v23 = vcombine.low %v7597_v14, %v7605_v52  ;;  %15395 = vmatmul.mubr.msk.bf16.gmra.mrb[92].mxu0 %vm2243_vm6, %v5651_v7  ;;  %v5443_v51 = vsel %vm1779_vm5, %v5304_v6, %v5166_v47  ;;  %v22939_v6 = vld [vmem:[#allocation61_spill] sm:$0xff]  ;;  %v22940_v7 = vld [vmem:[#allocation67_spill] sm:$0xff] }
 0x306   : > { %v10088_v40 = vrot.slane %v10074_v33, %v19031_v17  ;;  %v20266_v32 = vcombine.low %v7645_v63, %v7647_v19  ;;  %v7613_v54 = vcombine.high %v7612_v41, %v7612_v41  ;;  %v5654_v63 = vrot.slane %v20272_v45, 2 }
 0x307   : > { %v20277_v50 = vrot.slane %v12532_v25, 7  ;;  %v10054_v27 = vrot.slane %v10040_v23, %v19031_v17  ;;  %v5652_v46 = vrot.slane %v5443_v51, 2  ;;  %v5310_v13 = vsel %vm1642_vm4, %v15997_v20, %v4894_v37  ;;  %v22941_v23 = vld [vmem:[#allocation43_spill] sm:$0xff] }
 0x308   : > { %v10089_v30 = vcombine.low %v10081_v5, %v10088_v40  ;;  %v10098_v14 = vrot.slane %v20266_v32, %v19031_v17  ;;  %v10056_v52 = vcombine.low %v7612_v41, %v7613_v54  ;;  %15277 = vmatmul.mubr.msk.bf16.gmra.mrb[112].mxu1 %vm2243_vm6, %v22939_v6  ;;  %v15998_v5 = vld [vmem:[%s16077_s20 + $0x1b8] sm:$0xff]   ;;  %v20306_v2 = vsel %vm1779_vm5, %v5310_v13, %v5172_v11  ;;  %v4898_v40 = vpop.permute.xlu1 %4897 }
 0x309   : > { %v12537_v47 = vor.u32 %v12535_v0, %v20277_v50  ;;  %v12539_v18 = vrot.slane %v20277_v50, 4  ;;  %v10055_v48 = vcombine.low %v10047_v49, %v10054_v27  ;;  %v5308_v33 = vsel %vm1642_vm4, %v15998_v5, %v4892_v29  ;;  %15280 = vmatprep.mubr.msk.bf16.mxu1 %vm2243_vm6, %v22940_v7  ;;  %v22945_v7 = vld [vmem:[#allocation71_spill] sm:$0xff]  ;;  %v16002_v32 = vld [vmem:[%s16077_s20 + $0x1d8] sm:$0xff]  }
 0x30a   : > { %v14714_v19 = vpack.c.bf16 %v10089_v30, %v10089_v30  ;;  %v5653_v4 = vsel %vm5554_vm7, %v5650_v44, %v5652_v46  ;;  %v5655_v37 = vsel %vm5554_vm7, %v5652_v46, %v5654_v63  ;;  %v10064_v25 = vrot.slane %v10056_v52, %v19031_v17  ;;  %v4896_v52 = vpop.permute.xlu0 %4895 }
 0x30b   : > { %v12538_v49 = vsel %vm19456_vm14, %v12530_v60, %v12537_v47  ;;  %v14712_v0 = vpack.c.bf16 %v10055_v48, %v10055_v48  ;;  %15398 = vmatprep.mubr.msk.bf16.mxu0 %vm2243_vm6, %v5653_v4  ;;  %v5658_v41 = vrot.slane %v20306_v2, 2  ;;  %v15468_v12 = vadd.f32 %v19987_v62, %v22941_v23  ;;  %v22942_v62 = vld [vmem:[#allocation44_spill] sm:$0xff]  ;;  %v22944_v47 = vld [vmem:[#allocation46_spill] sm:$0xff] }
 0x30c   : > { %14501 = vst.msk [vmem:[%s17800_s6 + $0x80] sm:$0xf] %vm9471_vm8, %v12538_v49  ;;  %v12558_v44 = vshrl.u32 %v14714_v19, 16  ;;  %v12561_v29 = vshll.u32 %v14714_v19, 16  ;;  %v10072_v60 = vcombine.low %v10064_v25, %v10071_v24  ;;  %v20317_v11 = vsel %vm1779_vm5, %v5308_v33, %v5170_v55  ;;  %v22943_v24 = vld [vmem:[#allocation45_spill] sm:$0xff] }
 0x30d   : > { %v12541_v51 = vshrl.u32 %v14712_v0, 16  ;;  %v12544_v50 = vshll.u32 %v14712_v0, 16  ;;  %15399 = vmatmul.mubr.msk.bf16.gmra.mrb[96].mxu0 %vm2243_vm6, %v5655_v37  ;;  %v6654_v27 = vmul.f32 %v19889_v36, %v15468_v12  ;;  %v5656_v30 = vrot.slane %v20317_v11, 2  ;;  %v14503_v19 = vld [vmem:[%s17800_s6 + $0x88] sm:$0x1] }
 0x30e   : > { %v20319_v54 = vrot.slane %v12558_v44, 7  ;;  %v15469_v46 = vadd.f32 %v19992_v16, %v22942_v62  ;;  %v14713_v20 = vpack.c.bf16 %v10072_v60, %v10072_v60  ;;  %v15470_v13 = vadd.f32 %v19995_v21, %v22943_v24  ;;  %v20340_v44 = vpop.permute.xlu1 %5175  ;;  %v20442_v2 = vld [vmem:[%s22695_s2] ss:$0 sm:$0xff] }
 0x30f   : > { %v12543_v15 = vrot.slane %v12541_v51, 7  ;;  %v15471_v48 = vadd.f32 %v19999_v1, %v22944_v47  ;;  %v6797_v5 = vadd.f32 %v19901_v26, %v6654_v27  ;;  %v15999_v51 = vld [vmem:[%s16077_s20 + $0x1d0] sm:$0xff]   ;;  %v20350_v27 = vpop.f32.mrb[44].mxu0  ;;  %v16000_v47 = vld [vmem:[%s16077_s20 + $0x1c8] sm:$0xff]  }
 0x310   : > { %v12563_v55 = vor.u32 %v12561_v29, %v20319_v54  ;;  %v12565_v6 = vrot.slane %v20319_v54, 4  ;;  %v6652_v33 = vmul.f32 %v19889_v36, %v15469_v46  ;;  %v12550_v37 = vshrl.u32 %v14713_v20, 16  ;;  %15281 = vmatmul.mubr.msk.bf16.gmra.mrb[116].mxu1 %vm2243_vm6, %v22945_v7  ;;  %v22946_v29 = vld [vmem:[#allocation77_spill] sm:$0xff] }
 0x311   : > { %v12546_v16 = vor.u32 %v12544_v50, %v12543_v15  ;;  %v12548_v4 = vrot.slane %v12543_v15, 4  ;;  %v12553_v21 = vshll.u32 %v14713_v20, 16  ;;  %v6933_v1 = vmax.f32 %v6797_v5, 0.0  ;;  %15284 = vmatprep.mubr.msk.bf16.mxu1 %vm2243_vm6, %v22946_v29  ;;  %v20358_v15 = vpop.f32.mrb[45].mxu0 }
 0x312   : > { %v6795_v49 = vadd.f32 %v19901_v26, %v6652_v33  ;;  %v6655_v25 = vmul.f32 %v19889_v36, %v15470_v13  ;;  %v6653_v0 = vmul.f32 %v19889_v36, %v15471_v48  ;;  %v12552_v12 = vrot.slane %v12550_v37, 7  ;;  %v14505_v36 = vld [vmem:[%s17800_s6 + $0x8c] sm:$0xf]  ;;  %v20363_v5 = vpop.f32.mrb[46].mxu0 }
 0x313   : > { %v12547_v23 = vsel %vm19456_vm14, %v12539_v18, %v12546_v16  ;;  %v13677_v60 = vsel %vm19463_vm15, %v12548_v4, %v14503_v19  ;;  %v5314_v50 = vsel %vm1642_vm4, %v15999_v51, %v4898_v40  ;;  %v7682_v62 = vcombine.high %v6933_v1, %v6933_v1  ;;  %v5174_v19 = vpop.permute.xlu0 %5173  ;;  %v20367_v7 = vpop.f32.mrb[47].mxu0 }
 0x314   : > { %14502 = vst.msk [vmem:[%s17800_s6 + $0x84] sm:$0xf] %vm9471_vm8, %v12547_v23  ;;  %14504 = vst [vmem:[%s17800_s6 + $0x88] sm:$0x1] %v13677_v60  ;;  %v7689_v46 = vrot.slane %v6933_v1, %v19031_v17  ;;  %v6931_v20 = vmax.f32 %v6795_v49, 0.0  ;;  %v6798_v18 = vadd.f32 %v19901_v26, %v6655_v25  ;;  %v12555_v24 = vor.u32 %v12553_v21, %v12552_v12  ;;  %v4902_v23 = vpop.permute.xlu1 %4901 }
 0x315   : > { %v12556_v13 = vrot.slane %v12552_v12, 4  ;;  %v6796_v40 = vadd.f32 %v19901_v26, %v6653_v0  ;;  %v5312_v48 = vsel %vm1642_vm4, %v16000_v47, %v4896_v52  ;;  %v7696_v33 = vrot.slane %v7682_v62, %v19031_v17  ;;  %v22947_v62 = vld [vmem:[#allocation81_spill] sm:$0xff] }
 0x316   : > { %v7697_v16 = vcombine.high %v7689_v46, %v7689_v46  ;;  %v7648_v4 = vcombine.high %v6931_v20, %v6931_v20  ;;  %v7655_v37 = vrot.slane %v6931_v20, %v19031_v17  ;;  %v13680_v26 = vsel %vm19446_vm13, %v12555_v24, %v14505_v36 }
 0x317   : > { %v12564_v21 = vsel %vm19456_vm14, %v12556_v13, %v12563_v55  ;;  %v6934_v1 = vmax.f32 %v6798_v18, 0.0  ;;  %v6932_v49 = vmax.f32 %v6796_v40, 0.0  ;;  %14506 = vst [vmem:[%s17800_s6 + $0x8c] sm:$0xf] %v13680_v26  ;;  %v7698_v29 = vcombine.high %v7696_v33, %v7696_v33  ;;  %v22948_v13 = vld [vmem:[#allocation87_spill] sm:$0xff] }
 0x318   : > { %14507 = vst.msk [vmem:[%s17800_s6 + $0x90] sm:$0xf] %vm9471_vm8, %v12564_v21  ;;  %v10125_v52 = vcombine.low %v7697_v16, %v7696_v33  ;;  %v7662_v25 = vrot.slane %v7648_v4, %v19031_v17  ;;  %v7663_v0 = vcombine.high %v7655_v37, %v7655_v37  ;;  %15285 = vmatmul.mubr.msk.bf16.gmra.mrb[120].mxu1 %vm2243_vm6, %v22947_v62  ;;  %v4900_v4 = vpop.permute.xlu0 %4899  ;;  %v16001_v62 = vld [vmem:[%s16077_s20 + $0x1e0] sm:$0xff]  }
 0x319   : > { %v7699_v12 = vcombine.high %v6934_v1, %v6934_v1  ;;  %v7706_v60 = vrot.slane %v6934_v1, %v19031_v17  ;;  %v7665_v51 = vcombine.high %v6932_v49, %v6932_v49  ;;  %v7672_v55 = vrot.slane %v6932_v49, %v19031_v17  ;;  %15288 = vmatprep.mubr.msk.bf16.mxu1 %vm2243_vm6, %v22948_v13 }
 0x31a   : > { %v10139_v36 = vrot.slane %v10125_v52, %v19031_v17  ;;  %v7664_v20 = vcombine.high %v7662_v25, %v7662_v25  ;;  %v10091_v18 = vcombine.low %v7655_v37, %v7663_v0  ;;  %v5657_v24 = vsel %vm5554_vm7, %v5654_v63, %v5656_v30 }
 0x31b   : > { %v20390_v40 = vrot.slane %v7699_v12, %v19031_v17  ;;  %v7714_v47 = vcombine.high %v7706_v60, %v7706_v60  ;;  %v10141_v33 = vcombine.low %v7698_v29, %v7706_v60  ;;  %v7679_v16 = vrot.slane %v7665_v51, %v19031_v17  ;;  %15402 = vmatprep.mubr.msk.bf16.mxu0 %vm2243_vm6, %v5657_v24  ;;  %v5180_v29 = vpop.permute.xlu1 %5179 }
 0x31c   : > { %v10105_v37 = vrot.slane %v10091_v18, %v19031_v17  ;;  %v10107_v21 = vcombine.low %v7662_v25, %v7664_v20  ;;  %v7680_v45 = vcombine.high %v7672_v55, %v7672_v55  ;;  %v5659_v63 = vsel %vm5554_vm7, %v5656_v30, %v5658_v41 }
 0x31d   : > { %v10142_v26 = vcombine.low %v7714_v47, %v20390_v40  ;;  %v10149_v1 = vrot.slane %v10141_v33, %v19031_v17  ;;  %v7681_v49 = vcombine.high %v7679_v16, %v7679_v16  ;;  %15403 = vmatmul.mubr.msk.bf16.gmra.mrb[100].mxu0 %vm2243_vm6, %v5659_v63  ;;  %v20405_v52 = vsel %vm1779_vm5, %v5314_v50, %v20340_v44  ;;  %v22949_v47 = vld [vmem:[#allocation48_spill] sm:$0xff] }
 0x31e   : > { %v10106_v25 = vcombine.low %v10098_v14, %v10105_v37  ;;  %v10115_v11 = vrot.slane %v10107_v21, %v19031_v17  ;;  %v10108_v0 = vcombine.low %v7672_v55, %v7680_v45  ;;  %v5662_v30 = vrot.slane %v20405_v52, 2 }
 0x31f   : > { %v10156_v12 = vrot.slane %v10142_v26, %v19031_v17  ;;  %v10124_v60 = vcombine.low %v7681_v49, %v7689_v46  ;;  %v5451_v51 = vsel %vm1779_vm5, %v5312_v48, %v5174_v19  ;;  %v5318_v20 = vsel %vm1642_vm4, %v16001_v62, %v4902_v23  ;;  %v5178_v48 = vpop.permute.xlu0 %5177 }
 0x320   : > { %v14715_v44 = vpack.c.bf16 %v10106_v25, %v10106_v25  ;;  %v10122_v50 = vrot.slane %v10108_v0, %v19031_v17  ;;  %v5660_v18 = vrot.slane %v5451_v51, 2  ;;  %v5316_v14 = vsel %vm1642_vm4, %v16002_v32, %v4900_v4  ;;  %15289 = vmatmul.mubr.msk.bf16.gmra.mrb[124].mxu1 %vm2243_vm6, %v19145_v10  ;;  %v20437_v21 = vpop.f32.mrb[48].mxu0 }
 0x321   : > { %v10157_v24 = vcombine.low %v10149_v1, %v10156_v12  ;;  %v10132_v55 = vrot.slane %v10124_v60, %v19031_v17  ;;  %v20421_v13 = vsel %vm1779_vm5, %v5318_v20, %v5180_v29  ;;  %v15472_v46 = vadd.f32 %v20067_v43, %v22949_v47  ;;  %15292 = vmatprep.mubr.msk.bf16.mxu1 %vm2243_vm6, %v19232_v38  ;;  %v20448_v26 = vpop.f32.mrb[49].mxu0  ;;  %v22950_v47 = vld [vmem:[#allocation49_spill] sm:$0xff] }
 0x322   : > { %v12567_v19 = vshrl.u32 %v14715_v44, 16  ;;  %v12570_v23 = vshll.u32 %v14715_v44, 16  ;;  %v10123_v33 = vcombine.low %v10115_v11, %v10122_v50  ;;  %v5661_v16 = vsel %vm5554_vm7, %v5658_v41, %v5660_v18  ;;  %v20452_v0 = vpop.f32.mrb[50].mxu0 }
 0x323   : > { %v14718_v4 = vpack.c.bf16 %v10157_v24, %v10157_v24  ;;  %v10140_v37 = vcombine.low %v10132_v55, %v10139_v36  ;;  %15406 = vmatprep.mubr.msk.bf16.mxu0 %vm2243_vm6, %v5661_v16  ;;  %v5663_v43 = vsel %vm5554_vm7, %v5660_v18, %v5662_v30  ;;  %v5666_v10 = vrot.slane %v20421_v13, 2  ;;  %v4906_v36 = vpop.permute.xlu1 %4905  ;;  %v20454_v62 = vpop.f32.mrb[51].mxu0  ;;  %v20461_v18 = vld [vmem:[%s22696_s3] ss:$0 sm:$0xff]  ;;  %v14510_v16 = vld [vmem:[%s17800_s6 + $0x9c] sm:$0x1] }
 0x324   : > { %v12569_v45 = vrot.slane %v12567_v19, 7  ;;  %v14716_v63 = vpack.c.bf16 %v10123_v33, %v10123_v33  ;;  %v6658_v38 = vmul.f32 %v20442_v2, %v15472_v46  ;;  %v20446_v41 = vsel %vm1779_vm5, %v5316_v14, %v5178_v48  ;;  %v4904_v14 = vpop.permute.xlu0 %4903 }
 0x325   : > { %v12593_v1 = vshrl.u32 %v14718_v4, 16  ;;  %v12596_v49 = vshll.u32 %v14718_v4, 16  ;;  %v14717_v25 = vpack.c.bf16 %v10140_v37, %v10140_v37  ;;  %15407 = vmatmul.mubr.msk.bf16.gmra.mrb[104].mxu0 %vm2243_vm6, %v5663_v43  ;;  %v5664_v11 = vrot.slane %v20446_v41, 2 }
 0x326   : > { %v12572_v29 = vor.u32 %v12570_v23, %v12569_v45  ;;  %v12574_v12 = vrot.slane %v12569_v45, 4  ;;  %v12576_v60 = vshrl.u32 %v14716_v63, 16  ;;  %v12579_v51 = vshll.u32 %v14716_v63, 16 }
 0x327   : > { %v20456_v20 = vrot.slane %v12593_v1, 7  ;;  %v12585_v44 = vshrl.u32 %v14717_v25, 16  ;;  %v12588_v50 = vshll.u32 %v14717_v25, 16  ;;  %v6801_v32 = vadd.f32 %v20461_v18, %v6658_v38  ;;  %v5184_v45 = vpop.permute.xlu1 %5183 }
 0x328   : > { %v12573_v24 = vsel %vm19456_vm14, %v12565_v6, %v12572_v29  ;;  %v12578_v55 = vrot.slane %v12576_v60, 7  ;;  %v15473_v46 = vadd.f32 %v20073_v3, %v22950_v47  ;;  %v7715_v48 = vcombine.high %v20390_v40, %v20390_v40  ;;  %15293 = vmatmul.mubr.msk.bf16.gmra.mrb[128].mxu1 %vm2243_vm6, %v19296_v28  ;;  %v14512_v3 = vld [vmem:[%s17800_s6 + $0xa0] sm:$0xf]  ;;  %v16005_v47 = vld [vmem:[%s16077_s20 + $0x1f0] sm:$0xff]  }
 0x329   : > { %14508 = vst.msk [vmem:[%s17800_s6 + $0x94] sm:$0xf] %vm9471_vm8, %v12573_v24  ;;  %v12598_v19 = vor.u32 %v12596_v49, %v20456_v20  ;;  %v12600_v23 = vrot.slane %v20456_v20, 4  ;;  %v12587_v33 = vrot.slane %v12585_v44, 7  ;;  %v6937_v4 = vmax.f32 %v6801_v32, 0.0  ;;  %v22951_v40 = vld [vmem:[#allocation50_spill] sm:$0xff]  ;;  %15296 = vmatprep.mubr.msk.bf16.mxu1 %vm2243_vm6, %v19392_v31  ;;  %v5182_v44 = vpop.permute.xlu0 %5181 }
 0x32a   : > { %v12581_v54 = vor.u32 %v12579_v51, %v12578_v55  ;;  %v12583_v6 = vrot.slane %v12578_v55, 4  ;;  %v6656_v37 = vmul.f32 %v20442_v2, %v15473_v46  ;;  %v15474_v43 = vadd.f32 %v20078_v57, %v22951_v40  ;;  %v22952_v24 = vld [vmem:[#allocation52_spill] sm:$0xff] }
 0x32b   : > { %v12590_v63 = vor.u32 %v12588_v50, %v12587_v33  ;;  %v12591_v38 = vrot.slane %v12587_v33, 4  ;;  %v7749_v1 = vcombine.high %v6937_v4, %v6937_v4  ;;  %v7756_v28 = vrot.slane %v6937_v4, %v19031_v17 }
 0x32c   : > { %v12582_v49 = vsel %vm19456_vm14, %v12574_v12, %v12581_v54  ;;  %v13686_v25 = vsel %vm19463_vm15, %v12583_v6, %v14510_v16  ;;  %v6799_v57 = vadd.f32 %v20461_v18, %v6656_v37  ;;  %v6659_v29 = vmul.f32 %v20442_v2, %v15474_v43  ;;  %v16006_v16 = vld [vmem:[%s16077_s20 + $0x1e8] sm:$0xff]  }
 0x32d   : > { %v12599_v31 = vsel %vm19456_vm14, %v12591_v38, %v12598_v19  ;;  %14509 = vst.msk [vmem:[%s17800_s6 + $0x98] sm:$0xf] %vm9471_vm8, %v12582_v49  ;;  %14511 = vst [vmem:[%s17800_s6 + $0x9c] sm:$0x1] %v13686_v25  ;;  %v13689_v60 = vsel %vm19446_vm13, %v12590_v63, %v14512_v3  ;;  %v7763_v12 = vrot.slane %v7749_v1, %v19031_v17 }
 0x32e   : > { %v7764_v51 = vcombine.high %v7756_v28, %v7756_v28  ;;  %14513 = vst [vmem:[%s17800_s6 + $0xa0] sm:$0xf] %v13689_v60  ;;  %14514 = vst.msk [vmem:[%s17800_s6 + $0xa4] sm:$0xf] %vm9471_vm8, %v12599_v31  ;;  %v6935_v50 = vmax.f32 %v6799_v57, 0.0  ;;  %v6802_v32 = vadd.f32 %v20461_v18, %v6659_v29  ;;  %v15475_v55 = vadd.f32 %v20083_v8, %v22952_v24 }
 0x32f   : > { %v5322_v46 = vsel %vm1642_vm4, %v16005_v47, %v4906_v36  ;;  %v7765_v19 = vcombine.high %v7763_v12, %v7763_v12  ;;  %v5320_v4 = vsel %vm1642_vm4, %v16006_v16, %v4904_v14  ;;  %v5665_v54 = vsel %vm5554_vm7, %v5662_v30, %v5664_v11  ;;  %v4910_v36 = vpop.permute.xlu1 %4909  ;;  %v20533_v57 = vpop.f32.mrb[52].mxu0 }
 0x330   : > { %v10192_v33 = vcombine.low %v7756_v28, %v7764_v51  ;;  %v7716_v6 = vcombine.high %v6935_v50, %v6935_v50  ;;  %v7723_v3 = vrot.slane %v6935_v50, %v19031_v17  ;;  %v6938_v37 = vmax.f32 %v6802_v32, 0.0  ;;  %15410 = vmatprep.mubr.msk.bf16.mxu0 %vm2243_vm6, %v5665_v54  ;;  %v20537_v60 = vpop.f32.mrb[53].mxu0 }
 0x331   : > { %v6657_v8 = vmul.f32 %v20442_v2, %v15475_v55  ;;  %v10193_v40 = vcombine.low %v7763_v12, %v7765_v19  ;;  %v5667_v52 = vsel %vm5554_vm7, %v5664_v11, %v5666_v10  ;;  %v20525_v30 = vsel %vm1779_vm5, %v5322_v46, %v5184_v45  ;;  %v4908_v11 = vpop.permute.xlu0 %4907  ;;  %v20540_v24 = vpop.f32.mrb[54].mxu0  ;;  %v16007_v19 = vld [vmem:[%s16077_s20 + $0x200] sm:$0xff]  }
 0x332   : > { %v10200_v43 = vrot.slane %v10192_v33, %v19031_v17  ;;  %v7730_v14 = vrot.slane %v7716_v6, %v19031_v17  ;;  %v7731_v63 = vcombine.high %v7723_v3, %v7723_v3  ;;  %v10158_v38 = vcombine.low %v7715_v48, %v7723_v3  ;;  %15411 = vmatmul.mubr.msk.bf16.gmra.mrb[108].mxu0 %vm2243_vm6, %v5667_v52  ;;  %v20545_v54 = vpop.f32.mrb[55].mxu0 }
 0x333   : > { %v7766_v1 = vcombine.high %v6938_v37, %v6938_v37  ;;  %v10207_v28 = vrot.slane %v10193_v40, %v19031_v17  ;;  %v7773_v49 = vrot.slane %v6938_v37, %v19031_v17  ;;  %v6800_v25 = vadd.f32 %v20461_v18, %v6657_v8  ;;  %v5188_v16 = vpop.permute.xlu1 %5187 }
 0x334   : > { %v5670_v41 = vrot.slane %v20525_v30, 2  ;;  %v10159_v45 = vcombine.low %v7731_v63, %v7730_v14  ;;  %v10166_v29 = vrot.slane %v10158_v38, %v19031_v17  ;;  %v7732_v31 = vcombine.high %v7730_v14, %v7730_v14 }
 0x335   : > { %v7780_v48 = vrot.slane %v7766_v1, %v19031_v17  ;;  %v10208_v12 = vcombine.low %v10200_v43, %v10207_v28  ;;  %v7781_v51 = vcombine.high %v7773_v49, %v7773_v49  ;;  %v6936_v50 = vmax.f32 %v6800_v25, 0.0  ;;  %v5186_v1 = vpop.permute.xlu0 %5185 }
 0x336   : > { %v5459_v32 = vsel %vm1779_vm5, %v5320_v4, %v5182_v44  ;;  %v10173_v55 = vrot.slane %v10159_v45, %v19031_v17  ;;  %v5326_v33 = vsel %vm1642_vm4, %v16007_v19, %v4910_v36  ;;  %v16008_v44 = vld [vmem:[%s16077_s20 + $0x1f8] sm:$0xff]  }
 0x337   : > { %v7782_v47 = vcombine.high %v7780_v48, %v7780_v48  ;;  %v5668_v46 = vrot.slane %v5459_v32, 2  ;;  %v14721_v6 = vpack.c.bf16 %v10208_v12, %v10208_v12  ;;  %v10209_v3 = vcombine.low %v7773_v49, %v7781_v51  ;;  %v14519_v12 = vld [vmem:[%s17800_s6 + $0xb4] sm:$0xf] }
 0x338   : > { %v7733_v37 = vcombine.high %v6936_v50, %v6936_v50  ;;  %v7740_v8 = vrot.slane %v6936_v50, %v19031_v17  ;;  %v10174_v40 = vcombine.low %v10166_v29, %v10173_v55  ;;  %v5324_v4 = vsel %vm1642_vm4, %v16008_v44, %v4908_v11  ;;  %v22953_v29 = vld [vmem:[#allocation53_spill] sm:$0xff]  ;;  %v22955_v44 = vld [vmem:[#allocation55_spill] sm:$0xff] }
 0x339   : > { %v10210_v43 = vcombine.low %v7780_v48, %v7782_v47  ;;  %v5669_v52 = vsel %vm5554_vm7, %v5666_v10, %v5668_v46  ;;  %v12620_v14 = vshrl.u32 %v14721_v6, 16  ;;  %v12623_v36 = vshll.u32 %v14721_v6, 16 }
 0x33a   : > { %v10217_v63 = vrot.slane %v10209_v3, %v19031_v17  ;;  %v7747_v38 = vrot.slane %v7733_v37, %v19031_v17  ;;  %15414 = vmatprep.mubr.msk.bf16.mxu0 %vm2243_vm6, %v5669_v52  ;;  %v14719_v28 = vpack.c.bf16 %v10174_v40, %v10174_v40  ;;  %v7748_v25 = vcombine.high %v7740_v8, %v7740_v8  ;;  %v22954_v40 = vld [vmem:[#allocation54_spill] sm:$0xff] }
 0x33b   : > { %v10224_v49 = vrot.slane %v10210_v43, %v19031_v17  ;;  %v10175_v45 = vcombine.low %v7732_v31, %v7740_v8  ;;  %v12622_v11 = vrot.slane %v12620_v14, 7  ;;  %v5671_v13 = vsel %vm5554_vm7, %v5668_v46, %v5670_v41  ;;  %v4914_v31 = vpop.permute.xlu1 %4913  ;;  %v4912_v14 = vpop.permute.xlu0 %4911 }
 0x33c   : > { %v20561_v10 = vsel %vm1779_vm5, %v5326_v33, %v5188_v16  ;;  %v15476_v48 = vadd.f32 %v20165_v39, %v22953_v29  ;;  %v12602_v51 = vshrl.u32 %v14719_v28, 16  ;;  %v12605_v50 = vshll.u32 %v14719_v28, 16  ;;  %15415 = vmatmul.mubr.msk.bf16.gmra.mrb[112].mxu0 %vm2243_vm6, %v5671_v13 }
 0x33d   : > { %v10225_v32 = vcombine.low %v10217_v63, %v10224_v49  ;;  %v10176_v55 = vcombine.low %v7748_v25, %v7747_v38  ;;  %v12625_v47 = vor.u32 %v12623_v36, %v12622_v11  ;;  %v12626_v19 = vrot.slane %v12622_v11, 4  ;;  %v22956_v11 = vld [vmem:[#allocation56_spill] sm:$0xff] }
 0x33e   : > { %v10183_v6 = vrot.slane %v10175_v45, %v19031_v17  ;;  %v5674_v46 = vrot.slane %v20561_v10, 2  ;;  %v20569_v33 = vrot.slane %v12602_v51, 7  ;;  %v6662_v3 = vmul.f32 %v20442_v2, %v15476_v48 }
 0x33f   : > { %v14722_v16 = vpack.c.bf16 %v10225_v32, %v10225_v32  ;;  %v10190_v39 = vrot.slane %v10176_v55, %v19031_v17  ;;  %v13698_v37 = vsel %vm19446_vm13, %v12625_v47, %v14519_v12  ;;  %v20576_v8 = vsel %vm1779_vm5, %v5324_v4, %v5186_v1  ;;  %v5192_v29 = vpop.permute.xlu1 %5191 }
 0x340   : > { %v15477_v43 = vadd.f32 %v20169_v34, %v22954_v40  ;;  %v15478_v52 = vadd.f32 %v20177_v59, %v22955_v44  ;;  %14520 = vst [vmem:[%s17800_s6 + $0xb4] sm:$0xf] %v13698_v37  ;;  %v12607_v36 = vor.u32 %v12605_v50, %v20569_v33  ;;  %v12609_v63 = vrot.slane %v20569_v33, 4  ;;  %v16009_v50 = vld [vmem:[%s16077_s20 + $0x210] sm:$0xff]  }
 0x341   : > { %v12628_v38 = vshrl.u32 %v14722_v16, 16  ;;  %v12631_v28 = vshll.u32 %v14722_v16, 16  ;;  %v10191_v49 = vcombine.low %v10183_v6, %v10190_v39  ;;  %v6805_v4 = vadd.f32 %v20461_v18, %v6662_v3  ;;  %v5190_v39 = vpop.permute.xlu0 %5189 }
 0x342   : > { %v5672_v1 = vrot.slane %v20576_v8, 2  ;;  %v6660_v34 = vmul.f32 %v20442_v2, %v15477_v43  ;;  %v12608_v59 = vsel %vm19456_vm14, %v12600_v23, %v12607_v36  ;;  %v6663_v45 = vmul.f32 %v20442_v2, %v15478_v52  ;;  %v16010_v52 = vld [vmem:[%s16077_s20 + $0x208] sm:$0xff]  }
 0x343   : > { %v20592_v25 = vrot.slane %v12628_v38, 7  ;;  %v15479_v13 = vadd.f32 %v20184_v42, %v22956_v11  ;;  %14515 = vst.msk [vmem:[%s17800_s6 + $0xa8] sm:$0xf] %vm9471_vm8, %v12608_v59  ;;  %v14720_v48 = vpack.c.bf16 %v10191_v49, %v10191_v49  ;;  %v6941_v12 = vmax.f32 %v6805_v4, 0.0  ;;  %v14517_v38 = vld [vmem:[%s17800_s6 + $0xb0] sm:$0x1] }
 0x344   : > { %v6803_v51 = vadd.f32 %v20461_v18, %v6660_v34  ;;  %v5330_v20 = vsel %vm1642_vm4, %v16009_v50, %v4914_v31  ;;  %v6806_v55 = vadd.f32 %v20461_v18, %v6663_v45  ;;  %v5328_v36 = vsel %vm1642_vm4, %v16010_v52, %v4912_v14  ;;  %v4918_v34 = vpop.permute.xlu1 %4917 }
 0x345   : > { %v12633_v23 = vor.u32 %v12631_v28, %v20592_v25  ;;  %v12635_v32 = vrot.slane %v20592_v25, 4  ;;  %v6661_v42 = vmul.f32 %v20442_v2, %v15479_v13  ;;  %v12611_v47 = vshrl.u32 %v14720_v48, 16 }
 0x346   : > { %v12614_v6 = vshll.u32 %v14720_v48, 16  ;;  %v7817_v33 = vcombine.high %v6941_v12, %v6941_v12  ;;  %v7824_v16 = vrot.slane %v6941_v12, %v19031_v17  ;;  %v6939_v31 = vmax.f32 %v6803_v51, 0.0 }
 0x347   : > { %v12634_v3 = vsel %vm19456_vm14, %v12626_v19, %v12633_v23  ;;  %v6942_v37 = vmax.f32 %v6806_v55, 0.0  ;;  %v6804_v8 = vadd.f32 %v20461_v18, %v6661_v42  ;;  %v12613_v40 = vrot.slane %v12611_v47, 7  ;;  %v4916_v47 = vpop.permute.xlu0 %4915 }
 0x348   : > { %14521 = vst.msk [vmem:[%s17800_s6 + $0xb8] sm:$0xf] %vm9471_vm8, %v12634_v3  ;;  %v7831_v43 = vrot.slane %v7817_v33, %v19031_v17  ;;  %v7832_v44 = vcombine.high %v7824_v16, %v7824_v16  ;;  %v7783_v28 = vcombine.high %v6939_v31, %v6939_v31  ;;  %v7790_v49 = vrot.slane %v6939_v31, %v19031_v17  ;;  %v5196_v30 = vpop.permute.xlu1 %5195 }
 0x349   : > { %v7834_v4 = vcombine.high %v6942_v37, %v6942_v37  ;;  %v7841_v19 = vrot.slane %v6942_v37, %v19031_v17  ;;  %v12616_v59 = vor.u32 %v12614_v6, %v12613_v40  ;;  %v12618_v45 = vrot.slane %v12613_v40, 4 }
 0x34a   : > { %v10260_v11 = vcombine.low %v7832_v44, %v7831_v43  ;;  %v7833_v13 = vcombine.high %v7831_v43, %v7831_v43  ;;  %v7797_v48 = vrot.slane %v7783_v28, %v19031_v17  ;;  %v7798_v12 = vcombine.high %v7790_v49, %v7790_v49 }
 0x34b   : > { %v20620_v51 = vrot.slane %v7834_v4, %v19031_v17  ;;  %v7849_v14 = vcombine.high %v7841_v19, %v7841_v19  ;;  %v12617_v50 = vsel %vm19456_vm14, %v12609_v63, %v12616_v59  ;;  %v13695_v23 = vsel %vm19463_vm15, %v12618_v45, %v14517_v38  ;;  %v20627_v6 = vpop.f32.mrb[56].mxu0 }
 0x34c   : > { %v10268_v55 = vrot.slane %v10260_v11, %v19031_v17  ;;  %v10261_v42 = vcombine.low %v7833_v13, %v7841_v19  ;;  %14516 = vst.msk [vmem:[%s17800_s6 + $0xac] sm:$0xf] %vm9471_vm8, %v12617_v50  ;;  %14518 = vst [vmem:[%s17800_s6 + $0xb0] sm:$0x1] %v13695_v23  ;;  %v7799_v33 = vcombine.high %v7797_v48, %v7797_v48  ;;  %v6940_v31 = vmax.f32 %v6804_v8, 0.0  ;;  %v20635_v37 = vpop.f32.mrb[57].mxu0 }
 0x34d   : > { %v10226_v16 = vcombine.low %v7790_v49, %v7798_v12  ;;  %v20633_v3 = vcombine.low %v7849_v14, %v20620_v51  ;;  %v5673_v40 = vsel %vm5554_vm7, %v5670_v41, %v5672_v1  ;;  %v5675_v43 = vsel %vm5554_vm7, %v5672_v1, %v5674_v46  ;;  %v20647_v52 = vpop.f32.mrb[58].mxu0  ;;  %v16011_v11 = vld [vmem:[%s16077_s20 + $0x220] sm:$0xff]   ;;  %v16012_v14 = vld [vmem:[%s16077_s20 + $0x218] sm:$0xff]  }
 0x34e   : > { %v10275_v63 = vrot.slane %v10261_v42, %v19031_v17  ;;  %v20645_v44 = vsel %vm1779_vm5, %v5330_v20, %v5192_v29  ;;  %v10227_v38 = vcombine.low %v7797_v48, %v7799_v33  ;;  %v7800_v49 = vcombine.high %v6940_v31, %v6940_v31  ;;  %15418 = vmatprep.mubr.msk.bf16.mxu0 %vm2243_vm6, %v5673_v40  ;;  %v20653_v41 = vpop.f32.mrb[59].mxu0 }
 0x34f   : > { %v10234_v8 = vrot.slane %v10226_v16, %v19031_v17  ;;  %v10285_v28 = vrot.slane %v20633_v3, %v19031_v17  ;;  %v7807_v29 = vrot.slane %v6940_v31, %v19031_v17  ;;  %15419 = vmatmul.mubr.msk.bf16.gmra.mrb[116].mxu0 %vm2243_vm6, %v5675_v43  ;;  %v5678_v20 = vrot.slane %v20645_v44, 2  ;;  %v22957_v43 = vld [vmem:[#allocation58_spill] sm:$0xff] }
 0x350   : > { %v10276_v1 = vcombine.low %v10268_v55, %v10275_v63  ;;  %v5467_v4 = vsel %vm1779_vm5, %v5328_v36, %v5190_v39  ;;  %v10241_v19 = vrot.slane %v10227_v38, %v19031_v17  ;;  %v7814_v59 = vrot.slane %v7800_v49, %v19031_v17  ;;  %v5194_v55 = vpop.permute.xlu0 %5193 }
 0x351   : > { %v5676_v45 = vrot.slane %v5467_v4, 2  ;;  %v5334_v13 = vsel %vm1642_vm4, %v16011_v11, %v4918_v34  ;;  %v7815_v12 = vcombine.high %v7807_v29, %v7807_v29  ;;  %v5332_v50 = vsel %vm1642_vm4, %v16012_v14, %v4916_v47 }
 0x352   : > { %v14725_v48 = vpack.c.bf16 %v10276_v1, %v10276_v1  ;;  %v20666_v23 = vsel %vm1779_vm5, %v5334_v13, %v5196_v30  ;;  %v10242_v42 = vcombine.low %v10234_v8, %v10241_v19  ;;  %v7816_v33 = vcombine.high %v7814_v59, %v7814_v59  ;;  %v22958_v30 = vld [vmem:[#allocation59_spill] sm:$0xff] }
 0x353   : > { %v5677_v39 = vsel %vm5554_vm7, %v5674_v46, %v5676_v45  ;;  %v5679_v36 = vsel %vm5554_vm7, %v5676_v45, %v5678_v20  ;;  %v10243_v31 = vcombine.low %v7807_v29, %v7815_v12  ;;  %v5682_v47 = vrot.slane %v20666_v23, 2  ;;  %v14526_v19 = vld [vmem:[%s17800_s6 + $0xc8] sm:$0xf] }
 0x354   : > { %v12655_v34 = vshrl.u32 %v14725_v48, 16  ;;  %v12658_v16 = vshll.u32 %v14725_v48, 16  ;;  %15422 = vmatprep.mubr.msk.bf16.mxu0 %vm2243_vm6, %v5677_v39  ;;  %v14723_v63 = vpack.c.bf16 %v10242_v42, %v10242_v42  ;;  %v10244_v40 = vcombine.low %v7814_v59, %v7816_v33  ;;  %v4922_v42 = vpop.permute.xlu1 %4921  ;;  %v4920_v33 = vpop.permute.xlu0 %4919 }
 0x355   : > { %v15480_v38 = vadd.f32 %v20247_v35, %v22957_v43  ;;  %v20679_v10 = vsel %vm1779_vm5, %v5332_v50, %v5194_v55  ;;  %v10251_v8 = vrot.slane %v10243_v31, %v19031_v17  ;;  %v15481_v1 = vadd.f32 %v20259_v9, %v22958_v30  ;;  %v22959_v50 = vld [vmem:[#allocation60_spill] sm:$0xff] }
 0x356   : > { %v20681_v46 = vrot.slane %v12655_v34, 7  ;;  %v5680_v49 = vrot.slane %v20679_v10, 2  ;;  %v12637_v29 = vshrl.u32 %v14723_v63, 16  ;;  %v12640_v4 = vshll.u32 %v14723_v63, 16  ;;  %v22960_v34 = vld [vmem:[#allocation62_spill] sm:$0xff]  ;;  %v16013_v31 = vld [vmem:[%s16077_s20 + $0x230] sm:$0xff]  }
 0x357   : > { %v10258_v59 = vrot.slane %v10244_v40, %v19031_v17  ;;  %v6666_v35 = vmul.f32 %v20442_v2, %v15480_v38  ;;  %15423 = vmatmul.mubr.msk.bf16.gmra.mrb[120].mxu0 %vm2243_vm6, %v5679_v36  ;;  %v6664_v13 = vmul.f32 %v20442_v2, %v15481_v1  ;;  %v7850_v9 = vcombine.high %v20620_v51, %v20620_v51  ;;  %v16014_v1 = vld [vmem:[%s16077_s20 + $0x228] sm:$0xff]  }
 0x358   : > { %v12660_v45 = vor.u32 %v12658_v16, %v20681_v46  ;;  %v12661_v11 = vrot.slane %v20681_v46, 4  ;;  %v12639_v48 = vrot.slane %v12637_v29, 7  ;;  %v15482_v55 = vadd.f32 %v20263_v22, %v22959_v50  ;;  %v5200_v50 = vpop.permute.xlu1 %5199 }
 0x359   : > { %v10259_v12 = vcombine.low %v10251_v8, %v10258_v59  ;;  %v6809_v14 = vadd.f32 %v20461_v18, %v6666_v35  ;;  %v6807_v36 = vadd.f32 %v20461_v18, %v6664_v13  ;;  %v15483_v16 = vadd.f32 %v20275_v56, %v22960_v34  ;;  %v5198_v34 = vpop.permute.xlu0 %5197 }
 0x35a   : > { %v13707_v39 = vsel %vm19446_vm13, %v12660_v45, %v14526_v19  ;;  %v20706_v51 = vsel %vm1642_vm4, %v16013_v31, %v4922_v42  ;;  %v12642_v63 = vor.u32 %v12640_v4, %v12639_v48  ;;  %v12644_v40 = vrot.slane %v12639_v48, 4 }
 0x35b   : > { %14527 = vst [vmem:[%s17800_s6 + $0xc8] sm:$0xf] %v13707_v39  ;;  %v14724_v22 = vpack.c.bf16 %v10259_v12, %v10259_v12  ;;  %v20709_v43 = vmax.f32 %v6809_v14, 0.0  ;;  %v6943_v38 = vmax.f32 %v6807_v36, 0.0  ;;  %v6667_v8 = vmul.f32 %v20442_v2, %v15482_v55  ;;  %v14524_v55 = vld [vmem:[%s17800_s6 + $0xc4] sm:$0x1] }
 0x35c   : > { %v6665_v30 = vmul.f32 %v20442_v2, %v15483_v16  ;;  %v20715_v56 = vsel %vm1642_vm4, %v16014_v1, %v4920_v33  ;;  %v12643_v29 = vsel %vm19456_vm14, %v12635_v32, %v12642_v63  ;;  %v5681_v14 = vsel %vm5554_vm7, %v5678_v20, %v5680_v49 }
 0x35d   : > { %v12646_v4 = vshrl.u32 %v14724_v22, 16  ;;  %v12649_v19 = vshll.u32 %v14724_v22, 16  ;;  %v7885_v59 = vcombine.high %v20709_v43, %v20709_v43  ;;  %14522 = vst.msk [vmem:[%s17800_s6 + $0xbc] sm:$0xf] %vm9471_vm8, %v12643_v29  ;;  %v7892_v35 = vrot.slane %v20709_v43, %v19031_v17  ;;  %15426 = vmatprep.mubr.msk.bf16.mxu0 %vm2243_vm6, %v5681_v14 }
 0x35e   : > { %v7851_v45 = vcombine.high %v6943_v38, %v6943_v38  ;;  %v7858_v13 = vrot.slane %v6943_v38, %v19031_v17  ;;  %v6810_v48 = vadd.f32 %v20461_v18, %v6667_v8  ;;  %v6808_v32 = vadd.f32 %v20461_v18, %v6665_v30 }
 0x35f   : > { %v12648_v12 = vrot.slane %v12646_v4, 7  ;;  %v7899_v25 = vrot.slane %v7885_v59, %v19031_v17  ;;  %v20741_v30 = vpop.f32.mrb[60].mxu0  ;;  %v5683_v3 = vsel %vm5554_vm7, %v5680_v49, %v5682_v47  ;;  %v15876_v49 = vld [vmem:[%s16077_s20 + $0x240] ss:$0 sps:$4 sm:$0x33]  }
 0x360   : > { %v7865_v42 = vrot.slane %v7851_v45, %v19031_v17  ;;  %v7866_v33 = vcombine.high %v7858_v13, %v7858_v13  ;;  %v10278_v39 = vcombine.low %v7850_v9, %v7858_v13  ;;  %v6946_v36 = vmax.f32 %v6810_v48, 0.0  ;;  %15427 = vmatmul.mubr.msk.bf16.gmra.mrb[124].mxu0 %vm2243_vm6, %v5683_v3 }
 0x361   : > { %v12651_v16 = vor.u32 %v12649_v19, %v12648_v12  ;;  %v12653_v31 = vrot.slane %v12648_v12, 4  ;;  %v7900_v63 = vcombine.high %v7899_v25, %v7899_v25  ;;  %v6944_v22 = vmax.f32 %v6808_v32, 0.0  ;;  %v20747_v19 = vpop.f32.mrb[61].mxu0 }
 0x362   : > { %v10292_v44 = vrot.slane %v10278_v39, %v19031_v17  ;;  %v10294_v38 = vcombine.low %v7866_v33, %v7865_v42  ;;  %v7901_v20 = vcombine.high %v6946_v36, %v6946_v36  ;;  %v7908_v8 = vrot.slane %v6946_v36, %v19031_v17  ;;  %v4924_v36 = vpop.permute.xlu0 %4923 }
 0x363   : > { %v12652_v9 = vsel %vm19456_vm14, %v12644_v40, %v12651_v16  ;;  %v13704_v1 = vsel %vm19463_vm15, %v12653_v31, %v14524_v55  ;;  %v10328_v29 = vcombine.low %v7899_v25, %v7900_v63  ;;  %v7867_v4 = vcombine.high %v7865_v42, %v7865_v42  ;;  %v20757_v40 = vpop.f32.mrb[62].mxu0 }
 0x364   : > { %14523 = vst.msk [vmem:[%s17800_s6 + $0xc0] sm:$0xf] %vm9471_vm8, %v12652_v9  ;;  %14525 = vst [vmem:[%s17800_s6 + $0xc4] sm:$0x1] %v13704_v1  ;;  %v10293_v59 = vcombine.low %v10285_v28, %v10292_v44  ;;  %v10302_v45 = vrot.slane %v10294_v38, %v19031_v17  ;;  %v7915_v13 = vrot.slane %v7901_v20, %v19031_v17  ;;  %v4926_v28 = vpop.permute.xlu1 %4925  ;;  %v20766_v14 = vpop.f32.mrb[63].mxu0 }
 0x365   : > { %v7916_v48 = vcombine.high %v7908_v8, %v7908_v8  ;;  %v10336_v12 = vrot.slane %v10328_v29, %v19031_v17  ;;  %v7868_v25 = vcombine.high %v6944_v22, %v6944_v22  ;;  %v7875_v32 = vrot.slane %v6944_v22, %v19031_v17 }
 0x366   : > { %v14726_v55 = vpack.c.bf16 %v10293_v59, %v10293_v59  ;;  %v7917_v42 = vcombine.high %v7915_v13, %v7915_v13  ;;  %v20771_v39 = vsel %vm1779_vm5, %v20706_v51, %v5200_v50  ;;  %v5475_v50 = vsel %vm1779_vm5, %v20715_v56, %v5198_v34  ;;  %v16015_v34 = vld [vmem:[%s16077_s20 + $0x238] sm:$0xff]  }
 0x367   : > { %v10329_v33 = vcombine.low %v7908_v8, %v7916_v48  ;;  %v7882_v16 = vrot.slane %v7868_v25, %v19031_v17  ;;  %v7883_v31 = vcombine.high %v7875_v32, %v7875_v32  ;;  %v10295_v63 = vcombine.low %v7867_v4, %v7875_v32 }
 0x368   : > { %v5686_v10 = vrot.slane %v20771_v39, 2  ;;  %v12663_v22 = vshrl.u32 %v14726_v55, 16  ;;  %v12666_v44 = vshll.u32 %v14726_v55, 16  ;;  %v20777_v20 = vcombine.low %v7915_v13, %v7917_v42  ;;  %v5204_v3 = vpop.permute.xlu1 %5203 }
 0x369   : > { %v10343_v38 = vrot.slane %v10329_v33, %v19031_v17  ;;  %v7884_v8 = vcombine.high %v7882_v16, %v7882_v16  ;;  %v10309_v9 = vrot.slane %v10295_v63, %v19031_v17  ;;  %v10311_v51 = vcombine.low %v7883_v31, %v7882_v16  ;;  %v5202_v33 = vpop.permute.xlu0 %5201 }
 0x36a   : > { %v12665_v1 = vrot.slane %v12663_v22, 7  ;;  %v10353_v4 = vrot.slane %v20777_v20, %v19031_v17  ;;  %v5684_v59 = vrot.slane %v5475_v50, 2  ;;  %v5343_v32 = vsel %vm1642_vm4, %v15876_v49, %v4926_v28 }
 0x36b   : > { %v10344_v29 = vcombine.low %v10336_v12, %v10343_v38  ;;  %v10310_v48 = vcombine.low %v10302_v45, %v10309_v9  ;;  %v10312_v13 = vcombine.low %v7884_v8, %v7892_v35  ;;  %v10319_v25 = vrot.slane %v10311_v51, %v19031_v17  ;;  %v22962_v8 = vld [vmem:[#allocation64_spill] sm:$0xff]  ;;  %v14533_v51 = vld [vmem:[%s17800_s6 + $0xdc] sm:$0xf] }
 0x36c   : > { %v12668_v55 = vor.u32 %v12666_v44, %v12665_v1  ;;  %v12670_v42 = vrot.slane %v12665_v1, 4  ;;  %v5340_v12 = vsel %vm1642_vm4, %v16015_v34, %v4924_v36  ;;  %v5685_v43 = vsel %vm5554_vm7, %v5682_v47, %v5684_v59  ;;  %v22961_v44 = vld [vmem:[#allocation63_spill] sm:$0xff] }
 0x36d   : > { %v14729_v56 = vpack.c.bf16 %v10344_v29, %v10344_v29  ;;  %v10326_v16 = vrot.slane %v10312_v13, %v19031_v17  ;;  %v14727_v45 = vpack.c.bf16 %v10310_v48, %v10310_v48  ;;  %v5687_v35 = vsel %vm5554_vm7, %v5684_v59, %v5686_v10  ;;  %15430 = vmatprep.mubr.msk.bf16.mxu0 %vm2243_vm6, %v5685_v43  ;;  %v22963_v59 = vld [vmem:[#allocation65_spill] sm:$0xff] }
 0x36e   : > { %v12669_v28 = vsel %vm19456_vm14, %v12661_v11, %v12668_v55  ;;  %v20804_v63 = vsel %vm1779_vm5, %v5343_v32, %v5204_v3  ;;  %15431 = vmatmul.mubr.msk.bf16.gmra.mrb[128].mxu0 %vm2243_vm6, %v5687_v35  ;;  %v15484_v11 = vadd.f32 %v20350_v27, %v22961_v44  ;;  %v5479_v38 = vsel %vm1779_vm5, %v5340_v12, %v5202_v33  ;;  %v1364_v3 = vpop.permute.xlu0 %1363  ;;  %v1641_v12 = vpop.permute.xlu1 %1640 }
 0x36f   : > { %v12690_v31 = vshrl.u32 %v14729_v56, 16  ;;  %v12693_v36 = vshll.u32 %v14729_v56, 16  ;;  %14528 = vst.msk [vmem:[%s17800_s6 + $0xcc] sm:$0xf] %vm9471_vm8, %v12669_v28  ;;  %v10327_v23 = vcombine.low %v10319_v25, %v10326_v16  ;;  %v12672_v47 = vshrl.u32 %v14727_v45, 16  ;;  %v22964_v28 = vld [vmem:[#allocation66_spill] sm:$0xff] }
 0x370   : > { %v12675_v49 = vshll.u32 %v14727_v45, 16  ;;  %v5690_v46 = vrot.slane %v20804_v63, 2  ;;  %v15485_v9 = vadd.f32 %v20358_v15, %v22962_v8  ;;  %v5688_v29 = vrot.slane %v5479_v38, 2 }
 0x371   : > { %v20810_v22 = vrot.slane %v12690_v31, 7  ;;  %v14728_v50 = vpack.c.bf16 %v10327_v23, %v10327_v23  ;;  %v12674_v1 = vrot.slane %v12672_v47, 7  ;;  %v15486_v48 = vadd.f32 %v20363_v5, %v22963_v59  ;;  %v14531_v23 = vld [vmem:[%s17800_s6 + $0xd8] sm:$0x1] }
 0x372   : > { %v6670_v32 = vmul.f32 %v20442_v2, %v15484_v11  ;;  %v6668_v27 = vmul.f32 %v20442_v2, %v15485_v9  ;;  %v15487_v31 = vadd.f32 %v20367_v7, %v22964_v28  ;;  %v5689_v7 = vsel %vm5554_vm7, %v5686_v10, %v5688_v29 }
 0x373   : > { %v12695_v13 = vor.u32 %v12693_v36, %v20810_v22  ;;  %v12696_v25 = vrot.slane %v20810_v22, 4  ;;  %v12677_v15 = vor.u32 %v12675_v49, %v12674_v1  ;;  %v12679_v55 = vrot.slane %v12674_v1, 4  ;;  %v16016_v36 = vld [vmem:[%s16077_s20 + $0x218] sm:$0xff]   ;;  %15434 = vmatprep.mubr.msk.bf16.mxu0 %vm2243_vm6, %v5689_v7 }
 0x374   : > { %v12681_v56 = vshrl.u32 %v14728_v50, 16  ;;  %v12684_v34 = vshll.u32 %v14728_v50, 16  ;;  %v6813_v33 = vadd.f32 %v20461_v18, %v6670_v32  ;;  %v6811_v16 = vadd.f32 %v20461_v18, %v6668_v27  ;;  %v22966_v7 = vld [vmem:[#allocation69_spill] sm:$0xff] }
 0x375   : > { %v13716_v5 = vsel %vm19446_vm13, %v12695_v13, %v14533_v51  ;;  %v6671_v45 = vmul.f32 %v20442_v2, %v15486_v48  ;;  %v12678_v43 = vsel %vm19456_vm14, %v12670_v42, %v12677_v15  ;;  %v1778_v63 = vsel %vm1642_vm4, %v16016_v36, %v1364_v3 }
 0x376   : > { %14534 = vst [vmem:[%s17800_s6 + $0xdc] sm:$0xf] %v13716_v5  ;;  %v12683_v35 = vrot.slane %v12681_v56, 7  ;;  %14529 = vst.msk [vmem:[%s17800_s6 + $0xd0] sm:$0xf] %vm9471_vm8, %v12678_v43  ;;  %v6949_v47 = vmax.f32 %v6813_v33, 0.0  ;;  %v1915_v11 = vsel %vm1779_vm5, %v1778_v63, %v1641_v12  ;;  %v6669_v8 = vmul.f32 %v20442_v2, %v15487_v31 }
 0x377   : > { %v6947_v49 = vmax.f32 %v6811_v16, 0.0  ;;  %v6814_v44 = vadd.f32 %v20461_v18, %v6671_v45  ;;  %15297 = vmatmul.mubr.msk.bf16.gmra.mrb[132].mxu1 %vm2243_vm6, %v1915_v11 }
 0x378   : > { %v12686_v38 = vor.u32 %v12684_v34, %v12683_v35  ;;  %v12688_v42 = vrot.slane %v12683_v35, 4  ;;  %v7952_v9 = vcombine.high %v6949_v47, %v6949_v47  ;;  %v7959_v51 = vrot.slane %v6949_v47, %v19031_v17 }
 0x379   : > { %v7918_v50 = vcombine.high %v6947_v49, %v6947_v49  ;;  %v7925_v1 = vrot.slane %v6947_v49, %v19031_v17  ;;  %v6950_v13 = vmax.f32 %v6814_v44, 0.0  ;;  %v6812_v39 = vadd.f32 %v20461_v18, %v6669_v8  ;;  %v22965_v49 = vld [vmem:[#allocation68_spill] sm:$0xff] }
 0x37a   : > { %v12687_v59 = vsel %vm19456_vm14, %v12679_v55, %v12686_v38  ;;  %v13713_v48 = vsel %vm19463_vm15, %v12688_v42, %v14531_v23  ;;  %v7966_v10 = vrot.slane %v7952_v9, %v19031_v17  ;;  %v7967_v32 = vcombine.high %v7959_v51, %v7959_v51 }
 0x37b   : > { %14530 = vst.msk [vmem:[%s17800_s6 + $0xd4] sm:$0xf] %vm9471_vm8, %v12687_v59  ;;  %14532 = vst [vmem:[%s17800_s6 + $0xd8] sm:$0x1] %v13713_v48  ;;  %v7932_v27 = vrot.slane %v7918_v50, %v19031_v17  ;;  %v7933_v3 = vcombine.high %v7925_v1, %v7925_v1  ;;  %v7969_v15 = vcombine.high %v6950_v13, %v6950_v13  ;;  %v6948_v34 = vmax.f32 %v6812_v39, 0.0  ;;  %v22967_v39 = vld [vmem:[#allocation70_spill] sm:$0xff] }
 0x37c   : > { %v7976_v56 = vrot.slane %v6950_v13, %v19031_v17  ;;  %v5691_v55 = vsel %vm5554_vm7, %v5688_v29, %v5690_v46  ;;  %v7968_v12 = vcombine.high %v7966_v10, %v7966_v10  ;;  %v10380_v5 = vcombine.low %v7959_v51, %v7967_v32  ;;  %v20872_v11 = vpop.f32.mrb[64].mxu0 }
 0x37d   : > { %v7934_v33 = vcombine.high %v7932_v27, %v7932_v27  ;;  %v10346_v16 = vcombine.low %v7925_v1, %v7933_v3  ;;  %15435 = vmatmul.mubr.msk.bf16.gmra.mrb[132].mxu0 %vm2243_vm6, %v5691_v55  ;;  %v20863_v45 = vrot.slane %v7969_v15, %v19031_v17  ;;  %v7935_v35 = vcombine.high %v6948_v34, %v6948_v34  ;;  %v20881_v51 = vpop.f32.mrb[65].mxu0 }
 0x37e   : > { %v7984_v43 = vcombine.high %v7976_v56, %v7976_v56  ;;  %v7942_v28 = vrot.slane %v6948_v34, %v19031_v17  ;;  %v10394_v31 = vrot.slane %v10380_v5, %v19031_v17  ;;  %v10396_v23 = vcombine.low %v7968_v12, %v7976_v56  ;;  %v20885_v48 = vpop.f32.mrb[66].mxu0 }
 0x37f   : > { %v10360_v36 = vrot.slane %v10346_v16, %v19031_v17  ;;  %v10362_v63 = vcombine.low %v7932_v27, %v7934_v33  ;;  %v7949_v29 = vrot.slane %v7935_v35, %v19031_v17  ;;  %v15488_v44 = vadd.f32 %v20437_v21, %v22965_v49 }
 0x380   : > { %v10397_v46 = vcombine.low %v7984_v43, %v20863_v45  ;;  %v7950_v47 = vcombine.high %v7942_v28, %v7942_v28  ;;  %v10404_v8 = vrot.slane %v10396_v23, %v19031_v17  ;;  %v15489_v9 = vadd.f32 %v20448_v26, %v22966_v7  ;;  %v20892_v26 = vpop.f32.mrb[67].mxu0 }
 0x381   : > { %v10361_v38 = vcombine.low %v10353_v4, %v10360_v36  ;;  %v10370_v42 = vrot.slane %v10362_v63, %v19031_v17  ;;  %v7951_v1 = vcombine.high %v7949_v29, %v7949_v29  ;;  %v6674_v21 = vmul.f32 %v20442_v2, %v15488_v44  ;;  %v22968_v36 = vld [vmem:[#allocation72_spill] sm:$0xff] }
 0x382   : > { %v10411_v50 = vrot.slane %v10397_v46, %v19031_v17  ;;  %v10363_v59 = vcombine.low %v7942_v28, %v7950_v47  ;;  %v6672_v20 = vmul.f32 %v20442_v2, %v15489_v9  ;;  %v7985_v4 = vcombine.high %v20863_v45, %v20863_v45 }
 0x383   : > { %v14730_v13 = vpack.c.bf16 %v10361_v38, %v10361_v38  ;;  %v15490_v10 = vadd.f32 %v20452_v0, %v22967_v39  ;;  %v10379_v3 = vcombine.low %v7949_v29, %v7951_v1  ;;  %v6817_v15 = vadd.f32 %v20461_v18, %v6674_v21  ;;  %v20899_v0 = vpop.f32.mrb[68].mxu1  ;;  %v14540_v1 = vld [vmem:[%s17800_s6 + $0xf0] sm:$0xf] }
 0x384   : > { %v10412_v32 = vcombine.low %v10404_v8, %v10411_v50  ;;  %v10377_v27 = vrot.slane %v10363_v59, %v19031_v17  ;;  %v6815_v55 = vadd.f32 %v20461_v18, %v6672_v20  ;;  %v15491_v63 = vadd.f32 %v20454_v62, %v22968_v36  ;;  %v20904_v23 = vpop.f32.mrb[69].mxu1 }
 0x385   : > { %v12698_v56 = vshrl.u32 %v14730_v13, 16  ;;  %v12701_v34 = vshll.u32 %v14730_v13, 16  ;;  %v6675_v12 = vmul.f32 %v20442_v2, %v15490_v10  ;;  %v10387_v16 = vrot.slane %v10379_v3, %v19031_v17  ;;  %v20906_v49 = vpop.f32.mrb[70].mxu1 }
 0x386   : > { %v14733_v5 = vpack.c.bf16 %v10412_v32, %v10412_v32  ;;  %v10378_v33 = vcombine.low %v10370_v42, %v10377_v27  ;;  %v6953_v45 = vmax.f32 %v6817_v15, 0.0  ;;  %v6951_v35 = vmax.f32 %v6815_v55, 0.0 }
 0x387   : > { %v12700_v43 = vrot.slane %v12698_v56, 7  ;;  %v6818_v28 = vadd.f32 %v20461_v18, %v6675_v12  ;;  %v10395_v2 = vcombine.low %v10387_v16, %v10394_v31  ;;  %v20911_v18 = vpop.f32.mrb[71].mxu1 }
 0x388   : > { %v12725_v46 = vshrl.u32 %v14733_v5, 16  ;;  %v12728_v29 = vshll.u32 %v14733_v5, 16  ;;  %v14731_v47 = vpack.c.bf16 %v10378_v33, %v10378_v33  ;;  %v8020_v42 = vcombine.high %v6953_v45, %v6953_v45  ;;  %v14538_v5 = vld [vmem:[%s17800_s6 + $0xec] sm:$0x1] }
 0x389   : > { %v12703_v44 = vor.u32 %v12701_v34, %v12700_v43  ;;  %v12705_v38 = vrot.slane %v12700_v43, 4  ;;  %v20909_v8 = vrot.slane %v6953_v45, %v19031_v17  ;;  %v14732_v62 = vpack.c.bf16 %v10395_v2, %v10395_v2  ;;  %v20946_v2 = vld [vmem:[%s22695_s2] ss:$0 sm:$0xff] }
 0x38a   : > { %v20913_v7 = vrot.slane %v12725_v46, 7  ;;  %v12707_v9 = vshrl.u32 %v14731_v47, 16  ;;  %v12710_v50 = vshll.u32 %v14731_v47, 16  ;;  %v8034_v59 = vrot.slane %v8020_v42, %v19031_v17 }
 0x38b   : > { %v12704_v31 = vsel %vm19456_vm14, %v12696_v25, %v12703_v44  ;;  %v8035_v21 = vcombine.high %v20909_v8, %v20909_v8  ;;  %v7986_v13 = vcombine.high %v6951_v35, %v6951_v35  ;;  %v12716_v22 = vshrl.u32 %v14732_v62, 16  ;;  %v20933_v12 = vpop.f32.mrb[72].mxu1 }
 0x38c   : > { %14535 = vst.msk [vmem:[%s17800_s6 + $0xe0] sm:$0xf] %vm9471_vm8, %v12704_v31  ;;  %v12730_v20 = vor.u32 %v12728_v29, %v20913_v7  ;;  %v12709_v10 = vrot.slane %v12707_v9, 7  ;;  %v12719_v32 = vshll.u32 %v14732_v62, 16  ;;  %v7993_v25 = vrot.slane %v6951_v35, %v19031_v17  ;;  %v20939_v35 = vpop.f32.mrb[73].mxu1 }
 0x38d   : > { %v20927_v27 = vcombine.low %v8035_v21, %v8034_v59  ;;  %v8000_v3 = vrot.slane %v7986_v13, %v19031_v17  ;;  %v12718_v55 = vrot.slane %v12716_v22, 7  ;;  %v6954_v43 = vmax.f32 %v6818_v28, 0.0  ;;  %v20949_v44 = vpop.f32.mrb[68].mxu0 }
 0x38e   : > { %v13725_v15 = vsel %vm19446_vm13, %v12730_v20, %v14540_v1  ;;  %v12712_v56 = vor.u32 %v12710_v50, %v12709_v10  ;;  %v12714_v34 = vrot.slane %v12709_v10, 4  ;;  %v8001_v16 = vcombine.high %v7993_v25, %v7993_v25  ;;  %v20957_v9 = vpop.f32.mrb[69].mxu0  ;;  %v20968_v1 = vld [vmem:[%s22696_s3] ss:$0 sm:$0xff] }
 0x38f   : > { %14541 = vst [vmem:[%s17800_s6 + $0xf0] sm:$0xf] %v13725_v15  ;;  %v10413_v45 = vcombine.low %v7985_v4, %v7993_v25  ;;  %v12721_v46 = vor.u32 %v12719_v32, %v12718_v55  ;;  %v12723_v29 = vrot.slane %v12718_v55, 4  ;;  %v6673_v47 = vmul.f32 %v20946_v2, %v15491_v63  ;;  %v20951_v4 = vpop.f32.mrb[74].mxu1  ;;  %v20971_v13 = vpop.f32.mrb[70].mxu0  ;;  %v22969_v32 = vld [vmem:[#allocation73_spill] sm:$0xff] }
 0x390   : > { %v12713_v36 = vsel %vm19456_vm14, %v12705_v38, %v12712_v56  ;;  %v10414_v28 = vcombine.low %v8001_v16, %v8000_v3  ;;  %v8036_v42 = vcombine.high %v6954_v43, %v6954_v43  ;;  %v8043_v62 = vrot.slane %v6954_v43, %v19031_v17  ;;  %v20959_v50 = vpop.f32.mrb[75].mxu1  ;;  %v20980_v15 = vpop.f32.mrb[71].mxu0  ;;  %v22972_v16 = vld [vmem:[#allocation76_spill] sm:$0xff] }
 0x391   : > { %14536 = vst.msk [vmem:[%s17800_s6 + $0xe4] sm:$0xf] %vm9471_vm8, %v12713_v36  ;;  %v10421_v38 = vrot.slane %v10413_v45, %v19031_v17  ;;  %v12722_v63 = vsel %vm19456_vm14, %v12714_v34, %v12721_v46  ;;  %v13722_v31 = vsel %vm19463_vm15, %v12723_v29, %v14538_v5  ;;  %v6816_v59 = vadd.f32 %v20968_v1, %v6673_v47  ;;  %v22970_v34 = vld [vmem:[#allocation74_spill] sm:$0xff] }
 0x392   : > { %v8002_v21 = vcombine.high %v8000_v3, %v8000_v3  ;;  %14537 = vst.msk [vmem:[%s17800_s6 + $0xe8] sm:$0xf] %vm9471_vm8, %v12722_v63  ;;  %14539 = vst [vmem:[%s17800_s6 + $0xec] sm:$0x1] %v13722_v31  ;;  %v10428_v20 = vrot.slane %v10414_v28, %v19031_v17  ;;  %v8050_v10 = vrot.slane %v8036_v42, %v19031_v17  ;;  %v22971_v3 = vld [vmem:[#allocation75_spill] sm:$0xff] }
 0x393   : > { %v8051_v22 = vcombine.high %v8043_v62, %v8043_v62  ;;  %v15492_v25 = vadd.f32 %v20533_v57, %v22969_v32  ;;  %v6952_v56 = vmax.f32 %v6816_v59, 0.0  ;;  %v15493_v55 = vadd.f32 %v20537_v60, %v22970_v34  ;;  %v20994_v60 = vpop.f32.mrb[76].mxu1 }
 0x394   : > { %v15494_v5 = vadd.f32 %v20540_v24, %v22971_v3  ;;  %v20988_v45 = vadd.f32 %v20545_v54, %v22972_v16  ;;  %v10429_v43 = vcombine.low %v10421_v38, %v10428_v20  ;;  %v8052_v36 = vcombine.high %v8050_v10, %v8050_v10  ;;  %v20998_v38 = vpop.f32.mrb[77].mxu1 }
 0x395   : > { %v10464_v46 = vcombine.low %v8043_v62, %v8051_v22  ;;  %v6678_v29 = vmul.f32 %v20946_v2, %v15492_v25  ;;  %v8003_v47 = vcombine.high %v6952_v56, %v6952_v56  ;;  %v8010_v57 = vrot.slane %v6952_v56, %v19031_v17  ;;  %22973 = vst [vmem:[#allocation92_spill] sm:$0xff] %v20998_v38  ;;  %v21002_v32 = vpop.f32.mrb[72].mxu0  ;;  %v21004_v25 = vpop.f32.mrb[78].mxu1 }
 0x396   : > { %v6676_v28 = vmul.f32 %v20946_v2, %v15493_v55  ;;  %v6679_v42 = vmul.f32 %v20946_v2, %v15494_v5  ;;  %v14734_v63 = vpack.c.bf16 %v10429_v43, %v10429_v43  ;;  %v10465_v24 = vcombine.low %v8050_v10, %v8052_v36  ;;  %22974 = vst [vmem:[#allocation93_spill] sm:$0xff] %v21004_v25  ;;  %v21007_v3 = vpop.f32.mrb[73].mxu0  ;;  %v21009_v5 = vpop.f32.mrb[79].mxu1 }
 0x397   : > { %v10472_v31 = vrot.slane %v10464_v46, %v19031_v17  ;;  %v6821_v54 = vadd.f32 %v20968_v1, %v6678_v29  ;;  %v8017_v62 = vrot.slane %v8003_v47, %v19031_v17  ;;  %v8018_v59 = vcombine.high %v8010_v57, %v8010_v57  ;;  %22975 = vst [vmem:[#allocation16_spill] sm:$0xff] %v21009_v5  ;;  %v21012_v46 = vpop.f32.mrb[74].mxu0 }
 0x398   : > { %v10430_v20 = vcombine.low %v8002_v21, %v8010_v57  ;;  %v6819_v22 = vadd.f32 %v20968_v1, %v6676_v28  ;;  %v12733_v56 = vshrl.u32 %v14734_v63, 16  ;;  %v12736_v34 = vshll.u32 %v14734_v63, 16  ;;  %v21017_v63 = vpop.f32.mrb[75].mxu0 }
 0x399   : > { %v10479_v10 = vrot.slane %v10465_v24, %v19031_v17  ;;  %v6957_v55 = vmax.f32 %v6821_v54, 0.0  ;;  %v8019_v16 = vcombine.high %v8017_v62, %v8017_v62  ;;  %v10431_v43 = vcombine.low %v8018_v59, %v8017_v62 }
 0x39a   : > { %v10438_v36 = vrot.slane %v10430_v20, %v19031_v17  ;;  %v6955_v21 = vmax.f32 %v6819_v22, 0.0  ;;  %v21014_v29 = vrot.slane %v12733_v56, 7 }
 0x39b   : > { %v10480_v47 = vcombine.low %v10472_v31, %v10479_v10  ;;  %v8087_v57 = vcombine.high %v6957_v55, %v6957_v55  ;;  %v8094_v28 = vrot.slane %v6957_v55, %v19031_v17  ;;  %v10445_v24 = vrot.slane %v10431_v43, %v19031_v17 }
 0x39c   : > { %v10447_v54 = vcombine.low %v8019_v16, %v20909_v8  ;;  %v8053_v33 = vcombine.high %v6955_v21, %v6955_v21  ;;  %v8060_v62 = vrot.slane %v6955_v21, %v19031_v17  ;;  %v12738_v59 = vor.u32 %v12736_v34, %v21014_v29 }
 0x39d   : > { %v12740_v20 = vrot.slane %v21014_v29, 4  ;;  %v14737_v22 = vpack.c.bf16 %v10480_v47, %v10480_v47  ;;  %v8101_v31 = vrot.slane %v8087_v57, %v19031_v17  ;;  %v10446_v56 = vcombine.low %v10438_v36, %v10445_v24 }
 0x39e   : > { %v10455_v10 = vrot.slane %v10447_v54, %v19031_v17  ;;  %v8102_v55 = vcombine.high %v8094_v28, %v8094_v28  ;;  %v8067_v39 = vrot.slane %v8053_v33, %v19031_v17  ;;  %v22976_v43 = vrot.slane %v20913_v7, 4  ;;  %v21036_v54 = vpop.f32.mrb[80].mxu1 }
 0x39f   : > { %v12760_v16 = vshrl.u32 %v14737_v22, 16  ;;  %v12763_v21 = vshll.u32 %v14737_v22, 16  ;;  %v8103_v34 = vcombine.high %v8101_v31, %v8101_v31  ;;  %v22977_v29 = vrot.slane %v20927_v27, %v19031_v17  ;;  %22978 = vst [vmem:[#allocation94_spill] sm:$0xff] %v21036_v54  ;;  %v14547_v22 = vld [vmem:[%s17800_s6 + $0x104] sm:$0xf] }
 0x3a0   : > { %v12739_v8 = vsel %vm19456_vm14, %v22976_v43, %v12738_v59  ;;  %v14735_v47 = vpack.c.bf16 %v10446_v56, %v10446_v56  ;;  %v10515_v57 = vcombine.low %v8094_v28, %v8102_v55  ;;  %v8068_v24 = vcombine.high %v8060_v62, %v8060_v62  ;;  %v21041_v43 = vpop.f32.mrb[81].mxu1 }
 0x3a1   : > { %14542 = vst.msk [vmem:[%s17800_s6 + $0xf4] sm:$0xf] %vm9471_vm8, %v12739_v8  ;;  %v10463_v36 = vcombine.low %v10455_v10, %v22977_v29  ;;  %v21038_v33 = vrot.slane %v12760_v16, 7  ;;  %v10516_v7 = vcombine.low %v8101_v31, %v8103_v34  ;;  %v8069_v5 = vcombine.high %v8067_v39, %v8067_v39  ;;  %22979 = vst [vmem:[#allocation18_spill] sm:$0xff] %v21041_v43  ;;  %v21045_v56 = vpop.f32.mrb[82].mxu1 }
 0x3a2   : > { %v6822_v59 = vadd.f32 %v20968_v1, %v6679_v42  ;;  %v12742_v8 = vshrl.u32 %v14735_v47, 16  ;;  %v12745_v38 = vshll.u32 %v14735_v47, 16  ;;  %v10523_v27 = vrot.slane %v10515_v57, %v19031_v17  ;;  %22980 = vst [vmem:[#allocation19_spill] sm:$0xff] %v21045_v56 }
 0x3a3   : > { %v14736_v25 = vpack.c.bf16 %v10463_v36, %v10463_v36  ;;  %v12765_v28 = vor.u32 %v12763_v21, %v21038_v33  ;;  %v10530_v31 = vrot.slane %v10516_v7, %v19031_v17  ;;  %v10481_v55 = vcombine.low %v8060_v62, %v8068_v24  ;;  %v14545_v7 = vld [vmem:[%s17800_s6 + $0x100] sm:$0x1] }
 0x3a4   : > { %v12744_v42 = vrot.slane %v12742_v8, 7  ;;  %v10482_v29 = vcombine.low %v8067_v39, %v8069_v5  ;;  %v6958_v43 = vmax.f32 %v6822_v59, 0.0  ;;  %v6677_v39 = vmul.f32 %v20946_v2, %v20988_v45  ;;  %v21059_v5 = vpop.f32.mrb[76].mxu0 }
 0x3a5   : > { %v12751_v16 = vshrl.u32 %v14736_v25, 16  ;;  %v12754_v34 = vshll.u32 %v14736_v25, 16  ;;  %v13734_v36 = vsel %vm19446_vm13, %v12765_v28, %v14547_v22  ;;  %v10531_v47 = vcombine.low %v10523_v27, %v10530_v31  ;;  %v21061_v22 = vpop.f32.mrb[83].mxu1  ;;  %v21065_v28 = vpop.f32.mrb[77].mxu0 }
 0x3a6   : > { %v10489_v57 = vrot.slane %v10481_v55, %v19031_v17  ;;  %14548 = vst [vmem:[%s17800_s6 + $0x104] sm:$0xf] %v13734_v36  ;;  %v12747_v56 = vor.u32 %v12745_v38, %v12744_v42  ;;  %v12749_v21 = vrot.slane %v12744_v42, 4  ;;  %v10496_v54 = vrot.slane %v10482_v29, %v19031_v17  ;;  %22981 = vst [vmem:[#allocation20_spill] sm:$0xff] %v21061_v22  ;;  %v21072_v42 = vpop.f32.mrb[78].mxu0  ;;  %v22982_v36 = vld [vmem:[#allocation78_spill] sm:$0xff] }
 0x3a7   : > { %v12753_v10 = vrot.slane %v12751_v16, 7  ;;  %v14740_v62 = vpack.c.bf16 %v10531_v47, %v10531_v47  ;;  %v8104_v24 = vcombine.high %v6958_v43, %v6958_v43  ;;  %v8111_v25 = vrot.slane %v6958_v43, %v19031_v17  ;;  %v21079_v16 = vpop.f32.mrb[79].mxu0 }
 0x3a8   : > { %v12748_v38 = vsel %vm19456_vm14, %v12740_v20, %v12747_v56  ;;  %v10497_v27 = vcombine.low %v10489_v57, %v10496_v54  ;;  %v15496_v47 = vadd.f32 %v20627_v6, %v22982_v36  ;;  %v22983_v57 = vld [vmem:[#allocation79_spill] sm:$0xff] }
 0x3a9   : > { %v12756_v59 = vor.u32 %v12754_v34, %v12753_v10  ;;  %v12758_v8 = vrot.slane %v12753_v10, 4  ;;  %14543 = vst.msk [vmem:[%s17800_s6 + $0xf8] sm:$0xf] %vm9471_vm8, %v12748_v38  ;;  %v12786_v43 = vshrl.u32 %v14740_v62, 16  ;;  %v12789_v31 = vshll.u32 %v14740_v62, 16 }
 0x3aa   : > { %v21070_v45 = vrot.slane %v8104_v24, %v19031_v17  ;;  %v8119_v55 = vcombine.high %v8111_v25, %v8111_v25  ;;  %v14738_v54 = vpack.c.bf16 %v10497_v27, %v10497_v27  ;;  %v6820_v10 = vadd.f32 %v20968_v1, %v6677_v39  ;;  %v14552_v62 = vld [vmem:[%s17800_s6 + $0x114] sm:$0x1] }
 0x3ab   : > { %v12757_v20 = vsel %vm19456_vm14, %v12749_v21, %v12756_v59  ;;  %v13731_v56 = vsel %vm19463_vm15, %v12758_v8, %v14545_v7  ;;  %v12788_v34 = vrot.slane %v12786_v43, 7  ;;  %v15497_v21 = vadd.f32 %v20635_v37, %v22983_v57 }
 0x3ac   : > { %14544 = vst.msk [vmem:[%s17800_s6 + $0xfc] sm:$0xf] %vm9471_vm8, %v12757_v20  ;;  %14546 = vst [vmem:[%s17800_s6 + $0x100] sm:$0x1] %v13731_v56  ;;  %v21085_v29 = vcombine.low %v8119_v55, %v21070_v45  ;;  %v12768_v7 = vshrl.u32 %v14738_v54, 16  ;;  %v12771_v24 = vshll.u32 %v14738_v54, 16  ;;  %v8120_v39 = vcombine.high %v21070_v45, %v21070_v45 }
 0x3ad   : > { %v6956_v25 = vmax.f32 %v6820_v10, 0.0  ;;  %v21094_v38 = vor.u32 %v12789_v31, %v12788_v34  ;;  %v12793_v59 = vrot.slane %v12788_v34, 4  ;;  %v6682_v27 = vmul.f32 %v20946_v2, %v15496_v47  ;;  %v22984_v31 = vld [vmem:[#allocation80_spill] sm:$0xff]  ;;  %v22985_v54 = vld [vmem:[#allocation82_spill] sm:$0xff] }
 0x3ae   : > { %v21099_v6 = vrot.slane %v12768_v7, 7  ;;  %v6680_v55 = vmul.f32 %v20946_v2, %v15497_v21  ;;  %v15498_v56 = vadd.f32 %v20647_v52, %v22984_v31  ;;  %v15499_v10 = vadd.f32 %v20653_v41, %v22985_v54  ;;  %v21114_v21 = vpop.f32.mrb[80].mxu0 }
 0x3af   : > { %v8070_v43 = vcombine.high %v6956_v25, %v6956_v25  ;;  %v8077_v37 = vrot.slane %v6956_v25, %v19031_v17  ;;  %v13740_v20 = vsel %vm19463_vm15, %v12793_v59, %v14552_v62  ;;  %v6825_v45 = vadd.f32 %v20968_v1, %v6682_v27  ;;  %22986 = vst [vmem:[#allocation22_spill] sm:$0xff] %v21114_v21  ;;  %v21119_v59 = vpop.f32.mrb[81].mxu0 }
 0x3b0   : > { %14553 = vst [vmem:[%s17800_s6 + $0x114] sm:$0x1] %v13740_v20  ;;  %v12773_v34 = vor.u32 %v12771_v24, %v21099_v6  ;;  %v6823_v7 = vadd.f32 %v20968_v1, %v6680_v55  ;;  %v6683_v25 = vmul.f32 %v20946_v2, %v15498_v56  ;;  %v6681_v52 = vmul.f32 %v20946_v2, %v15499_v10  ;;  %v21127_v54 = vpop.f32.mrb[82].mxu0 }
 0x3b1   : > { %v8084_v47 = vrot.slane %v8070_v43, %v19031_v17  ;;  %v8085_v57 = vcombine.high %v8077_v37, %v8077_v37  ;;  %v6961_v62 = vmax.f32 %v6825_v45, 0.0  ;;  %22987 = vst [vmem:[#allocation2_spill] sm:$0xff] %v21119_v59  ;;  %v22988_v41 = vrot.slane %v21038_v33, 4  ;;  %v22989_v43 = vld [vmem:[#allocation83_spill] sm:$0xff]  ;;  %22990 = vst [vmem:[#allocation23_spill] sm:$0xff] %v21127_v54  ;;  %v21129_v45 = vpop.f32.mrb[84].mxu1 }
 0x3b2   : > { %v15500_v31 = vadd.f32 %v20741_v30, %v22989_v43  ;;  %22991 = vst [vmem:[#allocation24_spill] sm:$0xff] %v21129_v45  ;;  %v6959_v10 = vmax.f32 %v6823_v7, 0.0  ;;  %v6826_v33 = vadd.f32 %v20968_v1, %v6683_v25  ;;  %v21137_v36 = vpop.f32.mrb[83].mxu0 }
 0x3b3   : > { %v12774_v24 = vsel %vm19456_vm14, %v22988_v41, %v12773_v34  ;;  %v8086_v27 = vcombine.high %v8084_v47, %v8084_v47  ;;  %v10498_v20 = vcombine.low %v8077_v37, %v8085_v57  ;;  %v8155_v55 = vcombine.high %v6961_v62, %v6961_v62  ;;  %22992 = vst [vmem:[#allocation25_spill] sm:$0xff] %v21137_v36  ;;  %v21139_v34 = vpop.f32.mrb[85].mxu1 }
 0x3b4   : > { %14549 = vst.msk [vmem:[%s17800_s6 + $0x108] sm:$0xf] %vm9471_vm8, %v12774_v24  ;;  %v21134_v56 = vrot.slane %v6961_v62, %v19031_v17  ;;  %22993 = vst [vmem:[#allocation26_spill] sm:$0xff] %v21139_v34  ;;  %v6824_v57 = vadd.f32 %v20968_v1, %v6681_v52  ;;  %v6686_v41 = vmul.f32 %v20946_v2, %v15500_v31  ;;  %v6962_v8 = vmax.f32 %v6826_v33, 0.0  ;;  %v21151_v31 = vpop.f32.mrb[86].mxu1 }
 0x3b5   : > { %v10499_v37 = vcombine.low %v8084_v47, %v8086_v27  ;;  %v10506_v30 = vrot.slane %v10498_v20, %v19031_v17  ;;  %v8169_v24 = vrot.slane %v8155_v55, %v19031_v17  ;;  %v8121_v43 = vcombine.high %v6959_v10, %v6959_v10  ;;  %22994 = vst [vmem:[#allocation4_spill] sm:$0xff] %v21151_v31 }
 0x3b6   : > { %v8170_v62 = vcombine.high %v21134_v56, %v21134_v56  ;;  %v8128_v7 = vrot.slane %v6959_v10, %v19031_v17  ;;  %v6960_v45 = vmax.f32 %v6824_v57, 0.0  ;;  %v6829_v47 = vadd.f32 %v20968_v1, %v6686_v41 }
 0x3b7   : > { %v10513_v25 = vrot.slane %v10499_v37, %v19031_v17  ;;  %v8135_v20 = vrot.slane %v8121_v43, %v19031_v17  ;;  %v8171_v36 = vcombine.high %v8169_v24, %v8169_v24  ;;  %v8172_v22 = vcombine.high %v6962_v8, %v6962_v8 }
 0x3b8   : > { %v10583_v27 = vcombine.low %v8170_v62, %v8169_v24  ;;  %v8136_v52 = vcombine.high %v8128_v7, %v8128_v7  ;;  %v10533_v34 = vcombine.low %v8120_v39, %v8128_v7  ;;  %v8179_v54 = vrot.slane %v6962_v8, %v19031_v17 }
 0x3b9   : > { %v10514_v55 = vcombine.low %v10506_v30, %v10513_v25  ;;  %v8137_v57 = vcombine.high %v8135_v20, %v8135_v20  ;;  %v8186_v41 = vrot.slane %v8172_v22, %v19031_v17  ;;  %v8138_v43 = vcombine.high %v6960_v45, %v6960_v45 }
 0x3ba   : > { %v10591_v10 = vrot.slane %v10583_v27, %v19031_v17  ;;  %v10547_v37 = vrot.slane %v10533_v34, %v19031_v17  ;;  %v10549_v33 = vcombine.low %v8136_v52, %v8135_v20  ;;  %v10584_v62 = vcombine.low %v8171_v36, %v8179_v54 }
 0x3bb   : > { %v14739_v59 = vpack.c.bf16 %v10514_v55, %v10514_v55  ;;  %v22995_v39 = vrot.slane %v21085_v29, %v19031_v17  ;;  %v8145_v24 = vrot.slane %v6960_v45, %v19031_v17  ;;  %v6965_v8 = vmax.f32 %v6829_v47, 0.0 }
 0x3bc   : > { %v10557_v30 = vrot.slane %v10549_v33, %v19031_v17  ;;  %v8187_v31 = vcombine.high %v8186_v41, %v8186_v41  ;;  %v10598_v34 = vrot.slane %v10584_v62, %v19031_v17  ;;  %v8152_v52 = vrot.slane %v8138_v43, %v19031_v17 }
 0x3bd   : > { %v10548_v7 = vcombine.low %v22995_v39, %v10547_v37  ;;  %v12777_v25 = vshrl.u32 %v14739_v59, 16  ;;  %v12780_v27 = vshll.u32 %v14739_v59, 16  ;;  %v8153_v22 = vcombine.high %v8145_v24, %v8145_v24  ;;  %v21167_v59 = vpop.f32.mrb[87].mxu1 }
 0x3be   : > { %v10550_v36 = vcombine.low %v8137_v57, %v8145_v24  ;;  %v10599_v55 = vcombine.low %v10591_v10, %v10598_v34  ;;  %v21164_v21 = vcombine.low %v8186_v41, %v8187_v31  ;;  %v8222_v29 = vcombine.high %v6965_v8, %v6965_v8  ;;  %v21171_v10 = vpop.f32.mrb[84].mxu0 }
 0x3bf   : > { %v14741_v20 = vpack.c.bf16 %v10548_v7, %v10548_v7  ;;  %v12779_v54 = vrot.slane %v12777_v25, 7  ;;  %v8154_v45 = vcombine.high %v8152_v52, %v8152_v52  ;;  %v10566_v7 = vcombine.low %v8153_v22, %v8152_v52  ;;  %v21174_v25 = vpop.f32.mrb[85].mxu0 }
 0x3c0   : > { %v10564_v47 = vrot.slane %v10550_v36, %v19031_v17  ;;  %v14744_v43 = vpack.c.bf16 %v10599_v55, %v10599_v55  ;;  %v22996_v34 = vrot.slane %v21099_v6, 4  ;;  %v14554_v36 = vld [vmem:[%s17800_s6 + $0x118] sm:$0xf] }
 0x3c1   : > { %v12795_v37 = vshrl.u32 %v14741_v20, 16  ;;  %v12798_v33 = vshll.u32 %v14741_v20, 16  ;;  %v12782_v39 = vor.u32 %v12780_v27, %v12779_v54  ;;  %v12784_v62 = vrot.slane %v12779_v54, 4 }
 0x3c2   : > { %v10565_v41 = vcombine.low %v10557_v30, %v10564_v47  ;;  %v10567_v24 = vcombine.low %v8154_v45, %v21134_v56  ;;  %v12821_v54 = vshrl.u32 %v14744_v43, 16  ;;  %v12824_v55 = vshll.u32 %v14744_v43, 16  ;;  %v14559_v43 = vld [vmem:[%s17800_s6 + $0x128] sm:$0x1] }
 0x3c3   : > { %v12797_v31 = vrot.slane %v12795_v37, 7  ;;  %v12783_v27 = vsel %vm19456_vm14, %v22996_v34, %v12782_v39  ;;  %v12792_v20 = vsel %vm19456_vm14, %v12784_v62, %v21094_v38  ;;  %v21184_v37 = vpop.f32.mrb[86].mxu0  ;;  %v10574_v30 = vrot.slane %v10566_v7, %v19031_v17 }
 0x3c4   : > { %14550 = vst.msk [vmem:[%s17800_s6 + $0x10c] sm:$0xf] %vm9471_vm8, %v12783_v27  ;;  %14551 = vst.msk [vmem:[%s17800_s6 + $0x110] sm:$0xf] %vm9471_vm8, %v12792_v20  ;;  %v10581_v52 = vrot.slane %v10567_v24, %v19031_v17  ;;  %v21192_v22 = vpop.f32.mrb[87].mxu0  ;;  %v12823_v38 = vrot.slane %v12821_v54, 7  ;;  %v14742_v45 = vpack.c.bf16 %v10565_v41, %v10565_v41  ;;  %v8229_v47 = vrot.slane %v6965_v8, %v19031_v17 }
 0x3c5   : > { %v12800_v56 = vor.u32 %v12798_v33, %v12797_v31  ;;  %v12801_v6 = vrot.slane %v12797_v31, 4  ;;  %22997 = vst [vmem:[#allocation3_spill] sm:$0xff] %v21192_v22  ;;  %v8236_v39 = vrot.slane %v8222_v29, %v19031_v17  ;;  %v22998_v27 = vld [vmem:[#allocation84_spill] sm:$0xff]  ;;  %v22999_v31 = vld [vmem:[#allocation85_spill] sm:$0xff] }
 0x3c6   : > { %v10582_v34 = vcombine.low %v10574_v30, %v10581_v52  ;;  %v15501_v33 = vadd.f32 %v20747_v19, %v22998_v27  ;;  %v15502_v7 = vadd.f32 %v20757_v40, %v22999_v31  ;;  %v12826_v24 = vor.u32 %v12824_v55, %v12823_v38  ;;  %v23000_v19 = vld [vmem:[#allocation86_spill] sm:$0xff] }
 0x3c7   : > { %v13743_v62 = vsel %vm19446_vm13, %v12800_v56, %v14554_v36  ;;  %v12828_v20 = vrot.slane %v12823_v38, 4  ;;  %v12803_v41 = vshrl.u32 %v14742_v45, 16  ;;  %v12806_v54 = vshll.u32 %v14742_v45, 16 }
 0x3c8   : > { %14555 = vst [vmem:[%s17800_s6 + $0x118] sm:$0xf] %v13743_v62  ;;  %v14743_v8 = vpack.c.bf16 %v10582_v34, %v10582_v34  ;;  %v8237_v57 = vcombine.high %v8229_v47, %v8229_v47  ;;  %v8238_v29 = vcombine.high %v8236_v39, %v8236_v39  ;;  %v6684_v22 = vmul.f32 %v20946_v2, %v15501_v33 }
 0x3c9   : > { %v13749_v36 = vsel %vm19463_vm15, %v12828_v20, %v14559_v43  ;;  %v12805_v56 = vrot.slane %v12803_v41, 7  ;;  %v6687_v30 = vmul.f32 %v20946_v2, %v15502_v7  ;;  %v15503_v52 = vadd.f32 %v20766_v14, %v23000_v19  ;;  %v23001_v41 = vld [vmem:[#allocation88_spill] sm:$0xff] }
 0x3ca   : > { %14560 = vst [vmem:[%s17800_s6 + $0x128] sm:$0x1] %v13749_v36  ;;  %v12812_v40 = vshrl.u32 %v14743_v8, 16  ;;  %v12815_v55 = vshll.u32 %v14743_v8, 16  ;;  %v21211_v38 = vcombine.low %v8229_v47, %v8237_v57  ;;  %v21213_v45 = vcombine.low %v8236_v39, %v8238_v29  ;;  %v21222_v57 = vpop.f32.mrb[88].mxu1  ;;  %v21230_v8 = vpop.f32.mrb[88].mxu0 }
 0x3cb   : > { %v12808_v62 = vor.u32 %v12806_v54, %v12805_v56  ;;  %v12810_v34 = vrot.slane %v12805_v56, 4  ;;  %v6827_v27 = vadd.f32 %v20968_v1, %v6684_v22  ;;  %v6830_v43 = vadd.f32 %v20968_v1, %v6687_v30  ;;  %v21228_v54 = vpop.f32.mrb[89].mxu1  ;;  %v23003_v30 = vld [vmem:[#allocation89_spill] sm:$0xff] }
 0x3cc   : > { %v12814_v33 = vrot.slane %v12812_v40, 7  ;;  %v10659_v14 = vrot.slane %v21213_v45, %v19031_v17  ;;  %v6685_v7 = vmul.f32 %v20946_v2, %v15503_v52  ;;  %v15504_v22 = vadd.f32 %v20872_v11, %v23001_v41  ;;  %23002 = vst [vmem:[#allocation5_spill] sm:$0xff] %v21228_v54  ;;  %v21237_v19 = vpop.f32.mrb[90].mxu1  ;;  %v21239_v52 = vpop.f32.mrb[89].mxu0 }
 0x3cd   : > { %v12809_v47 = vsel %vm19456_vm14, %v12801_v6, %v12808_v62  ;;  %v6963_v39 = vmax.f32 %v6827_v27, 0.0  ;;  %v6966_v20 = vmax.f32 %v6830_v43, 0.0  ;;  %v15505_v6 = vadd.f32 %v20881_v51, %v23003_v30  ;;  %23004 = vst [vmem:[#allocation6_spill] sm:$0xff] %v21237_v19  ;;  %23005 = vst [vmem:[#allocation28_spill] sm:$0xff] %v21239_v52  ;;  %v21256_v41 = vpop.f32.mrb[90].mxu0 }
 0x3ce   : > { %v12817_v29 = vor.u32 %v12815_v55, %v12814_v33  ;;  %v12819_v36 = vrot.slane %v12814_v33, 4  ;;  %14556 = vst.msk [vmem:[%s17800_s6 + $0x11c] sm:$0xf] %vm9471_vm8, %v12809_v47  ;;  %v6828_v56 = vadd.f32 %v20968_v1, %v6685_v7  ;;  %v6690_v33 = vmul.f32 %v20946_v2, %v15504_v22  ;;  %23007 = vst [vmem:[#allocation8_spill] sm:$0xff] %v21256_v41 }
 0x3cf   : > { %v8188_v11 = vcombine.high %v6963_v39, %v6963_v39  ;;  %v8195_v40 = vrot.slane %v6963_v39, %v19031_v17  ;;  %v8239_v45 = vcombine.high %v6966_v20, %v6966_v20  ;;  %v8246_v62 = vrot.slane %v6966_v20, %v19031_v17  ;;  %v21254_v20 = vpop.f32.mrb[91].mxu1 }
 0x3d0   : > { %v12818_v55 = vsel %vm19456_vm14, %v12810_v34, %v12817_v29  ;;  %v12827_v27 = vsel %vm19456_vm14, %v12819_v36, %v12826_v24  ;;  %v6964_v43 = vmax.f32 %v6828_v56, 0.0  ;;  %23006 = vst [vmem:[#allocation7_spill] sm:$0xff] %v21254_v20  ;;  %v6833_v29 = vadd.f32 %v20968_v1, %v6690_v33 }
 0x3d1   : > { %14557 = vst.msk [vmem:[%s17800_s6 + $0x120] sm:$0xf] %vm9471_vm8, %v12818_v55  ;;  %14558 = vst.msk [vmem:[%s17800_s6 + $0x124] sm:$0xf] %vm9471_vm8, %v12827_v27  ;;  %v8202_v51 = vrot.slane %v8188_v11, %v19031_v17  ;;  %v8203_v7 = vcombine.high %v8195_v40, %v8195_v40  ;;  %v8253_v47 = vrot.slane %v8239_v45, %v19031_v17 }
 0x3d2   : > { %v8254_v39 = vcombine.high %v8246_v62, %v8246_v62  ;;  %v8205_v34 = vcombine.high %v6964_v43, %v6964_v43  ;;  %v8212_v24 = vrot.slane %v6964_v43, %v19031_v17  ;;  %v6688_v22 = vmul.f32 %v20946_v2, %v15505_v6  ;;  %v23008_v43 = vld [vmem:[#allocation90_spill] sm:$0xff] }
 0x3d3   : > { %v8204_v36 = vcombine.high %v8202_v51, %v8202_v51  ;;  %v10601_v56 = vcombine.low %v8195_v40, %v8203_v7  ;;  %v8255_v30 = vcombine.high %v8253_v47, %v8253_v47  ;;  %v6969_v45 = vmax.f32 %v6833_v29, 0.0 }
 0x3d4   : > { %v10652_v55 = vcombine.low %v8246_v62, %v8254_v39  ;;  %v8219_v11 = vrot.slane %v8205_v34, %v19031_v17  ;;  %v8220_v27 = vcombine.high %v8212_v24, %v8212_v24  ;;  %v6831_v31 = vadd.f32 %v20968_v1, %v6688_v22  ;;  %v21270_v62 = vpop.f32.mrb[91].mxu0 }
 0x3d5   : > { %v10615_v20 = vrot.slane %v10601_v56, %v19031_v17  ;;  %v10617_v41 = vcombine.low %v8202_v51, %v8204_v36  ;;  %v15506_v33 = vadd.f32 %v20885_v48, %v23008_v43  ;;  %v8290_v54 = vcombine.high %v6969_v45, %v6969_v45  ;;  %23009 = vst [vmem:[#allocation29_spill] sm:$0xff] %v21270_v62 }
 0x3d6   : > { %v10666_v19 = vrot.slane %v10652_v55, %v19031_v17  ;;  %v8221_v52 = vcombine.high %v8219_v11, %v8219_v11  ;;  %v10618_v6 = vcombine.low %v8212_v24, %v8220_v27  ;;  %v21268_v40 = vrot.slane %v6969_v45, %v19031_v17 }
 0x3d7   : > { %v23010_v7 = vrot.slane %v21164_v21, %v19031_v17  ;;  %v10625_v39 = vrot.slane %v10617_v41, %v19031_v17  ;;  %v6967_v34 = vmax.f32 %v6831_v31, 0.0  ;;  %v21278_v48 = vrot.slane %v8290_v54, %v19031_v17 }
 0x3d8   : > { %v10667_v51 = vcombine.low %v10659_v14, %v10666_v19  ;;  %v10632_v29 = vrot.slane %v10618_v6, %v19031_v17  ;;  %v10634_v22 = vcombine.low %v8219_v11, %v8221_v52  ;;  %v8305_v24 = vcombine.high %v21268_v40, %v21268_v40 }
 0x3d9   : > { %v10616_v47 = vcombine.low %v23010_v7, %v10615_v20  ;;  %v8256_v55 = vcombine.high %v6967_v34, %v6967_v34  ;;  %v8263_v27 = vrot.slane %v6967_v34, %v19031_v17  ;;  %v6691_v14 = vmul.f32 %v20946_v2, %v15506_v33  ;;  %v14561_v33 = vld [vmem:[%s17800_s6 + $0x12c] sm:$0xf] }
 0x3da   : > { %v14748_v56 = vpack.c.bf16 %v10667_v51, %v10667_v51  ;;  %v10633_v21 = vcombine.low %v10625_v39, %v10632_v29  ;;  %v10642_v20 = vrot.slane %v10634_v22, %v19031_v17  ;;  %v21285_v31 = vcombine.low %v8305_v24, %v21278_v48  ;;  %v14566_v29 = vld [vmem:[%s17800_s6 + $0x13c] sm:$0x1] }
 0x3db   : > { %v14745_v36 = vpack.c.bf16 %v10616_v47, %v10616_v47  ;;  %v23011_v11 = vrot.slane %v21211_v38, %v19031_v17  ;;  %v21294_v7 = vrot.slane %v8256_v55, %v19031_v17  ;;  %v8271_v51 = vcombine.high %v8263_v27, %v8263_v27 }
 0x3dc   : > { %v12856_v52 = vshrl.u32 %v14748_v56, 16  ;;  %v12859_v41 = vshll.u32 %v14748_v56, 16  ;;  %v14746_v43 = vpack.c.bf16 %v10633_v21, %v10633_v21  ;;  %v10668_v34 = vcombine.low %v8255_v30, %v8263_v27 }
 0x3dd   : > { %v12830_v54 = vshrl.u32 %v14745_v36, 16  ;;  %v12833_v19 = vshll.u32 %v14745_v36, 16  ;;  %v10650_v45 = vcombine.low %v10642_v20, %v23011_v11  ;;  %v6834_v56 = vadd.f32 %v20968_v1, %v6691_v14 }
 0x3de   : > { %v12858_v39 = vrot.slane %v12856_v52, 7  ;;  %v12838_v24 = vshrl.u32 %v14746_v43, 16  ;;  %v12841_v36 = vshll.u32 %v14746_v43, 16  ;;  %v21300_v52 = vpop.f32.mrb[92].mxu1  ;;  %v10676_v14 = vrot.slane %v10668_v34, %v19031_v17 }
 0x3df   : > { %v12832_v47 = vrot.slane %v12830_v54, 7  ;;  %v14747_v22 = vpack.c.bf16 %v10650_v45, %v10650_v45  ;;  %v10669_v54 = vcombine.low %v8271_v51, %v21294_v7  ;;  %v21307_v45 = vpop.f32.mrb[93].mxu1  ;;  %v8306_v34 = vcombine.high %v21278_v48, %v21278_v48 }
 0x3e0   : > { %v12861_v20 = vor.u32 %v12859_v41, %v12858_v39  ;;  %v12863_v11 = vrot.slane %v12858_v39, 4  ;;  %v12840_v6 = vrot.slane %v12838_v24, 7  ;;  %v21309_v41 = vpop.f32.mrb[92].mxu0 }
 0x3e1   : > { %v12835_v38 = vor.u32 %v12833_v19, %v12832_v47  ;;  %v12836_v21 = vrot.slane %v12832_v47, 4  ;;  %v12847_v55 = vshrl.u32 %v14747_v22, 16  ;;  %v12850_v62 = vshll.u32 %v14747_v22, 16  ;;  %v21314_v22 = vpop.f32.mrb[94].mxu1 }
 0x3e2   : > { %v13758_v27 = vsel %vm19463_vm15, %v12863_v11, %v14566_v29  ;;  %v6970_v19 = vmax.f32 %v6834_v56, 0.0  ;;  %v12843_v43 = vor.u32 %v12841_v36, %v12840_v6  ;;  %v12845_v47 = vrot.slane %v12840_v6, 4  ;;  %v23012_v56 = vld [vmem:[#allocation91_spill] sm:$0xff] }
 0x3e3   : > { %v13752_v30 = vsel %vm19446_vm13, %v12835_v38, %v14561_v33  ;;  %14567 = vst [vmem:[%s17800_s6 + $0x13c] sm:$0x1] %v13758_v27  ;;  %v12849_v39 = vrot.slane %v12847_v55, 7  ;;  %v10683_v51 = vrot.slane %v10669_v54, %v19031_v17  ;;  %v21316_v33 = vpop.f32.mrb[93].mxu0  ;;  %v15507_v38 = vadd.f32 %v20892_v26, %v23012_v56 }
 0x3e4   : > { %14562 = vst [vmem:[%s17800_s6 + $0x12c] sm:$0xf] %v13752_v30  ;;  %v8307_v29 = vcombine.high %v6970_v19, %v6970_v19  ;;  %v8314_v24 = vrot.slane %v6970_v19, %v19031_v17  ;;  %v12844_v6 = vsel %vm19456_vm14, %v12836_v21, %v12843_v43  ;;  %v21335_v21 = vpop.f32.mrb[95].mxu1 }
 0x3e5   : > { %v12852_v36 = vor.u32 %v12850_v62, %v12849_v39  ;;  %v12854_v11 = vrot.slane %v12849_v39, 4  ;;  %v10684_v55 = vcombine.low %v10676_v14, %v10683_v51  ;;  %14563 = vst.msk [vmem:[%s17800_s6 + $0x130] sm:$0xf] %vm9471_vm8, %v12844_v6  ;;  %v6689_v27 = vmul.f32 %v20946_v2, %v15507_v38  ;;  %v21337_v14 = vpop.f32.mrb[94].mxu0 }
 0x3e6   : > { %v8321_v54 = vrot.slane %v8307_v29, %v19031_v17  ;;  %v8322_v30 = vcombine.high %v8314_v24, %v8314_v24  ;;  %v10719_v48 = vcombine.low %v8306_v34, %v8314_v24  ;;  %v8272_v62 = vcombine.high %v21294_v7, %v21294_v7 }
 0x3e7   : > { %v12853_v19 = vsel %vm19456_vm14, %v12845_v47, %v12852_v36  ;;  %v12862_v26 = vsel %vm19456_vm14, %v12854_v11, %v12861_v20  ;;  %v14749_v56 = vpack.c.bf16 %v10684_v55, %v10684_v55  ;;  %v6832_v47 = vadd.f32 %v20968_v1, %v6689_v27  ;;  %v21372_v27 = vpop.f32.mrb[95].mxu0 }
 0x3e8   : > { %14564 = vst.msk [vmem:[%s17800_s6 + $0x134] sm:$0xf] %vm9471_vm8, %v12853_v19  ;;  %14565 = vst.msk [vmem:[%s17800_s6 + $0x138] sm:$0xf] %vm9471_vm8, %v12862_v26  ;;  %v10720_v43 = vcombine.low %v8322_v30, %v8321_v54  ;;  %v10727_v39 = vrot.slane %v10719_v48, %v19031_v17  ;;  %v15508_v20 = vadd.f32 %v20949_v44, %v20899_v0 }
 0x3e9   : > { %v12865_v51 = vshrl.u32 %v14749_v56, 16  ;;  %v12868_v34 = vshll.u32 %v14749_v56, 16  ;;  %v15509_v7 = vadd.f32 %v20957_v9, %v20904_v23  ;;  %v15510_v29 = vadd.f32 %v20971_v13, %v20906_v49  ;;  %v14568_v49 = vld [vmem:[%s17800_s6 + $0x140] sm:$0xf] }
 0x3ea   : > { %v10734_v24 = vrot.slane %v10720_v43, %v19031_v17  ;;  %v6968_v38 = vmax.f32 %v6832_v47, 0.0  ;;  %v6694_v6 = vmul.f32 %v20946_v2, %v15508_v20  ;;  %v21355_v36 = vadd.f32 %v20980_v15, %v20911_v18 }
 0x3eb   : > { %v21357_v11 = vrot.slane %v12865_v51, 7  ;;  %v6692_v0 = vmul.f32 %v20946_v2, %v15509_v7  ;;  %v6695_v44 = vmul.f32 %v20946_v2, %v15510_v29  ;;  %v21363_v23 = vadd.f32 %v21002_v32, %v20933_v12 }
 0x3ec   : > { %v10735_v9 = vcombine.low %v10727_v39, %v10734_v24  ;;  %v8273_v13 = vcombine.high %v6968_v38, %v6968_v38  ;;  %v8280_v55 = vrot.slane %v6968_v38, %v19031_v17  ;;  %v6837_v54 = vadd.f32 %v20968_v1, %v6694_v6 }
 0x3ed   : > { %v12870_v18 = vor.u32 %v12868_v34, %v21357_v11  ;;  %v6835_v30 = vadd.f32 %v20968_v1, %v6692_v0  ;;  %v6838_v48 = vadd.f32 %v20968_v1, %v6695_v44 }
 0x3ee   : > { %v14752_v12 = vpack.c.bf16 %v10735_v9, %v10735_v9  ;;  %v8287_v32 = vrot.slane %v8273_v13, %v19031_v17  ;;  %v8288_v19 = vcombine.high %v8280_v55, %v8280_v55  ;;  %v10685_v26 = vcombine.low %v8272_v62, %v8280_v55  ;;  %v14573_v9 = vld [vmem:[%s17800_s6 + $0x150] sm:$0x1] }
 0x3ef   : > { %v13761_v56 = vsel %vm19446_vm13, %v12870_v18, %v14568_v49  ;;  %v6973_v43 = vmax.f32 %v6837_v54, 0.0  ;;  %v6971_v39 = vmax.f32 %v6835_v30, 0.0  ;;  %v6974_v47 = vmax.f32 %v6838_v48, 0.0  ;;  %v21386_v30 = vpop.f32.mrb[96].mxu1 }
 0x3f0   : > { %14569 = vst [vmem:[%s17800_s6 + $0x140] sm:$0xf] %v13761_v56  ;;  %v12891_v20 = vshrl.u32 %v14752_v12, 16  ;;  %v12894_v51 = vshll.u32 %v14752_v12, 16  ;;  %v8289_v34 = vcombine.high %v8287_v32, %v8287_v32  ;;  %v10686_v7 = vcombine.low %v8288_v19, %v8287_v32 }
 0x3f1   : > { %v10693_v29 = vrot.slane %v10685_v26, %v19031_v17  ;;  %v8357_v24 = vcombine.high %v6973_v43, %v6973_v43  ;;  %v8364_v38 = vrot.slane %v6973_v43, %v19031_v17  ;;  %v8323_v6 = vcombine.high %v6971_v39, %v6971_v39  ;;  %v21389_v26 = vpop.f32.mrb[97].mxu1 }
 0x3f2   : > { %v12893_v0 = vrot.slane %v12891_v20, 7  ;;  %v10700_v62 = vrot.slane %v10686_v7, %v19031_v17  ;;  %v10702_v44 = vcombine.low %v8289_v34, %v21268_v40  ;;  %v8330_v49 = vrot.slane %v6971_v39, %v19031_v17  ;;  %23013 = vst [vmem:[#allocation9_spill] sm:$0xff] %v21389_v26  ;;  %v21391_v40 = vpop.f32.mrb[96].mxu0  ;;  %v21393_v34 = vpop.f32.mrb[98].mxu1 }
 0x3f3   : > { %v8371_v13 = vrot.slane %v8357_v24, %v19031_v17  ;;  %v8372_v55 = vcombine.high %v8364_v38, %v8364_v38  ;;  %v8337_v54 = vrot.slane %v8323_v6, %v19031_v17  ;;  %v8374_v18 = vcombine.high %v6974_v47, %v6974_v47  ;;  %23014 = vst [vmem:[#allocation30_spill] sm:$0xff] %v21393_v34  ;;  %v21395_v7 = vpop.f32.mrb[97].mxu0 }
 0x3f4   : > { %v12896_v48 = vor.u32 %v12894_v51, %v12893_v0  ;;  %v12898_v12 = vrot.slane %v12893_v0, 4  ;;  %v10701_v32 = vcombine.low %v10693_v29, %v10700_v62  ;;  %v10710_v19 = vrot.slane %v10702_v44, %v19031_v17  ;;  %23015 = vst [vmem:[#allocation10_spill] sm:$0xff] %v21395_v7 }
 0x3f5   : > { %v8373_v56 = vcombine.high %v8371_v13, %v8371_v13  ;;  %v10770_v43 = vcombine.low %v8364_v38, %v8372_v55  ;;  %v8338_v39 = vcombine.high %v8330_v49, %v8330_v49  ;;  %v8339_v20 = vcombine.high %v8337_v54, %v8337_v54 }
 0x3f6   : > { %v13767_v51 = vsel %vm19463_vm15, %v12898_v12, %v14573_v9  ;;  %v23016_v29 = vrot.slane %v21285_v31, %v19031_v17  ;;  %v14750_v6 = vpack.c.bf16 %v10701_v32, %v10701_v32  ;;  %v8381_v0 = vrot.slane %v6974_v47, %v19031_v17  ;;  %v21411_v47 = vpop.f32.mrb[98].mxu0 }
 0x3f7   : > { %14574 = vst [vmem:[%s17800_s6 + $0x150] sm:$0x1] %v13767_v51  ;;  %v10771_v62 = vcombine.low %v8371_v13, %v8373_v56  ;;  %v10778_v38 = vrot.slane %v10770_v43, %v19031_v17  ;;  %v10736_v44 = vcombine.low %v8330_v49, %v8338_v39  ;;  %v10737_v55 = vcombine.low %v8337_v54, %v8339_v20 }
 0x3f8   : > { %v10718_v24 = vcombine.low %v10710_v19, %v23016_v29  ;;  %v12873_v34 = vshrl.u32 %v14750_v6, 16  ;;  %v12876_v26 = vshll.u32 %v14750_v6, 16  ;;  %v8388_v7 = vrot.slane %v8374_v18, %v19031_v17  ;;  %v21409_v19 = vpop.f32.mrb[99].mxu1 }
 0x3f9   : > { %v10785_v9 = vrot.slane %v10771_v62, %v19031_v17  ;;  %v10744_v12 = vrot.slane %v10736_v44, %v19031_v17  ;;  %v10751_v31 = vrot.slane %v10737_v55, %v19031_v17  ;;  %v8389_v32 = vcombine.high %v8381_v0, %v8381_v0 }
 0x3fa   : > { %v14751_v15 = vpack.c.bf16 %v10718_v24, %v10718_v24  ;;  %v12875_v13 = vrot.slane %v12873_v34, 7  ;;  %v8390_v54 = vcombine.high %v8388_v7, %v8388_v7  ;;  %v6693_v18 = vmul.f32 %v20946_v2, %v21355_v36 }
 0x3fb   : > { %v10786_v43 = vcombine.low %v10778_v38, %v10785_v9  ;;  %v10752_v39 = vcombine.low %v10744_v12, %v10751_v31  ;;  %v10787_v20 = vcombine.low %v8381_v0, %v8389_v32  ;;  %v21424_v31 = vpop.f32.mrb[99].mxu0 }
 0x3fc   : > { %v12882_v56 = vshrl.u32 %v14751_v15, 16  ;;  %v12885_v49 = vshll.u32 %v14751_v15, 16  ;;  %v12878_v51 = vor.u32 %v12876_v26, %v12875_v13  ;;  %v12880_v29 = vrot.slane %v12875_v13, 4 }
 0x3fd   : > { %v10788_v6 = vcombine.low %v8388_v7, %v8390_v54  ;;  %v14755_v62 = vpack.c.bf16 %v10786_v43, %v10786_v43  ;;  %v14753_v44 = vpack.c.bf16 %v10752_v39, %v10752_v39  ;;  %v10795_v55 = vrot.slane %v10787_v20, %v19031_v17  ;;  %v21439_v54 = vld [vmem:[%s22695_s2] ss:$0 sm:$0xff]  ;;  %v14575_v39 = vld [vmem:[%s17800_s6 + $0x154] sm:$0xf] }
 0x3fe   : > { %v12884_v24 = vrot.slane %v12882_v56, 7  ;;  %v6836_v34 = vadd.f32 %v20968_v1, %v6693_v18  ;;  %v23017_v15 = vrot.slane %v21357_v11, 4  ;;  %v6698_v43 = vmul.f32 %v21439_v54, %v21363_v23 }
 0x3ff   : > { %v10802_v2 = vrot.slane %v10788_v6, %v19031_v17  ;;  %v12917_v36 = vshrl.u32 %v14755_v62, 16  ;;  %v12920_v26 = vshll.u32 %v14755_v62, 16  ;;  %v12900_v7 = vshrl.u32 %v14753_v44, 16 }
 0x400   : > { %v12879_v0 = vsel %vm19456_vm14, %v23017_v15, %v12878_v51  ;;  %v12887_v38 = vor.u32 %v12885_v49, %v12884_v24  ;;  %v12889_v9 = vrot.slane %v12884_v24, 4  ;;  %v12903_v12 = vshll.u32 %v14753_v44, 16 }
 0x401   : > { %14570 = vst.msk [vmem:[%s17800_s6 + $0x144] sm:$0xf] %vm9471_vm8, %v12879_v0  ;;  %v10803_v32 = vcombine.low %v10795_v55, %v10802_v2  ;;  %v6972_v13 = vmax.f32 %v6836_v34, 0.0  ;;  %v12919_v56 = vrot.slane %v12917_v36, 7  ;;  %v21434_v49 = vrot.slane %v12900_v7, 7 }
 0x402   : > { %v12888_v1 = vsel %vm19456_vm14, %v12880_v29, %v12887_v38  ;;  %v12897_v11 = vsel %vm19456_vm14, %v12889_v9, %v12896_v48  ;;  %v15513_v48 = vadd.f32 %v21007_v3, %v20939_v35  ;;  %v15514_v29 = vadd.f32 %v21012_v46, %v20951_v4  ;;  %v21458_v34 = vld [vmem:[%s22696_s3] ss:$0 sm:$0xff]  ;;  %v14580_v36 = vld [vmem:[%s17800_s6 + $0x164] sm:$0x1] }
 0x403   : > { %14571 = vst.msk [vmem:[%s17800_s6 + $0x148] sm:$0xf] %vm9471_vm8, %v12888_v1  ;;  %14572 = vst.msk [vmem:[%s17800_s6 + $0x14c] sm:$0xf] %vm9471_vm8, %v12897_v11  ;;  %v14756_v20 = vpack.c.bf16 %v10803_v32, %v10803_v32  ;;  %v8340_v18 = vcombine.high %v6972_v13, %v6972_v13  ;;  %v8347_v51 = vrot.slane %v6972_v13, %v19031_v17  ;;  %v12924_v6 = vrot.slane %v12919_v56, 4 }
 0x404   : > { %v21449_v24 = vor.u32 %v12920_v26, %v12919_v56  ;;  %v12905_v62 = vor.u32 %v12903_v12, %v21434_v49  ;;  %v6841_v4 = vadd.f32 %v21458_v34, %v6698_v43  ;;  %v6696_v46 = vmul.f32 %v21439_v54, %v15513_v48 }
 0x405   : > { %v12926_v44 = vshrl.u32 %v14756_v20, 16  ;;  %v12929_v23 = vshll.u32 %v14756_v20, 16  ;;  %v8354_v55 = vrot.slane %v8340_v18, %v19031_v17  ;;  %v8355_v35 = vcombine.high %v8347_v51, %v8347_v51 }
 0x406   : > { %v13770_v3 = vsel %vm19446_vm13, %v12905_v62, %v14575_v39  ;;  %v6699_v15 = vmul.f32 %v21439_v54, %v15514_v29  ;;  %v15515_v2 = vadd.f32 %v21017_v63, %v20959_v50  ;;  %v6977_v26 = vmax.f32 %v6841_v4, 0.0  ;;  %v21475_v39 = vpop.f32.mrb[100].mxu1  ;;  %v21485_v29 = vpop.f32.mrb[100].mxu0 }
 0x407   : > { %14576 = vst [vmem:[%s17800_s6 + $0x154] sm:$0xf] %v13770_v3  ;;  %v12928_v0 = vrot.slane %v12926_v44, 7  ;;  %v8356_v38 = vcombine.high %v8354_v55, %v8354_v55  ;;  %v10753_v9 = vcombine.low %v8347_v51, %v8355_v35  ;;  %v6839_v7 = vadd.f32 %v21458_v34, %v6696_v46  ;;  %v21483_v51 = vpop.f32.mrb[101].mxu1  ;;  %v21496_v35 = vpop.f32.mrb[101].mxu0 }
 0x408   : > { %v6842_v12 = vadd.f32 %v21458_v34, %v6699_v15  ;;  %v15516_v1 = vadd.f32 %v21059_v5, %v20994_v60  ;;  %v8425_v43 = vcombine.high %v6977_v26, %v6977_v26  ;;  %v21473_v48 = vrot.slane %v6977_v26, %v19031_v17 }
 0x409   : > { %v12931_v11 = vor.u32 %v12929_v23, %v12928_v0  ;;  %v12933_v32 = vrot.slane %v12928_v0, 4  ;;  %v10754_v13 = vcombine.low %v8354_v55, %v8356_v38  ;;  %v10761_v56 = vrot.slane %v10753_v9, %v19031_v17  ;;  %v21494_v55 = vpop.f32.mrb[102].mxu1 }
 0x40a   : > { %v6975_v50 = vmax.f32 %v6839_v7, 0.0  ;;  %v6978_v63 = vmax.f32 %v6842_v12, 0.0  ;;  %v6697_v18 = vmul.f32 %v21439_v54, %v15515_v2  ;;  %v8439_v62 = vrot.slane %v8425_v43, %v19031_v17 }
 0x40b   : > { %v12932_v20 = vsel %vm19456_vm14, %v12924_v6, %v12931_v11  ;;  %v13776_v60 = vsel %vm19463_vm15, %v12933_v32, %v14580_v36  ;;  %v10768_v5 = vrot.slane %v10754_v13, %v19031_v17  ;;  %v8440_v44 = vcombine.high %v21473_v48, %v21473_v48  ;;  %v21504_v11 = vpop.f32.mrb[103].mxu1  ;;  %v21506_v32 = vpop.f32.mrb[102].mxu0 }
 0x40c   : > { %14579 = vst.msk [vmem:[%s17800_s6 + $0x160] sm:$0xf] %vm9471_vm8, %v12932_v20  ;;  %14581 = vst [vmem:[%s17800_s6 + $0x164] sm:$0x1] %v13776_v60  ;;  %v8391_v6 = vcombine.high %v6975_v50, %v6975_v50  ;;  %v8398_v23 = vrot.slane %v6975_v50, %v19031_v17  ;;  %v8442_v4 = vcombine.high %v6978_v63, %v6978_v63  ;;  %v12906_v13 = vrot.slane %v21434_v49, 4 }
 0x40d   : > { %v10769_v3 = vcombine.low %v10761_v56, %v10768_v5  ;;  %v8449_v46 = vrot.slane %v6978_v63, %v19031_v17  ;;  %v6840_v15 = vadd.f32 %v21458_v34, %v6697_v18  ;;  %v10838_v0 = vcombine.low %v8440_v44, %v8439_v62 }
 0x40e   : > { %v8405_v38 = vrot.slane %v8391_v6, %v19031_v17  ;;  %v8406_v9 = vcombine.high %v8398_v23, %v8398_v23  ;;  %v8441_v2 = vcombine.high %v8439_v62, %v8439_v62  ;;  %v21502_v26 = vrot.slane %v8442_v4, %v19031_v17  ;;  %v23018_v4 = vld [vmem:[#allocation92_spill] sm:$0xff] }
 0x40f   : > { %v14754_v36 = vpack.c.bf16 %v10769_v3, %v10769_v3  ;;  %v8457_v7 = vcombine.high %v8449_v46, %v8449_v46  ;;  %v6976_v12 = vmax.f32 %v6840_v15, 0.0  ;;  %v10846_v60 = vrot.slane %v10838_v0, %v19031_v17 }
 0x410   : > { %v10804_v56 = vcombine.low %v8406_v9, %v8405_v38  ;;  %v10839_v43 = vcombine.low %v8441_v2, %v8449_v46  ;;  %v8407_v50 = vcombine.high %v8405_v38, %v8405_v38  ;;  %v6702_v6 = vmul.f32 %v21439_v54, %v15516_v1 }
 0x411   : > { %v12908_v63 = vshrl.u32 %v14754_v36, 16  ;;  %v12911_v20 = vshll.u32 %v14754_v36, 16  ;;  %v8408_v5 = vcombine.high %v6976_v12, %v6976_v12  ;;  %v21512_v62 = vcombine.low %v8457_v7, %v21502_v26 }
 0x412   : > { %v10853_v18 = vrot.slane %v10839_v43, %v19031_v17  ;;  %v8415_v44 = vrot.slane %v6976_v12, %v19031_v17  ;;  %v10812_v49 = vrot.slane %v10804_v56, %v19031_v17  ;;  %v15517_v46 = vadd.f32 %v21065_v28, %v23018_v4 }
 0x413   : > { %v12910_v23 = vrot.slane %v12908_v63, 7  ;;  %v8422_v3 = vrot.slane %v8408_v5, %v19031_v17  ;;  %v6845_v9 = vadd.f32 %v21458_v34, %v6702_v6  ;;  %v10863_v5 = vrot.slane %v21512_v62, %v19031_v17 }
 0x414   : > { %v10854_v15 = vcombine.low %v10846_v60, %v10853_v18  ;;  %v8423_v0 = vcombine.high %v8415_v44, %v8415_v44  ;;  %v10805_v38 = vcombine.low %v8407_v50, %v8415_v44  ;;  %v6700_v1 = vmul.f32 %v21439_v54, %v15517_v46 }
 0x415   : > { %v12913_v2 = vor.u32 %v12911_v20, %v12910_v23  ;;  %v12915_v36 = vrot.slane %v12910_v23, 4  ;;  %v8424_v7 = vcombine.high %v8422_v3, %v8422_v3  ;;  %v6981_v63 = vmax.f32 %v6845_v9, 0.0 }
 0x416   : > { %v14759_v12 = vpack.c.bf16 %v10854_v15, %v10854_v15  ;;  %v10819_v56 = vrot.slane %v10805_v38, %v19031_v17  ;;  %v10821_v43 = vcombine.low %v8423_v0, %v8422_v3  ;;  %v6843_v20 = vadd.f32 %v21458_v34, %v6700_v1  ;;  %v23019_v0 = vld [vmem:[#allocation93_spill] sm:$0xff] }
 0x417   : > { %v12914_v28 = vsel %vm19456_vm14, %v12906_v13, %v12913_v2  ;;  %v12923_v60 = vsel %vm19456_vm14, %v12915_v36, %v21449_v24  ;;  %v10822_v50 = vcombine.low %v8424_v7, %v21473_v48  ;;  %v21537_v13 = vpop.f32.mrb[103].mxu0  ;;  %v8492_v24 = vcombine.high %v6981_v63, %v6981_v63 }
 0x418   : > { %14577 = vst.msk [vmem:[%s17800_s6 + $0x158] sm:$0xf] %vm9471_vm8, %v12914_v28  ;;  %14578 = vst.msk [vmem:[%s17800_s6 + $0x15c] sm:$0xf] %vm9471_vm8, %v12923_v60  ;;  %v12952_v18 = vshrl.u32 %v14759_v12, 16  ;;  %v10820_v44 = vcombine.low %v10812_v49, %v10819_v56  ;;  %v10829_v6 = vrot.slane %v10821_v43, %v19031_v17  ;;  %v8499_v48 = vrot.slane %v6981_v63, %v19031_v17 }
 0x419   : > { %v10836_v23 = vrot.slane %v10822_v50, %v19031_v17  ;;  %v6979_v3 = vmax.f32 %v6843_v20, 0.0  ;;  %v12955_v46 = vshll.u32 %v14759_v12, 16  ;;  %v15518_v38 = vadd.f32 %v21072_v42, %v23019_v0  ;;  %v23020_v20 = vld [vmem:[#allocation16_spill] sm:$0xff] }
 0x41a   : > { %v21541_v4 = vrot.slane %v12952_v18, 7  ;;  %v14757_v15 = vpack.c.bf16 %v10820_v44, %v10820_v44  ;;  %v8506_v49 = vrot.slane %v8492_v24, %v19031_v17  ;;  %v8507_v9 = vcombine.high %v8499_v48, %v8499_v48 }
 0x41b   : > { %v10837_v62 = vcombine.low %v10829_v6, %v10836_v23  ;;  %v8459_v2 = vcombine.high %v6979_v3, %v6979_v3  ;;  %v8458_v56 = vcombine.high %v21502_v26, %v21502_v26  ;;  %v8466_v28 = vrot.slane %v6979_v3, %v19031_v17  ;;  %v14582_v23 = vld [vmem:[%s17800_s6 + $0x168] sm:$0xf] }
 0x41c   : > { %v12957_v36 = vor.u32 %v12955_v46, %v21541_v4  ;;  %v12935_v1 = vshrl.u32 %v14757_v15, 16  ;;  %v12938_v12 = vshll.u32 %v14757_v15, 16  ;;  %v8508_v63 = vcombine.high %v8506_v49, %v8506_v49 }
 0x41d   : > { %v14758_v43 = vpack.c.bf16 %v10837_v62, %v10837_v62  ;;  %v8473_v60 = vrot.slane %v8459_v2, %v19031_v17  ;;  %v6703_v50 = vmul.f32 %v21439_v54, %v15518_v38  ;;  %v15519_v18 = vadd.f32 %v21079_v16, %v23020_v20  ;;  %v21560_v62 = vpop.f32.mrb[104].mxu1 }
 0x41e   : > { %v12937_v42 = vrot.slane %v12935_v1, 7  ;;  %v21556_v24 = vcombine.low %v8499_v48, %v8507_v9  ;;  %v21558_v46 = vcombine.low %v8506_v49, %v8508_v63  ;;  %v10856_v3 = vcombine.low %v8458_v56, %v8466_v28  ;;  %v21568_v48 = vpop.f32.mrb[104].mxu0  ;;  %v23024_v63 = vld [vmem:[#allocation22_spill] sm:$0xff] }
 0x41f   : > { %v12943_v44 = vshrl.u32 %v14758_v43, 16  ;;  %v12946_v6 = vshll.u32 %v14758_v43, 16  ;;  %v8474_v0 = vcombine.high %v8473_v60, %v8473_v60  ;;  %v6846_v16 = vadd.f32 %v21458_v34, %v6703_v50  ;;  %v21566_v43 = vpop.f32.mrb[105].mxu1  ;;  %23022 = vst [vmem:[#allocation11_spill] sm:$0xff] %v21568_v48 }
 0x420   : > { %v12940_v26 = vor.u32 %v12938_v12, %v12937_v42  ;;  %v12941_v15 = vrot.slane %v12937_v42, 4  ;;  %v10914_v38 = vrot.slane %v21558_v46, %v19031_v17  ;;  %v6701_v1 = vmul.f32 %v21439_v54, %v15519_v18  ;;  %23021 = vst [vmem:[#allocation32_spill] sm:$0xff] %v21566_v43  ;;  %v23023_v12 = vld [vmem:[#allocation94_spill] sm:$0xff] }
 0x421   : > { %v12945_v2 = vrot.slane %v12943_v44, 7  ;;  %v10870_v9 = vrot.slane %v10856_v3, %v19031_v17  ;;  %v21573_v56 = vcombine.low %v8473_v60, %v8474_v0  ;;  %v15520_v28 = vadd.f32 %v23024_v63, %v23023_v12  ;;  %v23026_v3 = vld [vmem:[#allocation2_spill] sm:$0xff]  ;;  %v21597_v12 = vpop.f32.mrb[105].mxu0  ;;  %v23029_v63 = vld [vmem:[#allocation19_spill] sm:$0xff] }
 0x422   : > { %v13779_v49 = vsel %vm19446_vm13, %v12940_v26, %v14582_v23  ;;  %v6982_v20 = vmax.f32 %v6846_v16, 0.0  ;;  %v6844_v18 = vadd.f32 %v21458_v34, %v6701_v1  ;;  %v23025_v26 = vld [vmem:[#allocation18_spill] sm:$0xff]  ;;  %23028 = vst [vmem:[#allocation13_spill] sm:$0xff] %v21597_v12 }
 0x423   : > { %v12948_v42 = vor.u32 %v12946_v6, %v12945_v2  ;;  %v12950_v50 = vrot.slane %v12945_v2, 4  ;;  %14583 = vst [vmem:[%s17800_s6 + $0x168] sm:$0xf] %v13779_v49  ;;  %v10871_v44 = vcombine.low %v10863_v5, %v10870_v9  ;;  %v10880_v46 = vrot.slane %v21573_v56, %v19031_v17  ;;  %v21595_v56 = vpop.f32.mrb[106].mxu1 }
 0x424   : > { %v6706_v23 = vmul.f32 %v21439_v54, %v15520_v28  ;;  %v15521_v60 = vadd.f32 %v23026_v3, %v23025_v26  ;;  %v8509_v2 = vcombine.high %v6982_v20, %v6982_v20  ;;  %v8516_v16 = vrot.slane %v6982_v20, %v19031_v17  ;;  %23027 = vst [vmem:[#allocation12_spill] sm:$0xff] %v21595_v56  ;;  %v23030_v28 = vld [vmem:[#allocation23_spill] sm:$0xff]  ;;  %v23032_v20 = vld [vmem:[#allocation25_spill] sm:$0xff] }
 0x425   : > { %v12949_v0 = vsel %vm19456_vm14, %v12941_v15, %v12948_v42  ;;  %v12958_v6 = vsel %vm19456_vm14, %v12950_v50, %v12957_v36  ;;  %v14760_v5 = vpack.c.bf16 %v10871_v44, %v10871_v44  ;;  %v6980_v1 = vmax.f32 %v6844_v18, 0.0  ;;  %v23031_v50 = vld [vmem:[#allocation20_spill] sm:$0xff] }
 0x426   : > { %14584 = vst.msk [vmem:[%s17800_s6 + $0x16c] sm:$0xf] %vm9471_vm8, %v12949_v0  ;;  %14585 = vst.msk [vmem:[%s17800_s6 + $0x170] sm:$0xf] %vm9471_vm8, %v12958_v6  ;;  %v6849_v49 = vadd.f32 %v21458_v34, %v6706_v23  ;;  %v6704_v9 = vmul.f32 %v21439_v54, %v15521_v60  ;;  %v8523_v15 = vrot.slane %v8509_v2, %v19031_v17  ;;  %v21605_v60 = vpop.f32.mrb[107].mxu1  ;;  %v21607_v0 = vpop.f32.mrb[106].mxu0 }
 0x427   : > { %v8524_v36 = vcombine.high %v8516_v16, %v8516_v16  ;;  %v15522_v42 = vadd.f32 %v23030_v28, %v23029_v63  ;;  %v15523_v26 = vadd.f32 %v23032_v20, %v23031_v50  ;;  %v12961_v44 = vshrl.u32 %v14760_v5, 16  ;;  %23033 = vst [vmem:[#allocation14_spill] sm:$0xff] %v21605_v60  ;;  %23034 = vst [vmem:[#allocation33_spill] sm:$0xff] %v21607_v0  ;;  %v14587_v20 = vld [vmem:[%s17800_s6 + $0x178] sm:$0x1] }
 0x428   : > { %v12964_v18 = vshll.u32 %v14760_v5, 16  ;;  %v8475_v3 = vcombine.high %v6980_v1, %v6980_v1  ;;  %v8482_v23 = vrot.slane %v6980_v1, %v19031_v17  ;;  %v8525_v6 = vcombine.high %v8523_v15, %v8523_v15 }
 0x429   : > { %v10907_v7 = vcombine.low %v8516_v16, %v8524_v36  ;;  %v6985_v2 = vmax.f32 %v6849_v49, 0.0  ;;  %v6847_v56 = vadd.f32 %v21458_v34, %v6704_v9  ;;  %v12963_v12 = vrot.slane %v12961_v44, 7  ;;  %v21619_v16 = vpop.f32.mrb[107].mxu0 }
 0x42a   : > { %v8489_v63 = vrot.slane %v8475_v3, %v19031_v17  ;;  %v8490_v28 = vcombine.high %v8482_v23, %v8482_v23  ;;  %v6707_v50 = vmul.f32 %v21439_v54, %v15522_v42  ;;  %v21614_v43 = vcombine.low %v8523_v15, %v8525_v6  ;;  %23035 = vst [vmem:[#allocation34_spill] sm:$0xff] %v21619_v16 }
 0x42b   : > { %v10921_v5 = vrot.slane %v10907_v7, %v19031_v17  ;;  %v8560_v1 = vcombine.high %v6985_v2, %v6985_v2  ;;  %v21617_v60 = vrot.slane %v6985_v2, %v19031_v17  ;;  %v12966_v49 = vor.u32 %v12964_v18, %v12963_v12 }
 0x42c   : > { %v12968_v9 = vrot.slane %v12963_v12, 4  ;;  %v8491_v36 = vcombine.high %v8489_v63, %v8489_v63  ;;  %v10873_v44 = vcombine.low %v8482_v23, %v8490_v28  ;;  %v10904_v42 = vrot.slane %v21556_v24, %v19031_v17 }
 0x42d   : > { %v10922_v3 = vcombine.low %v10914_v38, %v10921_v5  ;;  %v8574_v7 = vrot.slane %v8560_v1, %v19031_v17  ;;  %v8575_v15 = vcombine.high %v21617_v60, %v21617_v60  ;;  %v23036_v6 = vrot.slane %v21541_v4, 4 }
 0x42e   : > { %v13785_v18 = vsel %vm19463_vm15, %v12968_v9, %v14587_v20  ;;  %v10887_v12 = vrot.slane %v10873_v44, %v19031_v17  ;;  %v10889_v23 = vcombine.low %v8489_v63, %v8491_v36  ;;  %v10931_v24 = vrot.slane %v21614_v43, %v19031_v17 }
 0x42f   : > { %v12967_v2 = vsel %vm19456_vm14, %v23036_v6, %v12966_v49  ;;  %14588 = vst [vmem:[%s17800_s6 + $0x178] sm:$0x1] %v13785_v18  ;;  %v14763_v38 = vpack.c.bf16 %v10922_v3, %v10922_v3  ;;  %v6983_v28 = vmax.f32 %v6847_v56, 0.0  ;;  %v6850_v5 = vadd.f32 %v21458_v34, %v6707_v50  ;;  %v21643_v6 = vpop.f32.mrb[108].mxu1 }
 0x430   : > { %14586 = vst.msk [vmem:[%s17800_s6 + $0x174] sm:$0xf] %vm9471_vm8, %v12967_v2  ;;  %v10888_v4 = vcombine.low %v10880_v46, %v10887_v12  ;;  %v10897_v1 = vrot.slane %v10889_v23, %v19031_v17  ;;  %v21640_v49 = vcombine.low %v8575_v15, %v8574_v7  ;;  %v6705_v20 = vmul.f32 %v21439_v54, %v15523_v26  ;;  %v21646_v3 = vpop.f32.mrb[109].mxu1  ;;  %v21648_v46 = vpop.f32.mrb[108].mxu0  ;;  %v23040_v12 = vld [vmem:[#allocation24_spill] sm:$0xff] }
 0x431   : > { %v12987_v9 = vshrl.u32 %v14763_v38, 16  ;;  %v12990_v44 = vshll.u32 %v14763_v38, 16  ;;  %v8526_v63 = vcombine.high %v6983_v28, %v6983_v28  ;;  %v8576_v36 = vcombine.high %v8574_v7, %v8574_v7  ;;  %23037 = vst [vmem:[#allocation35_spill] sm:$0xff] %v21643_v6  ;;  %23038 = vst [vmem:[#allocation15_spill] sm:$0xff] %v21646_v3  ;;  %v21656_v23 = vpop.f32.mrb[110].mxu1 }
 0x432   : > { %v10905_v2 = vcombine.low %v10897_v1, %v10904_v42  ;;  %v14761_v18 = vpack.c.bf16 %v10888_v4, %v10888_v4  ;;  %v8533_v43 = vrot.slane %v6983_v28, %v19031_v17  ;;  %v6986_v56 = vmax.f32 %v6850_v5, 0.0  ;;  %23039 = vst [vmem:[#allocation36_spill] sm:$0xff] %v21648_v46  ;;  %23041 = vst [vmem:[#allocation17_spill] sm:$0xff] %v21656_v23  ;;  %v21658_v42 = vpop.f32.mrb[109].mxu0 }
 0x433   : > { %v21650_v50 = vrot.slane %v12987_v9, 7  ;;  %v8540_v15 = vrot.slane %v8526_v63, %v19031_v17  ;;  %v6848_v26 = vadd.f32 %v21458_v34, %v6705_v20  ;;  %v15524_v7 = vadd.f32 %v21171_v10, %v23040_v12  ;;  %23042 = vst [vmem:[#allocation21_spill] sm:$0xff] %v21658_v42  ;;  %v14589_v10 = vld [vmem:[%s17800_s6 + $0x17c] sm:$0xf] }
 0x434   : > { %v14762_v38 = vpack.c.bf16 %v10905_v2, %v10905_v2  ;;  %v12970_v28 = vshrl.u32 %v14761_v18, 16  ;;  %v8541_v4 = vcombine.high %v8533_v43, %v8533_v43  ;;  %v12973_v9 = vshll.u32 %v14761_v18, 16 }
 0x435   : > { %v12992_v1 = vor.u32 %v12990_v44, %v21650_v50  ;;  %v8542_v63 = vcombine.high %v8540_v15, %v8540_v15  ;;  %v8577_v3 = vcombine.high %v6986_v56, %v6986_v56  ;;  %v8584_v12 = vrot.slane %v6986_v56, %v19031_v17  ;;  %v21673_v56 = vpop.f32.mrb[110].mxu0 }
 0x436   : > { %v12972_v20 = vrot.slane %v12970_v28, 7  ;;  %v12978_v46 = vshrl.u32 %v14762_v38, 16  ;;  %v12981_v6 = vshll.u32 %v14762_v38, 16  ;;  %v10924_v16 = vcombine.low %v8533_v43, %v8541_v4  ;;  %v21671_v38 = vpop.f32.mrb[111].mxu1 }
 0x437   : > { %v21666_v23 = vrot.slane %v8577_v3, %v19031_v17  ;;  %v6984_v2 = vmax.f32 %v6848_v26, 0.0  ;;  %v6710_v5 = vmul.f32 %v21439_v54, %v15524_v7  ;;  %v8592_v15 = vcombine.high %v8584_v12, %v8584_v12 }
 0x438   : > { %v12975_v42 = vor.u32 %v12973_v9, %v12972_v20  ;;  %v12976_v0 = vrot.slane %v12972_v20, 4  ;;  %v12980_v44 = vrot.slane %v12978_v46, 7  ;;  %v10938_v18 = vrot.slane %v10924_v16, %v19031_v17 }
 0x439   : > { %v10974_v28 = vcombine.low %v8576_v36, %v8584_v12  ;;  %v8543_v48 = vcombine.high %v6984_v2, %v6984_v2  ;;  %v8550_v43 = vrot.slane %v6984_v2, %v19031_v17  ;;  %v10975_v16 = vcombine.low %v8592_v15, %v21666_v23  ;;  %v23043_v15 = vld [vmem:[#allocation26_spill] sm:$0xff] }
 0x43a   : > { %v12983_v3 = vor.u32 %v12981_v6, %v12980_v44  ;;  %v12985_v26 = vrot.slane %v12980_v44, 4  ;;  %v13788_v7 = vsel %vm19446_vm13, %v12975_v42, %v14589_v10  ;;  %v10939_v4 = vcombine.low %v10931_v24, %v10938_v18 }
 0x43b   : > { %14590 = vst [vmem:[%s17800_s6 + $0x17c] sm:$0xf] %v13788_v7  ;;  %v10982_v36 = vrot.slane %v10974_v28, %v19031_v17  ;;  %v8557_v46 = vrot.slane %v8543_v48, %v19031_v17  ;;  %v8558_v9 = vcombine.high %v8550_v43, %v8550_v43  ;;  %v10940_v2 = vcombine.low %v8542_v63, %v8550_v43  ;;  %v21695_v63 = vpop.f32.mrb[111].mxu0 }
 0x43c   : > { %v12984_v20 = vsel %vm19456_vm14, %v12976_v0, %v12983_v3  ;;  %v12993_v12 = vsel %vm19456_vm14, %v12985_v26, %v12992_v1  ;;  %v14764_v6 = vpack.c.bf16 %v10939_v4, %v10939_v4  ;;  %v10989_v24 = vrot.slane %v10975_v16, %v19031_v17  ;;  %v23044_v16 = vld [vmem:[#allocation4_spill] sm:$0xff] }
 0x43d   : > { %14591 = vst.msk [vmem:[%s17800_s6 + $0x180] sm:$0xf] %vm9471_vm8, %v12984_v20  ;;  %14592 = vst.msk [vmem:[%s17800_s6 + $0x184] sm:$0xf] %vm9471_vm8, %v12993_v12  ;;  %v8559_v42 = vcombine.high %v8557_v46, %v8557_v46  ;;  %v10941_v10 = vcombine.low %v8558_v9, %v8557_v46  ;;  %v6853_v48 = vadd.f32 %v21458_v34, %v6710_v5  ;;  %v12994_v44 = vrot.slane %v21650_v50, 4 }
 0x43e   : > { %v12996_v18 = vshrl.u32 %v14764_v6, 16  ;;  %v10948_v0 = vrot.slane %v10940_v2, %v19031_v17  ;;  %v15525_v1 = vadd.f32 %v21174_v25, %v23043_v15  ;;  %v10990_v28 = vcombine.low %v10982_v36, %v10989_v24  ;;  %v14594_v46 = vld [vmem:[%s17800_s6 + $0x18c] sm:$0x1] }
 0x43f   : > { %v10955_v43 = vrot.slane %v10941_v10, %v19031_v17  ;;  %v10957_v3 = vcombine.low %v8559_v42, %v21617_v60  ;;  %v6989_v26 = vmax.f32 %v6853_v48, 0.0  ;;  %v12999_v4 = vshll.u32 %v14764_v6, 16 }
 0x440   : > { %v12998_v7 = vrot.slane %v12996_v18, 7  ;;  %v6708_v5 = vmul.f32 %v21439_v54, %v15525_v1  ;;  %v15526_v50 = vadd.f32 %v21184_v37, %v23044_v16  ;;  %v14767_v9 = vpack.c.bf16 %v10990_v28, %v10990_v28 }
 0x441   : > { %v10956_v20 = vcombine.low %v10948_v0, %v10955_v43  ;;  %v10965_v25 = vrot.slane %v10957_v3, %v19031_v17  ;;  %v8627_v36 = vcombine.high %v6989_v26, %v6989_v26  ;;  %v8634_v60 = vrot.slane %v6989_v26, %v19031_v17 }
 0x442   : > { %v13001_v12 = vor.u32 %v12999_v4, %v12998_v7  ;;  %v13003_v2 = vrot.slane %v12998_v7, 4  ;;  %v6851_v24 = vadd.f32 %v21458_v34, %v6708_v5  ;;  %v13022_v6 = vshrl.u32 %v14767_v9, 16 }
 0x443   : > { %v23045_v42 = vrot.slane %v21640_v49, %v19031_v17  ;;  %v14765_v37 = vpack.c.bf16 %v10956_v20, %v10956_v20  ;;  %v8593_v48 = vcombine.high %v21666_v23, %v21666_v23  ;;  %v8641_v15 = vrot.slane %v8627_v36, %v19031_v17  ;;  %v21723_v20 = vpop.f32.mrb[112].mxu1  ;;  %v14596_v36 = vld [vmem:[%s17800_s6 + $0x190] sm:$0xf] }
 0x444   : > { %v13002_v18 = vsel %vm19456_vm14, %v12994_v44, %v13001_v12  ;;  %v13794_v0 = vsel %vm19463_vm15, %v13003_v2, %v14594_v46  ;;  %v8642_v1 = vcombine.high %v8634_v60, %v8634_v60  ;;  %v21719_v28 = vrot.slane %v13022_v6, 7  ;;  %v21727_v6 = vpop.f32.mrb[113].mxu1 }
 0x445   : > { %v10973_v10 = vcombine.low %v10965_v25, %v23045_v42  ;;  %14593 = vst.msk [vmem:[%s17800_s6 + $0x188] sm:$0xf] %vm9471_vm8, %v13002_v18  ;;  %14595 = vst [vmem:[%s17800_s6 + $0x18c] sm:$0x1] %v13794_v0  ;;  %v13025_v49 = vshll.u32 %v14767_v9, 16  ;;  %v13005_v3 = vshrl.u32 %v14765_v37, 16  ;;  %v8643_v26 = vcombine.high %v8641_v15, %v8641_v15 }
 0x446   : > { %v11025_v23 = vcombine.low %v8634_v60, %v8642_v1  ;;  %v6987_v7 = vmax.f32 %v6851_v24, 0.0  ;;  %v6711_v44 = vmul.f32 %v21439_v54, %v15526_v50  ;;  %v13008_v16 = vshll.u32 %v14765_v37, 16  ;;  %v21729_v60 = vpop.f32.mrb[112].mxu0  ;;  %v21732_v37 = vpop.f32.mrb[114].mxu1 }
 0x447   : > { %v14766_v43 = vpack.c.bf16 %v10973_v10, %v10973_v10  ;;  %v13027_v4 = vor.u32 %v13025_v49, %v21719_v28  ;;  %v13007_v5 = vrot.slane %v13005_v3, 7  ;;  %v11026_v12 = vcombine.low %v8641_v15, %v8643_v26  ;;  %v21734_v18 = vpop.f32.mrb[113].mxu0  ;;  %v23046_v49 = vld [vmem:[#allocation3_spill] sm:$0xff] }
 0x448   : > { %v11033_v2 = vrot.slane %v11025_v23, %v19031_v17  ;;  %v8594_v9 = vcombine.high %v6987_v7, %v6987_v7  ;;  %v8601_v10 = vrot.slane %v6987_v7, %v19031_v17  ;;  %v6854_v1 = vadd.f32 %v21458_v34, %v6711_v44  ;;  %v21747_v44 = vpop.f32.mrb[114].mxu0 }
 0x449   : > { %v13013_v46 = vshrl.u32 %v14766_v43, 16  ;;  %v13016_v25 = vshll.u32 %v14766_v43, 16  ;;  %v13010_v24 = vor.u32 %v13008_v16, %v13007_v5  ;;  %v13011_v50 = vrot.slane %v13007_v5, 4 }
 0x44a   : > { %v11040_v0 = vrot.slane %v11026_v12, %v19031_v17  ;;  %v8608_v15 = vrot.slane %v8594_v9, %v19031_v17  ;;  %v15527_v43 = vadd.f32 %v23046_v49, %v21167_v59  ;;  %v8609_v7 = vcombine.high %v8601_v10, %v8601_v10  ;;  %v21745_v9 = vpop.f32.mrb[115].mxu1 }
 0x44b   : > { %v13015_v42 = vrot.slane %v13013_v46, 7  ;;  %v13797_v23 = vsel %vm19446_vm13, %v13010_v24, %v14596_v36  ;;  %v10991_v16 = vcombine.low %v8593_v48, %v8601_v10  ;;  %v6990_v46 = vmax.f32 %v6854_v1, 0.0  ;;  %23047 = vst [vmem:[#allocation27_spill] sm:$0xff] %v21745_v9  ;;  %v23049_v1 = vld [vmem:[#allocation28_spill] sm:$0xff] }
 0x44c   : > { %14597 = vst [vmem:[%s17800_s6 + $0x190] sm:$0xf] %v13797_v23  ;;  %v11041_v5 = vcombine.low %v11033_v2, %v11040_v0  ;;  %v6709_v12 = vmul.f32 %v21439_v54, %v15527_v43  ;;  %v15528_v36 = vadd.f32 %v21230_v8, %v21222_v57 }
 0x44d   : > { %v13018_v3 = vor.u32 %v13016_v25, %v13015_v42  ;;  %v13020_v26 = vrot.slane %v13015_v42, 4  ;;  %v10992_v42 = vcombine.low %v8609_v7, %v8608_v15  ;;  %v10999_v2 = vrot.slane %v10991_v16, %v19031_v17  ;;  %v23048_v15 = vld [vmem:[#allocation5_spill] sm:$0xff] }
 0x44e   : > { %v14770_v48 = vpack.c.bf16 %v11041_v5, %v11041_v5  ;;  %v8644_v24 = vcombine.high %v6990_v46, %v6990_v46  ;;  %v8651_v10 = vrot.slane %v6990_v46, %v19031_v17  ;;  %v15529_v49 = vadd.f32 %v23049_v1, %v23048_v15 }
 0x44f   : > { %v13019_v59 = vsel %vm19456_vm14, %v13011_v50, %v13018_v3  ;;  %v13028_v25 = vsel %vm19456_vm14, %v13020_v26, %v13027_v4  ;;  %v11006_v0 = vrot.slane %v10992_v42, %v19031_v17  ;;  %v6852_v50 = vadd.f32 %v21458_v34, %v6709_v12 }
 0x450   : > { %14598 = vst.msk [vmem:[%s17800_s6 + $0x194] sm:$0xf] %vm9471_vm8, %v13019_v59  ;;  %14599 = vst.msk [vmem:[%s17800_s6 + $0x198] sm:$0xf] %vm9471_vm8, %v13028_v25  ;;  %v6714_v4 = vmul.f32 %v21439_v54, %v15528_v36  ;;  %v13048_v57 = vshrl.u32 %v14770_v48, 16  ;;  %v13051_v8 = vshll.u32 %v14770_v48, 16  ;;  %v8658_v43 = vrot.slane %v8644_v24, %v19031_v17 }
 0x451   : > { %v8659_v3 = vcombine.high %v8651_v10, %v8651_v10  ;;  %v11007_v26 = vcombine.low %v10999_v2, %v11006_v0  ;;  %v6988_v23 = vmax.f32 %v6852_v50, 0.0  ;;  %v6712_v5 = vmul.f32 %v21439_v54, %v15529_v49  ;;  %v23050_v59 = vld [vmem:[#allocation6_spill] sm:$0xff]  ;;  %v23051_v25 = vld [vmem:[#allocation8_spill] sm:$0xff] }
 0x452   : > { %v6857_v7 = vadd.f32 %v21458_v34, %v6714_v4  ;;  %v21769_v16 = vrot.slane %v13048_v57, 7  ;;  %v8660_v46 = vcombine.high %v8658_v43, %v8658_v43  ;;  %v15530_v42 = vadd.f32 %v23051_v25, %v23050_v59  ;;  %v21779_v4 = vpop.f32.mrb[115].mxu0 }
 0x453   : > { %v11042_v12 = vcombine.low %v8651_v10, %v8659_v3  ;;  %v14768_v36 = vpack.c.bf16 %v11007_v26, %v11007_v26  ;;  %v8610_v15 = vcombine.high %v6988_v23, %v6988_v23  ;;  %v8617_v48 = vrot.slane %v6988_v23, %v19031_v17  ;;  %23052 = vst [vmem:[#allocation31_spill] sm:$0xff] %v21779_v4 }
 0x454   : > { %v6993_v1 = vmax.f32 %v6857_v7, 0.0  ;;  %v13029_v24 = vrot.slane %v21719_v28, 4  ;;  %v21776_v2 = vor.u32 %v13051_v8, %v21769_v16  ;;  %v11043_v0 = vcombine.low %v8658_v43, %v8660_v46 }
 0x455   : > { %v11050_v50 = vrot.slane %v11042_v12, %v19031_v17  ;;  %v13031_v10 = vshrl.u32 %v14768_v36, 16  ;;  %v13034_v49 = vshll.u32 %v14768_v36, 16  ;;  %v8624_v57 = vrot.slane %v8610_v15, %v19031_v17  ;;  %v14601_v12 = vld [vmem:[%s17800_s6 + $0x1a0] sm:$0x1] }
 0x456   : > { %v8625_v3 = vcombine.high %v8617_v48, %v8617_v48  ;;  %v11057_v26 = vrot.slane %v11043_v0, %v19031_v17  ;;  %v8695_v23 = vcombine.high %v6993_v1, %v6993_v1  ;;  %v21784_v7 = vrot.slane %v6993_v1, %v19031_v17  ;;  %v21792_v0 = vpop.f32.mrb[116].mxu1 }
 0x457   : > { %v6855_v28 = vadd.f32 %v21458_v34, %v6712_v5  ;;  %v13033_v8 = vrot.slane %v13031_v10, 7  ;;  %v8626_v59 = vcombine.high %v8624_v57, %v8624_v57  ;;  %v6715_v46 = vmul.f32 %v21439_v54, %v15530_v42  ;;  %23053 = vst [vmem:[#allocation38_spill] sm:$0xff] %v21792_v0  ;;  %v21797_v42 = vpop.f32.mrb[116].mxu0 }
 0x458   : > { %v11008_v43 = vcombine.low %v8617_v48, %v8625_v3  ;;  %v11058_v25 = vcombine.low %v11050_v50, %v11057_v26  ;;  %v8709_v36 = vrot.slane %v8695_v23, %v19031_v17  ;;  %v8710_v15 = vcombine.high %v21784_v7, %v21784_v7  ;;  %v21795_v48 = vpop.f32.mrb[117].mxu1  ;;  %23055 = vst [vmem:[#allocation37_spill] sm:$0xff] %v21797_v42 }
 0x459   : > { %v6991_v4 = vmax.f32 %v6855_v28, 0.0  ;;  %v13055_v1 = vrot.slane %v21769_v16, 4  ;;  %v13036_v5 = vor.u32 %v13034_v49, %v13033_v8  ;;  %v13038_v10 = vrot.slane %v13033_v8, 4  ;;  %23054 = vst [vmem:[#allocation39_spill] sm:$0xff] %v21795_v48 }
 0x45a   : > { %v11009_v9 = vcombine.low %v8624_v57, %v8626_v59  ;;  %v14771_v50 = vpack.c.bf16 %v11058_v25, %v11058_v25  ;;  %v11016_v3 = vrot.slane %v11008_v43, %v19031_v17  ;;  %v6858_v49 = vadd.f32 %v21458_v34, %v6715_v46  ;;  %v23057_v46 = vld [vmem:[#allocation7_spill] sm:$0xff] }
 0x45b   : > { %v8661_v26 = vcombine.high %v6991_v4, %v6991_v4  ;;  %v8668_v23 = vrot.slane %v6991_v4, %v19031_v17  ;;  %v13037_v28 = vsel %vm19456_vm14, %v13029_v24, %v13036_v5  ;;  %v13803_v0 = vsel %vm19463_vm15, %v13038_v10, %v14601_v12  ;;  %v21811_v24 = vpop.f32.mrb[118].mxu1  ;;  %v21813_v5 = vpop.f32.mrb[117].mxu0  ;;  %v23058_v10 = vld [vmem:[#allocation29_spill] sm:$0xff] }
 0x45c   : > { %v11023_v16 = vrot.slane %v11009_v9, %v19031_v17  ;;  %14600 = vst.msk [vmem:[%s17800_s6 + $0x19c] sm:$0xf] %vm9471_vm8, %v13037_v28  ;;  %14602 = vst [vmem:[%s17800_s6 + $0x1a0] sm:$0x1] %v13803_v0  ;;  %v13057_v57 = vshrl.u32 %v14771_v50, 16  ;;  %v13060_v8 = vshll.u32 %v14771_v50, 16  ;;  %v11093_v59 = vcombine.low %v8710_v15, %v8709_v36 }
 0x45d   : > { %v8675_v43 = vrot.slane %v8661_v26, %v19031_v17  ;;  %v8676_v4 = vcombine.high %v8668_v23, %v8668_v23  ;;  %v6994_v48 = vmax.f32 %v6858_v49, 0.0  ;;  %v8711_v42 = vcombine.high %v8709_v36, %v8709_v36  ;;  %23056 = vst [vmem:[#allocation40_spill] sm:$0xff] %v21811_v24  ;;  %v21825_v24 = vpop.f32.mrb[119].mxu1 }
 0x45e   : > { %v11024_v25 = vcombine.low %v11016_v3, %v11023_v16  ;;  %v21815_v12 = vrot.slane %v13057_v57, 7  ;;  %v15531_v28 = vadd.f32 %v23058_v10, %v23057_v46  ;;  %v15532_v0 = vadd.f32 %v21309_v41, %v21300_v52  ;;  %v21827_v46 = vpop.f32.mrb[118].mxu0 }
 0x45f   : > { %v8677_v9 = vcombine.high %v8675_v43, %v8675_v43  ;;  %v11059_v50 = vcombine.low %v8668_v23, %v8676_v4  ;;  %v8712_v26 = vcombine.high %v6994_v48, %v6994_v48  ;;  %v8719_v3 = vrot.slane %v6994_v48, %v19031_v17 }
 0x460   : > { %v14769_v15 = vpack.c.bf16 %v11024_v25, %v11024_v25  ;;  %v13062_v36 = vor.u32 %v13060_v8, %v21815_v12  ;;  %v11101_v16 = vrot.slane %v11093_v59, %v19031_v17  ;;  %v6713_v57 = vmul.f32 %v21439_v54, %v15531_v28 }
 0x461   : > { %v11060_v49 = vcombine.low %v8675_v43, %v8677_v9  ;;  %v11067_v41 = vrot.slane %v11059_v50, %v19031_v17  ;;  %v21831_v23 = vrot.slane %v8712_v26, %v19031_v17  ;;  %v8727_v59 = vcombine.high %v8719_v3, %v8719_v3  ;;  %v14603_v50 = vld [vmem:[%s17800_s6 + $0x1a4] sm:$0xf] }
 0x462   : > { %v13040_v10 = vshrl.u32 %v14769_v15, 16  ;;  %v13043_v52 = vshll.u32 %v14769_v15, 16  ;;  %v13063_v48 = vsel %vm19456_vm14, %v13055_v1, %v13062_v36  ;;  %v11094_v43 = vcombine.low %v8711_v42, %v8719_v3 }
 0x463   : > { %v11074_v8 = vrot.slane %v11060_v49, %v19031_v17  ;;  %14606 = vst.msk [vmem:[%s17800_s6 + $0x1ac] sm:$0xf] %vm9471_vm8, %v13063_v48  ;;  %v6856_v4 = vadd.f32 %v21458_v34, %v6713_v57  ;;  %v6718_v9 = vmul.f32 %v21439_v54, %v15532_v0  ;;  %v15533_v28 = vadd.f32 %v21316_v33, %v21307_v45 }
 0x464   : > { %v13042_v25 = vrot.slane %v13040_v10, 7  ;;  %v13064_v15 = vrot.slane %v21815_v12, 4  ;;  %v11108_v1 = vrot.slane %v11094_v43, %v19031_v17  ;;  %v21846_v42 = vcombine.low %v8727_v59, %v21831_v23  ;;  %v21861_v43 = vpop.f32.mrb[119].mxu0 }
 0x465   : > { %v11075_v26 = vcombine.low %v11067_v41, %v11074_v8  ;;  %v6992_v49 = vmax.f32 %v6856_v4, 0.0  ;;  %v6861_v57 = vadd.f32 %v21458_v34, %v6718_v9  ;;  %v6716_v45 = vmul.f32 %v21439_v54, %v15533_v28 }
 0x466   : > { %v13045_v3 = vor.u32 %v13043_v52, %v13042_v25  ;;  %v13046_v36 = vrot.slane %v13042_v25, 4  ;;  %v11109_v10 = vcombine.low %v11101_v16, %v11108_v1  ;;  %v8728_v33 = vcombine.high %v21831_v23, %v21831_v23  ;;  %v14608_v1 = vld [vmem:[%s17800_s6 + $0x1b4] sm:$0x1] }
 0x467   : > { %v14772_v0 = vpack.c.bf16 %v11075_v26, %v11075_v26  ;;  %v8678_v48 = vcombine.high %v6992_v49, %v6992_v49  ;;  %v8685_v52 = vrot.slane %v6992_v49, %v19031_v17  ;;  %v6997_v59 = vmax.f32 %v6861_v57, 0.0 }
 0x468   : > { %v13054_v12 = vsel %vm19456_vm14, %v13046_v36, %v21776_v2  ;;  %v13806_v41 = vsel %vm19446_vm13, %v13045_v3, %v14603_v50  ;;  %v14774_v54 = vpack.c.bf16 %v11109_v10, %v11109_v10  ;;  %v6859_v2 = vadd.f32 %v21458_v34, %v6716_v45 }
 0x469   : > { %14604 = vst [vmem:[%s17800_s6 + $0x1a4] sm:$0xf] %v13806_v41  ;;  %14605 = vst.msk [vmem:[%s17800_s6 + $0x1a8] sm:$0xf] %vm9471_vm8, %v13054_v12  ;;  %v13066_v16 = vshrl.u32 %v14772_v0, 16  ;;  %v13069_v8 = vshll.u32 %v14772_v0, 16  ;;  %v8692_v23 = vrot.slane %v8678_v48, %v19031_v17  ;;  %v8693_v25 = vcombine.high %v8685_v52, %v8685_v52 }
 0x46a   : > { %v15534_v4 = vadd.f32 %v21337_v14, %v21314_v22  ;;  %v13083_v28 = vshrl.u32 %v14774_v54, 16  ;;  %v13086_v50 = vshll.u32 %v14774_v54, 16  ;;  %v8762_v26 = vcombine.high %v6997_v59, %v6997_v59 }
 0x46b   : > { %v13068_v9 = vrot.slane %v13066_v16, 7  ;;  %v8694_v3 = vcombine.high %v8692_v23, %v8692_v23  ;;  %v11076_v36 = vcombine.low %v8693_v25, %v8692_v23  ;;  %v8769_v49 = vrot.slane %v6997_v59, %v19031_v17  ;;  %v21893_v25 = vld [vmem:[%s22695_s2] ss:$0 sm:$0xff] }
 0x46c   : > { %v6995_v57 = vmax.f32 %v6859_v2, 0.0  ;;  %v21869_v12 = vrot.slane %v13083_v28, 7  ;;  %v8776_v45 = vrot.slane %v8762_v26, %v19031_v17  ;;  %v11118_v22 = vrot.slane %v21846_v42, %v19031_v17 }
 0x46d   : > { %v13071_v0 = vor.u32 %v13069_v8, %v13068_v9  ;;  %v13073_v10 = vrot.slane %v13068_v9, 4  ;;  %v11077_v14 = vcombine.low %v8694_v3, %v21784_v7  ;;  %v8777_v41 = vcombine.high %v8769_v49, %v8769_v49 }
 0x46e   : > { %v8729_v48 = vcombine.high %v6995_v57, %v6995_v57  ;;  %v21880_v8 = vor.u32 %v13086_v50, %v21869_v12  ;;  %v11084_v54 = vrot.slane %v11076_v36, %v19031_v17  ;;  %v8778_v59 = vcombine.high %v8776_v45, %v8776_v45  ;;  %v21904_v36 = vpop.f32.mrb[120].mxu1 }
 0x46f   : > { %v13072_v52 = vsel %vm19456_vm14, %v13064_v15, %v13071_v0  ;;  %v13812_v16 = vsel %vm19463_vm15, %v13073_v10, %v14608_v1  ;;  %v11091_v7 = vrot.slane %v11077_v14, %v19031_v17  ;;  %v8736_v23 = vrot.slane %v6995_v57, %v19031_v17  ;;  %v21908_v14 = vpop.f32.mrb[121].mxu1 }
 0x470   : > { %14607 = vst.msk [vmem:[%s17800_s6 + $0x1b0] sm:$0xf] %vm9471_vm8, %v13072_v52  ;;  %14609 = vst [vmem:[%s17800_s6 + $0x1b4] sm:$0x1] %v13812_v16  ;;  %v8743_v15 = vrot.slane %v8729_v48, %v19031_v17  ;;  %v6719_v2 = vmul.f32 %v21893_v25, %v15534_v4  ;;  %v15535_v9 = vadd.f32 %v21372_v27, %v21335_v21  ;;  %v21910_v21 = vpop.f32.mrb[120].mxu0  ;;  %v23061_v16 = vld [vmem:[#allocation9_spill] sm:$0xff] }
 0x471   : > { %v15536_v28 = vadd.f32 %v21391_v40, %v21386_v30  ;;  %v11092_v50 = vcombine.low %v11084_v54, %v11091_v7  ;;  %v21900_v26 = vcombine.low %v8769_v49, %v8777_v41  ;;  %v21902_v1 = vcombine.low %v8776_v45, %v8778_v59  ;;  %v21915_v45 = vpop.f32.mrb[122].mxu1  ;;  %v21917_v41 = vpop.f32.mrb[121].mxu0  ;;  %v21923_v48 = vld [vmem:[%s22696_s3] ss:$0 sm:$0xff] }
 0x472   : > { %v8744_v3 = vcombine.high %v8736_v23, %v8736_v23  ;;  %v11111_v57 = vcombine.low %v8728_v33, %v8736_v23  ;;  %v6862_v0 = vadd.f32 %v21458_v34, %v6719_v2  ;;  %v6717_v10 = vmul.f32 %v21893_v25, %v15535_v9  ;;  %23059 = vst [vmem:[#allocation42_spill] sm:$0xff] %v21915_v45  ;;  %v23062_v54 = vld [vmem:[#allocation10_spill] sm:$0xff]  ;;  %v21928_v59 = vpop.f32.mrb[123].mxu1  ;;  %v21930_v23 = vpop.f32.mrb[122].mxu0 }
 0x473   : > { %v8745_v4 = vcombine.high %v8743_v15, %v8743_v15  ;;  %v14773_v27 = vpack.c.bf16 %v11092_v50, %v11092_v50  ;;  %v11169_v30 = vrot.slane %v21902_v1, %v19031_v17  ;;  %v6722_v49 = vmul.f32 %v21893_v25, %v15536_v28  ;;  %23060 = vst [vmem:[#allocation41_spill] sm:$0xff] %v21917_v41  ;;  %v21947_v41 = vpop.f32.mrb[123].mxu0 }
 0x474   : > { %v11127_v40 = vcombine.low %v8744_v3, %v8743_v15  ;;  %v11125_v34 = vrot.slane %v11111_v57, %v19031_v17  ;;  %v6998_v33 = vmax.f32 %v6862_v0, 0.0  ;;  %v6860_v52 = vadd.f32 %v21923_v48, %v6717_v10  ;;  %23063 = vst [vmem:[#allocation47_spill] sm:$0xff] %v21928_v59  ;;  %23064 = vst [vmem:[#allocation51_spill] sm:$0xff] %v21930_v23  ;;  %v14610_v59 = vld [vmem:[%s17800_s6 + $0x1b8] sm:$0xf] }
 0x475   : > { %v15537_v7 = vadd.f32 %v23062_v54, %v23061_v16  ;;  %v13075_v15 = vshrl.u32 %v14773_v27, 16  ;;  %v13078_v2 = vshll.u32 %v14773_v27, 16  ;;  %v6865_v28 = vadd.f32 %v21923_v48, %v6722_v49  ;;  %v23065_v16 = vld [vmem:[#allocation30_spill] sm:$0xff] }
 0x476   : > { %v11135_v9 = vrot.slane %v11127_v40, %v19031_v17  ;;  %v11126_v50 = vcombine.low %v11118_v22, %v11125_v34  ;;  %v8779_v1 = vcombine.high %v6998_v33, %v6998_v33  ;;  %v8786_v3 = vrot.slane %v6998_v33, %v19031_v17 }
 0x477   : > { %v6996_v57 = vmax.f32 %v6860_v52, 0.0  ;;  %v13077_v0 = vrot.slane %v13075_v15, 7  ;;  %v7001_v10 = vmax.f32 %v6865_v28, 0.0  ;;  %v6720_v42 = vmul.f32 %v21893_v25, %v15537_v7 }
 0x478   : > { %v15538_v54 = vadd.f32 %v21411_v47, %v23065_v16  ;;  %v14775_v23 = vpack.c.bf16 %v11126_v50, %v11126_v50  ;;  %v8793_v27 = vrot.slane %v8779_v1, %v19031_v17  ;;  %v8794_v40 = vcombine.high %v8786_v3, %v8786_v3 }
 0x479   : > { %v8746_v49 = vcombine.high %v6996_v57, %v6996_v57  ;;  %v13080_v22 = vor.u32 %v13078_v2, %v13077_v0  ;;  %v13081_v34 = vrot.slane %v13077_v0, 4  ;;  %v8753_v33 = vrot.slane %v6996_v57, %v19031_v17 }
 0x47a   : > { %v8830_v52 = vcombine.high %v7001_v10, %v7001_v10  ;;  %v13092_v15 = vshrl.u32 %v14775_v23, 16  ;;  %v13095_v28 = vshll.u32 %v14775_v23, 16  ;;  %v8795_v45 = vcombine.high %v8793_v27, %v8793_v27 }
 0x47b   : > { %v11162_v7 = vcombine.low %v8786_v3, %v8794_v40  ;;  %v13089_v47 = vsel %vm19456_vm14, %v13081_v34, %v21880_v8  ;;  %v13815_v50 = vsel %vm19446_vm13, %v13080_v22, %v14610_v59  ;;  %v8760_v1 = vrot.slane %v8746_v49, %v19031_v17 }
 0x47c   : > { %v11128_v16 = vcombine.low %v8745_v4, %v8753_v33  ;;  %14611 = vst [vmem:[%s17800_s6 + $0x1b8] sm:$0xf] %v13815_v50  ;;  %14612 = vst.msk [vmem:[%s17800_s6 + $0x1bc] sm:$0xf] %vm9471_vm8, %v13089_v47  ;;  %v13094_v2 = vrot.slane %v13092_v15, 7  ;;  %v21953_v57 = vcombine.low %v8793_v27, %v8795_v45  ;;  %v21956_v3 = vrot.slane %v7001_v10, %v19031_v17 }
 0x47d   : > { %v11176_v23 = vrot.slane %v11162_v7, %v19031_v17  ;;  %v8761_v8 = vcombine.high %v8760_v1, %v8760_v1  ;;  %v21960_v0 = vrot.slane %v8830_v52, %v19031_v17  ;;  %v6863_v4 = vadd.f32 %v21923_v48, %v6720_v42 }
 0x47e   : > { %v11142_v59 = vrot.slane %v11128_v16, %v19031_v17  ;;  %v11159_v40 = vrot.slane %v21900_v26, %v19031_v17  ;;  %v13097_v49 = vor.u32 %v13095_v28, %v13094_v2  ;;  %v13099_v22 = vrot.slane %v13094_v2, 4 }
 0x47f   : > { %v11177_v34 = vcombine.low %v11169_v30, %v11176_v23  ;;  %v11144_v27 = vcombine.low %v8760_v1, %v8761_v8  ;;  %v8845_v10 = vcombine.high %v21956_v3, %v21956_v3  ;;  %v6999_v33 = vmax.f32 %v6863_v4, 0.0 }
 0x480   : > { %v11143_v45 = vcombine.low %v11135_v9, %v11142_v59  ;;  %v23066_v15 = vrot.slane %v21869_v12, 4  ;;  %v11186_v42 = vrot.slane %v21953_v57, %v19031_v17  ;;  %v6723_v26 = vmul.f32 %v21893_v25, %v15538_v54 }
 0x481   : > { %v14778_v7 = vpack.c.bf16 %v11177_v34, %v11177_v34  ;;  %v11152_v30 = vrot.slane %v11144_v27, %v19031_v17  ;;  %v8796_v28 = vcombine.high %v6999_v33, %v6999_v33  ;;  %v8846_v47 = vcombine.high %v21960_v0, %v21960_v0 }
 0x482   : > { %v13098_v52 = vsel %vm19456_vm14, %v23066_v15, %v13097_v49  ;;  %v14776_v9 = vpack.c.bf16 %v11143_v45, %v11143_v45  ;;  %v21980_v12 = vcombine.low %v8845_v10, %v21960_v0  ;;  %v8803_v1 = vrot.slane %v6999_v33, %v19031_v17  ;;  %v14615_v33 = vld [vmem:[%s17800_s6 + $0x1c8] sm:$0x1] }
 0x483   : > { %14613 = vst.msk [vmem:[%s17800_s6 + $0x1c0] sm:$0xf] %vm9471_vm8, %v13098_v52  ;;  %v13118_v50 = vshrl.u32 %v14778_v7, 16  ;;  %v6866_v16 = vadd.f32 %v21923_v48, %v6723_v26  ;;  %v13121_v2 = vshll.u32 %v14778_v7, 16  ;;  %v11160_v54 = vcombine.low %v11152_v30, %v11159_v40 }
 0x484   : > { %v13101_v23 = vshrl.u32 %v14776_v9, 16  ;;  %v13104_v57 = vshll.u32 %v14776_v9, 16  ;;  %v8810_v59 = vrot.slane %v8796_v28, %v19031_v17  ;;  %v8811_v4 = vcombine.high %v8803_v1, %v8803_v1 }
 0x485   : > { %v21984_v8 = vrot.slane %v13118_v50, 7  ;;  %v7002_v49 = vmax.f32 %v6866_v16, 0.0  ;;  %v14777_v34 = vpack.c.bf16 %v11160_v54, %v11160_v54  ;;  %v15539_v0 = vadd.f32 %v21424_v31, %v21409_v19  ;;  %v21996_v19 = vpop.f32.mrb[124].mxu1  ;;  %v22002_v16 = vpop.f32.mrb[124].mxu0 }
 0x486   : > { %v13103_v45 = vrot.slane %v13101_v23, 7  ;;  %v15540_v27 = vadd.f32 %v21485_v29, %v21475_v39  ;;  %v8812_v15 = vcombine.high %v8810_v59, %v8810_v59  ;;  %v11179_v52 = vcombine.low %v8803_v1, %v8811_v4  ;;  %v22000_v50 = vpop.f32.mrb[125].mxu1  ;;  %v22011_v4 = vpop.f32.mrb[125].mxu0 }
 0x487   : > { %v13123_v10 = vor.u32 %v13121_v2, %v21984_v8  ;;  %v13125_v7 = vrot.slane %v21984_v8, 4  ;;  %v13110_v9 = vshrl.u32 %v14777_v34, 16  ;;  %v13113_v31 = vshll.u32 %v14777_v34, 16  ;;  %v22023_v40 = vpop.f32.mrb[126].mxu0 }
 0x488   : > { %v13106_v26 = vor.u32 %v13104_v57, %v13103_v45  ;;  %v13108_v30 = vrot.slane %v13103_v45, 4  ;;  %v11193_v39 = vrot.slane %v11179_v52, %v19031_v17  ;;  %v8847_v29 = vcombine.high %v7002_v49, %v7002_v49  ;;  %v22009_v57 = vpop.f32.mrb[126].mxu1 }
 0x489   : > { %v8854_v28 = vrot.slane %v7002_v49, %v19031_v17  ;;  %v13112_v2 = vrot.slane %v13110_v9, 7  ;;  %v6721_v23 = vmul.f32 %v21893_v25, %v15539_v0  ;;  %v14617_v49 = vld [vmem:[%s17800_s6 + $0x1cc] sm:$0xf]  ;;  %v11195_v45 = vcombine.low %v8810_v59, %v8812_v15  ;;  %v22021_v9 = vpop.f32.mrb[127].mxu1 }
 0x48a   : > { %v13107_v1 = vsel %vm19456_vm14, %v13099_v22, %v13106_v26  ;;  %v13821_v54 = vsel %vm19463_vm15, %v13108_v30, %v14615_v33  ;;  %v11194_v34 = vcombine.low %v11186_v42, %v11193_v39  ;;  %v22018_v52 = vrot.slane %v8847_v29, %v19031_v17 }
 0x48b   : > { %14614 = vst.msk [vmem:[%s17800_s6 + $0x1c4] sm:$0xf] %vm9471_vm8, %v13107_v1  ;;  %14616 = vst [vmem:[%s17800_s6 + $0x1c8] sm:$0x1] %v13821_v54  ;;  %v8862_v22 = vcombine.high %v8854_v28, %v8854_v28  ;;  %v13115_v26 = vor.u32 %v13113_v31, %v13112_v2  ;;  %v13116_v33 = vrot.slane %v13112_v2, 4  ;;  %v11229_v30 = vcombine.low %v8846_v47, %v8854_v28 }
 0x48c   : > { %v6864_v0 = vadd.f32 %v21923_v48, %v6721_v23  ;;  %v14779_v1 = vpack.c.bf16 %v11194_v34, %v11194_v34  ;;  %v6726_v42 = vmul.f32 %v21893_v25, %v15540_v27  ;;  %v15541_v59 = vadd.f32 %v21496_v35, %v21483_v51 }
 0x48d   : > { %v11230_v54 = vcombine.low %v8862_v22, %v22018_v52  ;;  %v13124_v15 = vsel %vm19456_vm14, %v13116_v33, %v13123_v10  ;;  %v13824_v47 = vsel %vm19446_vm13, %v13115_v26, %v14617_v49  ;;  %v11237_v31 = vrot.slane %v11229_v30, %v19031_v17  ;;  %v22042_v49 = vpop.f32.mrb[127].mxu0 }
 0x48e   : > { %v7000_v39 = vmax.f32 %v6864_v0, 0.0  ;;  %14618 = vst [vmem:[%s17800_s6 + $0x1cc] sm:$0xf] %v13824_v47  ;;  %14619 = vst.msk [vmem:[%s17800_s6 + $0x1d0] sm:$0xf] %vm9471_vm8, %v13124_v15  ;;  %v11203_v29 = vrot.slane %v11195_v45, %v19031_v17  ;;  %v13127_v28 = vshrl.u32 %v14779_v1, 16  ;;  %v6869_v2 = vadd.f32 %v21923_v48, %v6726_v42 }
 0x48f   : > { %v11244_v27 = vrot.slane %v11230_v54, %v19031_v17  ;;  %v13130_v51 = vshll.u32 %v14779_v1, 16  ;;  %v6724_v23 = vmul.f32 %v21893_v25, %v15541_v59  ;;  %v15542_v45 = vadd.f32 %v21506_v32, %v21494_v55  ;;  %v22069_v8 = vpop.f32.mrb[128].mxu0 }
 0x490   : > { %v8813_v35 = vcombine.high %v7000_v39, %v7000_v39  ;;  %v8820_v10 = vrot.slane %v7000_v39, %v19031_v17  ;;  %v22044_v34 = vrot.slane %v13127_v28, 7  ;;  %v7005_v26 = vmax.f32 %v6869_v2, 0.0 }
 0x491   : > { %v11245_v22 = vcombine.low %v11237_v31, %v11244_v27  ;;  %v6867_v0 = vadd.f32 %v21923_v48, %v6724_v23  ;;  %v15543_v1 = vadd.f32 %v21537_v13, %v21504_v11  ;;  %v8863_v15 = vcombine.high %v22018_v52, %v22018_v52  ;;  %v22061_v13 = vpop.f32.mrb[128].mxu1 }
 0x492   : > { %v8827_v33 = vrot.slane %v8813_v35, %v19031_v17  ;;  %v8828_v30 = vcombine.high %v8820_v10, %v8820_v10  ;;  %v13132_v54 = vor.u32 %v13130_v51, %v22044_v34  ;;  %v8897_v59 = vcombine.high %v7005_v26, %v7005_v26 }
 0x493   : > { %v14782_v42 = vpack.c.bf16 %v11245_v22, %v11245_v22  ;;  %v8904_v55 = vrot.slane %v7005_v26, %v19031_v17  ;;  %v7003_v32 = vmax.f32 %v6867_v0, 0.0  ;;  %v6727_v26 = vmul.f32 %v21893_v25, %v15542_v45 }
 0x494   : > { %v8829_v47 = vcombine.high %v8827_v33, %v8827_v33  ;;  %v11196_v31 = vcombine.low %v8820_v10, %v8828_v30  ;;  %v13133_v39 = vsel %vm19456_vm14, %v13125_v7, %v13132_v54  ;;  %v8911_v11 = vrot.slane %v8897_v59, %v19031_v17  ;;  %v22067_v10 = vpop.f32.mrb[129].mxu1 }
 0x495   : > { %v13153_v28 = vshrl.u32 %v14782_v42, 16  ;;  %v13156_v27 = vshll.u32 %v14782_v42, 16  ;;  %14620 = vst.msk [vmem:[%s17800_s6 + $0x1d4] sm:$0xf] %vm9471_vm8, %v13133_v39  ;;  %v8912_v51 = vcombine.high %v8904_v55, %v8904_v55  ;;  %v8864_v35 = vcombine.high %v7003_v32, %v7003_v32 }
 0x496   : > { %v11210_v52 = vrot.slane %v11196_v31, %v19031_v17  ;;  %v11212_v2 = vcombine.low %v8829_v47, %v21956_v3  ;;  %v8913_v7 = vcombine.high %v8911_v11, %v8911_v11  ;;  %v8871_v22 = vrot.slane %v7003_v32, %v19031_v17 }
 0x497   : > { %v22071_v23 = vrot.slane %v13153_v28, 7  ;;  %v11280_v0 = vcombine.low %v8904_v55, %v8912_v51  ;;  %v22077_v54 = vrot.slane %v8864_v35, %v19031_v17  ;;  %v13134_v3 = vrot.slane %v22044_v34, 4 }
 0x498   : > { %v11211_v33 = vcombine.low %v11203_v29, %v11210_v52  ;;  %v11220_v30 = vrot.slane %v11212_v2, %v19031_v17  ;;  %v11281_v59 = vcombine.low %v8911_v11, %v8913_v7  ;;  %v8879_v47 = vcombine.high %v8871_v22, %v8871_v22  ;;  %v22091_v11 = vpop.f32.mrb[129].mxu0 }
 0x499   : > { %v13158_v42 = vor.u32 %v13156_v27, %v22071_v23  ;;  %v23067_v31 = vrot.slane %v21980_v12, %v19031_v17  ;;  %v11288_v45 = vrot.slane %v11280_v0, %v19031_v17  ;;  %v11246_v29 = vcombine.low %v8863_v15, %v8871_v22  ;;  %v22089_v27 = vpop.f32.mrb[130].mxu1 }
 0x49a   : > { %v14780_v32 = vpack.c.bf16 %v11211_v33, %v11211_v33  ;;  %v11295_v28 = vrot.slane %v11281_v59, %v19031_v17  ;;  %v11247_v55 = vcombine.low %v8879_v47, %v22077_v54  ;;  %v6870_v52 = vadd.f32 %v21923_v48, %v6727_v26  ;;  %23068 = vst [vmem:[#allocation57_spill] sm:$0xff] %v22089_v27  ;;  %v14622_v59 = vld [vmem:[%s17800_s6 + $0x1dc] sm:$0x1]  ;;  %v14624_v27 = vld [vmem:[%s17800_s6 + $0x1e0] sm:$0xf] }
 0x49b   : > { %v11228_v39 = vcombine.low %v11220_v30, %v23067_v31  ;;  %v6725_v34 = vmul.f32 %v21893_v25, %v15543_v1  ;;  %v11254_v35 = vrot.slane %v11246_v29, %v19031_v17 }
 0x49c   : > { %v13136_v51 = vshrl.u32 %v14780_v32, 16  ;;  %v11296_v15 = vcombine.low %v11288_v45, %v11295_v28  ;;  %v11261_v7 = vrot.slane %v11247_v55, %v19031_v17  ;;  %v7006_v22 = vmax.f32 %v6870_v52, 0.0 }
 0x49d   : > { %v14781_v2 = vpack.c.bf16 %v11228_v39, %v11228_v39  ;;  %v6868_v26 = vadd.f32 %v21923_v48, %v6725_v34  ;;  %v13139_v30 = vshll.u32 %v14780_v32, 16 }
 0x49e   : > { %v13138_v33 = vrot.slane %v13136_v51, 7  ;;  %v14785_v47 = vpack.c.bf16 %v11296_v15, %v11296_v15  ;;  %v11262_v31 = vcombine.low %v11254_v35, %v11261_v7  ;;  %v8914_v12 = vcombine.high %v7006_v22, %v7006_v22 }
 0x49f   : > { %v13145_v1 = vshrl.u32 %v14781_v2, 16  ;;  %v13148_v0 = vshll.u32 %v14781_v2, 16  ;;  %v8921_v39 = vrot.slane %v7006_v22, %v19031_v17  ;;  %v7004_v55 = vmax.f32 %v6868_v26, 0.0 }
 0x4a0   : > { %v13141_v29 = vor.u32 %v13139_v30, %v13138_v33  ;;  %v13143_v45 = vrot.slane %v13138_v33, 4  ;;  %v13180_v52 = vshrl.u32 %v14785_v47, 16  ;;  %v14783_v34 = vpack.c.bf16 %v11262_v31, %v11262_v31  ;;  %v14631_v30 = vld [vmem:[%s17800_s6 + $0x1f4] sm:$0xf]  ;;  %v22117_v31 = vpop.f32.mrb[131].mxu1 }
 0x4a1   : > { %v13147_v28 = vrot.slane %v13145_v1, 7  ;;  %v8928_v32 = vrot.slane %v8914_v12, %v19031_v17  ;;  %v8880_v2 = vcombine.high %v22077_v54, %v22077_v54  ;;  %v13183_v26 = vshll.u32 %v14785_v47, 16  ;;  %23069 = vst [vmem:[#allocation61_spill] sm:$0xff] %v22117_v31 }
 0x4a2   : > { %v13142_v51 = vsel %vm19456_vm14, %v13134_v3, %v13141_v29  ;;  %v13830_v7 = vsel %vm19463_vm15, %v13143_v45, %v14622_v59  ;;  %v22110_v22 = vrot.slane %v13180_v52, 7  ;;  %v13162_v12 = vshrl.u32 %v14783_v34, 16  ;;  %v22119_v59 = vpop.f32.mrb[130].mxu0 }
 0x4a3   : > { %v13150_v35 = vor.u32 %v13148_v0, %v13147_v28  ;;  %v13151_v15 = vrot.slane %v13147_v28, 4  ;;  %14621 = vst.msk [vmem:[%s17800_s6 + $0x1d8] sm:$0xf] %vm9471_vm8, %v13142_v51  ;;  %14623 = vst [vmem:[%s17800_s6 + $0x1dc] sm:$0x1] %v13830_v7  ;;  %v8929_v33 = vcombine.high %v8921_v39, %v8921_v39  ;;  %v8930_v1 = vcombine.high %v8928_v32, %v8928_v32  ;;  %v23070_v51 = vld [vmem:[#allocation11_spill] sm:$0xff] }
 0x4a4   : > { %v8881_v0 = vcombine.high %v7004_v55, %v7004_v55  ;;  %v13185_v47 = vor.u32 %v13183_v26, %v22110_v22  ;;  %v22125_v29 = vrot.slane %v13162_v12, 7  ;;  %v13165_v45 = vshll.u32 %v14783_v34, 16 }
 0x4a5   : > { %v13159_v54 = vsel %vm19456_vm14, %v13151_v15, %v13158_v42  ;;  %v13833_v3 = vsel %vm19446_vm13, %v13150_v35, %v14624_v27  ;;  %v11297_v42 = vcombine.low %v8921_v39, %v8929_v33  ;;  %v11298_v28 = vcombine.low %v8928_v32, %v8930_v1  ;;  %v22131_v15 = vpop.f32.mrb[131].mxu0 }
 0x4a6   : > { %14625 = vst [vmem:[%s17800_s6 + $0x1e0] sm:$0xf] %v13833_v3  ;;  %14626 = vst.msk [vmem:[%s17800_s6 + $0x1e4] sm:$0xf] %vm9471_vm8, %v13159_v54  ;;  %v8888_v27 = vrot.slane %v7004_v55, %v19031_v17  ;;  %v8895_v52 = vrot.slane %v8881_v0, %v19031_v17  ;;  %v15544_v35 = vadd.f32 %v23070_v51, %v21560_v62  ;;  %v13186_v7 = vrot.slane %v22110_v22, 4  ;;  %v23073_v22 = vld [vmem:[#allocation32_spill] sm:$0xff] }
 0x4a7   : > { %23071 = vst [vmem:[#allocation67_spill] sm:$0xff] %v22131_v15  ;;  %v13842_v26 = vsel %vm19446_vm13, %v13185_v47, %v14631_v30  ;;  %v13167_v12 = vor.u32 %v13165_v45, %v22125_v29  ;;  %v11305_v39 = vrot.slane %v11297_v42, %v19031_v17  ;;  %v11312_v55 = vrot.slane %v11298_v28, %v19031_v17  ;;  %v23074_v3 = vld [vmem:[#allocation13_spill] sm:$0xff]  ;;  %v23075_v30 = vld [vmem:[#allocation12_spill] sm:$0xff]  ;;  %v23077_v45 = vld [vmem:[#allocation14_spill] sm:$0xff] }
 0x4a8   : > { %14632 = vst [vmem:[%s17800_s6 + $0x1f4] sm:$0xf] %v13842_v26  ;;  %v8896_v34 = vcombine.high %v8888_v27, %v8888_v27  ;;  %v11263_v32 = vcombine.low %v8880_v2, %v8888_v27  ;;  %v6730_v33 = vmul.f32 %v21893_v25, %v15544_v35  ;;  %v23072_v62 = vrot.slane %v22071_v23, 4  ;;  %v23076_v0 = vld [vmem:[#allocation33_spill] sm:$0xff]  ;;  %v23078_v42 = vld [vmem:[#allocation34_spill] sm:$0xff] }
 0x4a9   : > { %v15545_v1 = vadd.f32 %v23074_v3, %v23073_v22  ;;  %v15546_v47 = vadd.f32 %v23076_v0, %v23075_v30  ;;  %v15547_v51 = vadd.f32 %v23078_v42, %v23077_v45  ;;  %v11313_v28 = vcombine.low %v11305_v39, %v11312_v55  ;;  %v23080_v22 = vld [vmem:[#allocation36_spill] sm:$0xff]  ;;  %v23082_v39 = vld [vmem:[#allocation21_spill] sm:$0xff] }
 0x4aa   : > { %v13168_v54 = vsel %vm19456_vm14, %v23072_v62, %v13167_v12  ;;  %v11264_v2 = vcombine.low %v8896_v34, %v8895_v52  ;;  %v11271_v27 = vrot.slane %v11263_v32, %v19031_v17  ;;  %v6873_v23 = vadd.f32 %v21923_v48, %v6730_v33  ;;  %v23079_v62 = vld [vmem:[#allocation35_spill] sm:$0xff] }
 0x4ab   : > { %14627 = vst.msk [vmem:[%s17800_s6 + $0x1e8] sm:$0xf] %vm9471_vm8, %v13168_v54  ;;  %v6728_v35 = vmul.f32 %v21893_v25, %v15545_v1  ;;  %v6731_v26 = vmul.f32 %v21893_v25, %v15546_v47  ;;  %v6729_v12 = vmul.f32 %v21893_v25, %v15547_v51  ;;  %v15548_v3 = vadd.f32 %v23080_v22, %v23079_v62  ;;  %v23081_v54 = vld [vmem:[#allocation15_spill] sm:$0xff]  ;;  %v22171_v22 = vpop.f32.mrb[132].mxu0 }
 0x4ac   : > { %v14786_v30 = vpack.c.bf16 %v11313_v28, %v11313_v28  ;;  %v11278_v0 = vrot.slane %v11264_v2, %v19031_v17  ;;  %v7009_v45 = vmax.f32 %v6873_v23, 0.0  ;;  %v22163_v52 = vadd.f32 %v23082_v39, %v23081_v54  ;;  %23083 = vst [vmem:[#allocation43_spill] sm:$0xff] %v22171_v22  ;;  %v22176_v39 = vpop.f32.mrb[132].mxu1 }
 0x4ad   : > { %v13169_v55 = vrot.slane %v22125_v29, 4  ;;  %v6871_v34 = vadd.f32 %v21923_v48, %v6728_v35  ;;  %v6874_v32 = vadd.f32 %v21923_v48, %v6731_v26  ;;  %v6872_v33 = vadd.f32 %v21923_v48, %v6729_v12  ;;  %23084 = vst [vmem:[#allocation44_spill] sm:$0xff] %v22176_v39  ;;  %v22178_v12 = vpop.f32.mrb[133].mxu0 }
 0x4ae   : > { %v13188_v1 = vshrl.u32 %v14786_v30, 16  ;;  %v11279_v47 = vcombine.low %v11271_v27, %v11278_v0  ;;  %v8965_v42 = vcombine.high %v7009_v45, %v7009_v45  ;;  %v6734_v51 = vmul.f32 %v21893_v25, %v15548_v3  ;;  %23085 = vst [vmem:[#allocation45_spill] sm:$0xff] %v22178_v12 }
 0x4af   : > { %v13191_v28 = vshll.u32 %v14786_v30, 16  ;;  %v8972_v2 = vrot.slane %v7009_v45, %v19031_v17  ;;  %v7007_v23 = vmax.f32 %v6871_v34, 0.0  ;;  %v7010_v62 = vmax.f32 %v6874_v32, 0.0  ;;  %v22181_v45 = vpop.f32.mrb[133].mxu1  ;;  %v22183_v34 = vpop.f32.mrb[134].mxu0 }
 0x4b0   : > { %v22173_v54 = vrot.slane %v13188_v1, 7  ;;  %v14784_v29 = vpack.c.bf16 %v11279_v47, %v11279_v47  ;;  %v8979_v35 = vrot.slane %v8965_v42, %v19031_v17  ;;  %v7008_v26 = vmax.f32 %v6872_v33, 0.0  ;;  %23086 = vst [vmem:[#allocation46_spill] sm:$0xff] %v22181_v45  ;;  %23087 = vst [vmem:[#allocation71_spill] sm:$0xff] %v22183_v34  ;;  %v22187_v42 = vpop.f32.mrb[134].mxu1 }
 0x4b1   : > { %v8980_v27 = vcombine.high %v8972_v2, %v8972_v2  ;;  %v8931_v0 = vcombine.high %v7007_v23, %v7007_v23  ;;  %v8938_v3 = vrot.slane %v7007_v23, %v19031_v17  ;;  %v8982_v30 = vcombine.high %v7010_v62, %v7010_v62  ;;  %23088 = vst [vmem:[#allocation77_spill] sm:$0xff] %v22187_v42 }
 0x4b2   : > { %v13193_v32 = vor.u32 %v13191_v28, %v22173_v54  ;;  %v13171_v1 = vshrl.u32 %v14784_v29, 16  ;;  %v13174_v47 = vshll.u32 %v14784_v29, 16  ;;  %v6877_v33 = vadd.f32 %v21923_v48, %v6734_v51  ;;  %v14629_v28 = vld [vmem:[%s17800_s6 + $0x1f0] sm:$0x1] }
 0x4b3   : > { %v11348_v12 = vcombine.low %v8980_v27, %v8979_v35  ;;  %v8945_v2 = vrot.slane %v8931_v0, %v19031_v17  ;;  %v8946_v22 = vcombine.high %v8938_v3, %v8938_v3  ;;  %v8981_v23 = vcombine.high %v8979_v35, %v8979_v35 }
 0x4b4   : > { %v13194_v39 = vsel %vm19456_vm14, %v13186_v7, %v13193_v32  ;;  %v13173_v45 = vrot.slane %v13171_v1, 7  ;;  %v8989_v15 = vrot.slane %v7010_v62, %v19031_v17  ;;  %v22194_v34 = vrot.slane %v8982_v30, %v19031_v17 }
 0x4b5   : > { %14633 = vst.msk [vmem:[%s17800_s6 + $0x1f8] sm:$0xf] %vm9471_vm8, %v13194_v39  ;;  %v11356_v51 = vrot.slane %v11348_v12, %v19031_v17  ;;  %v8947_v29 = vcombine.high %v8945_v2, %v8945_v2  ;;  %v11314_v27 = vcombine.low %v8938_v3, %v8946_v22  ;;  %v8948_v0 = vcombine.high %v7008_v26, %v7008_v26  ;;  %v22203_v39 = vpop.f32.mrb[135].mxu0 }
 0x4b6   : > { %v13176_v35 = vor.u32 %v13174_v47, %v13173_v45  ;;  %v13178_v42 = vrot.slane %v13173_v45, 4  ;;  %v8997_v31 = vcombine.high %v8989_v15, %v8989_v15  ;;  %v11349_v7 = vcombine.low %v8981_v23, %v8989_v15  ;;  %v22213_v15 = vpop.f32.mrb[135].mxu1 }
 0x4b7   : > { %v11315_v32 = vcombine.low %v8945_v2, %v8947_v29  ;;  %v11322_v62 = vrot.slane %v11314_v27, %v19031_v17  ;;  %v8955_v30 = vrot.slane %v7008_v26, %v19031_v17  ;;  %v8962_v1 = vrot.slane %v8948_v0, %v19031_v17 }
 0x4b8   : > { %v13177_v12 = vsel %vm19456_vm14, %v13169_v55, %v13176_v35  ;;  %v13839_v22 = vsel %vm19463_vm15, %v13178_v42, %v14629_v28  ;;  %v11363_v3 = vrot.slane %v11349_v7, %v19031_v17  ;;  %v22211_v45 = vcombine.low %v8997_v31, %v22194_v34 }
 0x4b9   : > { %14628 = vst.msk [vmem:[%s17800_s6 + $0x1ec] sm:$0xf] %vm9471_vm8, %v13177_v12  ;;  %14630 = vst [vmem:[%s17800_s6 + $0x1f0] sm:$0x1] %v13839_v22  ;;  %v11329_v26 = vrot.slane %v11315_v32, %v19031_v17  ;;  %v8963_v47 = vcombine.high %v8955_v30, %v8955_v30  ;;  %v8964_v2 = vcombine.high %v8962_v1, %v8962_v1  ;;  %v22219_v23 = vmax.f32 %v6877_v33, 0.0  ;;  %v23089_v33 = vld [vmem:[#allocation17_spill] sm:$0xff] }
 0x4ba   : > { %v13195_v55 = vrot.slane %v22173_v54, 4  ;;  %v11364_v29 = vcombine.low %v11356_v51, %v11363_v3  ;;  %v6732_v42 = vmul.f32 %v21893_v25, %v22163_v52  ;;  %v11373_v35 = vrot.slane %v22211_v45, %v19031_v17 }
 0x4bb   : > { %v11330_v28 = vcombine.low %v11322_v62, %v11329_v26  ;;  %v11331_v31 = vcombine.low %v8955_v30, %v8963_v47  ;;  %v11332_v27 = vcombine.low %v8962_v1, %v8964_v2  ;;  %v9033_v0 = vcombine.high %v22219_v23, %v22219_v23 }
 0x4bc   : > { %v14789_v7 = vpack.c.bf16 %v11364_v29, %v11364_v29  ;;  %v6875_v32 = vadd.f32 %v21923_v48, %v6732_v42  ;;  %v15550_v12 = vadd.f32 %v21673_v56, %v23089_v33  ;;  %v8998_v22 = vcombine.high %v22194_v34, %v22194_v34 }
 0x4bd   : > { %v14787_v54 = vpack.c.bf16 %v11330_v28, %v11330_v28  ;;  %v11339_v51 = vrot.slane %v11331_v31, %v19031_v17  ;;  %v11346_v52 = vrot.slane %v11332_v27, %v19031_v17  ;;  %v9047_v62 = vrot.slane %v9033_v0, %v19031_v17  ;;  %v14638_v27 = vld [vmem:[%s17800_s6 + $0x208] sm:$0xf] }
 0x4be   : > { %v13215_v30 = vshrl.u32 %v14789_v7, 16  ;;  %v7011_v1 = vmax.f32 %v6875_v32, 0.0  ;;  %v6735_v3 = vmul.f32 %v21893_v25, %v15550_v12  ;;  %v13218_v26 = vshll.u32 %v14789_v7, 16 }
 0x4bf   : > { %v13197_v45 = vshrl.u32 %v14787_v54, 16  ;;  %v11347_v47 = vcombine.low %v11339_v51, %v11346_v52  ;;  %v9048_v2 = vcombine.high %v9047_v62, %v9047_v62  ;;  %v13200_v56 = vshll.u32 %v14787_v54, 16 }
 0x4c0   : > { %v22237_v29 = vrot.slane %v13215_v30, 7  ;;  %v8999_v42 = vcombine.high %v7011_v1, %v7011_v1  ;;  %v9006_v28 = vrot.slane %v7011_v1, %v19031_v17  ;;  %v6878_v32 = vadd.f32 %v21923_v48, %v6735_v3 }
 0x4c1   : > { %v13199_v31 = vrot.slane %v13197_v45, 7  ;;  %v14788_v0 = vpack.c.bf16 %v11347_v47, %v11347_v47  ;;  %v15551_v34 = vadd.f32 %v21695_v63, %v21671_v38  ;;  %v9040_v7 = vrot.slane %v22219_v23, %v19031_v17 }
 0x4c2   : > { %v13220_v33 = vor.u32 %v13218_v26, %v22237_v29  ;;  %v11416_v12 = vcombine.low %v9047_v62, %v9048_v2  ;;  %v9013_v54 = vrot.slane %v8999_v42, %v19031_v17  ;;  %v13221_v52 = vrot.slane %v22237_v29, 4 }
 0x4c3   : > { %v13202_v51 = vor.u32 %v13200_v56, %v13199_v31  ;;  %v13206_v30 = vshrl.u32 %v14788_v0, 16  ;;  %v9014_v1 = vcombine.high %v9006_v28, %v9006_v28  ;;  %v13204_v45 = vrot.slane %v13199_v31, 4  ;;  %v14636_v56 = vld [vmem:[%s17800_s6 + $0x204] sm:$0x1] }
 0x4c4   : > { %v13851_v3 = vsel %vm19446_vm13, %v13220_v33, %v14638_v27  ;;  %v13209_v38 = vshll.u32 %v14788_v0, 16  ;;  %v11366_v63 = vcombine.low %v8998_v22, %v9006_v28  ;;  %v7014_v62 = vmax.f32 %v6878_v32, 0.0 }
 0x4c5   : > { %v13203_v26 = vsel %vm19456_vm14, %v13195_v55, %v13202_v51  ;;  %14639 = vst [vmem:[%s17800_s6 + $0x208] sm:$0xf] %v13851_v3  ;;  %v13208_v47 = vrot.slane %v13206_v30, 7  ;;  %v6733_v2 = vmul.f32 %v21893_v25, %v15551_v34  ;;  %v11424_v42 = vrot.slane %v11416_v12, %v19031_v17 }
 0x4c6   : > { %14634 = vst.msk [vmem:[%s17800_s6 + $0x1fc] sm:$0xf] %vm9471_vm8, %v13203_v26  ;;  %v11380_v31 = vrot.slane %v11366_v63, %v19031_v17  ;;  %v9015_v27 = vcombine.high %v9013_v54, %v9013_v54  ;;  %v15552_v22 = vadd.f32 %v21729_v60, %v21723_v20  ;;  %v9049_v0 = vcombine.high %v7014_v62, %v7014_v62 }
 0x4c7   : > { %v13211_v28 = vor.u32 %v13209_v38, %v13208_v47  ;;  %v13213_v55 = vrot.slane %v13208_v47, 4  ;;  %v9056_v32 = vrot.slane %v7014_v62, %v19031_v17  ;;  %v6876_v34 = vadd.f32 %v21923_v48, %v6733_v2  ;;  %v23091_v62 = vld [vmem:[#allocation31_spill] sm:$0xff] }
 0x4c8   : > { %v11381_v33 = vcombine.low %v11373_v35, %v11380_v31  ;;  %v6738_v51 = vmul.f32 %v21893_v25, %v15552_v22  ;;  %v15553_v12 = vadd.f32 %v21734_v18, %v21727_v6  ;;  %v9063_v20 = vrot.slane %v9049_v0, %v19031_v17 }
 0x4c9   : > { %v13212_v30 = vsel %vm19456_vm14, %v13204_v45, %v13211_v28  ;;  %v13848_v3 = vsel %vm19463_vm15, %v13213_v55, %v14636_v56  ;;  %v9064_v60 = vcombine.high %v9056_v32, %v9056_v32  ;;  %v7012_v38 = vmax.f32 %v6876_v34, 0.0  ;;  %v23090_v45 = vld [vmem:[#allocation27_spill] sm:$0xff] }
 0x4ca   : > { %14635 = vst.msk [vmem:[%s17800_s6 + $0x200] sm:$0xf] %vm9471_vm8, %v13212_v30  ;;  %14637 = vst [vmem:[%s17800_s6 + $0x204] sm:$0x1] %v13848_v3  ;;  %v14790_v35 = vpack.c.bf16 %v11381_v33, %v11381_v33  ;;  %v6881_v63 = vadd.f32 %v21923_v48, %v6738_v51  ;;  %v6736_v26 = vmul.f32 %v21893_v25, %v15553_v12 }
 0x4cb   : > { %v9065_v47 = vcombine.high %v9063_v20, %v9063_v20  ;;  %v11417_v6 = vcombine.low %v9056_v32, %v9064_v60  ;;  %v15554_v18 = vadd.f32 %v21747_v44, %v21732_v37  ;;  %v15555_v2 = vadd.f32 %v23091_v62, %v23090_v45 }
 0x4cc   : > { %v11382_v56 = vcombine.low %v9014_v1, %v9013_v54  ;;  %v13223_v31 = vshrl.u32 %v14790_v35, 16  ;;  %v9016_v22 = vcombine.high %v7012_v38, %v7012_v38  ;;  %v9023_v28 = vrot.slane %v7012_v38, %v19031_v17 }
 0x4cd   : > { %v13226_v55 = vshll.u32 %v14790_v35, 16  ;;  %v11431_v0 = vrot.slane %v11417_v6, %v19031_v17  ;;  %v7017_v33 = vmax.f32 %v6881_v63, 0.0  ;;  %v6879_v34 = vadd.f32 %v21923_v48, %v6736_v26 }
 0x4ce   : > { %v13225_v51 = vrot.slane %v13223_v31, 7  ;;  %v9030_v32 = vrot.slane %v9016_v22, %v19031_v17  ;;  %v9031_v12 = vcombine.high %v9023_v28, %v9023_v28  ;;  %v11383_v30 = vcombine.low %v9015_v27, %v9023_v28 }
 0x4cf   : > { %v11432_v37 = vcombine.low %v11424_v42, %v11431_v0  ;;  %v11433_v44 = vcombine.low %v9063_v20, %v9065_v47  ;;  %v9100_v3 = vcombine.high %v7017_v33, %v7017_v33  ;;  %v9107_v54 = vrot.slane %v7017_v33, %v19031_v17 }
 0x4d0   : > { %v11390_v1 = vrot.slane %v11382_v56, %v19031_v17  ;;  %v13228_v60 = vor.u32 %v13226_v55, %v13225_v51  ;;  %v9032_v35 = vcombine.high %v9030_v32, %v9030_v32  ;;  %v11397_v38 = vrot.slane %v11383_v30, %v19031_v17 }
 0x4d1   : > { %v14793_v63 = vpack.c.bf16 %v11432_v37, %v11432_v37  ;;  %v11399_v6 = vcombine.low %v9031_v12, %v9030_v32  ;;  %v22289_v26 = vrot.slane %v9100_v3, %v19031_v17  ;;  %v9115_v45 = vcombine.high %v9107_v54, %v9107_v54 }
 0x4d2   : > { %v13229_v42 = vsel %vm19456_vm14, %v13221_v52, %v13228_v60  ;;  %v11398_v27 = vcombine.low %v11390_v1, %v11397_v38  ;;  %v11400_v20 = vcombine.low %v9032_v35, %v9040_v7  ;;  %v7015_v47 = vmax.f32 %v6879_v34, 0.0  ;;  %v14645_v34 = vld [vmem:[%s17800_s6 + $0x21c] sm:$0xf] }
 0x4d3   : > { %v13230_v62 = vrot.slane %v13225_v51, 4  ;;  %14640 = vst.msk [vmem:[%s17800_s6 + $0x20c] sm:$0xf] %vm9471_vm8, %v13229_v42  ;;  %v11441_v56 = vrot.slane %v11433_v44, %v19031_v17  ;;  %v13250_v31 = vshrl.u32 %v14793_v63, 16  ;;  %v13253_v22 = vshll.u32 %v14793_v63, 16 }
 0x4d4   : > { %v11407_v28 = vrot.slane %v11399_v6, %v19031_v17  ;;  %v11414_v29 = vrot.slane %v11400_v20, %v19031_v17  ;;  %v14791_v55 = vpack.c.bf16 %v11398_v27, %v11398_v27  ;;  %v9066_v52 = vcombine.high %v7015_v47, %v7015_v47 }
 0x4d5   : > { %v22303_v0 = vrot.slane %v13250_v31, 7  ;;  %v9073_v23 = vrot.slane %v7015_v47, %v19031_v17  ;;  %v6739_v7 = vmul.f32 %v21893_v25, %v15554_v18  ;;  %v6737_v33 = vmul.f32 %v21893_v25, %v15555_v2 }
 0x4d6   : > { %v11415_v51 = vcombine.low %v11407_v28, %v11414_v29  ;;  %v13232_v32 = vshrl.u32 %v14791_v55, 16  ;;  %v9116_v12 = vcombine.high %v22289_v26, %v22289_v26  ;;  %v22311_v30 = vcombine.low %v9107_v54, %v9115_v45  ;;  %v23092_v54 = vld [vmem:[#allocation38_spill] sm:$0xff]  ;;  %v23093_v26 = vld [vmem:[#allocation37_spill] sm:$0xff] }
 0x4d7   : > { %v13255_v37 = vor.u32 %v13253_v22, %v22303_v0  ;;  %v13235_v44 = vshll.u32 %v14791_v55, 16  ;;  %v9080_v3 = vrot.slane %v9066_v52, %v19031_v17  ;;  %v9081_v1 = vcombine.high %v9073_v23, %v9073_v23 }
 0x4d8   : > { %v14792_v60 = vpack.c.bf16 %v11415_v51, %v11415_v51  ;;  %v13234_v35 = vrot.slane %v13232_v32, 7  ;;  %v6882_v18 = vadd.f32 %v21923_v48, %v6739_v7  ;;  %v6880_v2 = vadd.f32 %v21923_v48, %v6737_v33  ;;  %v23094_v7 = vld [vmem:[#allocation39_spill] sm:$0xff] }
 0x4d9   : > { %v13860_v38 = vsel %vm19446_vm13, %v13255_v37, %v14645_v34  ;;  %v9082_v63 = vcombine.high %v9080_v3, %v9080_v3  ;;  %v11434_v6 = vcombine.low %v9073_v23, %v9081_v1  ;;  %v15556_v45 = vadd.f32 %v23093_v26, %v23092_v54  ;;  %v14643_v34 = vld [vmem:[%s17800_s6 + $0x218] sm:$0x1] }
 0x4da   : > { %14646 = vst [vmem:[%s17800_s6 + $0x21c] sm:$0xf] %v13860_v38  ;;  %v13237_v42 = vor.u32 %v13235_v44, %v13234_v35  ;;  %v13239_v27 = vrot.slane %v13234_v35, 4  ;;  %v13241_v20 = vshrl.u32 %v14792_v60, 16  ;;  %v11482_v47 = vrot.slane %v22311_v30, %v19031_v17 }
 0x4db   : > { %v13244_v31 = vshll.u32 %v14792_v60, 16  ;;  %v11448_v22 = vrot.slane %v11434_v6, %v19031_v17  ;;  %v7018_v28 = vmax.f32 %v6882_v18, 0.0  ;;  %v7016_v29 = vmax.f32 %v6880_v2, 0.0 }
 0x4dc   : > { %v13238_v55 = vsel %vm19456_vm14, %v13230_v62, %v13237_v42  ;;  %v13243_v52 = vrot.slane %v13241_v20, 7  ;;  %v11450_v23 = vcombine.low %v9080_v3, %v9082_v63  ;;  %v15557_v33 = vadd.f32 %v21813_v5, %v23094_v7 }
 0x4dd   : > { %14641 = vst.msk [vmem:[%s17800_s6 + $0x210] sm:$0xf] %vm9471_vm8, %v13238_v55  ;;  %v11449_v51 = vcombine.low %v11441_v56, %v11448_v22  ;;  %v9117_v32 = vcombine.high %v7018_v28, %v7018_v28  ;;  %v9124_v30 = vrot.slane %v7018_v28, %v19031_v17  ;;  %v6742_v37 = vmul.f32 %v21893_v25, %v15556_v45 }
 0x4de   : > { %v13246_v44 = vor.u32 %v13244_v31, %v13243_v52  ;;  %v13248_v1 = vrot.slane %v13243_v52, 4  ;;  %v9083_v60 = vcombine.high %v7016_v29, %v7016_v29  ;;  %v9090_v62 = vrot.slane %v7016_v29, %v19031_v17  ;;  %v23095_v29 = vld [vmem:[#allocation40_spill] sm:$0xff] }
 0x4df   : > { %v14794_v3 = vpack.c.bf16 %v11449_v51, %v11449_v51  ;;  %v9131_v35 = vrot.slane %v9117_v32, %v19031_v17  ;;  %v9132_v5 = vcombine.high %v9124_v30, %v9124_v30  ;;  %v11484_v18 = vcombine.low %v9116_v12, %v9124_v30 }
 0x4e0   : > { %v13247_v56 = vsel %vm19456_vm14, %v13239_v27, %v13246_v44  ;;  %v13857_v2 = vsel %vm19463_vm15, %v13248_v1, %v14643_v34  ;;  %v9097_v38 = vrot.slane %v9083_v60, %v19031_v17  ;;  %v9098_v63 = vcombine.high %v9090_v62, %v9090_v62  ;;  %v22350_v27 = vld [vmem:[%s22695_s2] ss:$0 sm:$0xff] }
 0x4e1   : > { %14642 = vst.msk [vmem:[%s17800_s6 + $0x214] sm:$0xf] %vm9471_vm8, %v13247_v56  ;;  %14644 = vst [vmem:[%s17800_s6 + $0x218] sm:$0x1] %v13857_v2  ;;  %v11458_v25 = vrot.slane %v11450_v23, %v19031_v17  ;;  %v13258_v6 = vshrl.u32 %v14794_v3, 16  ;;  %v11485_v54 = vcombine.low %v9132_v5, %v9131_v35  ;;  %v11492_v26 = vrot.slane %v11484_v18, %v19031_v17 }
 0x4e2   : > { %v9099_v45 = vcombine.high %v9097_v38, %v9097_v38  ;;  %v11451_v12 = vcombine.low %v9090_v62, %v9098_v63  ;;  %v6885_v42 = vadd.f32 %v21923_v48, %v6742_v37  ;;  %v6740_v20 = vmul.f32 %v22350_v27, %v15557_v33 }
 0x4e3   : > { %v13260_v31 = vrot.slane %v13258_v6, 7  ;;  %v13261_v22 = vshll.u32 %v14794_v3, 16  ;;  %v11499_v28 = vrot.slane %v11485_v54, %v19031_v17  ;;  %v15558_v55 = vadd.f32 %v21827_v46, %v23095_v29 }
 0x4e4   : > { %v11465_v52 = vrot.slane %v11451_v12, %v19031_v17  ;;  %v11467_v23 = vcombine.low %v9097_v38, %v9099_v45  ;;  %v7021_v7 = vmax.f32 %v6885_v42, 0.0  ;;  %v6883_v34 = vadd.f32 %v21923_v48, %v6740_v20 }
 0x4e5   : > { %v13256_v51 = vrot.slane %v22303_v0, 4  ;;  %v13263_v32 = vor.u32 %v13261_v22, %v13260_v31  ;;  %v11500_v30 = vcombine.low %v11492_v26, %v11499_v28  ;;  %v6743_v33 = vmul.f32 %v22350_v27, %v15558_v55 }
 0x4e6   : > { %v11466_v37 = vcombine.low %v11458_v25, %v11465_v52  ;;  %v11475_v44 = vrot.slane %v11467_v23, %v19031_v17  ;;  %v9168_v1 = vcombine.high %v7021_v7, %v7021_v7  ;;  %v22362_v60 = vrot.slane %v7021_v7, %v19031_v17 }
 0x4e7   : > { %v13264_v46 = vsel %vm19456_vm14, %v13256_v51, %v13263_v32  ;;  %v14797_v62 = vpack.c.bf16 %v11500_v30, %v11500_v30  ;;  %v7019_v3 = vmax.f32 %v6883_v34, 0.0  ;;  %v9133_v5 = vcombine.high %v9131_v35, %v9131_v35  ;;  %v22375_v35 = vld [vmem:[%s22696_s3] ss:$0 sm:$0xff] }
 0x4e8   : > { %14647 = vst.msk [vmem:[%s17800_s6 + $0x220] sm:$0xf] %vm9471_vm8, %v13264_v46  ;;  %v11483_v48 = vcombine.low %v11475_v44, %v11482_v47  ;;  %v14795_v0 = vpack.c.bf16 %v11466_v37, %v11466_v37  ;;  %v9182_v18 = vrot.slane %v9168_v1, %v19031_v17  ;;  %v9183_v56 = vcombine.high %v22362_v60, %v22362_v60  ;;  %v14650_v1 = vld [vmem:[%s17800_s6 + $0x22c] sm:$0x1] }
 0x4e9   : > { %v13265_v2 = vrot.slane %v13260_v31, 4  ;;  %v13285_v38 = vshrl.u32 %v14797_v62, 16  ;;  %v9134_v63 = vcombine.high %v7019_v3, %v7019_v3  ;;  %v9141_v25 = vrot.slane %v7019_v3, %v19031_v17  ;;  %v14652_v31 = vld [vmem:[%s17800_s6 + $0x230] sm:$0xf] }
 0x4ea   : > { %v13288_v6 = vshll.u32 %v14797_v62, 16  ;;  %v14796_v54 = vpack.c.bf16 %v11483_v48, %v11483_v48  ;;  %v13267_v26 = vshrl.u32 %v14795_v0, 16  ;;  %v6886_v47 = vadd.f32 %v22375_v35, %v6743_v33 }
 0x4eb   : > { %v22378_v45 = vrot.slane %v13285_v38, 7  ;;  %v22381_v12 = vrot.slane %v9134_v63, %v19031_v17  ;;  %v9149_v42 = vcombine.high %v9141_v25, %v9141_v25  ;;  %v11501_v20 = vcombine.low %v9133_v5, %v9141_v25  ;;  %v23096_v25 = vld [vmem:[#allocation41_spill] sm:$0xff] }
 0x4ec   : > { %v13269_v22 = vrot.slane %v13267_v26, 7  ;;  %v13270_v28 = vshll.u32 %v14795_v0, 16  ;;  %v13276_v29 = vshrl.u32 %v14796_v54, 16  ;;  %v22384_v55 = vcombine.low %v9183_v56, %v9182_v18 }
 0x4ed   : > { %v13290_v52 = vor.u32 %v13288_v6, %v22378_v45  ;;  %v13291_v23 = vrot.slane %v22378_v45, 4  ;;  %v13279_v7 = vshll.u32 %v14796_v54, 16  ;;  %v11502_v34 = vcombine.low %v9149_v42, %v22381_v12  ;;  %v23097_v42 = vld [vmem:[#allocation42_spill] sm:$0xff] }
 0x4ee   : > { %v13272_v51 = vor.u32 %v13270_v28, %v13269_v22  ;;  %v13278_v32 = vrot.slane %v13276_v29, 7  ;;  %v11509_v30 = vrot.slane %v11501_v20, %v19031_v17  ;;  %v7022_v33 = vmax.f32 %v6886_v47, 0.0  ;;  %v23098_v20 = vld [vmem:[#allocation51_spill] sm:$0xff] }
 0x4ef   : > { %v13869_v37 = vsel %vm19446_vm13, %v13290_v52, %v14652_v31  ;;  %v13274_v44 = vrot.slane %v13269_v22, 4  ;;  %v11516_v46 = vrot.slane %v11502_v34, %v19031_v17  ;;  %v15559_v62 = vadd.f32 %v21861_v43, %v21825_v24  ;;  %v23099_v22 = vld [vmem:[#allocation47_spill] sm:$0xff] }
 0x4f0   : > { %14653 = vst [vmem:[%s17800_s6 + $0x230] sm:$0xf] %v13869_v37  ;;  %v13273_v3 = vsel %vm19456_vm14, %v13265_v2, %v13272_v51  ;;  %v13281_v5 = vor.u32 %v13279_v7, %v13278_v32  ;;  %v13283_v48 = vrot.slane %v13278_v32, 4  ;;  %v9184_v0 = vcombine.high %v7022_v33, %v7022_v33 }
 0x4f1   : > { %14648 = vst.msk [vmem:[%s17800_s6 + $0x224] sm:$0xf] %vm9471_vm8, %v13273_v3  ;;  %v11517_v18 = vcombine.low %v11509_v30, %v11516_v46  ;;  %v9191_v56 = vrot.slane %v7022_v33, %v19031_v17  ;;  %v6741_v38 = vmul.f32 %v22350_v27, %v15559_v62  ;;  %v15560_v63 = vadd.f32 %v21910_v21, %v21904_v36 }
 0x4f2   : > { %v13282_v24 = vsel %vm19456_vm14, %v13274_v44, %v13281_v5  ;;  %v13866_v43 = vsel %vm19463_vm15, %v13283_v48, %v14650_v1  ;;  %v9198_v2 = vrot.slane %v9184_v0, %v19031_v17  ;;  %v15561_v6 = vadd.f32 %v23096_v25, %v21908_v14 }
 0x4f3   : > { %14649 = vst.msk [vmem:[%s17800_s6 + $0x228] sm:$0xf] %vm9471_vm8, %v13282_v24  ;;  %14651 = vst [vmem:[%s17800_s6 + $0x22c] sm:$0x1] %v13866_v43  ;;  %v14798_v54 = vpack.c.bf16 %v11517_v18, %v11517_v18  ;;  %v9199_v26 = vcombine.high %v9191_v56, %v9191_v56  ;;  %v6884_v47 = vadd.f32 %v22375_v35, %v6741_v38 }
 0x4f4   : > { %v6746_v36 = vmul.f32 %v22350_v27, %v15560_v63  ;;  %v9200_v21 = vcombine.high %v9198_v2, %v9198_v2  ;;  %v6744_v45 = vmul.f32 %v22350_v27, %v15561_v6  ;;  %v15562_v31 = vadd.f32 %v23098_v20, %v23097_v42 }
 0x4f5   : > { %v22422_v28 = vadd.f32 %v21947_v41, %v23099_v22  ;;  %v13293_v14 = vshrl.u32 %v14798_v54, 16  ;;  %v11552_v29 = vcombine.low %v9191_v56, %v9199_v26  ;;  %v7020_v52 = vmax.f32 %v6884_v47, 0.0 }
 0x4f6   : > { %v9150_v7 = vcombine.high %v22381_v12, %v22381_v12  ;;  %v11553_v34 = vcombine.low %v9198_v2, %v9200_v21  ;;  %v6889_v51 = vadd.f32 %v22375_v35, %v6746_v36  ;;  %v6887_v32 = vadd.f32 %v22375_v35, %v6744_v45 }
 0x4f7   : > { %v6747_v30 = vmul.f32 %v22350_v27, %v15562_v31  ;;  %v22429_v33 = vrot.slane %v13293_v14, 7  ;;  %v13296_v37 = vshll.u32 %v14798_v54, 16  ;;  %v9151_v44 = vcombine.high %v7020_v52, %v7020_v52 }
 0x4f8   : > { %v9158_v41 = vrot.slane %v7020_v52, %v19031_v17  ;;  %v11560_v1 = vrot.slane %v11552_v29, %v19031_v17  ;;  %v11567_v46 = vrot.slane %v11553_v34, %v19031_v17  ;;  %v7025_v62 = vmax.f32 %v6889_v51, 0.0 }
 0x4f9   : > { %v7023_v12 = vmax.f32 %v6887_v32, 0.0  ;;  %v13298_v3 = vor.u32 %v13296_v37, %v22429_v33  ;;  %v9165_v5 = vrot.slane %v9151_v44, %v19031_v17  ;;  %v6890_v0 = vadd.f32 %v22375_v35, %v6747_v30  ;;  %v14659_v30 = vld [vmem:[%s17800_s6 + $0x244] sm:$0xf] }
 0x4fa   : > { %v9166_v48 = vcombine.high %v9158_v41, %v9158_v41  ;;  %v11568_v18 = vcombine.low %v11560_v1, %v11567_v46  ;;  %v11518_v56 = vcombine.low %v9150_v7, %v9158_v41  ;;  %v9235_v38 = vcombine.high %v7025_v62, %v7025_v62 }
 0x4fb   : > { %v9242_v63 = vrot.slane %v7025_v62, %v19031_v17  ;;  %v13299_v24 = vsel %vm19456_vm14, %v13291_v23, %v13298_v3  ;;  %v9167_v43 = vcombine.high %v9165_v5, %v9165_v5  ;;  %v9201_v25 = vcombine.high %v7023_v12, %v7023_v12 }
 0x4fc   : > { %v11519_v2 = vcombine.low %v9166_v48, %v9165_v5  ;;  %14654 = vst.msk [vmem:[%s17800_s6 + $0x234] sm:$0xf] %vm9471_vm8, %v13299_v24  ;;  %v14801_v6 = vpack.c.bf16 %v11568_v18, %v11568_v18  ;;  %v11526_v54 = vrot.slane %v11518_v56, %v19031_v17  ;;  %v9249_v26 = vrot.slane %v9235_v38, %v19031_v17 }
 0x4fd   : > { %v9250_v47 = vcombine.high %v9242_v63, %v9242_v63  ;;  %v11535_v21 = vcombine.low %v9167_v43, %v22362_v60  ;;  %v9208_v45 = vrot.slane %v7023_v12, %v19031_v17  ;;  %v9215_v23 = vrot.slane %v9201_v25, %v19031_v17 }
 0x4fe   : > { %v11533_v36 = vrot.slane %v11519_v2, %v19031_v17  ;;  %v11550_v42 = vrot.slane %v22384_v55, %v19031_v17  ;;  %v13320_v20 = vshrl.u32 %v14801_v6, 16  ;;  %v9251_v31 = vcombine.high %v9249_v26, %v9249_v26 }
 0x4ff   : > { %v11603_v22 = vcombine.low %v9242_v63, %v9250_v47  ;;  %v11543_v29 = vrot.slane %v11535_v21, %v19031_v17  ;;  %v9216_v52 = vcombine.high %v9208_v45, %v9208_v45  ;;  %v9217_v7 = vcombine.high %v9215_v23, %v9215_v23 }
 0x500   : > { %v11534_v14 = vcombine.low %v11526_v54, %v11533_v36  ;;  %v22451_v34 = vrot.slane %v13320_v20, 7  ;;  %v13323_v51 = vshll.u32 %v14801_v6, 16  ;;  %v11604_v32 = vcombine.low %v9249_v26, %v9251_v31 }
 0x501   : > { %v7026_v60 = vmax.f32 %v6890_v0, 0.0  ;;  %v11551_v37 = vcombine.low %v11543_v29, %v11550_v42  ;;  %v11569_v41 = vcombine.low %v9208_v45, %v9216_v52  ;;  %v11570_v1 = vcombine.low %v9215_v23, %v9217_v7  ;;  %v14657_v42 = vld [vmem:[%s17800_s6 + $0x240] sm:$0x1] }
 0x502   : > { %v14799_v44 = vpack.c.bf16 %v11534_v14, %v11534_v14  ;;  %v13325_v55 = vor.u32 %v13323_v51, %v22451_v34  ;;  %v11611_v46 = vrot.slane %v11603_v22, %v19031_v17  ;;  %v11618_v62 = vrot.slane %v11604_v32, %v19031_v17 }
 0x503   : > { %v9252_v12 = vcombine.high %v7026_v60, %v7026_v60  ;;  %v13300_v3 = vrot.slane %v22429_v33, 4  ;;  %v14800_v5 = vpack.c.bf16 %v11551_v37, %v11551_v37  ;;  %v11577_v18 = vrot.slane %v11569_v41, %v19031_v17 }
 0x504   : > { %v13302_v48 = vshrl.u32 %v14799_v44, 16  ;;  %v13878_v0 = vsel %vm19446_vm13, %v13325_v55, %v14659_v30  ;;  %v11619_v56 = vcombine.low %v11611_v46, %v11618_v62  ;;  %v11584_v38 = vrot.slane %v11570_v1, %v19031_v17  ;;  %v14664_v30 = vld [vmem:[%s17800_s6 + $0x254] sm:$0x1] }
 0x505   : > { %v9259_v63 = vrot.slane %v7026_v60, %v19031_v17  ;;  %14660 = vst [vmem:[%s17800_s6 + $0x244] sm:$0xf] %v13878_v0  ;;  %v13305_v43 = vshll.u32 %v14799_v44, 16  ;;  %v13311_v2 = vshrl.u32 %v14800_v5, 16  ;;  %v22465_v25 = vrot.slane %v9252_v12, %v19031_v17 }
 0x506   : > { %v13304_v24 = vrot.slane %v13302_v48, 7  ;;  %v14804_v33 = vpack.c.bf16 %v11619_v56, %v11619_v56  ;;  %v11585_v6 = vcombine.low %v11577_v18, %v11584_v38  ;;  %v6745_v26 = vmul.f32 %v22350_v27, %v22422_v28 }
 0x507   : > { %v9267_v54 = vcombine.high %v9259_v63, %v9259_v63  ;;  %v13313_v36 = vrot.slane %v13311_v2, 7  ;;  %v13314_v21 = vshll.u32 %v14800_v5, 16  ;;  %v15564_v45 = vadd.f32 %v22002_v16, %v21996_v19 }
 0x508   : > { %v13307_v47 = vor.u32 %v13305_v43, %v13304_v24  ;;  %v13309_v23 = vrot.slane %v13304_v24, 4  ;;  %v13346_v20 = vshrl.u32 %v14804_v33, 16  ;;  %v14802_v31 = vpack.c.bf16 %v11585_v6, %v11585_v6 }
 0x509   : > { %v22473_v22 = vcombine.low %v9267_v54, %v22465_v25  ;;  %v13316_v28 = vor.u32 %v13314_v21, %v13313_v36  ;;  %v13318_v29 = vrot.slane %v13313_v36, 4  ;;  %v6888_v52 = vadd.f32 %v22375_v35, %v6745_v26 }
 0x50a   : > { %v13308_v14 = vsel %vm19456_vm14, %v13300_v3, %v13307_v47  ;;  %v13326_v7 = vrot.slane %v22451_v34, 4  ;;  %v13348_v19 = vrot.slane %v13346_v20, 7  ;;  %v13349_v16 = vshll.u32 %v14804_v33, 16 }
 0x50b   : > { %14655 = vst.msk [vmem:[%s17800_s6 + $0x238] sm:$0xf] %vm9471_vm8, %v13308_v14  ;;  %v13328_v51 = vshrl.u32 %v14802_v31, 16  ;;  %v13317_v32 = vsel %vm19456_vm14, %v13309_v23, %v13316_v28  ;;  %v13875_v60 = vsel %vm19463_vm15, %v13318_v29, %v14657_v42  ;;  %v7024_v37 = vmax.f32 %v6888_v52, 0.0 }
 0x50c   : > { %v6750_v44 = vmul.f32 %v22350_v27, %v15564_v45  ;;  %14656 = vst.msk [vmem:[%s17800_s6 + $0x23c] sm:$0xf] %vm9471_vm8, %v13317_v32  ;;  %14658 = vst [vmem:[%s17800_s6 + $0x240] sm:$0x1] %v13875_v60  ;;  %v13353_v34 = vrot.slane %v13348_v19, 4  ;;  %v13331_v1 = vshll.u32 %v14802_v31, 16  ;;  %v15565_v55 = vadd.f32 %v22011_v4, %v22000_v50 }
 0x50d   : > { %v22490_v41 = vrot.slane %v13328_v51, 7  ;;  %v11628_v46 = vrot.slane %v22473_v22, %v19031_v17  ;;  %v9218_v62 = vcombine.high %v7024_v37, %v7024_v37  ;;  %v9225_v12 = vrot.slane %v7024_v37, %v19031_v17 }
 0x50e   : > { %v6893_v3 = vadd.f32 %v22375_v35, %v6750_v44  ;;  %v22498_v5 = vor.u32 %v13349_v16, %v13348_v19  ;;  %v13884_v48 = vsel %vm19463_vm15, %v13353_v34, %v14664_v30  ;;  %v6748_v0 = vmul.f32 %v22350_v27, %v15565_v55 }
 0x50f   : > { %v13333_v18 = vor.u32 %v13331_v1, %v22490_v41  ;;  %14665 = vst [vmem:[%s17800_s6 + $0x254] sm:$0x1] %v13884_v48  ;;  %v9232_v50 = vrot.slane %v9218_v62, %v19031_v17  ;;  %v9233_v4 = vcombine.high %v9225_v12, %v9225_v12  ;;  %v15566_v38 = vadd.f32 %v22023_v40, %v22009_v57 }
 0x510   : > { %v7029_v56 = vmax.f32 %v6893_v3, 0.0  ;;  %v6891_v24 = vadd.f32 %v22375_v35, %v6748_v0  ;;  %v15567_v43 = vadd.f32 %v22042_v49, %v22021_v9  ;;  %v15568_v2 = vadd.f32 %v22069_v8, %v22061_v13 }
 0x511   : > { %v13334_v63 = vsel %vm19456_vm14, %v13326_v7, %v13333_v18  ;;  %v9234_v33 = vcombine.high %v9232_v50, %v9232_v50  ;;  %v11586_v6 = vcombine.low %v9225_v12, %v9233_v4  ;;  %v6751_v40 = vmul.f32 %v22350_v27, %v15566_v38 }
 0x512   : > { %14661 = vst.msk [vmem:[%s17800_s6 + $0x248] sm:$0xf] %vm9471_vm8, %v13334_v63  ;;  %v9303_v54 = vcombine.high %v7029_v56, %v7029_v56  ;;  %v9310_v26 = vrot.slane %v7029_v56, %v19031_v17  ;;  %v7027_v47 = vmax.f32 %v6891_v24, 0.0  ;;  %v6749_v57 = vmul.f32 %v22350_v27, %v15567_v43 }
 0x513   : > { %v6754_v36 = vmul.f32 %v22350_v27, %v15568_v2  ;;  %v11587_v21 = vcombine.low %v9232_v50, %v9234_v33  ;;  %v9268_v13 = vcombine.high %v22465_v25, %v22465_v25  ;;  %v6894_v23 = vadd.f32 %v22375_v35, %v6751_v40 }
 0x514   : > { %v9317_v9 = vrot.slane %v9303_v54, %v19031_v17  ;;  %v9318_v49 = vcombine.high %v9310_v26, %v9310_v26  ;;  %v9269_v8 = vcombine.high %v7027_v47, %v7027_v47  ;;  %v9276_v45 = vrot.slane %v7027_v47, %v19031_v17 }
 0x515   : > { %v6892_v42 = vadd.f32 %v22375_v35, %v6749_v57  ;;  %v11594_v20 = vrot.slane %v11586_v6, %v19031_v17  ;;  %v11601_v31 = vrot.slane %v11587_v21, %v19031_v17  ;;  %v6897_v14 = vadd.f32 %v22375_v35, %v6754_v36 }
 0x516   : > { %v9319_v22 = vcombine.high %v9317_v9, %v9317_v9  ;;  %v9283_v28 = vrot.slane %v9269_v8, %v19031_v17  ;;  %v9284_v29 = vcombine.high %v9276_v45, %v9276_v45  ;;  %v11621_v52 = vcombine.low %v9268_v13, %v9276_v45 }
 0x517   : > { %v7030_v7 = vmax.f32 %v6894_v23, 0.0  ;;  %v13335_v25 = vrot.slane %v22490_v41, 4  ;;  %v11602_v19 = vcombine.low %v11594_v20, %v11601_v31  ;;  %v11671_v16 = vcombine.low %v9318_v49, %v9317_v9 }
 0x518   : > { %v7028_v51 = vmax.f32 %v6892_v42, 0.0  ;;  %v11635_v32 = vrot.slane %v11621_v52, %v19031_v17  ;;  %v11637_v60 = vcombine.low %v9284_v29, %v9283_v28  ;;  %v9285_v34 = vcombine.high %v9283_v28, %v9283_v28  ;;  %v14666_v42 = vld [vmem:[%s17800_s6 + $0x258] sm:$0xf] }
 0x519   : > { %v9320_v30 = vcombine.high %v7030_v7, %v7030_v7  ;;  %v9327_v37 = vrot.slane %v7030_v7, %v19031_v17  ;;  %v14803_v44 = vpack.c.bf16 %v11602_v19, %v11602_v19  ;;  %v7033_v48 = vmax.f32 %v6897_v14, 0.0  ;;  %v23100_v19 = vld [vmem:[#allocation57_spill] sm:$0xff] }
 0x51a   : > { %v9286_v1 = vcombine.high %v7028_v51, %v7028_v51  ;;  %v9293_v55 = vrot.slane %v7028_v51, %v19031_v17  ;;  %v11636_v62 = vcombine.low %v11628_v46, %v11635_v32  ;;  %v11679_v18 = vrot.slane %v11671_v16, %v19031_v17 }
 0x51b   : > { %v9334_v12 = vrot.slane %v9320_v30, %v19031_v17  ;;  %v11672_v3 = vcombine.low %v9319_v22, %v9327_v37  ;;  %v13337_v41 = vshrl.u32 %v14803_v44, 16  ;;  %v11645_v4 = vrot.slane %v11637_v60, %v19031_v17  ;;  %v14671_v60 = vld [vmem:[%s17800_s6 + $0x268] sm:$0x1] }
 0x51c   : > { %v9300_v0 = vrot.slane %v9286_v1, %v19031_v17  ;;  %v9301_v50 = vcombine.high %v9293_v55, %v9293_v55  ;;  %v14805_v56 = vpack.c.bf16 %v11636_v62, %v11636_v62  ;;  %v11638_v63 = vcombine.low %v9285_v34, %v9293_v55 }
 0x51d   : > { %v11686_v38 = vrot.slane %v11672_v3, %v19031_v17  ;;  %v13339_v24 = vrot.slane %v13337_v41, 7  ;;  %v13340_v43 = vshll.u32 %v14803_v44, 16  ;;  %v9335_v6 = vcombine.high %v9334_v12, %v9334_v12 }
 0x51e   : > { %v9302_v2 = vcombine.high %v9300_v0, %v9300_v0  ;;  %v11654_v46 = vcombine.low %v9301_v50, %v9300_v0  ;;  %v13355_v33 = vshrl.u32 %v14805_v56, 16  ;;  %v9370_v47 = vcombine.high %v7033_v48, %v7033_v48 }
 0x51f   : > { %v11687_v54 = vcombine.low %v11679_v18, %v11686_v38  ;;  %v13342_v40 = vor.u32 %v13340_v43, %v13339_v24  ;;  %v13344_v57 = vrot.slane %v13339_v24, 4  ;;  %v11652_v36 = vrot.slane %v11638_v63, %v19031_v17  ;;  %v23101_v24 = vld [vmem:[#allocation61_spill] sm:$0xff]  ;;  %v23102_v43 = vld [vmem:[#allocation67_spill] sm:$0xff] }
 0x520   : > { %v11655_v21 = vcombine.low %v9302_v2, %v9310_v26  ;;  %v13357_v9 = vrot.slane %v13355_v33, 7  ;;  %v13358_v49 = vshll.u32 %v14805_v56, 16  ;;  %v11662_v8 = vrot.slane %v11654_v46, %v19031_v17 }
 0x521   : > { %v14808_v13 = vpack.c.bf16 %v11687_v54, %v11687_v54  ;;  %v13343_v45 = vsel %vm19456_vm14, %v13335_v25, %v13342_v40  ;;  %v13352_v23 = vsel %vm19456_vm14, %v13344_v57, %v22498_v5  ;;  %v11653_v20 = vcombine.low %v11645_v4, %v11652_v36  ;;  %v23103_v54 = vld [vmem:[#allocation44_spill] sm:$0xff] }
 0x522   : > { %v11669_v31 = vrot.slane %v11655_v21, %v19031_v17  ;;  %14662 = vst.msk [vmem:[%s17800_s6 + $0x24c] sm:$0xf] %vm9471_vm8, %v13343_v45  ;;  %14663 = vst.msk [vmem:[%s17800_s6 + $0x250] sm:$0xf] %vm9471_vm8, %v13352_v23  ;;  %v13360_v26 = vor.u32 %v13358_v49, %v13357_v9  ;;  %v9377_v29 = vrot.slane %v7033_v48, %v19031_v17  ;;  %v13361_v51 = vrot.slane %v13357_v9, 4  ;;  %v23105_v45 = vld [vmem:[#allocation46_spill] sm:$0xff] }
 0x523   : > { %v13381_v22 = vshrl.u32 %v14808_v13, 16  ;;  %v14806_v28 = vpack.c.bf16 %v11653_v20, %v11653_v20  ;;  %v9384_v52 = vrot.slane %v9370_v47, %v19031_v17  ;;  %v15569_v25 = vadd.f32 %v22091_v11, %v22067_v10  ;;  %v23104_v47 = vld [vmem:[#allocation43_spill] sm:$0xff]  ;;  %v23106_v23 = vld [vmem:[#allocation45_spill] sm:$0xff] }
 0x524   : > { %v11670_v14 = vcombine.low %v11662_v8, %v11669_v31  ;;  %v13887_v5 = vsel %vm19446_vm13, %v13360_v26, %v14666_v42  ;;  %v15570_v16 = vadd.f32 %v22119_v59, %v23100_v19  ;;  %v22562_v32 = vcombine.low %v9334_v12, %v9335_v6 }
 0x525   : > { %v13383_v7 = vrot.slane %v13381_v22, 7  ;;  %14667 = vst [vmem:[%s17800_s6 + $0x258] sm:$0xf] %v13887_v5  ;;  %v13363_v37 = vshrl.u32 %v14806_v28, 16  ;;  %v13384_v44 = vshll.u32 %v14808_v13, 16  ;;  %v9386_v1 = vcombine.high %v9384_v52, %v9384_v52  ;;  %v23107_v5 = vld [vmem:[#allocation77_spill] sm:$0xff] }
 0x526   : > { %v14807_v30 = vpack.c.bf16 %v11670_v14, %v11670_v14  ;;  %v6752_v55 = vmul.f32 %v22350_v27, %v15569_v25  ;;  %v13366_v3 = vshll.u32 %v14806_v28, 16  ;;  %v9385_v10 = vcombine.high %v9377_v29, %v9377_v29 }
 0x527   : > { %v13388_v34 = vrot.slane %v13383_v7, 4  ;;  %v13365_v62 = vrot.slane %v13363_v37, 7  ;;  %v13386_v11 = vor.u32 %v13384_v44, %v13383_v7  ;;  %v6755_v41 = vmul.f32 %v22350_v27, %v15570_v16  ;;  %v23108_v7 = vld [vmem:[#allocation71_spill] sm:$0xff] }
 0x528   : > { %v13372_v48 = vshrl.u32 %v14807_v30, 16  ;;  %v6895_v12 = vadd.f32 %v22375_v35, %v6752_v55  ;;  %v13375_v50 = vshll.u32 %v14807_v30, 16  ;;  %v11739_v4 = vcombine.low %v9384_v52, %v9386_v1 }
 0x529   : > { %v13893_v59 = vsel %vm19463_vm15, %v13388_v34, %v14671_v60  ;;  %v13368_v18 = vor.u32 %v13366_v3, %v13365_v62  ;;  %v13370_v56 = vrot.slane %v13365_v62, 4  ;;  %v6898_v63 = vadd.f32 %v22375_v35, %v6755_v41 }
 0x52a   : > { %14672 = vst [vmem:[%s17800_s6 + $0x268] sm:$0x1] %v13893_v59  ;;  %v13374_v0 = vrot.slane %v13372_v48, 7  ;;  %v7031_v38 = vmax.f32 %v6895_v12, 0.0  ;;  %v15571_v2 = vadd.f32 %v23102_v43, %v23101_v24  ;;  %v15572_v40 = vadd.f32 %v23104_v47, %v23103_v54 }
 0x52b   : > { %v13369_v46 = vsel %vm19456_vm14, %v13361_v51, %v13368_v18  ;;  %v7034_v21 = vmax.f32 %v6898_v63, 0.0  ;;  %v15573_v42 = vadd.f32 %v23106_v23, %v23105_v45  ;;  %v15574_v25 = vadd.f32 %v23108_v7, %v23107_v5  ;;  %v14673_v23 = vld [vmem:[%s17800_s6 + $0x26c] sm:$0xf]  ;;  %v14678_v5 = vld [vmem:[%s17800_s6 + $0x27c] sm:$0x1] }
 0x52c   : > { %v13377_v33 = vor.u32 %v13375_v50, %v13374_v0  ;;  %v13379_v6 = vrot.slane %v13374_v0, 4  ;;  %14668 = vst.msk [vmem:[%s17800_s6 + $0x25c] sm:$0xf] %vm9471_vm8, %v13369_v46  ;;  %v9336_v57 = vcombine.high %v7031_v38, %v7031_v38  ;;  %v9343_v36 = vrot.slane %v7031_v38, %v19031_v17 }
 0x52d   : > { %v6753_v9 = vmul.f32 %v22350_v27, %v15571_v2  ;;  %v6758_v8 = vmul.f32 %v22350_v27, %v15572_v40  ;;  %v9387_v26 = vcombine.high %v7034_v21, %v7034_v21  ;;  %v9394_v22 = vrot.slane %v7034_v21, %v19031_v17 }
 0x52e   : > { %v13378_v49 = vsel %vm19456_vm14, %v13370_v56, %v13377_v33  ;;  %v13387_v13 = vsel %vm19456_vm14, %v13379_v6, %v13386_v11  ;;  %v9350_v20 = vrot.slane %v9336_v57, %v19031_v17  ;;  %v9351_v31 = vcombine.high %v9343_v36, %v9343_v36 }
 0x52f   : > { %14669 = vst.msk [vmem:[%s17800_s6 + $0x260] sm:$0xf] %vm9471_vm8, %v13378_v49  ;;  %14670 = vst.msk [vmem:[%s17800_s6 + $0x264] sm:$0xf] %vm9471_vm8, %v13387_v13  ;;  %v6896_v14 = vadd.f32 %v22375_v35, %v6753_v9  ;;  %v6901_v28 = vadd.f32 %v22375_v35, %v6758_v8  ;;  %v6756_v52 = vmul.f32 %v22350_v27, %v15573_v42 }
 0x530   : > { %v11723_v19 = vcombine.low %v9377_v29, %v9385_v10  ;;  %v9352_v16 = vcombine.high %v9350_v20, %v9350_v20  ;;  %v11689_v51 = vcombine.low %v9343_v36, %v9351_v31  ;;  %v9402_v60 = vcombine.high %v9394_v22, %v9394_v22 }
 0x531   : > { %v9401_v30 = vrot.slane %v9387_v26, %v19031_v17  ;;  %v7032_v37 = vmax.f32 %v6896_v14, 0.0  ;;  %v7037_v44 = vmax.f32 %v6901_v28, 0.0  ;;  %v6899_v34 = vadd.f32 %v22375_v35, %v6756_v52 }
 0x532   : > { %v11696_v1 = vrot.slane %v22562_v32, %v19031_v17  ;;  %v11747_v55 = vrot.slane %v11739_v4, %v19031_v17  ;;  %v11703_v62 = vrot.slane %v11689_v51, %v19031_v17  ;;  %v11740_v3 = vcombine.low %v9394_v22, %v9402_v60 }
 0x533   : > { %v11705_v48 = vcombine.low %v9350_v20, %v9352_v16  ;;  %v9353_v11 = vcombine.high %v7032_v37, %v7032_v37  ;;  %v9360_v29 = vrot.slane %v7032_v37, %v19031_v17  ;;  %v6759_v10 = vmul.f32 %v22350_v27, %v15574_v25 }
 0x534   : > { %v11737_v59 = vrot.slane %v11723_v19, %v19031_v17  ;;  %v11704_v12 = vcombine.low %v11696_v1, %v11703_v62  ;;  %v11754_v41 = vrot.slane %v11740_v3, %v19031_v17  ;;  %v7035_v18 = vmax.f32 %v6899_v34, 0.0 }
 0x535   : > { %v9403_v0 = vcombine.high %v9401_v30, %v9401_v30  ;;  %v9367_v32 = vrot.slane %v9353_v11, %v19031_v17  ;;  %v9368_v50 = vcombine.high %v9360_v29, %v9360_v29  ;;  %v9438_v4 = vcombine.high %v7037_v44, %v7037_v44 }
 0x536   : > { %v14809_v56 = vpack.c.bf16 %v11704_v12, %v11704_v12  ;;  %v11755_v38 = vcombine.low %v11747_v55, %v11754_v41  ;;  %v9404_v63 = vcombine.high %v7035_v18, %v7035_v18  ;;  %v9411_v24 = vrot.slane %v7035_v18, %v19031_v17 }
 0x537   : > { %v11713_v43 = vrot.slane %v11705_v48, %v19031_v17  ;;  %v9369_v2 = vcombine.high %v9367_v32, %v9367_v32  ;;  %v11706_v46 = vcombine.low %v9360_v29, %v9368_v50  ;;  %v6902_v33 = vadd.f32 %v22375_v35, %v6759_v10 }
 0x538   : > { %v13390_v6 = vshrl.u32 %v14809_v56, 16  ;;  %v14812_v54 = vpack.c.bf16 %v11755_v38, %v11755_v38  ;;  %v22615_v47 = vrot.slane %v7037_v44, %v19031_v17  ;;  %v22618_v40 = vrot.slane %v9404_v63, %v19031_v17 }
 0x539   : > { %v11720_v57 = vrot.slane %v11706_v46, %v19031_v17  ;;  %v11722_v36 = vcombine.low %v9367_v32, %v9369_v2  ;;  %v22622_v21 = vrot.slane %v9438_v4, %v19031_v17  ;;  %v9419_v9 = vcombine.high %v9411_v24, %v9411_v24 }
 0x53a   : > { %v13392_v49 = vrot.slane %v13390_v6, 7  ;;  %v13393_v13 = vshll.u32 %v14809_v56, 16  ;;  %v13416_v8 = vshrl.u32 %v14812_v54, 16  ;;  %v11756_v45 = vcombine.low %v9403_v0, %v9411_v24 }
 0x53b   : > { %v11721_v42 = vcombine.low %v11713_v43, %v11720_v57  ;;  %v11730_v20 = vrot.slane %v11722_v36, %v19031_v17  ;;  %v11757_v31 = vcombine.low %v9419_v9, %v22618_v40  ;;  %v7038_v26 = vmax.f32 %v6902_v33, 0.0 }
 0x53c   : > { %v13395_v22 = vor.u32 %v13393_v13, %v13392_v49  ;;  %v13396_v14 = vrot.slane %v13392_v49, 4  ;;  %v13418_v28 = vrot.slane %v13416_v8, 7  ;;  %v13419_v52 = vshll.u32 %v14812_v54, 16 }
 0x53d   : > { %v11738_v7 = vcombine.low %v11730_v20, %v11737_v59  ;;  %v14810_v25 = vpack.c.bf16 %v11721_v42, %v11721_v42  ;;  %v11764_v19 = vrot.slane %v11756_v45, %v19031_v17  ;;  %v11771_v16 = vrot.slane %v11757_v31, %v19031_v17 }
 0x53e   : > { %v13896_v51 = vsel %vm19446_vm13, %v13395_v22, %v14673_v23  ;;  %v13423_v60 = vrot.slane %v13418_v28, 4  ;;  %v9454_v30 = vcombine.high %v22622_v21, %v22622_v21  ;;  %v9455_v37 = vcombine.high %v7038_v26, %v7038_v26 }
 0x53f   : > { %14674 = vst [vmem:[%s17800_s6 + $0x26c] sm:$0xf] %v13896_v51  ;;  %v13421_v44 = vor.u32 %v13419_v52, %v13418_v28  ;;  %v14811_v34 = vpack.c.bf16 %v11738_v7, %v11738_v7  ;;  %v13398_v1 = vshrl.u32 %v14810_v25, 16  ;;  %v11772_v55 = vcombine.low %v11764_v19, %v11771_v16 }
 0x540   : > { %v13902_v62 = vsel %vm19463_vm15, %v13423_v60, %v14678_v5  ;;  %v9462_v3 = vrot.slane %v7038_v26, %v19031_v17  ;;  %v9469_v48 = vrot.slane %v9455_v37, %v19031_v17  ;;  %v15575_v11 = vadd.f32 %v22203_v39, %v22213_v15 }
 0x541   : > { %14679 = vst [vmem:[%s17800_s6 + $0x27c] sm:$0x1] %v13902_v62  ;;  %v13400_v29 = vrot.slane %v13398_v1, 7  ;;  %v13401_v10 = vshll.u32 %v14810_v25, 16  ;;  %v13407_v59 = vshrl.u32 %v14811_v34, 16  ;;  %v14813_v12 = vpack.c.bf16 %v11772_v55, %v11772_v55 }
 0x542   : > { %v13410_v41 = vshll.u32 %v14811_v34, 16  ;;  %v9470_v18 = vcombine.high %v9462_v3, %v9462_v3  ;;  %v11807_v0 = vcombine.low %v9454_v30, %v9462_v3  ;;  %v6757_v32 = vmul.f32 %v22350_v27, %v15575_v11  ;;  %v14680_v27 = vld [vmem:[%s17800_s6 + $0x280] sm:$0xf]  ;;  %v14685_v25 = vld [vmem:[%s17800_s6 + $0x290] sm:$0x1] }
 0x543   : > { %v13403_v50 = vor.u32 %v13401_v10, %v13400_v29  ;;  %v13405_v4 = vrot.slane %v13400_v29, 4  ;;  %v13409_v56 = vrot.slane %v13407_v59, 7  ;;  %v13425_v38 = vshrl.u32 %v14813_v12, 16 }
 0x544   : > { %v13428_v63 = vshll.u32 %v14813_v12, 16  ;;  %v11808_v24 = vcombine.low %v9470_v18, %v9469_v48  ;;  %v11815_v39 = vrot.slane %v11807_v0, %v19031_v17  ;;  %v6900_v15 = vadd.f32 %v22375_v35, %v6757_v32 }
 0x545   : > { %v13404_v43 = vsel %vm19456_vm14, %v13396_v14, %v13403_v50  ;;  %v13412_v2 = vor.u32 %v13410_v41, %v13409_v56  ;;  %v13414_v46 = vrot.slane %v13409_v56, 4  ;;  %v13427_v33 = vrot.slane %v13425_v38, 7 }
 0x546   : > { %14675 = vst.msk [vmem:[%s17800_s6 + $0x270] sm:$0xf] %vm9471_vm8, %v13404_v43  ;;  %v11822_v6 = vrot.slane %v11808_v24, %v19031_v17  ;;  %v7036_v54 = vmax.f32 %v6900_v15, 0.0  ;;  %v9420_v57 = vcombine.high %v22618_v40, %v22618_v40  ;;  %v9453_v49 = vcombine.high %v22615_v47, %v22615_v47 }
 0x547   : > { %v13413_v36 = vsel %vm19456_vm14, %v13405_v4, %v13412_v2  ;;  %v13422_v35 = vsel %vm19456_vm14, %v13414_v46, %v13421_v44  ;;  %v13430_v9 = vor.u32 %v13428_v63, %v13427_v33  ;;  %v13431_v3 = vrot.slane %v13427_v33, 4 }
 0x548   : > { %14676 = vst.msk [vmem:[%s17800_s6 + $0x274] sm:$0xf] %vm9471_vm8, %v13413_v36  ;;  %14677 = vst.msk [vmem:[%s17800_s6 + $0x278] sm:$0xf] %vm9471_vm8, %v13422_v35  ;;  %v11823_v13 = vcombine.low %v11815_v39, %v11822_v6  ;;  %v9421_v8 = vcombine.high %v7036_v54, %v7036_v54  ;;  %v9428_v45 = vrot.slane %v7036_v54, %v19031_v17 }
 0x549   : > { %v13905_v40 = vsel %vm19446_vm13, %v13430_v9, %v14680_v27  ;;  %v11791_v26 = vcombine.low %v9453_v49, %v22622_v21 }
 0x54a   : > { %14681 = vst [vmem:[%s17800_s6 + $0x280] sm:$0xf] %v13905_v40  ;;  %v14816_v23 = vpack.c.bf16 %v11823_v13, %v11823_v13  ;;  %v9435_v42 = vrot.slane %v9421_v8, %v19031_v17  ;;  %v9436_v20 = vcombine.high %v9428_v45, %v9428_v45  ;;  %v11773_v31 = vcombine.low %v9420_v57, %v9428_v45 }
 0x54b   : > { %v11805_v19 = vrot.slane %v11791_v26, %v19031_v17 }
 0x54c   : > { %v13451_v22 = vshrl.u32 %v14816_v23, 16  ;;  %v9437_v14 = vcombine.high %v9435_v42, %v9435_v42  ;;  %v11774_v28 = vcombine.low %v9436_v20, %v9435_v42  ;;  %v11781_v52 = vrot.slane %v11773_v31, %v19031_v17 }
 0x54d   : > { %v13454_v62 = vshll.u32 %v14816_v23, 16 }
 0x54e   : > { %v13453_v5 = vrot.slane %v13451_v22, 7  ;;  %v11788_v7 = vrot.slane %v11774_v28, %v19031_v17  ;;  %v11790_v53 = vcombine.low %v9437_v14, %v22615_v47 }
 0x550   : > { %v13458_v16 = vrot.slane %v13453_v5, 4  ;;  %v11789_v51 = vcombine.low %v11781_v52, %v11788_v7  ;;  %v11798_v60 = vrot.slane %v11790_v53, %v19031_v17  ;;  %v13456_v17 = vor.u32 %v13454_v62, %v13453_v5 }
 0x552   : > { %v13911_v21 = vsel %vm19463_vm15, %v13458_v16, %v14685_v25  ;;  %v11806_v30 = vcombine.low %v11798_v60, %v11805_v19  ;;  %v14814_v37 = vpack.c.bf16 %v11789_v51, %v11789_v51 }
 0x553   : > { %14686 = vst [vmem:[%s17800_s6 + $0x290] sm:$0x1] %v13911_v21 }
 0x554   : > { %v14815_v44 = vpack.c.bf16 %v11806_v30, %v11806_v30  ;;  %v13433_v34 = vshrl.u32 %v14814_v37, 16  ;;  %v13436_v55 = vshll.u32 %v14814_v37, 16 }
 0x556   : > { %v13435_v1 = vrot.slane %v13433_v34, 7  ;;  %v13442_v47 = vshrl.u32 %v14815_v44, 16  ;;  %v13445_v29 = vshll.u32 %v14815_v44, 16 }
 0x558   : > { %v13438_v48 = vor.u32 %v13436_v55, %v13435_v1  ;;  %v13444_v11 = vrot.slane %v13442_v47, 7  ;;  %v13440_v10 = vrot.slane %v13435_v1, 4 }
 0x55a   : > { %v13439_v61 = vsel %vm19456_vm14, %v13431_v3, %v13438_v48  ;;  %v13447_v59 = vor.u32 %v13445_v29, %v13444_v11  ;;  %v13449_v12 = vrot.slane %v13444_v11, 4 }
 0x55b   : > { %14682 = vst.msk [vmem:[%s17800_s6 + $0x284] sm:$0xf] %vm9471_vm8, %v13439_v61 }
 0x55c   : > { %v13448_v41 = vsel %vm19456_vm14, %v13440_v10, %v13447_v59  ;;  %v13457_v18 = vsel %vm19456_vm14, %v13449_v12, %v13456_v17 }
 0x55d   : > { %14683 = vst.msk [vmem:[%s17800_s6 + $0x288] sm:$0xf] %vm9471_vm8, %v13448_v41  ;;  %14684 = vst.msk [vmem:[%s17800_s6 + $0x28c] sm:$0xf] %vm9471_vm8, %v13457_v18 }
 0x55e PF: > { %s14_s15 = sadd.s32 1, %s16031_s15  }
 0x55f   : > { %p11_p4 = scmp.ge.s32.totalorder %s14_s15, 4  }
 0x561   :  { %13 = sbr.rel (!%p11_p4) target bundleno = 1 (0x1), region = 69 }

</bundles_post_ra>
